<compile_context>
chip_gen: v7x
topology: tpu7x:2x2x1
jax: 0.10.0
libtpu: 0.0.40
codegen_flags: <defaults>
</compile_context>

<pallas_src>
import math
import functools

import jax
import jax.numpy as jnp
from jax.experimental import pallas as pl
from jax.experimental.pallas import tpu as pltpu

SQRT2 = math.sqrt(2.0)
NEG_SLOPE = 0.2
_BK = (1.0 / 8.0, 3.0 / 8.0, 3.0 / 8.0, 1.0 / 8.0)   # separable [1,3,3,1]/8


def _round_up(x, m):
    return ((x + m - 1) // m) * m


# ----------------------------------------------------------------------------
# Pallas kernel 1: tiled matmul + fused bias / leaky / skip-add epilogue
# ----------------------------------------------------------------------------
def _mm_kernel(a_ref, w_ref, b_ref, *rest, act, out_scale, has_extra):
    if has_extra:
        e_ref, o_ref, acc_ref = rest
    else:
        o_ref, acc_ref = rest
    kk = pl.program_id(2)

    @pl.when(kk == 0)
    def _init():
        acc_ref[...] = jnp.zeros_like(acc_ref)

    acc_ref[...] += jnp.dot(a_ref[...], w_ref[...],
                            preferred_element_type=jnp.float32)

    @pl.when(kk == pl.num_programs(2) - 1)
    def _finalize():
        r = acc_ref[...] + b_ref[...]
        if act:  # FusedLeakyReLU: leaky(x + b, 0.2) * sqrt(2)
            r = jnp.where(r >= 0.0, r, NEG_SLOPE * r) * SQRT2
        if has_extra:  # fused residual/skip add
            r = r + e_ref[...].astype(jnp.float32)
        if out_scale != 1.0:
            r = r * out_scale
        o_ref[...] = r.astype(o_ref.dtype)


def matmul_fused(a, w, b, *, act, extra=None, out_scale=1.0,
                 out_dtype=jnp.bfloat16):
    """out = out_scale * (act(a @ w + b) + extra).  a:(M,K) w:(K,N) b:(1,N)."""
    M, K = a.shape
    N = w.shape[1]
    a = a.astype(jnp.bfloat16)
    w = w.astype(jnp.bfloat16)
    if b is None:
        b = jnp.zeros((1, N), jnp.float32)

    # M tiles: big tiles, but >=2 parallel steps when M allows (v7x dual TC).
    if M > 512:
        tm = 512
    elif M > 256:
        tm = _round_up((M + 1) // 2, 8)
    else:
        tm = M
    # N tiles.
    tn = N if (N <= 512 or N % 128 != 0) else 256
    # K tiles (only tile when it divides exactly; partial K blocks would
    # contaminate the accumulation).
    tk = K if (K <= 1024 or K % 512 != 0) else 512
    nk = K // tk

    grid = (pl.cdiv(M, tm), pl.cdiv(N, tn), nk)
    has_extra = extra is not None

    in_specs = [
        pl.BlockSpec((tm, tk), lambda i, j, kk: (i, kk)),
        pl.BlockSpec((tk, tn), lambda i, j, kk: (kk, j)),
        pl.BlockSpec((1, tn), lambda i, j, kk: (0, j)),
    ]
    operands = [a, w, b]
    if has_extra:
        in_specs.append(pl.BlockSpec((tm, tn), lambda i, j, kk: (i, j)))
        operands.append(extra)

    return pl.pallas_call(
        functools.partial(_mm_kernel, act=act, out_scale=out_scale,
                          has_extra=has_extra),
        out_shape=jax.ShapeDtypeStruct((M, N), out_dtype),
        grid_spec=pltpu.PrefetchScalarGridSpec(
            num_scalar_prefetch=0,
            grid=grid,
            in_specs=in_specs,
            out_specs=pl.BlockSpec((tm, tn), lambda i, j, kk: (i, j)),
            scratch_shapes=[pltpu.VMEM((tm, tn), jnp.float32)],
        ),
        compiler_params=pltpu.CompilerParams(
            dimension_semantics=("parallel", "parallel", "arbitrary")),
    )(*operands)


# ----------------------------------------------------------------------------
# Pallas kernel 2: KxK conv as accumulated shifted-slice matmuls (no im2col)
# ----------------------------------------------------------------------------
def _conv_taps_kernel(x_ref, w_ref, b_ref, o_ref, *, taps, Mo, act):
    # x_ref: (1, S, L, Cin) flat padded slab(s) for one image (bf16)
    # w_ref: (T, Cin, tn)   per-tap weight matrices (bf16, pre-scaled)
    acc = None
    for t, (s, off) in enumerate(taps):
        a = x_ref[0, s, off:off + Mo, :]                   # (Mo, Cin)
        contrib = jnp.dot(a, w_ref[t], preferred_element_type=jnp.float32)
        acc = contrib if acc is None else acc + contrib
    acc = acc + b_ref[...]
    if act:
        acc = jnp.where(acc >= 0.0, acc, NEG_SLOPE * acc) * SQRT2
    o_ref[0, :, :] = acc.astype(o_ref.dtype)


def conv_taps_call(slab, w, b, taps, Mo, act, out_dtype=jnp.bfloat16):
    """slab:(B,S,L,Cin) bf16, w:(T,Cin,N) bf16, b:(1,N) f32 -> (B, Mo, N)."""
    B, S, L, C = slab.shape
    T, _, N = w.shape
    max_off = max(off for _, off in taps)
    L_need = _round_up(Mo + max_off, 8)
    if L_need > L:                                   # tiny junk-column halo pad
        slab = jnp.pad(slab, ((0, 0), (0, 0), (0, L_need - L), (0, 0)))
    L2 = slab.shape[2]

    tn = N if (N <= 512 or N % 128 != 0) else 256
    grid_n = pl.cdiv(N, tn)

    return pl.pallas_call(
        functools.partial(_conv_taps_kernel, taps=taps, Mo=Mo, act=act),
        out_shape=jax.ShapeDtypeStruct((B, Mo, N), out_dtype),
        grid_spec=pltpu.PrefetchScalarGridSpec(
            num_scalar_prefetch=0,
            grid=(B, grid_n),
            in_specs=[
                pl.BlockSpec((1, S, L2, C), lambda bi, ni: (bi, 0, 0, 0)),
                pl.BlockSpec((T, C, tn), lambda bi, ni: (0, 0, ni)),
                pl.BlockSpec((1, tn), lambda bi, ni: (0, ni)),
            ],
            out_specs=pl.BlockSpec((1, Mo, tn), lambda bi, ni: (bi, 0, ni)),
        ),
        compiler_params=pltpu.CompilerParams(
            dimension_semantics=("parallel", "parallel")),
    )(slab, w, b)


def conv2d_stride1(x, cp, act):
    """Same-padded stride-1 KxK conv in NHWC via shifted flat slices."""
    w = cp['w']
    k = int(round(math.sqrt(w.shape[0])))
    pad = k // 2
    B, H, W, C = x.shape
    xp = jnp.pad(x, ((0, 0), (pad, pad), (pad, pad), (0, 0)))
    Hp, Wp = H + 2 * pad, W + 2 * pad
    Mo = H * Wp                                    # junk cols at the right edge
    taps = tuple((0, i * Wp + j) for i in range(k) for j in range(k))
    slab = xp.reshape(B, 1, Hp * Wp, C)
    out = conv_taps_call(slab, w, cp['b'], taps, Mo, act)
    Cout = w.shape[2]
    return out.reshape(B, H, Wp, Cout)[:, :, :W, :]


def conv2d_stride2(xb, cp, act):
    """Stride-2 KxK conv (pad 0) via 4-phase split + shifted flat slices."""
    w = cp['w']
    k = int(round(math.sqrt(w.shape[0])))
    B, Hb, Wb, C = xb.shape
    Ho = (Hb - k) // 2 + 1
    Wo = (Wb - k) // 2 + 1
    Hph = (Hb + 1) // 2
    Wph = (Wb + 1) // 2
    slabs = []
    for p in range(2):
        for q in range(2):
            ph = xb[:, p::2, q::2, :]
            ph = jnp.pad(ph, ((0, 0), (0, Hph - ph.shape[1]),
                              (0, Wph - ph.shape[2]), (0, 0)))
            slabs.append(ph.reshape(B, Hph * Wph, C))
    slab = jnp.stack(slabs, axis=1)                # (B, 4, Hph*Wph, C)
    Mo = Ho * Wph
    taps = tuple(((i % 2) * 2 + (j % 2), (i // 2) * Wph + (j // 2))
                 for i in range(k) for j in range(k))
    out = conv_taps_call(slab, w, cp['b'], taps, Mo, act)
    Cout = w.shape[2]
    return out.reshape(B, Ho, Wph, Cout)[:, :, :Wo, :]


# ----------------------------------------------------------------------------
# Pallas kernel 3: minibatch stddev statistic
# ----------------------------------------------------------------------------
def _stddev_kernel(x_ref, o_ref):
    x = x_ref[...].astype(jnp.float32)             # (group, n, L)
    mean = jnp.mean(x, axis=0, keepdims=True)
    var = jnp.mean((x - mean) ** 2, axis=0)        # (n, L)   (unbiased=False)
    sd = jnp.sqrt(var + 1e-8)
    val = jnp.mean(sd, axis=-1, keepdims=True)     # (n, 1)
    o_ref[...] = jnp.broadcast_to(val, o_ref.shape)


def stddev_map(h, group):
    """NHWC h:(B,H,W,C) -> stddev feature channel (B,H,W,1)."""
    B, H, W, C = h.shape
    n = B // group
    x = h.reshape(group, n, H * W * C)
    out = pl.pallas_call(
        _stddev_kernel,
        out_shape=jax.ShapeDtypeStruct((n, 128), jnp.float32),
    )(x)
    vals = out[:, 0]                               # (n,)
    sd = jnp.broadcast_to(vals.reshape(n, 1, 1, 1), (n, H, W, 1))
    sd = jnp.tile(sd, (group, 1, 1, 1))            # (B, H, W, 1)
    return sd.astype(h.dtype)


# ----------------------------------------------------------------------------
# Blur: separable [1,3,3,1] depthwise filter on the VPU (plain JAX shifted MACs)
# ----------------------------------------------------------------------------
def blur_nhwc(x, pad0, pad1):
    xp = jnp.pad(x, ((0, 0), (pad0, pad1), (pad0, pad1), (0, 0)))
    xp = xp.astype(jnp.float32)
    Hp, Wp = xp.shape[1], xp.shape[2]
    Ho, Wo = Hp - 3, Wp - 3
    y = sum(_BK[t] * xp[:, t:t + Ho, :, :] for t in range(4))
    z = sum(_BK[t] * y[:, :, t:t + Wo, :] for t in range(4))
    return z.astype(x.dtype)


# ----------------------------------------------------------------------------
# Parameter setup (raw torch-layout -> pre-scaled / transposed / bf16)
# ----------------------------------------------------------------------------
def make_channels(channel_multiplier, d_extra):
    base = {4: 512, 8: 512, 16: 512, 32: 512, 64: 256 * channel_multiplier,
            128: 128 * channel_multiplier, 256: 64 * channel_multiplier,
            512: 32 * channel_multiplier, 1024: 16 * channel_multiplier,
            2048: 8 * channel_multiplier}
    return {k: int(round(v * d_extra)) for k, v in base.items()}


def init_raw_params(key, size, channel_multiplier, d_extra_multiplier):
    channels = make_channels(channel_multiplier, d_extra_multiplier)
    linear_ch = int(round(512 * d_extra_multiplier))
    log_size = int(round(math.log2(size)))
    keys = iter(jax.random.split(key, 64))

    def conv_w(cout, cin, k):
        return jax.random.normal(next(keys), (cout, cin, k, k), jnp.float32)

    raw = {}
    in_ch = channels[2 ** log_size]
    raw['conv0'] = dict(w=conv_w(in_ch, 3, 1),
                        b=jnp.zeros((in_ch,), jnp.float32))
    blocks = []
    cur = size
    for i in range(log_size, 2, -1):
        out_ch = channels[2 ** (i - 1)]
        blocks.append(dict(
            conv1_w=conv_w(in_ch, in_ch, 3),
            conv1_b=jnp.zeros((in_ch,), jnp.float32),
            conv2_w=conv_w(out_ch, in_ch, 3),
            conv2_b=jnp.zeros((out_ch,), jnp.float32),
            skip_w=conv_w(out_ch, in_ch, 1)))
        in_ch = out_ch
        cur //= 2
    raw['blocks'] = blocks
    raw['final_conv'] = dict(w=conv_w(linear_ch, in_ch + 1, 3),
                             b=jnp.zeros((linear_ch,), jnp.float32))
    flat = linear_ch * cur * cur
    raw['lin1'] = dict(w=jax.random.normal(next(keys), (linear_ch, flat),
                                           jnp.float32),
                       b=jnp.zeros((linear_ch,), jnp.float32))
    raw['lin2'] = dict(w=jax.random.normal(next(keys), (1, linear_ch),
                                           jnp.float32),
                       b=jnp.zeros((1,), jnp.float32))
    raw['meta'] = dict(final_spatial=cur, final_ch=linear_ch)
    return raw


def _prep_conv_taps(w, b):
    cout, cin, kh, kw = w.shape
    scale = 1.0 / math.sqrt(cin * kh * kw)
    wt = (jnp.transpose(w, (2, 3, 1, 0)).reshape(kh * kw, cin, cout) * scale)
    if b is None:
        b = jnp.zeros((cout,), jnp.float32)
    return dict(w=wt.astype(jnp.bfloat16),
                b=b.reshape(1, cout).astype(jnp.float32))


def _prep_conv1x1_mat(w, b):
    cout, cin = w.shape[0], w.shape[1]
    scale = 1.0 / math.sqrt(cin)
    wm = (w.reshape(cout, cin) * scale).T
    if b is None:
        b = jnp.zeros((cout,), jnp.float32)
    return dict(w=wm.astype(jnp.bfloat16),
                b=b.reshape(1, cout).astype(jnp.float32))


def _prep_linear(w, b, chw=None):
    out_f, in_f = w.shape
    scale = 1.0 / math.sqrt(in_f)
    if chw is not None:  # permute CHW-flatten torch weights to HWC-flatten
        C, Hs, Ws = chw
        w = w.reshape(out_f, C, Hs, Ws).transpose(0, 2, 3, 1).reshape(out_f, in_f)
    wm = (w * scale).T
    return dict(w=wm.astype(jnp.bfloat16),
                b=b.reshape(1, out_f).astype(jnp.float32))


def prepare_params(raw):
    p = {'conv0': _prep_conv1x1_mat(raw['conv0']['w'], raw['conv0']['b'])}
    p['blocks'] = [dict(conv1=_prep_conv_taps(b['conv1_w'], b['conv1_b']),
                        conv2=_prep_conv_taps(b['conv2_w'], b['conv2_b']),
                        skip=_prep_conv1x1_mat(b['skip_w'], None))
                   for b in raw['blocks']]
    p['final_conv'] = _prep_conv_taps(raw['final_conv']['w'],
                                      raw['final_conv']['b'])
    cur = raw['meta']['final_spatial']
    ch = raw['meta']['final_ch']
    p['lin1'] = _prep_linear(raw['lin1']['w'], raw['lin1']['b'],
                             chw=(ch, cur, cur))
    p['lin2'] = _prep_linear(raw['lin2']['w'], raw['lin2']['b'])
    return p


# ----------------------------------------------------------------------------
# Forward (no_adds_on path: use_coord_ac = use_coord_pd = False)
# ----------------------------------------------------------------------------
def resblock(x, blk):
    out = conv2d_stride1(x, blk['conv1'], act=True)
    out2 = conv2d_stride2(blur_nhwc(out, 2, 2), blk['conv2'], act=True)
    # skip: blur(pad 1,1) -> stride-2 1x1 conv; (out2 + skip)/sqrt(2) fused
    xb = blur_nhwc(x, 1, 1)[:, ::2, ::2, :]
    Bn, Ho, Wo, Cin = xb.shape
    Cout = blk['skip']['w'].shape[1]
    fused = matmul_fused(xb.reshape(Bn * Ho * Wo, Cin),
                         blk['skip']['w'], blk['skip']['b'],
                         act=False,
                         extra=out2.reshape(Bn * Ho * Wo, Cout),
                         out_scale=1.0 / SQRT2)
    return fused.reshape(Bn, Ho, Wo, Cout)


def discriminator_forward(params, img, *, stddev_group):
    x = jnp.transpose(img, (0, 2, 3, 1)).astype(jnp.bfloat16)   # NCHW -> NHWC
    B, H, W, _ = x.shape
    C0 = params['conv0']['w'].shape[1]
    h = matmul_fused(x.reshape(B * H * W, -1),
                     params['conv0']['w'], params['conv0']['b'], act=True)
    h = h.reshape(B, H, W, C0)
    for blk in params['blocks']:
        h = resblock(h, blk)
    group = min(B, stddev_group)
    sd = stddev_map(h, group)
    h = jnp.concatenate([h, sd], axis=-1)
    h = conv2d_stride1(h, params['final_conv'], act=True)
    B2, Hc, Wc, Cc = h.shape
    out = matmul_fused(h.reshape(B2, Hc * Wc * Cc),
                       params['lin1']['w'], params['lin1']['b'], act=True)
    out = matmul_fused(out, params['lin2']['w'], params['lin2']['b'],
                       act=False, out_dtype=jnp.float32)
    # TODO(synk): coord_ac / coord_pd heads omitted (no_adds_on path: both False)
    return {'d_patch': out}


def smallest_divisor_larger_than(number, start=4):
    for i in range(start, int(math.sqrt(number))):
        if number % i == 0:
            return i
    return number


if __name__ == "__main__":
    # small config: patch_size=16, channel_multiplier=2, d_extra_multiplier=1/16
    # -> all channels = 32, linear_ch = 32, final spatial = 4x4
    size = 16
    channel_multiplier = 2
    d_extra_multiplier = 0.0625
    batch_size = 2

    key = jax.random.PRNGKey(0)
    pkey, xkey = jax.random.split(key)
    raw = init_raw_params(pkey, size, channel_multiplier, d_extra_multiplier)
    params = prepare_params(raw)
    img = jax.random.normal(xkey, (batch_size, 3, size, size), jnp.float32)

    stddev_group = smallest_divisor_larger_than(batch_size, 4)
    fwd = jax.jit(functools.partial(discriminator_forward,
                                    stddev_group=stddev_group))
    ret = fwd(params, img)
    d_patch = jax.block_until_ready(ret['d_patch'])
    assert d_patch.shape == (batch_size, 1)
    assert bool(jnp.all(jnp.isfinite(d_patch)))
    print("KERNEL_OK")
</pallas_src>

<mosaic_0001>
module attributes {stable_mosaic.version = 11 : i64} {
  func.func @_mm_kernel(%arg0: i32, %arg1: i32, %arg2: i32, %arg3: memref<256x3xbf16, #tpu.memory_space<vmem>>, %arg4: memref<3x32xbf16, #tpu.memory_space<vmem>>, %arg5: memref<1x32xf32, #tpu.memory_space<vmem>>, %arg6: memref<256x32xbf16, #tpu.memory_space<vmem>>, %arg7: memref<256x32xf32, #tpu.memory_space<vmem>>) attributes {dimension_semantics = [#tpu.dimension_semantics<parallel>, #tpu.dimension_semantics<parallel>, #tpu.dimension_semantics<arbitrary>], iteration_bounds = array<i64: 2, 1, 1>, scalar_prefetch = 0 : i64, scratch_operands = 1 : i64, tpu.core_type = #tpu.core_type<tc>, window_params = [{transform_indices = @transform_0, window_bounds = array<i64: 256, 3>}, {transform_indices = @transform_1, window_bounds = array<i64: 3, 32>}, {transform_indices = @transform_2, window_bounds = array<i64: 1, 32>}, {transform_indices = @transform_3, window_bounds = array<i64: 256, 32>}]} {
    %c0_i32 = arith.constant 0 : i32
    %0 = arith.cmpi eq, %arg2, %c0_i32 : i32
    %1 = arith.extui %0 : i1 to i32
    %c0_i32_0 = arith.constant 0 : i32
    %2 = arith.cmpi ne, %1, %c0_i32_0 : i32
    scf.if %2 {
      %cst_10 = arith.constant 0.000000e+00 : f32
      %12 = vector.broadcast %cst_10 : f32 to vector<256x32xf32>
      %c0_11 = arith.constant 0 : index
      %c0_12 = arith.constant 0 : index
      %13 = vector.load %arg7[%c0_11, %c0_12] : memref<256x32xf32, #tpu.memory_space<vmem>>, vector<256x32xf32>
      tpu.vector_store %arg7[%c0_11, %c0_12], %12 {strides = array<i32>} : memref<256x32xf32, #tpu.memory_space<vmem>>, vector<256x32xf32>,
    } else {
    }
    %c0 = arith.constant 0 : index
    %c0_1 = arith.constant 0 : index
    %3 = vector.load %arg7[%c0, %c0_1] : memref<256x32xf32, #tpu.memory_space<vmem>>, vector<256x32xf32>
    %c0_2 = arith.constant 0 : index
    %c0_3 = arith.constant 0 : index
    %4 = vector.load %arg3[%c0_2, %c0_3] : memref<256x3xbf16, #tpu.memory_space<vmem>>, vector<256x3xbf16>
    %c0_4 = arith.constant 0 : index
    %c0_5 = arith.constant 0 : index
    %5 = vector.load %arg4[%c0_4, %c0_5] : memref<3x32xbf16, #tpu.memory_space<vmem>>, vector<3x32xbf16>
    %cst = arith.constant dense<0.000000e+00> : vector<256x32xf32>
    %6 = tpu.matmul %4, %5, %cst {dimension_numbers = #tpu.dot_dimension_numbers<[1], [0], [0], [1], [0, 0, 1, 1], [], []>} : vector<256x3xbf16>, vector<3x32xbf16>, vector<256x32xf32> -> vector<256x32xf32>
    %7 = arith.addf %3, %6 : vector<256x32xf32>
    %c0_6 = arith.constant 0 : index
    %c0_7 = arith.constant 0 : index
    %8 = vector.load %arg7[%c0_6, %c0_7] : memref<256x32xf32, #tpu.memory_space<vmem>>, vector<256x32xf32>
    tpu.vector_store %arg7[%c0_6, %c0_7], %7 {strides = array<i32>} : memref<256x32xf32, #tpu.memory_space<vmem>>, vector<256x32xf32>,
    %c0_i32_8 = arith.constant 0 : i32
    %9 = arith.cmpi eq, %arg2, %c0_i32_8 : i32
    %10 = arith.extui %9 : i1 to i32
    %c0_i32_9 = arith.constant 0 : i32
    %11 = arith.cmpi ne, %10, %c0_i32_9 : i32
    scf.if %11 {
      %c0_10 = arith.constant 0 : index
      %c0_11 = arith.constant 0 : index
      %12 = vector.load %arg7[%c0_10, %c0_11] : memref<256x32xf32, #tpu.memory_space<vmem>>, vector<256x32xf32>
      %c0_12 = arith.constant 0 : index
      %c0_13 = arith.constant 0 : index
      %13 = vector.load %arg5[%c0_12, %c0_13] : memref<1x32xf32, #tpu.memory_space<vmem>>, vector<1x32xf32>
      %14 = vector.broadcast %13 : vector<1x32xf32> to vector<256x32xf32>
      %15 = arith.addf %12, %14 : vector<256x32xf32>
      %cst_14 = arith.constant 0.000000e+00 : f32
      %16 = vector.broadcast %cst_14 : f32 to vector<256x32xf32>
      %17 = arith.cmpf oge, %15, %16 : vector<256x32xf32>
      %cst_15 = arith.constant 2.000000e-01 : f32
      %18 = vector.broadcast %cst_15 : f32 to vector<256x32xf32>
      %19 = arith.mulf %18, %15 : vector<256x32xf32>
      %20 = arith.select %17, %15, %19 : vector<256x32xi1>, vector<256x32xf32>
      %cst_16 = arith.constant 1.41421354 : f32
      %21 = vector.broadcast %cst_16 : f32 to vector<256x32xf32>
      %22 = arith.mulf %20, %21 : vector<256x32xf32>
      %23 = arith.truncf %22 : vector<256x32xf32> to vector<256x32xbf16>
      %c0_17 = arith.constant 0 : index
      %c0_18 = arith.constant 0 : index
      %24 = vector.load %arg6[%c0_17, %c0_18] : memref<256x32xbf16, #tpu.memory_space<vmem>>, vector<256x32xbf16>
      tpu.vector_store %arg6[%c0_17, %c0_18], %23 {strides = array<i32>} : memref<256x32xbf16, #tpu.memory_space<vmem>>, vector<256x32xbf16>,
    } else {
    }
    return
  }
  func.func @transform_0(%arg0: i32, %arg1: i32, %arg2: i32) -> (i32, i32) {
    %c0_i32 = arith.constant 0 : i32
    return %arg0, %arg2 : i32, i32
  }
  func.func @transform_1(%arg0: i32, %arg1: i32, %arg2: i32) -> (i32, i32) {
    %c0_i32 = arith.constant 0 : i32
    return %arg2, %arg1 : i32, i32
  }
  func.func @transform_2(%arg0: i32, %arg1: i32, %arg2: i32) -> (i32, i32) {
    %c0_i32 = arith.constant 0 : i32
    %c0_i32_0 = arith.constant 0 : i32
    return %c0_i32, %arg1 : i32, i32
  }
  func.func @transform_3(%arg0: i32, %arg1: i32, %arg2: i32) -> (i32, i32) {
    %c0_i32 = arith.constant 0 : i32
    return %arg0, %arg1 : i32, i32
  }
}

module attributes {stable_mosaic.version = 11 : i64} {
  func.func @_conv_taps_kernel(%arg0: i32, %arg1: i32, %arg2: memref<1x1x328x32xbf16, #tpu.memory_space<vmem>>, %arg3: memref<9x32x32xbf16, #tpu.memory_space<vmem>>, %arg4: memref<1x32xf32, #tpu.memory_space<vmem>>, %arg5: memref<1x288x32xbf16, #tpu.memory_space<vmem>>) attributes {dimension_semantics = [#tpu.dimension_semantics<parallel>, #tpu.dimension_semantics<parallel>], iteration_bounds = array<i64: 2, 1>, scalar_prefetch = 0 : i64, scratch_operands = 0 : i64, tpu.core_type = #tpu.core_type<tc>, window_params = [{transform_indices = @transform_0, window_bounds = array<i64: 1, 1, 328, 32>}, {transform_indices = @transform_1, window_bounds = array<i64: 9, 32, 32>}, {transform_indices = @transform_2, window_bounds = array<i64: 1, 32>}, {transform_indices = @transform_3, window_bounds = array<i64: 1, 288, 32>}]} {
    %c0 = arith.constant 0 : index
    %c0_0 = arith.constant 0 : index
    %c0_1 = arith.constant 0 : index
    %c0_2 = arith.constant 0 : index
    %0 = vector.load %arg2[%c0, %c0_0, %c0_1, %c0_2] : memref<1x1x328x32xbf16, #tpu.memory_space<vmem>>, vector<1x1x288x32xbf16>
    %1 = vector.shape_cast %0 : vector<1x1x288x32xbf16> to vector<288x32xbf16>
    %c0_3 = arith.constant 0 : index
    %c0_4 = arith.constant 0 : index
    %c0_5 = arith.constant 0 : index
    %2 = vector.load %arg3[%c0_3, %c0_4, %c0_5] : memref<9x32x32xbf16, #tpu.memory_space<vmem>>, vector<1x32x32xbf16>
    %3 = vector.shape_cast %2 : vector<1x32x32xbf16> to vector<32x32xbf16>
    %cst = arith.constant dense<0.000000e+00> : vector<288x32xf32>
    %4 = tpu.matmul %1, %3, %cst {dimension_numbers = #tpu.dot_dimension_numbers<[1], [0], [0], [1], [0, 0, 1, 1], [], []>} : vector<288x32xbf16>, vector<32x32xbf16>, vector<288x32xf32> -> vector<288x32xf32>
    %c0_6 = arith.constant 0 : index
    %c0_7 = arith.constant 0 : index
    %c1 = arith.constant 1 : index
    %c0_8 = arith.constant 0 : index
    %5 = vector.load %arg2[%c0_6, %c0_7, %c1, %c0_8] : memref<1x1x328x32xbf16, #tpu.memory_space<vmem>>, vector<1x1x288x32xbf16>
    %6 = vector.shape_cast %5 : vector<1x1x288x32xbf16> to vector<288x32xbf16>
    %c1_9 = arith.constant 1 : index
    %c0_10 = arith.constant 0 : index
    %c0_11 = arith.constant 0 : index
    %7 = vector.load %arg3[%c1_9, %c0_10, %c0_11] : memref<9x32x32xbf16, #tpu.memory_space<vmem>>, vector<1x32x32xbf16>
    %8 = vector.shape_cast %7 : vector<1x32x32xbf16> to vector<32x32xbf16>
    %cst_12 = arith.constant dense<0.000000e+00> : vector<288x32xf32>
    %9 = tpu.matmul %6, %8, %cst_12 {dimension_numbers = #tpu.dot_dimension_numbers<[1], [0], [0], [1], [0, 0, 1, 1], [], []>} : vector<288x32xbf16>, vector<32x32xbf16>, vector<288x32xf32> -> vector<288x32xf32>
    %10 = arith.addf %4, %9 : vector<288x32xf32>
    %c0_13 = arith.constant 0 : index
    %c0_14 = arith.constant 0 : index
    %c2 = arith.constant 2 : index
    %c0_15 = arith.constant 0 : index
    %11 = vector.load %arg2[%c0_13, %c0_14, %c2, %c0_15] : memref<1x1x328x32xbf16, #tpu.memory_space<vmem>>, vector<1x1x288x32xbf16>
    %12 = vector.shape_cast %11 : vector<1x1x288x32xbf16> to vector<288x32xbf16>
    %c2_16 = arith.constant 2 : index
    %c0_17 = arith.constant 0 : index
    %c0_18 = arith.constant 0 : index
    %13 = vector.load %arg3[%c2_16, %c0_17, %c0_18] : memref<9x32x32xbf16, #tpu.memory_space<vmem>>, vector<1x32x32xbf16>
    %14 = vector.shape_cast %13 : vector<1x32x32xbf16> to vector<32x32xbf16>
    %cst_19 = arith.constant dense<0.000000e+00> : vector<288x32xf32>
    %15 = tpu.matmul %12, %14, %cst_19 {dimension_numbers = #tpu.dot_dimension_numbers<[1], [0], [0], [1], [0, 0, 1, 1], [], []>} : vector<288x32xbf16>, vector<32x32xbf16>, vector<288x32xf32> -> vector<288x32xf32>
    %16 = arith.addf %10, %15 : vector<288x32xf32>
    %c0_20 = arith.constant 0 : index
    %c0_21 = arith.constant 0 : index
    %c18 = arith.constant 18 : index
    %c0_22 = arith.constant 0 : index
    %17 = vector.load %arg2[%c0_20, %c0_21, %c18, %c0_22] : memref<1x1x328x32xbf16, #tpu.memory_space<vmem>>, vector<1x1x288x32xbf16>
    %18 = vector.shape_cast %17 : vector<1x1x288x32xbf16> to vector<288x32xbf16>
    %c3 = arith.constant 3 : index
    %c0_23 = arith.constant 0 : index
    %c0_24 = arith.constant 0 : index
    %19 = vector.load %arg3[%c3, %c0_23, %c0_24] : memref<9x32x32xbf16, #tpu.memory_space<vmem>>, vector<1x32x32xbf16>
    %20 = vector.shape_cast %19 : vector<1x32x32xbf16> to vector<32x32xbf16>
    %cst_25 = arith.constant dense<0.000000e+00> : vector<288x32xf32>
    %21 = tpu.matmul %18, %20, %cst_25 {dimension_numbers = #tpu.dot_dimension_numbers<[1], [0], [0], [1], [0, 0, 1, 1], [], []>} : vector<288x32xbf16>, vector<32x32xbf16>, vector<288x32xf32> -> vector<288x32xf32>
    %22 = arith.addf %16, %21 : vector<288x32xf32>
    %c0_26 = arith.constant 0 : index
    %c0_27 = arith.constant 0 : index
    %c19 = arith.constant 19 : index
    %c0_28 = arith.constant 0 : index
    %23 = vector.load %arg2[%c0_26, %c0_27, %c19, %c0_28] : memref<1x1x328x32xbf16, #tpu.memory_space<vmem>>, vector<1x1x288x32xbf16>
    %24 = vector.shape_cast %23 : vector<1x1x288x32xbf16> to vector<288x32xbf16>
    %c4 = arith.constant 4 : index
    %c0_29 = arith.constant 0 : index
    %c0_30 = arith.constant 0 : index
    %25 = vector.load %arg3[%c4, %c0_29, %c0_30] : memref<9x32x32xbf16, #tpu.memory_space<vmem>>, vector<1x32x32xbf16>
    %26 = vector.shape_cast %25 : vector<1x32x32xbf16> to vector<32x32xbf16>
    %cst_31 = arith.constant dense<0.000000e+00> : vector<288x32xf32>
    %27 = tpu.matmul %24, %26, %cst_31 {dimension_numbers = #tpu.dot_dimension_numbers<[1], [0], [0], [1], [0, 0, 1, 1], [], []>} : vector<288x32xbf16>, vector<32x32xbf16>, vector<288x32xf32> -> vector<288x32xf32>
    %28 = arith.addf %22, %27 : vector<288x32xf32>
    %c0_32 = arith.constant 0 : index
    %c0_33 = arith.constant 0 : index
    %c20 = arith.constant 20 : index
    %c0_34 = arith.constant 0 : index
    %29 = vector.load %arg2[%c0_32, %c0_33, %c20, %c0_34] : memref<1x1x328x32xbf16, #tpu.memory_space<vmem>>, vector<1x1x288x32xbf16>
    %30 = vector.shape_cast %29 : vector<1x1x288x32xbf16> to vector<288x32xbf16>
    %c5 = arith.constant 5 : index
    %c0_35 = arith.constant 0 : index
    %c0_36 = arith.constant 0 : index
    %31 = vector.load %arg3[%c5, %c0_35, %c0_36] : memref<9x32x32xbf16, #tpu.memory_space<vmem>>, vector<1x32x32xbf16>
    %32 = vector.shape_cast %31 : vector<1x32x32xbf16> to vector<32x32xbf16>
    %cst_37 = arith.constant dense<0.000000e+00> : vector<288x32xf32>
    %33 = tpu.matmul %30, %32, %cst_37 {dimension_numbers = #tpu.dot_dimension_numbers<[1], [0], [0], [1], [0, 0, 1, 1], [], []>} : vector<288x32xbf16>, vector<32x32xbf16>, vector<288x32xf32> -> vector<288x32xf32>
    %34 = arith.addf %28, %33 : vector<288x32xf32>
    %c0_38 = arith.constant 0 : index
    %c0_39 = arith.constant 0 : index
    %c36 = arith.constant 36 : index
    %c0_40 = arith.constant 0 : index
    %35 = vector.load %arg2[%c0_38, %c0_39, %c36, %c0_40] : memref<1x1x328x32xbf16, #tpu.memory_space<vmem>>, vector<1x1x288x32xbf16>
    %36 = vector.shape_cast %35 : vector<1x1x288x32xbf16> to vector<288x32xbf16>
    %c6 = arith.constant 6 : index
    %c0_41 = arith.constant 0 : index
    %c0_42 = arith.constant 0 : index
    %37 = vector.load %arg3[%c6, %c0_41, %c0_42] : memref<9x32x32xbf16, #tpu.memory_space<vmem>>, vector<1x32x32xbf16>
    %38 = vector.shape_cast %37 : vector<1x32x32xbf16> to vector<32x32xbf16>
    %cst_43 = arith.constant dense<0.000000e+00> : vector<288x32xf32>
    %39 = tpu.matmul %36, %38, %cst_43 {dimension_numbers = #tpu.dot_dimension_numbers<[1], [0], [0], [1], [0, 0, 1, 1], [], []>} : vector<288x32xbf16>, vector<32x32xbf16>, vector<288x32xf32> -> vector<288x32xf32>
    %40 = arith.addf %34, %39 : vector<288x32xf32>
    %c0_44 = arith.constant 0 : index
    %c0_45 = arith.constant 0 : index
    %c37 = arith.constant 37 : index
    %c0_46 = arith.constant 0 : index
    %41 = vector.load %arg2[%c0_44, %c0_45, %c37, %c0_46] : memref<1x1x328x32xbf16, #tpu.memory_space<vmem>>, vector<1x1x288x32xbf16>
    %42 = vector.shape_cast %41 : vector<1x1x288x32xbf16> to vector<288x32xbf16>
    %c7 = arith.constant 7 : index
    %c0_47 = arith.constant 0 : index
    %c0_48 = arith.constant 0 : index
    %43 = vector.load %arg3[%c7, %c0_47, %c0_48] : memref<9x32x32xbf16, #tpu.memory_space<vmem>>, vector<1x32x32xbf16>
    %44 = vector.shape_cast %43 : vector<1x32x32xbf16> to vector<32x32xbf16>
    %cst_49 = arith.constant dense<0.000000e+00> : vector<288x32xf32>
    %45 = tpu.matmul %42, %44, %cst_49 {dimension_numbers = #tpu.dot_dimension_numbers<[1], [0], [0], [1], [0, 0, 1, 1], [], []>} : vector<288x32xbf16>, vector<32x32xbf16>, vector<288x32xf32> -> vector<288x32xf32>
    %46 = arith.addf %40, %45 : vector<288x32xf32>
    %c0_50 = arith.constant 0 : index
    %c0_51 = arith.constant 0 : index
    %c38 = arith.constant 38 : index
    %c0_52 = arith.constant 0 : index
    %47 = vector.load %arg2[%c0_50, %c0_51, %c38, %c0_52] : memref<1x1x328x32xbf16, #tpu.memory_space<vmem>>, vector<1x1x288x32xbf16>
    %48 = vector.shape_cast %47 : vector<1x1x288x32xbf16> to vector<288x32xbf16>
    %c8 = arith.constant 8 : index
    %c0_53 = arith.constant 0 : index
    %c0_54 = arith.constant 0 : index
    %49 = vector.load %arg3[%c8, %c0_53, %c0_54] : memref<9x32x32xbf16, #tpu.memory_space<vmem>>, vector<1x32x32xbf16>
    %50 = vector.shape_cast %49 : vector<1x32x32xbf16> to vector<32x32xbf16>
    %cst_55 = arith.constant dense<0.000000e+00> : vector<288x32xf32>
    %51 = tpu.matmul %48, %50, %cst_55 {dimension_numbers = #tpu.dot_dimension_numbers<[1], [0], [0], [1], [0, 0, 1, 1], [], []>} : vector<288x32xbf16>, vector<32x32xbf16>, vector<288x32xf32> -> vector<288x32xf32>
    %52 = arith.addf %46, %51 : vector<288x32xf32>
    %c0_56 = arith.constant 0 : index
    %c0_57 = arith.constant 0 : index
    %53 = vector.load %arg4[%c0_56, %c0_57] : memref<1x32xf32, #tpu.memory_space<vmem>>, vector<1x32xf32>
    %54 = vector.broadcast %53 : vector<1x32xf32> to vector<288x32xf32>
    %55 = arith.addf %52, %54 : vector<288x32xf32>
    %cst_58 = arith.constant 0.000000e+00 : f32
    %56 = vector.broadcast %cst_58 : f32 to vector<288x32xf32>
    %57 = arith.cmpf oge, %55, %56 : vector<288x32xf32>
    %cst_59 = arith.constant 2.000000e-01 : f32
    %58 = vector.broadcast %cst_59 : f32 to vector<288x32xf32>
    %59 = arith.mulf %58, %55 : vector<288x32xf32>
    %60 = arith.select %57, %55, %59 : vector<288x32xi1>, vector<288x32xf32>
    %cst_60 = arith.constant 1.41421354 : f32
    %61 = vector.broadcast %cst_60 : f32 to vector<288x32xf32>
    %62 = arith.mulf %60, %61 : vector<288x32xf32>
    %63 = arith.truncf %62 : vector<288x32xf32> to vector<288x32xbf16>
    %c0_61 = arith.constant 0 : index
    %c0_62 = arith.constant 0 : index
    %c0_63 = arith.constant 0 : index
    %64 = vector.load %arg5[%c0_61, %c0_62, %c0_63] : memref<1x288x32xbf16, #tpu.memory_space<vmem>>, vector<1x288x32xbf16>
    %65 = vector.shape_cast %64 : vector<1x288x32xbf16> to vector<288x32xbf16>
    %66 = vector.shape_cast %63 : vector<288x32xbf16> to vector<1x288x32xbf16>
    tpu.vector_store %arg5[%c0_61, %c0_62, %c0_63], %66 {strides = array<i32>} : memref<1x288x32xbf16, #tpu.memory_space<vmem>>, vector<1x288x32xbf16>,
    return
  }
  func.func @transform_0(%arg0: i32, %arg1: i32) -> (i32, i32, i32, i32) {
    %c0_i32 = arith.constant 0 : i32
    %c0_i32_0 = arith.constant 0 : i32
    %c0_i32_1 = arith.constant 0 : i32
    %c0_i32_2 = arith.constant 0 : i32
    return %arg0, %c0_i32, %c0_i32_0, %c0_i32_1 : i32, i32, i32, i32
  }
  func.func @transform_1(%arg0: i32, %arg1: i32) -> (i32, i32, i32) {
    %c0_i32 = arith.constant 0 : i32
    %c0_i32_0 = arith.constant 0 : i32
    %c0_i32_1 = arith.constant 0 : i32
    return %c0_i32, %c0_i32_0, %arg1 : i32, i32, i32
  }
  func.func @transform_2(%arg0: i32, %arg1: i32) -> (i32, i32) {
    %c0_i32 = arith.constant 0 : i32
    %c0_i32_0 = arith.constant 0 : i32
    return %c0_i32, %arg1 : i32, i32
  }
  func.func @transform_3(%arg0: i32, %arg1: i32) -> (i32, i32, i32) {
    %c0_i32 = arith.constant 0 : i32
    %c0_i32_0 = arith.constant 0 : i32
    return %arg0, %c0_i32, %arg1 : i32, i32, i32
  }
}

module attributes {stable_mosaic.version = 11 : i64} {
  func.func @_conv_taps_kernel(%arg0: i32, %arg1: i32, %arg2: memref<1x4x88x32xbf16, #tpu.memory_space<vmem>>, %arg3: memref<9x32x32xbf16, #tpu.memory_space<vmem>>, %arg4: memref<1x32xf32, #tpu.memory_space<vmem>>, %arg5: memref<1x72x32xbf16, #tpu.memory_space<vmem>>) attributes {dimension_semantics = [#tpu.dimension_semantics<parallel>, #tpu.dimension_semantics<parallel>], iteration_bounds = array<i64: 2, 1>, scalar_prefetch = 0 : i64, scratch_operands = 0 : i64, tpu.core_type = #tpu.core_type<tc>, window_params = [{transform_indices = @transform_0, window_bounds = array<i64: 1, 4, 88, 32>}, {transform_indices = @transform_1, window_bounds = array<i64: 9, 32, 32>}, {transform_indices = @transform_2, window_bounds = array<i64: 1, 32>}, {transform_indices = @transform_3, window_bounds = array<i64: 1, 72, 32>}]} {
    %c0 = arith.constant 0 : index
    %c0_0 = arith.constant 0 : index
    %c0_1 = arith.constant 0 : index
    %c0_2 = arith.constant 0 : index
    %0 = vector.load %arg2[%c0, %c0_0, %c0_1, %c0_2] : memref<1x4x88x32xbf16, #tpu.memory_space<vmem>>, vector<1x1x72x32xbf16>
    %1 = vector.shape_cast %0 : vector<1x1x72x32xbf16> to vector<72x32xbf16>
    %c0_3 = arith.constant 0 : index
    %c0_4 = arith.constant 0 : index
    %c0_5 = arith.constant 0 : index
    %2 = vector.load %arg3[%c0_3, %c0_4, %c0_5] : memref<9x32x32xbf16, #tpu.memory_space<vmem>>, vector<1x32x32xbf16>
    %3 = vector.shape_cast %2 : vector<1x32x32xbf16> to vector<32x32xbf16>
    %cst = arith.constant dense<0.000000e+00> : vector<72x32xf32>
    %4 = tpu.matmul %1, %3, %cst {dimension_numbers = #tpu.dot_dimension_numbers<[1], [0], [0], [1], [0, 0, 1, 1], [], []>} : vector<72x32xbf16>, vector<32x32xbf16>, vector<72x32xf32> -> vector<72x32xf32>
    %c0_6 = arith.constant 0 : index
    %c1 = arith.constant 1 : index
    %c0_7 = arith.constant 0 : index
    %c0_8 = arith.constant 0 : index
    %5 = vector.load %arg2[%c0_6, %c1, %c0_7, %c0_8] : memref<1x4x88x32xbf16, #tpu.memory_space<vmem>>, vector<1x1x72x32xbf16>
    %6 = vector.shape_cast %5 : vector<1x1x72x32xbf16> to vector<72x32xbf16>
    %c1_9 = arith.constant 1 : index
    %c0_10 = arith.constant 0 : index
    %c0_11 = arith.constant 0 : index
    %7 = vector.load %arg3[%c1_9, %c0_10, %c0_11] : memref<9x32x32xbf16, #tpu.memory_space<vmem>>, vector<1x32x32xbf16>
    %8 = vector.shape_cast %7 : vector<1x32x32xbf16> to vector<32x32xbf16>
    %cst_12 = arith.constant dense<0.000000e+00> : vector<72x32xf32>
    %9 = tpu.matmul %6, %8, %cst_12 {dimension_numbers = #tpu.dot_dimension_numbers<[1], [0], [0], [1], [0, 0, 1, 1], [], []>} : vector<72x32xbf16>, vector<32x32xbf16>, vector<72x32xf32> -> vector<72x32xf32>
    %10 = arith.addf %4, %9 : vector<72x32xf32>
    %c0_13 = arith.constant 0 : index
    %c0_14 = arith.constant 0 : index
    %c1_15 = arith.constant 1 : index
    %c0_16 = arith.constant 0 : index
    %11 = vector.load %arg2[%c0_13, %c0_14, %c1_15, %c0_16] : memref<1x4x88x32xbf16, #tpu.memory_space<vmem>>, vector<1x1x72x32xbf16>
    %12 = vector.shape_cast %11 : vector<1x1x72x32xbf16> to vector<72x32xbf16>
    %c2 = arith.constant 2 : index
    %c0_17 = arith.constant 0 : index
    %c0_18 = arith.constant 0 : index
    %13 = vector.load %arg3[%c2, %c0_17, %c0_18] : memref<9x32x32xbf16, #tpu.memory_space<vmem>>, vector<1x32x32xbf16>
    %14 = vector.shape_cast %13 : vector<1x32x32xbf16> to vector<32x32xbf16>
    %cst_19 = arith.constant dense<0.000000e+00> : vector<72x32xf32>
    %15 = tpu.matmul %12, %14, %cst_19 {dimension_numbers = #tpu.dot_dimension_numbers<[1], [0], [0], [1], [0, 0, 1, 1], [], []>} : vector<72x32xbf16>, vector<32x32xbf16>, vector<72x32xf32> -> vector<72x32xf32>
    %16 = arith.addf %10, %15 : vector<72x32xf32>
    %c0_20 = arith.constant 0 : index
    %c2_21 = arith.constant 2 : index
    %c0_22 = arith.constant 0 : index
    %c0_23 = arith.constant 0 : index
    %17 = vector.load %arg2[%c0_20, %c2_21, %c0_22, %c0_23] : memref<1x4x88x32xbf16, #tpu.memory_space<vmem>>, vector<1x1x72x32xbf16>
    %18 = vector.shape_cast %17 : vector<1x1x72x32xbf16> to vector<72x32xbf16>
    %c3 = arith.constant 3 : index
    %c0_24 = arith.constant 0 : index
    %c0_25 = arith.constant 0 : index
    %19 = vector.load %arg3[%c3, %c0_24, %c0_25] : memref<9x32x32xbf16, #tpu.memory_space<vmem>>, vector<1x32x32xbf16>
    %20 = vector.shape_cast %19 : vector<1x32x32xbf16> to vector<32x32xbf16>
    %cst_26 = arith.constant dense<0.000000e+00> : vector<72x32xf32>
    %21 = tpu.matmul %18, %20, %cst_26 {dimension_numbers = #tpu.dot_dimension_numbers<[1], [0], [0], [1], [0, 0, 1, 1], [], []>} : vector<72x32xbf16>, vector<32x32xbf16>, vector<72x32xf32> -> vector<72x32xf32>
    %22 = arith.addf %16, %21 : vector<72x32xf32>
    %c0_27 = arith.constant 0 : index
    %c3_28 = arith.constant 3 : index
    %c0_29 = arith.constant 0 : index
    %c0_30 = arith.constant 0 : index
    %23 = vector.load %arg2[%c0_27, %c3_28, %c0_29, %c0_30] : memref<1x4x88x32xbf16, #tpu.memory_space<vmem>>, vector<1x1x72x32xbf16>
    %24 = vector.shape_cast %23 : vector<1x1x72x32xbf16> to vector<72x32xbf16>
    %c4 = arith.constant 4 : index
    %c0_31 = arith.constant 0 : index
    %c0_32 = arith.constant 0 : index
    %25 = vector.load %arg3[%c4, %c0_31, %c0_32] : memref<9x32x32xbf16, #tpu.memory_space<vmem>>, vector<1x32x32xbf16>
    %26 = vector.shape_cast %25 : vector<1x32x32xbf16> to vector<32x32xbf16>
    %cst_33 = arith.constant dense<0.000000e+00> : vector<72x32xf32>
    %27 = tpu.matmul %24, %26, %cst_33 {dimension_numbers = #tpu.dot_dimension_numbers<[1], [0], [0], [1], [0, 0, 1, 1], [], []>} : vector<72x32xbf16>, vector<32x32xbf16>, vector<72x32xf32> -> vector<72x32xf32>
    %28 = arith.addf %22, %27 : vector<72x32xf32>
    %c0_34 = arith.constant 0 : index
    %c2_35 = arith.constant 2 : index
    %c1_36 = arith.constant 1 : index
    %c0_37 = arith.constant 0 : index
    %29 = vector.load %arg2[%c0_34, %c2_35, %c1_36, %c0_37] : memref<1x4x88x32xbf16, #tpu.memory_space<vmem>>, vector<1x1x72x32xbf16>
    %30 = vector.shape_cast %29 : vector<1x1x72x32xbf16> to vector<72x32xbf16>
    %c5 = arith.constant 5 : index
    %c0_38 = arith.constant 0 : index
    %c0_39 = arith.constant 0 : index
    %31 = vector.load %arg3[%c5, %c0_38, %c0_39] : memref<9x32x32xbf16, #tpu.memory_space<vmem>>, vector<1x32x32xbf16>
    %32 = vector.shape_cast %31 : vector<1x32x32xbf16> to vector<32x32xbf16>
    %cst_40 = arith.constant dense<0.000000e+00> : vector<72x32xf32>
    %33 = tpu.matmul %30, %32, %cst_40 {dimension_numbers = #tpu.dot_dimension_numbers<[1], [0], [0], [1], [0, 0, 1, 1], [], []>} : vector<72x32xbf16>, vector<32x32xbf16>, vector<72x32xf32> -> vector<72x32xf32>
    %34 = arith.addf %28, %33 : vector<72x32xf32>
    %c0_41 = arith.constant 0 : index
    %c0_42 = arith.constant 0 : index
    %c9 = arith.constant 9 : index
    %c0_43 = arith.constant 0 : index
    %35 = vector.load %arg2[%c0_41, %c0_42, %c9, %c0_43] : memref<1x4x88x32xbf16, #tpu.memory_space<vmem>>, vector<1x1x72x32xbf16>
    %36 = vector.shape_cast %35 : vector<1x1x72x32xbf16> to vector<72x32xbf16>
    %c6 = arith.constant 6 : index
    %c0_44 = arith.constant 0 : index
    %c0_45 = arith.constant 0 : index
    %37 = vector.load %arg3[%c6, %c0_44, %c0_45] : memref<9x32x32xbf16, #tpu.memory_space<vmem>>, vector<1x32x32xbf16>
    %38 = vector.shape_cast %37 : vector<1x32x32xbf16> to vector<32x32xbf16>
    %cst_46 = arith.constant dense<0.000000e+00> : vector<72x32xf32>
    %39 = tpu.matmul %36, %38, %cst_46 {dimension_numbers = #tpu.dot_dimension_numbers<[1], [0], [0], [1], [0, 0, 1, 1], [], []>} : vector<72x32xbf16>, vector<32x32xbf16>, vector<72x32xf32> -> vector<72x32xf32>
    %40 = arith.addf %34, %39 : vector<72x32xf32>
    %c0_47 = arith.constant 0 : index
    %c1_48 = arith.constant 1 : index
    %c9_49 = arith.constant 9 : index
    %c0_50 = arith.constant 0 : index
    %41 = vector.load %arg2[%c0_47, %c1_48, %c9_49, %c0_50] : memref<1x4x88x32xbf16, #tpu.memory_space<vmem>>, vector<1x1x72x32xbf16>
    %42 = vector.shape_cast %41 : vector<1x1x72x32xbf16> to vector<72x32xbf16>
    %c7 = arith.constant 7 : index
    %c0_51 = arith.constant 0 : index
    %c0_52 = arith.constant 0 : index
    %43 = vector.load %arg3[%c7, %c0_51, %c0_52] : memref<9x32x32xbf16, #tpu.memory_space<vmem>>, vector<1x32x32xbf16>
    %44 = vector.shape_cast %43 : vector<1x32x32xbf16> to vector<32x32xbf16>
    %cst_53 = arith.constant dense<0.000000e+00> : vector<72x32xf32>
    %45 = tpu.matmul %42, %44, %cst_53 {dimension_numbers = #tpu.dot_dimension_numbers<[1], [0], [0], [1], [0, 0, 1, 1], [], []>} : vector<72x32xbf16>, vector<32x32xbf16>, vector<72x32xf32> -> vector<72x32xf32>
    %46 = arith.addf %40, %45 : vector<72x32xf32>
    %c0_54 = arith.constant 0 : index
    %c0_55 = arith.constant 0 : index
    %c10 = arith.constant 10 : index
    %c0_56 = arith.constant 0 : index
    %47 = vector.load %arg2[%c0_54, %c0_55, %c10, %c0_56] : memref<1x4x88x32xbf16, #tpu.memory_space<vmem>>, vector<1x1x72x32xbf16>
    %48 = vector.shape_cast %47 : vector<1x1x72x32xbf16> to vector<72x32xbf16>
    %c8 = arith.constant 8 : index
    %c0_57 = arith.constant 0 : index
    %c0_58 = arith.constant 0 : index
    %49 = vector.load %arg3[%c8, %c0_57, %c0_58] : memref<9x32x32xbf16, #tpu.memory_space<vmem>>, vector<1x32x32xbf16>
    %50 = vector.shape_cast %49 : vector<1x32x32xbf16> to vector<32x32xbf16>
    %cst_59 = arith.constant dense<0.000000e+00> : vector<72x32xf32>
    %51 = tpu.matmul %48, %50, %cst_59 {dimension_numbers = #tpu.dot_dimension_numbers<[1], [0], [0], [1], [0, 0, 1, 1], [], []>} : vector<72x32xbf16>, vector<32x32xbf16>, vector<72x32xf32> -> vector<72x32xf32>
    %52 = arith.addf %46, %51 : vector<72x32xf32>
    %c0_60 = arith.constant 0 : index
    %c0_61 = arith.constant 0 : index
    %53 = vector.load %arg4[%c0_60, %c0_61] : memref<1x32xf32, #tpu.memory_space<vmem>>, vector<1x32xf32>
    %54 = vector.broadcast %53 : vector<1x32xf32> to vector<72x32xf32>
    %55 = arith.addf %52, %54 : vector<72x32xf32>
    %cst_62 = arith.constant 0.000000e+00 : f32
    %56 = vector.broadcast %cst_62 : f32 to vector<72x32xf32>
    %57 = arith.cmpf oge, %55, %56 : vector<72x32xf32>
    %cst_63 = arith.constant 2.000000e-01 : f32
    %58 = vector.broadcast %cst_63 : f32 to vector<72x32xf32>
    %59 = arith.mulf %58, %55 : vector<72x32xf32>
    %60 = arith.select %57, %55, %59 : vector<72x32xi1>, vector<72x32xf32>
    %cst_64 = arith.constant 1.41421354 : f32
    %61 = vector.broadcast %cst_64 : f32 to vector<72x32xf32>
    %62 = arith.mulf %60, %61 : vector<72x32xf32>
    %63 = arith.truncf %62 : vector<72x32xf32> to vector<72x32xbf16>
    %c0_65 = arith.constant 0 : index
    %c0_66 = arith.constant 0 : index
    %c0_67 = arith.constant 0 : index
    %64 = vector.load %arg5[%c0_65, %c0_66, %c0_67] : memref<1x72x32xbf16, #tpu.memory_space<vmem>>, vector<1x72x32xbf16>
    %65 = vector.shape_cast %64 : vector<1x72x32xbf16> to vector<72x32xbf16>
    %66 = vector.shape_cast %63 : vector<72x32xbf16> to vector<1x72x32xbf16>
    tpu.vector_store %arg5[%c0_65, %c0_66, %c0_67], %66 {strides = array<i32>} : memref<1x72x32xbf16, #tpu.memory_space<vmem>>, vector<1x72x32xbf16>,
    return
  }
  func.func @transform_0(%arg0: i32, %arg1: i32) -> (i32, i32, i32, i32) {
    %c0_i32 = arith.constant 0 : i32
    %c0_i32_0 = arith.constant 0 : i32
    %c0_i32_1 = arith.constant 0 : i32
    %c0_i32_2 = arith.constant 0 : i32
    return %arg0, %c0_i32, %c0_i32_0, %c0_i32_1 : i32, i32, i32, i32
  }
  func.func @transform_1(%arg0: i32, %arg1: i32) -> (i32, i32, i32) {
    %c0_i32 = arith.constant 0 : i32
    %c0_i32_0 = arith.constant 0 : i32
    %c0_i32_1 = arith.constant 0 : i32
    return %c0_i32, %c0_i32_0, %arg1 : i32, i32, i32
  }
  func.func @transform_2(%arg0: i32, %arg1: i32) -> (i32, i32) {
    %c0_i32 = arith.constant 0 : i32
    %c0_i32_0 = arith.constant 0 : i32
    return %c0_i32, %arg1 : i32, i32
  }
  func.func @transform_3(%arg0: i32, %arg1: i32) -> (i32, i32, i32) {
    %c0_i32 = arith.constant 0 : i32
    %c0_i32_0 = arith.constant 0 : i32
    return %arg0, %c0_i32, %arg1 : i32, i32, i32
  }
}

module attributes {stable_mosaic.version = 11 : i64} {
  func.func @_mm_kernel(%arg0: i32, %arg1: i32, %arg2: i32, %arg3: memref<128x32xbf16, #tpu.memory_space<vmem>>, %arg4: memref<32x32xbf16, #tpu.memory_space<vmem>>, %arg5: memref<1x32xf32, #tpu.memory_space<vmem>>, %arg6: memref<128x32xbf16, #tpu.memory_space<vmem>>, %arg7: memref<128x32xbf16, #tpu.memory_space<vmem>>, %arg8: memref<128x32xf32, #tpu.memory_space<vmem>>) attributes {dimension_semantics = [#tpu.dimension_semantics<parallel>, #tpu.dimension_semantics<parallel>, #tpu.dimension_semantics<arbitrary>], iteration_bounds = array<i64: 1, 1, 1>, scalar_prefetch = 0 : i64, scratch_operands = 1 : i64, tpu.core_type = #tpu.core_type<tc>, window_params = [{transform_indices = @transform_0, window_bounds = array<i64: 128, 32>}, {transform_indices = @transform_1, window_bounds = array<i64: 32, 32>}, {transform_indices = @transform_2, window_bounds = array<i64: 1, 32>}, {transform_indices = @transform_3, window_bounds = array<i64: 128, 32>}, {transform_indices = @transform_4, window_bounds = array<i64: 128, 32>}]} {
    %c0_i32 = arith.constant 0 : i32
    %0 = arith.cmpi eq, %arg2, %c0_i32 : i32
    %1 = arith.extui %0 : i1 to i32
    %c0_i32_0 = arith.constant 0 : i32
    %2 = arith.cmpi ne, %1, %c0_i32_0 : i32
    scf.if %2 {
      %cst_10 = arith.constant 0.000000e+00 : f32
      %12 = vector.broadcast %cst_10 : f32 to vector<128x32xf32>
      %c0_11 = arith.constant 0 : index
      %c0_12 = arith.constant 0 : index
      %13 = vector.load %arg8[%c0_11, %c0_12] : memref<128x32xf32, #tpu.memory_space<vmem>>, vector<128x32xf32>
      tpu.vector_store %arg8[%c0_11, %c0_12], %12 {strides = array<i32>} : memref<128x32xf32, #tpu.memory_space<vmem>>, vector<128x32xf32>,
    } else {
    }
    %c0 = arith.constant 0 : index
    %c0_1 = arith.constant 0 : index
    %3 = vector.load %arg8[%c0, %c0_1] : memref<128x32xf32, #tpu.memory_space<vmem>>, vector<128x32xf32>
    %c0_2 = arith.constant 0 : index
    %c0_3 = arith.constant 0 : index
    %4 = vector.load %arg3[%c0_2, %c0_3] : memref<128x32xbf16, #tpu.memory_space<vmem>>, vector<128x32xbf16>
    %c0_4 = arith.constant 0 : index
    %c0_5 = arith.constant 0 : index
    %5 = vector.load %arg4[%c0_4, %c0_5] : memref<32x32xbf16, #tpu.memory_space<vmem>>, vector<32x32xbf16>
    %cst = arith.constant dense<0.000000e+00> : vector<128x32xf32>
    %6 = tpu.matmul %4, %5, %cst {dimension_numbers = #tpu.dot_dimension_numbers<[1], [0], [0], [1], [0, 0, 1, 1], [], []>} : vector<128x32xbf16>, vector<32x32xbf16>, vector<128x32xf32> -> vector<128x32xf32>
    %7 = arith.addf %3, %6 : vector<128x32xf32>
    %c0_6 = arith.constant 0 : index
    %c0_7 = arith.constant 0 : index
    %8 = vector.load %arg8[%c0_6, %c0_7] : memref<128x32xf32, #tpu.memory_space<vmem>>, vector<128x32xf32>
    tpu.vector_store %arg8[%c0_6, %c0_7], %7 {strides = array<i32>} : memref<128x32xf32, #tpu.memory_space<vmem>>, vector<128x32xf32>,
    %c0_i32_8 = arith.constant 0 : i32
    %9 = arith.cmpi eq, %arg2, %c0_i32_8 : i32
    %10 = arith.extui %9 : i1 to i32
    %c0_i32_9 = arith.constant 0 : i32
    %11 = arith.cmpi ne, %10, %c0_i32_9 : i32
    scf.if %11 {
      %c0_10 = arith.constant 0 : index
      %c0_11 = arith.constant 0 : index
      %12 = vector.load %arg8[%c0_10, %c0_11] : memref<128x32xf32, #tpu.memory_space<vmem>>, vector<128x32xf32>
      %c0_12 = arith.constant 0 : index
      %c0_13 = arith.constant 0 : index
      %13 = vector.load %arg5[%c0_12, %c0_13] : memref<1x32xf32, #tpu.memory_space<vmem>>, vector<1x32xf32>
      %14 = vector.broadcast %13 : vector<1x32xf32> to vector<128x32xf32>
      %15 = arith.addf %12, %14 : vector<128x32xf32>
      %c0_14 = arith.constant 0 : index
      %c0_15 = arith.constant 0 : index
      %16 = vector.load %arg6[%c0_14, %c0_15] : memref<128x32xbf16, #tpu.memory_space<vmem>>, vector<128x32xbf16>
      %17 = arith.extf %16 : vector<128x32xbf16> to vector<128x32xf32>
      %18 = arith.addf %15, %17 : vector<128x32xf32>
      %cst_16 = arith.constant 0.707106769 : f32
      %19 = vector.broadcast %cst_16 : f32 to vector<128x32xf32>
      %20 = arith.mulf %18, %19 : vector<128x32xf32>
      %21 = arith.truncf %20 : vector<128x32xf32> to vector<128x32xbf16>
      %c0_17 = arith.constant 0 : index
      %c0_18 = arith.constant 0 : index
      %22 = vector.load %arg7[%c0_17, %c0_18] : memref<128x32xbf16, #tpu.memory_space<vmem>>, vector<128x32xbf16>
      tpu.vector_store %arg7[%c0_17, %c0_18], %21 {strides = array<i32>} : memref<128x32xbf16, #tpu.memory_space<vmem>>, vector<128x32xbf16>,
    } else {
    }
    return
  }
  func.func @transform_0(%arg0: i32, %arg1: i32, %arg2: i32) -> (i32, i32) {
    %c0_i32 = arith.constant 0 : i32
    return %arg0, %arg2 : i32, i32
  }
  func.func @transform_1(%arg0: i32, %arg1: i32, %arg2: i32) -> (i32, i32) {
    %c0_i32 = arith.constant 0 : i32
    return %arg2, %arg1 : i32, i32
  }
  func.func @transform_2(%arg0: i32, %arg1: i32, %arg2: i32) -> (i32, i32) {
    %c0_i32 = arith.constant 0 : i32
    %c0_i32_0 = arith.constant 0 : i32
    return %c0_i32, %arg1 : i32, i32
  }
  func.func @transform_3(%arg0: i32, %arg1: i32, %arg2: i32) -> (i32, i32) {
    %c0_i32 = arith.constant 0 : i32
    return %arg0, %arg1 : i32, i32
  }
  func.func @transform_4(%arg0: i32, %arg1: i32, %arg2: i32) -> (i32, i32) {
    %c0_i32 = arith.constant 0 : i32
    return %arg0, %arg1 : i32, i32
  }
}

module attributes {stable_mosaic.version = 11 : i64} {
  func.func @_conv_taps_kernel(%arg0: i32, %arg1: i32, %arg2: memref<1x1x104x32xbf16, #tpu.memory_space<vmem>>, %arg3: memref<9x32x32xbf16, #tpu.memory_space<vmem>>, %arg4: memref<1x32xf32, #tpu.memory_space<vmem>>, %arg5: memref<1x80x32xbf16, #tpu.memory_space<vmem>>) attributes {dimension_semantics = [#tpu.dimension_semantics<parallel>, #tpu.dimension_semantics<parallel>], iteration_bounds = array<i64: 2, 1>, scalar_prefetch = 0 : i64, scratch_operands = 0 : i64, tpu.core_type = #tpu.core_type<tc>, window_params = [{transform_indices = @transform_0, window_bounds = array<i64: 1, 1, 104, 32>}, {transform_indices = @transform_1, window_bounds = array<i64: 9, 32, 32>}, {transform_indices = @transform_2, window_bounds = array<i64: 1, 32>}, {transform_indices = @transform_3, window_bounds = array<i64: 1, 80, 32>}]} {
    %c0 = arith.constant 0 : index
    %c0_0 = arith.constant 0 : index
    %c0_1 = arith.constant 0 : index
    %c0_2 = arith.constant 0 : index
    %0 = vector.load %arg2[%c0, %c0_0, %c0_1, %c0_2] : memref<1x1x104x32xbf16, #tpu.memory_space<vmem>>, vector<1x1x80x32xbf16>
    %1 = vector.shape_cast %0 : vector<1x1x80x32xbf16> to vector<80x32xbf16>
    %c0_3 = arith.constant 0 : index
    %c0_4 = arith.constant 0 : index
    %c0_5 = arith.constant 0 : index
    %2 = vector.load %arg3[%c0_3, %c0_4, %c0_5] : memref<9x32x32xbf16, #tpu.memory_space<vmem>>, vector<1x32x32xbf16>
    %3 = vector.shape_cast %2 : vector<1x32x32xbf16> to vector<32x32xbf16>
    %cst = arith.constant dense<0.000000e+00> : vector<80x32xf32>
    %4 = tpu.matmul %1, %3, %cst {dimension_numbers = #tpu.dot_dimension_numbers<[1], [0], [0], [1], [0, 0, 1, 1], [], []>} : vector<80x32xbf16>, vector<32x32xbf16>, vector<80x32xf32> -> vector<80x32xf32>
    %c0_6 = arith.constant 0 : index
    %c0_7 = arith.constant 0 : index
    %c1 = arith.constant 1 : index
    %c0_8 = arith.constant 0 : index
    %5 = vector.load %arg2[%c0_6, %c0_7, %c1, %c0_8] : memref<1x1x104x32xbf16, #tpu.memory_space<vmem>>, vector<1x1x80x32xbf16>
    %6 = vector.shape_cast %5 : vector<1x1x80x32xbf16> to vector<80x32xbf16>
    %c1_9 = arith.constant 1 : index
    %c0_10 = arith.constant 0 : index
    %c0_11 = arith.constant 0 : index
    %7 = vector.load %arg3[%c1_9, %c0_10, %c0_11] : memref<9x32x32xbf16, #tpu.memory_space<vmem>>, vector<1x32x32xbf16>
    %8 = vector.shape_cast %7 : vector<1x32x32xbf16> to vector<32x32xbf16>
    %cst_12 = arith.constant dense<0.000000e+00> : vector<80x32xf32>
    %9 = tpu.matmul %6, %8, %cst_12 {dimension_numbers = #tpu.dot_dimension_numbers<[1], [0], [0], [1], [0, 0, 1, 1], [], []>} : vector<80x32xbf16>, vector<32x32xbf16>, vector<80x32xf32> -> vector<80x32xf32>
    %10 = arith.addf %4, %9 : vector<80x32xf32>
    %c0_13 = arith.constant 0 : index
    %c0_14 = arith.constant 0 : index
    %c2 = arith.constant 2 : index
    %c0_15 = arith.constant 0 : index
    %11 = vector.load %arg2[%c0_13, %c0_14, %c2, %c0_15] : memref<1x1x104x32xbf16, #tpu.memory_space<vmem>>, vector<1x1x80x32xbf16>
    %12 = vector.shape_cast %11 : vector<1x1x80x32xbf16> to vector<80x32xbf16>
    %c2_16 = arith.constant 2 : index
    %c0_17 = arith.constant 0 : index
    %c0_18 = arith.constant 0 : index
    %13 = vector.load %arg3[%c2_16, %c0_17, %c0_18] : memref<9x32x32xbf16, #tpu.memory_space<vmem>>, vector<1x32x32xbf16>
    %14 = vector.shape_cast %13 : vector<1x32x32xbf16> to vector<32x32xbf16>
    %cst_19 = arith.constant dense<0.000000e+00> : vector<80x32xf32>
    %15 = tpu.matmul %12, %14, %cst_19 {dimension_numbers = #tpu.dot_dimension_numbers<[1], [0], [0], [1], [0, 0, 1, 1], [], []>} : vector<80x32xbf16>, vector<32x32xbf16>, vector<80x32xf32> -> vector<80x32xf32>
    %16 = arith.addf %10, %15 : vector<80x32xf32>
    %c0_20 = arith.constant 0 : index
    %c0_21 = arith.constant 0 : index
    %c10 = arith.constant 10 : index
    %c0_22 = arith.constant 0 : index
    %17 = vector.load %arg2[%c0_20, %c0_21, %c10, %c0_22] : memref<1x1x104x32xbf16, #tpu.memory_space<vmem>>, vector<1x1x80x32xbf16>
    %18 = vector.shape_cast %17 : vector<1x1x80x32xbf16> to vector<80x32xbf16>
    %c3 = arith.constant 3 : index
    %c0_23 = arith.constant 0 : index
    %c0_24 = arith.constant 0 : index
    %19 = vector.load %arg3[%c3, %c0_23, %c0_24] : memref<9x32x32xbf16, #tpu.memory_space<vmem>>, vector<1x32x32xbf16>
    %20 = vector.shape_cast %19 : vector<1x32x32xbf16> to vector<32x32xbf16>
    %cst_25 = arith.constant dense<0.000000e+00> : vector<80x32xf32>
    %21 = tpu.matmul %18, %20, %cst_25 {dimension_numbers = #tpu.dot_dimension_numbers<[1], [0], [0], [1], [0, 0, 1, 1], [], []>} : vector<80x32xbf16>, vector<32x32xbf16>, vector<80x32xf32> -> vector<80x32xf32>
    %22 = arith.addf %16, %21 : vector<80x32xf32>
    %c0_26 = arith.constant 0 : index
    %c0_27 = arith.constant 0 : index
    %c11 = arith.constant 11 : index
    %c0_28 = arith.constant 0 : index
    %23 = vector.load %arg2[%c0_26, %c0_27, %c11, %c0_28] : memref<1x1x104x32xbf16, #tpu.memory_space<vmem>>, vector<1x1x80x32xbf16>
    %24 = vector.shape_cast %23 : vector<1x1x80x32xbf16> to vector<80x32xbf16>
    %c4 = arith.constant 4 : index
    %c0_29 = arith.constant 0 : index
    %c0_30 = arith.constant 0 : index
    %25 = vector.load %arg3[%c4, %c0_29, %c0_30] : memref<9x32x32xbf16, #tpu.memory_space<vmem>>, vector<1x32x32xbf16>
    %26 = vector.shape_cast %25 : vector<1x32x32xbf16> to vector<32x32xbf16>
    %cst_31 = arith.constant dense<0.000000e+00> : vector<80x32xf32>
    %27 = tpu.matmul %24, %26, %cst_31 {dimension_numbers = #tpu.dot_dimension_numbers<[1], [0], [0], [1], [0, 0, 1, 1], [], []>} : vector<80x32xbf16>, vector<32x32xbf16>, vector<80x32xf32> -> vector<80x32xf32>
    %28 = arith.addf %22, %27 : vector<80x32xf32>
    %c0_32 = arith.constant 0 : index
    %c0_33 = arith.constant 0 : index
    %c12 = arith.constant 12 : index
    %c0_34 = arith.constant 0 : index
    %29 = vector.load %arg2[%c0_32, %c0_33, %c12, %c0_34] : memref<1x1x104x32xbf16, #tpu.memory_space<vmem>>, vector<1x1x80x32xbf16>
    %30 = vector.shape_cast %29 : vector<1x1x80x32xbf16> to vector<80x32xbf16>
    %c5 = arith.constant 5 : index
    %c0_35 = arith.constant 0 : index
    %c0_36 = arith.constant 0 : index
    %31 = vector.load %arg3[%c5, %c0_35, %c0_36] : memref<9x32x32xbf16, #tpu.memory_space<vmem>>, vector<1x32x32xbf16>
    %32 = vector.shape_cast %31 : vector<1x32x32xbf16> to vector<32x32xbf16>
    %cst_37 = arith.constant dense<0.000000e+00> : vector<80x32xf32>
    %33 = tpu.matmul %30, %32, %cst_37 {dimension_numbers = #tpu.dot_dimension_numbers<[1], [0], [0], [1], [0, 0, 1, 1], [], []>} : vector<80x32xbf16>, vector<32x32xbf16>, vector<80x32xf32> -> vector<80x32xf32>
    %34 = arith.addf %28, %33 : vector<80x32xf32>
    %c0_38 = arith.constant 0 : index
    %c0_39 = arith.constant 0 : index
    %c20 = arith.constant 20 : index
    %c0_40 = arith.constant 0 : index
    %35 = vector.load %arg2[%c0_38, %c0_39, %c20, %c0_40] : memref<1x1x104x32xbf16, #tpu.memory_space<vmem>>, vector<1x1x80x32xbf16>
    %36 = vector.shape_cast %35 : vector<1x1x80x32xbf16> to vector<80x32xbf16>
    %c6 = arith.constant 6 : index
    %c0_41 = arith.constant 0 : index
    %c0_42 = arith.constant 0 : index
    %37 = vector.load %arg3[%c6, %c0_41, %c0_42] : memref<9x32x32xbf16, #tpu.memory_space<vmem>>, vector<1x32x32xbf16>
    %38 = vector.shape_cast %37 : vector<1x32x32xbf16> to vector<32x32xbf16>
    %cst_43 = arith.constant dense<0.000000e+00> : vector<80x32xf32>
    %39 = tpu.matmul %36, %38, %cst_43 {dimension_numbers = #tpu.dot_dimension_numbers<[1], [0], [0], [1], [0, 0, 1, 1], [], []>} : vector<80x32xbf16>, vector<32x32xbf16>, vector<80x32xf32> -> vector<80x32xf32>
    %40 = arith.addf %34, %39 : vector<80x32xf32>
    %c0_44 = arith.constant 0 : index
    %c0_45 = arith.constant 0 : index
    %c21 = arith.constant 21 : index
    %c0_46 = arith.constant 0 : index
    %41 = vector.load %arg2[%c0_44, %c0_45, %c21, %c0_46] : memref<1x1x104x32xbf16, #tpu.memory_space<vmem>>, vector<1x1x80x32xbf16>
    %42 = vector.shape_cast %41 : vector<1x1x80x32xbf16> to vector<80x32xbf16>
    %c7 = arith.constant 7 : index
    %c0_47 = arith.constant 0 : index
    %c0_48 = arith.constant 0 : index
    %43 = vector.load %arg3[%c7, %c0_47, %c0_48] : memref<9x32x32xbf16, #tpu.memory_space<vmem>>, vector<1x32x32xbf16>
    %44 = vector.shape_cast %43 : vector<1x32x32xbf16> to vector<32x32xbf16>
    %cst_49 = arith.constant dense<0.000000e+00> : vector<80x32xf32>
    %45 = tpu.matmul %42, %44, %cst_49 {dimension_numbers = #tpu.dot_dimension_numbers<[1], [0], [0], [1], [0, 0, 1, 1], [], []>} : vector<80x32xbf16>, vector<32x32xbf16>, vector<80x32xf32> -> vector<80x32xf32>
    %46 = arith.addf %40, %45 : vector<80x32xf32>
    %c0_50 = arith.constant 0 : index
    %c0_51 = arith.constant 0 : index
    %c22 = arith.constant 22 : index
    %c0_52 = arith.constant 0 : index
    %47 = vector.load %arg2[%c0_50, %c0_51, %c22, %c0_52] : memref<1x1x104x32xbf16, #tpu.memory_space<vmem>>, vector<1x1x80x32xbf16>
    %48 = vector.shape_cast %47 : vector<1x1x80x32xbf16> to vector<80x32xbf16>
    %c8 = arith.constant 8 : index
    %c0_53 = arith.constant 0 : index
    %c0_54 = arith.constant 0 : index
    %49 = vector.load %arg3[%c8, %c0_53, %c0_54] : memref<9x32x32xbf16, #tpu.memory_space<vmem>>, vector<1x32x32xbf16>
    %50 = vector.shape_cast %49 : vector<1x32x32xbf16> to vector<32x32xbf16>
    %cst_55 = arith.constant dense<0.000000e+00> : vector<80x32xf32>
    %51 = tpu.matmul %48, %50, %cst_55 {dimension_numbers = #tpu.dot_dimension_numbers<[1], [0], [0], [1], [0, 0, 1, 1], [], []>} : vector<80x32xbf16>, vector<32x32xbf16>, vector<80x32xf32> -> vector<80x32xf32>
    %52 = arith.addf %46, %51 : vector<80x32xf32>
    %c0_56 = arith.constant 0 : index
    %c0_57 = arith.constant 0 : index
    %53 = vector.load %arg4[%c0_56, %c0_57] : memref<1x32xf32, #tpu.memory_space<vmem>>, vector<1x32xf32>
    %54 = vector.broadcast %53 : vector<1x32xf32> to vector<80x32xf32>
    %55 = arith.addf %52, %54 : vector<80x32xf32>
    %cst_58 = arith.constant 0.000000e+00 : f32
    %56 = vector.broadcast %cst_58 : f32 to vector<80x32xf32>
    %57 = arith.cmpf oge, %55, %56 : vector<80x32xf32>
    %cst_59 = arith.constant 2.000000e-01 : f32
    %58 = vector.broadcast %cst_59 : f32 to vector<80x32xf32>
    %59 = arith.mulf %58, %55 : vector<80x32xf32>
    %60 = arith.select %57, %55, %59 : vector<80x32xi1>, vector<80x32xf32>
    %cst_60 = arith.constant 1.41421354 : f32
    %61 = vector.broadcast %cst_60 : f32 to vector<80x32xf32>
    %62 = arith.mulf %60, %61 : vector<80x32xf32>
    %63 = arith.truncf %62 : vector<80x32xf32> to vector<80x32xbf16>
    %c0_61 = arith.constant 0 : index
    %c0_62 = arith.constant 0 : index
    %c0_63 = arith.constant 0 : index
    %64 = vector.load %arg5[%c0_61, %c0_62, %c0_63] : memref<1x80x32xbf16, #tpu.memory_space<vmem>>, vector<1x80x32xbf16>
    %65 = vector.shape_cast %64 : vector<1x80x32xbf16> to vector<80x32xbf16>
    %66 = vector.shape_cast %63 : vector<80x32xbf16> to vector<1x80x32xbf16>
    tpu.vector_store %arg5[%c0_61, %c0_62, %c0_63], %66 {strides = array<i32>} : memref<1x80x32xbf16, #tpu.memory_space<vmem>>, vector<1x80x32xbf16>,
    return
  }
  func.func @transform_0(%arg0: i32, %arg1: i32) -> (i32, i32, i32, i32) {
    %c0_i32 = arith.constant 0 : i32
    %c0_i32_0 = arith.constant 0 : i32
    %c0_i32_1 = arith.constant 0 : i32
    %c0_i32_2 = arith.constant 0 : i32
    return %arg0, %c0_i32, %c0_i32_0, %c0_i32_1 : i32, i32, i32, i32
  }
  func.func @transform_1(%arg0: i32, %arg1: i32) -> (i32, i32, i32) {
    %c0_i32 = arith.constant 0 : i32
    %c0_i32_0 = arith.constant 0 : i32
    %c0_i32_1 = arith.constant 0 : i32
    return %c0_i32, %c0_i32_0, %arg1 : i32, i32, i32
  }
  func.func @transform_2(%arg0: i32, %arg1: i32) -> (i32, i32) {
    %c0_i32 = arith.constant 0 : i32
    %c0_i32_0 = arith.constant 0 : i32
    return %c0_i32, %arg1 : i32, i32
  }
  func.func @transform_3(%arg0: i32, %arg1: i32) -> (i32, i32, i32) {
    %c0_i32 = arith.constant 0 : i32
    %c0_i32_0 = arith.constant 0 : i32
    return %arg0, %c0_i32, %arg1 : i32, i32, i32
  }
}

module attributes {stable_mosaic.version = 11 : i64} {
  func.func @_conv_taps_kernel(%arg0: i32, %arg1: i32, %arg2: memref<1x4x32x32xbf16, #tpu.memory_space<vmem>>, %arg3: memref<9x32x32xbf16, #tpu.memory_space<vmem>>, %arg4: memref<1x32xf32, #tpu.memory_space<vmem>>, %arg5: memref<1x20x32xbf16, #tpu.memory_space<vmem>>) attributes {dimension_semantics = [#tpu.dimension_semantics<parallel>, #tpu.dimension_semantics<parallel>], iteration_bounds = array<i64: 2, 1>, scalar_prefetch = 0 : i64, scratch_operands = 0 : i64, tpu.core_type = #tpu.core_type<tc>, window_params = [{transform_indices = @transform_0, window_bounds = array<i64: 1, 4, 32, 32>}, {transform_indices = @transform_1, window_bounds = array<i64: 9, 32, 32>}, {transform_indices = @transform_2, window_bounds = array<i64: 1, 32>}, {transform_indices = @transform_3, window_bounds = array<i64: 1, 20, 32>}]} {
    %c0 = arith.constant 0 : index
    %c0_0 = arith.constant 0 : index
    %c0_1 = arith.constant 0 : index
    %c0_2 = arith.constant 0 : index
    %0 = vector.load %arg2[%c0, %c0_0, %c0_1, %c0_2] : memref<1x4x32x32xbf16, #tpu.memory_space<vmem>>, vector<1x1x20x32xbf16>
    %1 = vector.shape_cast %0 : vector<1x1x20x32xbf16> to vector<20x32xbf16>
    %c0_3 = arith.constant 0 : index
    %c0_4 = arith.constant 0 : index
    %c0_5 = arith.constant 0 : index
    %2 = vector.load %arg3[%c0_3, %c0_4, %c0_5] : memref<9x32x32xbf16, #tpu.memory_space<vmem>>, vector<1x32x32xbf16>
    %3 = vector.shape_cast %2 : vector<1x32x32xbf16> to vector<32x32xbf16>
    %cst = arith.constant dense<0.000000e+00> : vector<20x32xf32>
    %4 = tpu.matmul %1, %3, %cst {dimension_numbers = #tpu.dot_dimension_numbers<[1], [0], [0], [1], [0, 0, 1, 1], [], []>} : vector<20x32xbf16>, vector<32x32xbf16>, vector<20x32xf32> -> vector<20x32xf32>
    %c0_6 = arith.constant 0 : index
    %c1 = arith.constant 1 : index
    %c0_7 = arith.constant 0 : index
    %c0_8 = arith.constant 0 : index
    %5 = vector.load %arg2[%c0_6, %c1, %c0_7, %c0_8] : memref<1x4x32x32xbf16, #tpu.memory_space<vmem>>, vector<1x1x20x32xbf16>
    %6 = vector.shape_cast %5 : vector<1x1x20x32xbf16> to vector<20x32xbf16>
    %c1_9 = arith.constant 1 : index
    %c0_10 = arith.constant 0 : index
    %c0_11 = arith.constant 0 : index
    %7 = vector.load %arg3[%c1_9, %c0_10, %c0_11] : memref<9x32x32xbf16, #tpu.memory_space<vmem>>, vector<1x32x32xbf16>
    %8 = vector.shape_cast %7 : vector<1x32x32xbf16> to vector<32x32xbf16>
    %cst_12 = arith.constant dense<0.000000e+00> : vector<20x32xf32>
    %9 = tpu.matmul %6, %8, %cst_12 {dimension_numbers = #tpu.dot_dimension_numbers<[1], [0], [0], [1], [0, 0, 1, 1], [], []>} : vector<20x32xbf16>, vector<32x32xbf16>, vector<20x32xf32> -> vector<20x32xf32>
    %10 = arith.addf %4, %9 : vector<20x32xf32>
    %c0_13 = arith.constant 0 : index
    %c0_14 = arith.constant 0 : index
    %c1_15 = arith.constant 1 : index
    %c0_16 = arith.constant 0 : index
    %11 = vector.load %arg2[%c0_13, %c0_14, %c1_15, %c0_16] : memref<1x4x32x32xbf16, #tpu.memory_space<vmem>>, vector<1x1x20x32xbf16>
    %12 = vector.shape_cast %11 : vector<1x1x20x32xbf16> to vector<20x32xbf16>
    %c2 = arith.constant 2 : index
    %c0_17 = arith.constant 0 : index
    %c0_18 = arith.constant 0 : index
    %13 = vector.load %arg3[%c2, %c0_17, %c0_18] : memref<9x32x32xbf16, #tpu.memory_space<vmem>>, vector<1x32x32xbf16>
    %14 = vector.shape_cast %13 : vector<1x32x32xbf16> to vector<32x32xbf16>
    %cst_19 = arith.constant dense<0.000000e+00> : vector<20x32xf32>
    %15 = tpu.matmul %12, %14, %cst_19 {dimension_numbers = #tpu.dot_dimension_numbers<[1], [0], [0], [1], [0, 0, 1, 1], [], []>} : vector<20x32xbf16>, vector<32x32xbf16>, vector<20x32xf32> -> vector<20x32xf32>
    %16 = arith.addf %10, %15 : vector<20x32xf32>
    %c0_20 = arith.constant 0 : index
    %c2_21 = arith.constant 2 : index
    %c0_22 = arith.constant 0 : index
    %c0_23 = arith.constant 0 : index
    %17 = vector.load %arg2[%c0_20, %c2_21, %c0_22, %c0_23] : memref<1x4x32x32xbf16, #tpu.memory_space<vmem>>, vector<1x1x20x32xbf16>
    %18 = vector.shape_cast %17 : vector<1x1x20x32xbf16> to vector<20x32xbf16>
    %c3 = arith.constant 3 : index
    %c0_24 = arith.constant 0 : index
    %c0_25 = arith.constant 0 : index
    %19 = vector.load %arg3[%c3, %c0_24, %c0_25] : memref<9x32x32xbf16, #tpu.memory_space<vmem>>, vector<1x32x32xbf16>
    %20 = vector.shape_cast %19 : vector<1x32x32xbf16> to vector<32x32xbf16>
    %cst_26 = arith.constant dense<0.000000e+00> : vector<20x32xf32>
    %21 = tpu.matmul %18, %20, %cst_26 {dimension_numbers = #tpu.dot_dimension_numbers<[1], [0], [0], [1], [0, 0, 1, 1], [], []>} : vector<20x32xbf16>, vector<32x32xbf16>, vector<20x32xf32> -> vector<20x32xf32>
    %22 = arith.addf %16, %21 : vector<20x32xf32>
    %c0_27 = arith.constant 0 : index
    %c3_28 = arith.constant 3 : index
    %c0_29 = arith.constant 0 : index
    %c0_30 = arith.constant 0 : index
    %23 = vector.load %arg2[%c0_27, %c3_28, %c0_29, %c0_30] : memref<1x4x32x32xbf16, #tpu.memory_space<vmem>>, vector<1x1x20x32xbf16>
    %24 = vector.shape_cast %23 : vector<1x1x20x32xbf16> to vector<20x32xbf16>
    %c4 = arith.constant 4 : index
    %c0_31 = arith.constant 0 : index
    %c0_32 = arith.constant 0 : index
    %25 = vector.load %arg3[%c4, %c0_31, %c0_32] : memref<9x32x32xbf16, #tpu.memory_space<vmem>>, vector<1x32x32xbf16>
    %26 = vector.shape_cast %25 : vector<1x32x32xbf16> to vector<32x32xbf16>
    %cst_33 = arith.constant dense<0.000000e+00> : vector<20x32xf32>
    %27 = tpu.matmul %24, %26, %cst_33 {dimension_numbers = #tpu.dot_dimension_numbers<[1], [0], [0], [1], [0, 0, 1, 1], [], []>} : vector<20x32xbf16>, vector<32x32xbf16>, vector<20x32xf32> -> vector<20x32xf32>
    %28 = arith.addf %22, %27 : vector<20x32xf32>
    %c0_34 = arith.constant 0 : index
    %c2_35 = arith.constant 2 : index
    %c1_36 = arith.constant 1 : index
    %c0_37 = arith.constant 0 : index
    %29 = vector.load %arg2[%c0_34, %c2_35, %c1_36, %c0_37] : memref<1x4x32x32xbf16, #tpu.memory_space<vmem>>, vector<1x1x20x32xbf16>
    %30 = vector.shape_cast %29 : vector<1x1x20x32xbf16> to vector<20x32xbf16>
    %c5 = arith.constant 5 : index
    %c0_38 = arith.constant 0 : index
    %c0_39 = arith.constant 0 : index
    %31 = vector.load %arg3[%c5, %c0_38, %c0_39] : memref<9x32x32xbf16, #tpu.memory_space<vmem>>, vector<1x32x32xbf16>
    %32 = vector.shape_cast %31 : vector<1x32x32xbf16> to vector<32x32xbf16>
    %cst_40 = arith.constant dense<0.000000e+00> : vector<20x32xf32>
    %33 = tpu.matmul %30, %32, %cst_40 {dimension_numbers = #tpu.dot_dimension_numbers<[1], [0], [0], [1], [0, 0, 1, 1], [], []>} : vector<20x32xbf16>, vector<32x32xbf16>, vector<20x32xf32> -> vector<20x32xf32>
    %34 = arith.addf %28, %33 : vector<20x32xf32>
    %c0_41 = arith.constant 0 : index
    %c0_42 = arith.constant 0 : index
    %c5_43 = arith.constant 5 : index
    %c0_44 = arith.constant 0 : index
    %35 = vector.load %arg2[%c0_41, %c0_42, %c5_43, %c0_44] : memref<1x4x32x32xbf16, #tpu.memory_space<vmem>>, vector<1x1x20x32xbf16>
    %36 = vector.shape_cast %35 : vector<1x1x20x32xbf16> to vector<20x32xbf16>
    %c6 = arith.constant 6 : index
    %c0_45 = arith.constant 0 : index
    %c0_46 = arith.constant 0 : index
    %37 = vector.load %arg3[%c6, %c0_45, %c0_46] : memref<9x32x32xbf16, #tpu.memory_space<vmem>>, vector<1x32x32xbf16>
    %38 = vector.shape_cast %37 : vector<1x32x32xbf16> to vector<32x32xbf16>
    %cst_47 = arith.constant dense<0.000000e+00> : vector<20x32xf32>
    %39 = tpu.matmul %36, %38, %cst_47 {dimension_numbers = #tpu.dot_dimension_numbers<[1], [0], [0], [1], [0, 0, 1, 1], [], []>} : vector<20x32xbf16>, vector<32x32xbf16>, vector<20x32xf32> -> vector<20x32xf32>
    %40 = arith.addf %34, %39 : vector<20x32xf32>
    %c0_48 = arith.constant 0 : index
    %c1_49 = arith.constant 1 : index
    %c5_50 = arith.constant 5 : index
    %c0_51 = arith.constant 0 : index
    %41 = vector.load %arg2[%c0_48, %c1_49, %c5_50, %c0_51] : memref<1x4x32x32xbf16, #tpu.memory_space<vmem>>, vector<1x1x20x32xbf16>
    %42 = vector.shape_cast %41 : vector<1x1x20x32xbf16> to vector<20x32xbf16>
    %c7 = arith.constant 7 : index
    %c0_52 = arith.constant 0 : index
    %c0_53 = arith.constant 0 : index
    %43 = vector.load %arg3[%c7, %c0_52, %c0_53] : memref<9x32x32xbf16, #tpu.memory_space<vmem>>, vector<1x32x32xbf16>
    %44 = vector.shape_cast %43 : vector<1x32x32xbf16> to vector<32x32xbf16>
    %cst_54 = arith.constant dense<0.000000e+00> : vector<20x32xf32>
    %45 = tpu.matmul %42, %44, %cst_54 {dimension_numbers = #tpu.dot_dimension_numbers<[1], [0], [0], [1], [0, 0, 1, 1], [], []>} : vector<20x32xbf16>, vector<32x32xbf16>, vector<20x32xf32> -> vector<20x32xf32>
    %46 = arith.addf %40, %45 : vector<20x32xf32>
    %c0_55 = arith.constant 0 : index
    %c0_56 = arith.constant 0 : index
    %c6_57 = arith.constant 6 : index
    %c0_58 = arith.constant 0 : index
    %47 = vector.load %arg2[%c0_55, %c0_56, %c6_57, %c0_58] : memref<1x4x32x32xbf16, #tpu.memory_space<vmem>>, vector<1x1x20x32xbf16>
    %48 = vector.shape_cast %47 : vector<1x1x20x32xbf16> to vector<20x32xbf16>
    %c8 = arith.constant 8 : index
    %c0_59 = arith.constant 0 : index
    %c0_60 = arith.constant 0 : index
    %49 = vector.load %arg3[%c8, %c0_59, %c0_60] : memref<9x32x32xbf16, #tpu.memory_space<vmem>>, vector<1x32x32xbf16>
    %50 = vector.shape_cast %49 : vector<1x32x32xbf16> to vector<32x32xbf16>
    %cst_61 = arith.constant dense<0.000000e+00> : vector<20x32xf32>
    %51 = tpu.matmul %48, %50, %cst_61 {dimension_numbers = #tpu.dot_dimension_numbers<[1], [0], [0], [1], [0, 0, 1, 1], [], []>} : vector<20x32xbf16>, vector<32x32xbf16>, vector<20x32xf32> -> vector<20x32xf32>
    %52 = arith.addf %46, %51 : vector<20x32xf32>
    %c0_62 = arith.constant 0 : index
    %c0_63 = arith.constant 0 : index
    %53 = vector.load %arg4[%c0_62, %c0_63] : memref<1x32xf32, #tpu.memory_space<vmem>>, vector<1x32xf32>
    %54 = vector.broadcast %53 : vector<1x32xf32> to vector<20x32xf32>
    %55 = arith.addf %52, %54 : vector<20x32xf32>
    %cst_64 = arith.constant 0.000000e+00 : f32
    %56 = vector.broadcast %cst_64 : f32 to vector<20x32xf32>
    %57 = arith.cmpf oge, %55, %56 : vector<20x32xf32>
    %cst_65 = arith.constant 2.000000e-01 : f32
    %58 = vector.broadcast %cst_65 : f32 to vector<20x32xf32>
    %59 = arith.mulf %58, %55 : vector<20x32xf32>
    %60 = arith.select %57, %55, %59 : vector<20x32xi1>, vector<20x32xf32>
    %cst_66 = arith.constant 1.41421354 : f32
    %61 = vector.broadcast %cst_66 : f32 to vector<20x32xf32>
    %62 = arith.mulf %60, %61 : vector<20x32xf32>
    %63 = arith.truncf %62 : vector<20x32xf32> to vector<20x32xbf16>
    %c0_67 = arith.constant 0 : index
    %c0_68 = arith.constant 0 : index
    %c0_69 = arith.constant 0 : index
    %64 = vector.load %arg5[%c0_67, %c0_68, %c0_69] : memref<1x20x32xbf16, #tpu.memory_space<vmem>>, vector<1x20x32xbf16>
    %65 = vector.shape_cast %64 : vector<1x20x32xbf16> to vector<20x32xbf16>
    %66 = vector.shape_cast %63 : vector<20x32xbf16> to vector<1x20x32xbf16>
    tpu.vector_store %arg5[%c0_67, %c0_68, %c0_69], %66 {strides = array<i32>} : memref<1x20x32xbf16, #tpu.memory_space<vmem>>, vector<1x20x32xbf16>,
    return
  }
  func.func @transform_0(%arg0: i32, %arg1: i32) -> (i32, i32, i32, i32) {
    %c0_i32 = arith.constant 0 : i32
    %c0_i32_0 = arith.constant 0 : i32
    %c0_i32_1 = arith.constant 0 : i32
    %c0_i32_2 = arith.constant 0 : i32
    return %arg0, %c0_i32, %c0_i32_0, %c0_i32_1 : i32, i32, i32, i32
  }
  func.func @transform_1(%arg0: i32, %arg1: i32) -> (i32, i32, i32) {
    %c0_i32 = arith.constant 0 : i32
    %c0_i32_0 = arith.constant 0 : i32
    %c0_i32_1 = arith.constant 0 : i32
    return %c0_i32, %c0_i32_0, %arg1 : i32, i32, i32
  }
  func.func @transform_2(%arg0: i32, %arg1: i32) -> (i32, i32) {
    %c0_i32 = arith.constant 0 : i32
    %c0_i32_0 = arith.constant 0 : i32
    return %c0_i32, %arg1 : i32, i32
  }
  func.func @transform_3(%arg0: i32, %arg1: i32) -> (i32, i32, i32) {
    %c0_i32 = arith.constant 0 : i32
    %c0_i32_0 = arith.constant 0 : i32
    return %arg0, %c0_i32, %arg1 : i32, i32, i32
  }
}

module attributes {stable_mosaic.version = 11 : i64} {
  func.func @_mm_kernel(%arg0: i32, %arg1: i32, %arg2: i32, %arg3: memref<32x32xbf16, #tpu.memory_space<vmem>>, %arg4: memref<32x32xbf16, #tpu.memory_space<vmem>>, %arg5: memref<1x32xf32, #tpu.memory_space<vmem>>, %arg6: memref<32x32xbf16, #tpu.memory_space<vmem>>, %arg7: memref<32x32xbf16, #tpu.memory_space<vmem>>, %arg8: memref<32x32xf32, #tpu.memory_space<vmem>>) attributes {dimension_semantics = [#tpu.dimension_semantics<parallel>, #tpu.dimension_semantics<parallel>, #tpu.dimension_semantics<arbitrary>], iteration_bounds = array<i64: 1, 1, 1>, scalar_prefetch = 0 : i64, scratch_operands = 1 : i64, tpu.core_type = #tpu.core_type<tc>, window_params = [{transform_indices = @transform_0, window_bounds = array<i64: 32, 32>}, {transform_indices = @transform_1, window_bounds = array<i64: 32, 32>}, {transform_indices = @transform_2, window_bounds = array<i64: 1, 32>}, {transform_indices = @transform_3, window_bounds = array<i64: 32, 32>}, {transform_indices = @transform_4, window_bounds = array<i64: 32, 32>}]} {
    %c0_i32 = arith.constant 0 : i32
    %0 = arith.cmpi eq, %arg2, %c0_i32 : i32
    %1 = arith.extui %0 : i1 to i32
    %c0_i32_0 = arith.constant 0 : i32
    %2 = arith.cmpi ne, %1, %c0_i32_0 : i32
    scf.if %2 {
      %cst_10 = arith.constant 0.000000e+00 : f32
      %12 = vector.broadcast %cst_10 : f32 to vector<32x32xf32>
      %c0_11 = arith.constant 0 : index
      %c0_12 = arith.constant 0 : index
      %13 = vector.load %arg8[%c0_11, %c0_12] : memref<32x32xf32, #tpu.memory_space<vmem>>, vector<32x32xf32>
      tpu.vector_store %arg8[%c0_11, %c0_12], %12 {strides = array<i32>} : memref<32x32xf32, #tpu.memory_space<vmem>>, vector<32x32xf32>,
    } else {
    }
    %c0 = arith.constant 0 : index
    %c0_1 = arith.constant 0 : index
    %3 = vector.load %arg8[%c0, %c0_1] : memref<32x32xf32, #tpu.memory_space<vmem>>, vector<32x32xf32>
    %c0_2 = arith.constant 0 : index
    %c0_3 = arith.constant 0 : index
    %4 = vector.load %arg3[%c0_2, %c0_3] : memref<32x32xbf16, #tpu.memory_space<vmem>>, vector<32x32xbf16>
    %c0_4 = arith.constant 0 : index
    %c0_5 = arith.constant 0 : index
    %5 = vector.load %arg4[%c0_4, %c0_5] : memref<32x32xbf16, #tpu.memory_space<vmem>>, vector<32x32xbf16>
    %cst = arith.constant dense<0.000000e+00> : vector<32x32xf32>
    %6 = tpu.matmul %4, %5, %cst {dimension_numbers = #tpu.dot_dimension_numbers<[1], [0], [0], [1], [0, 0, 1, 1], [], []>} : vector<32x32xbf16>, vector<32x32xbf16>, vector<32x32xf32> -> vector<32x32xf32>
    %7 = arith.addf %3, %6 : vector<32x32xf32>
    %c0_6 = arith.constant 0 : index
    %c0_7 = arith.constant 0 : index
    %8 = vector.load %arg8[%c0_6, %c0_7] : memref<32x32xf32, #tpu.memory_space<vmem>>, vector<32x32xf32>
    tpu.vector_store %arg8[%c0_6, %c0_7], %7 {strides = array<i32>} : memref<32x32xf32, #tpu.memory_space<vmem>>, vector<32x32xf32>,
    %c0_i32_8 = arith.constant 0 : i32
    %9 = arith.cmpi eq, %arg2, %c0_i32_8 : i32
    %10 = arith.extui %9 : i1 to i32
    %c0_i32_9 = arith.constant 0 : i32
    %11 = arith.cmpi ne, %10, %c0_i32_9 : i32
    scf.if %11 {
      %c0_10 = arith.constant 0 : index
      %c0_11 = arith.constant 0 : index
      %12 = vector.load %arg8[%c0_10, %c0_11] : memref<32x32xf32, #tpu.memory_space<vmem>>, vector<32x32xf32>
      %c0_12 = arith.constant 0 : index
      %c0_13 = arith.constant 0 : index
      %13 = vector.load %arg5[%c0_12, %c0_13] : memref<1x32xf32, #tpu.memory_space<vmem>>, vector<1x32xf32>
      %14 = vector.broadcast %13 : vector<1x32xf32> to vector<32x32xf32>
      %15 = arith.addf %12, %14 : vector<32x32xf32>
      %c0_14 = arith.constant 0 : index
      %c0_15 = arith.constant 0 : index
      %16 = vector.load %arg6[%c0_14, %c0_15] : memref<32x32xbf16, #tpu.memory_space<vmem>>, vector<32x32xbf16>
      %17 = arith.extf %16 : vector<32x32xbf16> to vector<32x32xf32>
      %18 = arith.addf %15, %17 : vector<32x32xf32>
      %cst_16 = arith.constant 0.707106769 : f32
      %19 = vector.broadcast %cst_16 : f32 to vector<32x32xf32>
      %20 = arith.mulf %18, %19 : vector<32x32xf32>
      %21 = arith.truncf %20 : vector<32x32xf32> to vector<32x32xbf16>
      %c0_17 = arith.constant 0 : index
      %c0_18 = arith.constant 0 : index
      %22 = vector.load %arg7[%c0_17, %c0_18] : memref<32x32xbf16, #tpu.memory_space<vmem>>, vector<32x32xbf16>
      tpu.vector_store %arg7[%c0_17, %c0_18], %21 {strides = array<i32>} : memref<32x32xbf16, #tpu.memory_space<vmem>>, vector<32x32xbf16>,
    } else {
    }
    return
  }
  func.func @transform_0(%arg0: i32, %arg1: i32, %arg2: i32) -> (i32, i32) {
    %c0_i32 = arith.constant 0 : i32
    return %arg0, %arg2 : i32, i32
  }
  func.func @transform_1(%arg0: i32, %arg1: i32, %arg2: i32) -> (i32, i32) {
    %c0_i32 = arith.constant 0 : i32
    return %arg2, %arg1 : i32, i32
  }
  func.func @transform_2(%arg0: i32, %arg1: i32, %arg2: i32) -> (i32, i32) {
    %c0_i32 = arith.constant 0 : i32
    %c0_i32_0 = arith.constant 0 : i32
    return %c0_i32, %arg1 : i32, i32
  }
  func.func @transform_3(%arg0: i32, %arg1: i32, %arg2: i32) -> (i32, i32) {
    %c0_i32 = arith.constant 0 : i32
    return %arg0, %arg1 : i32, i32
  }
  func.func @transform_4(%arg0: i32, %arg1: i32, %arg2: i32) -> (i32, i32) {
    %c0_i32 = arith.constant 0 : i32
    return %arg0, %arg1 : i32, i32
  }
}

module attributes {stable_mosaic.version = 11 : i64} {
  func.func @_stddev_kernel(%arg0: memref<2x1x512xbf16, #tpu.memory_space<vmem>>, %arg1: memref<1x128xf32, #tpu.memory_space<vmem>>) attributes {dimension_semantics = [], scalar_prefetch = 0 : i64, scratch_operands = 0 : i64, tpu.core_type = #tpu.core_type<tc>} {
    %c0 = arith.constant 0 : index
    %c0_0 = arith.constant 0 : index
    %c0_1 = arith.constant 0 : index
    %0 = vector.load %arg0[%c0, %c0_0, %c0_1] : memref<2x1x512xbf16, #tpu.memory_space<vmem>>, vector<2x1x512xbf16>
    %1 = arith.extf %0 : vector<2x1x512xbf16> to vector<2x1x512xf32>
    %cst = arith.constant dense<0.000000e+00> : vector<1x512xf32>
    %2 = vector.multi_reduction <add>, %1, %cst [0] : vector<2x1x512xf32> to vector<1x512xf32>
    %3 = vector.shape_cast %2 : vector<1x512xf32> to vector<1x1x512xf32>
    %cst_2 = arith.constant 2.000000e+00 : f32
    %4 = vector.broadcast %cst_2 : f32 to vector<1x1x512xf32>
    %5 = arith.divf %3, %4 : vector<1x1x512xf32>
    %6 = vector.broadcast %5 : vector<1x1x512xf32> to vector<2x1x512xf32>
    %7 = arith.subf %1, %6 : vector<2x1x512xf32>
    %8 = arith.mulf %7, %7 : vector<2x1x512xf32>
    %cst_3 = arith.constant dense<0.000000e+00> : vector<1x512xf32>
    %9 = vector.multi_reduction <add>, %8, %cst_3 [0] : vector<2x1x512xf32> to vector<1x512xf32>
    %cst_4 = arith.constant 2.000000e+00 : f32
    %10 = vector.broadcast %cst_4 : f32 to vector<1x512xf32>
    %11 = arith.divf %9, %10 : vector<1x512xf32>
    %cst_5 = arith.constant 9.99999993E-9 : f32
    %12 = vector.broadcast %cst_5 : f32 to vector<1x512xf32>
    %13 = arith.addf %11, %12 : vector<1x512xf32>
    %14 = math.sqrt %13 : vector<1x512xf32>
    %cst_6 = arith.constant dense<0.000000e+00> : vector<1xf32>
    %15 = vector.multi_reduction <add>, %14, %cst_6 [1] : vector<1x512xf32> to vector<1xf32>
    %16 = vector.shape_cast %15 : vector<1xf32> to vector<1x1xf32>
    %cst_7 = arith.constant 5.120000e+02 : f32
    %17 = vector.broadcast %cst_7 : f32 to vector<1x1xf32>
    %18 = arith.divf %16, %17 : vector<1x1xf32>
    %19 = vector.shape_cast %18 : vector<1x1xf32> to vector<1x1xf32>
    %20 = vector.broadcast %19 : vector<1x1xf32> to vector<1x128xf32>
    %c0_8 = arith.constant 0 : index
    %c0_9 = arith.constant 0 : index
    %21 = vector.load %arg1[%c0_8, %c0_9] : memref<1x128xf32, #tpu.memory_space<vmem>>, vector<1x128xf32>
    tpu.vector_store %arg1[%c0_8, %c0_9], %20 {strides = array<i32>} : memref<1x128xf32, #tpu.memory_space<vmem>>, vector<1x128xf32>,
    return
  }
}

module attributes {stable_mosaic.version = 11 : i64} {
  func.func @_conv_taps_kernel(%arg0: i32, %arg1: i32, %arg2: memref<1x1x40x33xbf16, #tpu.memory_space<vmem>>, %arg3: memref<9x33x32xbf16, #tpu.memory_space<vmem>>, %arg4: memref<1x32xf32, #tpu.memory_space<vmem>>, %arg5: memref<1x24x32xbf16, #tpu.memory_space<vmem>>) attributes {dimension_semantics = [#tpu.dimension_semantics<parallel>, #tpu.dimension_semantics<parallel>], iteration_bounds = array<i64: 2, 1>, scalar_prefetch = 0 : i64, scratch_operands = 0 : i64, tpu.core_type = #tpu.core_type<tc>, window_params = [{transform_indices = @transform_0, window_bounds = array<i64: 1, 1, 40, 33>}, {transform_indices = @transform_1, window_bounds = array<i64: 9, 33, 32>}, {transform_indices = @transform_2, window_bounds = array<i64: 1, 32>}, {transform_indices = @transform_3, window_bounds = array<i64: 1, 24, 32>}]} {
    %c0 = arith.constant 0 : index
    %c0_0 = arith.constant 0 : index
    %c0_1 = arith.constant 0 : index
    %c0_2 = arith.constant 0 : index
    %0 = vector.load %arg2[%c0, %c0_0, %c0_1, %c0_2] : memref<1x1x40x33xbf16, #tpu.memory_space<vmem>>, vector<1x1x24x33xbf16>
    %1 = vector.shape_cast %0 : vector<1x1x24x33xbf16> to vector<24x33xbf16>
    %c0_3 = arith.constant 0 : index
    %c0_4 = arith.constant 0 : index
    %c0_5 = arith.constant 0 : index
    %2 = vector.load %arg3[%c0_3, %c0_4, %c0_5] : memref<9x33x32xbf16, #tpu.memory_space<vmem>>, vector<1x33x32xbf16>
    %3 = vector.shape_cast %2 : vector<1x33x32xbf16> to vector<33x32xbf16>
    %cst = arith.constant dense<0.000000e+00> : vector<24x32xf32>
    %4 = tpu.matmul %1, %3, %cst {dimension_numbers = #tpu.dot_dimension_numbers<[1], [0], [0], [1], [0, 0, 1, 1], [], []>} : vector<24x33xbf16>, vector<33x32xbf16>, vector<24x32xf32> -> vector<24x32xf32>
    %c0_6 = arith.constant 0 : index
    %c0_7 = arith.constant 0 : index
    %c1 = arith.constant 1 : index
    %c0_8 = arith.constant 0 : index
    %5 = vector.load %arg2[%c0_6, %c0_7, %c1, %c0_8] : memref<1x1x40x33xbf16, #tpu.memory_space<vmem>>, vector<1x1x24x33xbf16>
    %6 = vector.shape_cast %5 : vector<1x1x24x33xbf16> to vector<24x33xbf16>
    %c1_9 = arith.constant 1 : index
    %c0_10 = arith.constant 0 : index
    %c0_11 = arith.constant 0 : index
    %7 = vector.load %arg3[%c1_9, %c0_10, %c0_11] : memref<9x33x32xbf16, #tpu.memory_space<vmem>>, vector<1x33x32xbf16>
    %8 = vector.shape_cast %7 : vector<1x33x32xbf16> to vector<33x32xbf16>
    %cst_12 = arith.constant dense<0.000000e+00> : vector<24x32xf32>
    %9 = tpu.matmul %6, %8, %cst_12 {dimension_numbers = #tpu.dot_dimension_numbers<[1], [0], [0], [1], [0, 0, 1, 1], [], []>} : vector<24x33xbf16>, vector<33x32xbf16>, vector<24x32xf32> -> vector<24x32xf32>
    %10 = arith.addf %4, %9 : vector<24x32xf32>
    %c0_13 = arith.constant 0 : index
    %c0_14 = arith.constant 0 : index
    %c2 = arith.constant 2 : index
    %c0_15 = arith.constant 0 : index
    %11 = vector.load %arg2[%c0_13, %c0_14, %c2, %c0_15] : memref<1x1x40x33xbf16, #tpu.memory_space<vmem>>, vector<1x1x24x33xbf16>
    %12 = vector.shape_cast %11 : vector<1x1x24x33xbf16> to vector<24x33xbf16>
    %c2_16 = arith.constant 2 : index
    %c0_17 = arith.constant 0 : index
    %c0_18 = arith.constant 0 : index
    %13 = vector.load %arg3[%c2_16, %c0_17, %c0_18] : memref<9x33x32xbf16, #tpu.memory_space<vmem>>, vector<1x33x32xbf16>
    %14 = vector.shape_cast %13 : vector<1x33x32xbf16> to vector<33x32xbf16>
    %cst_19 = arith.constant dense<0.000000e+00> : vector<24x32xf32>
    %15 = tpu.matmul %12, %14, %cst_19 {dimension_numbers = #tpu.dot_dimension_numbers<[1], [0], [0], [1], [0, 0, 1, 1], [], []>} : vector<24x33xbf16>, vector<33x32xbf16>, vector<24x32xf32> -> vector<24x32xf32>
    %16 = arith.addf %10, %15 : vector<24x32xf32>
    %c0_20 = arith.constant 0 : index
    %c0_21 = arith.constant 0 : index
    %c6 = arith.constant 6 : index
    %c0_22 = arith.constant 0 : index
    %17 = vector.load %arg2[%c0_20, %c0_21, %c6, %c0_22] : memref<1x1x40x33xbf16, #tpu.memory_space<vmem>>, vector<1x1x24x33xbf16>
    %18 = vector.shape_cast %17 : vector<1x1x24x33xbf16> to vector<24x33xbf16>
    %c3 = arith.constant 3 : index
    %c0_23 = arith.constant 0 : index
    %c0_24 = arith.constant 0 : index
    %19 = vector.load %arg3[%c3, %c0_23, %c0_24] : memref<9x33x32xbf16, #tpu.memory_space<vmem>>, vector<1x33x32xbf16>
    %20 = vector.shape_cast %19 : vector<1x33x32xbf16> to vector<33x32xbf16>
    %cst_25 = arith.constant dense<0.000000e+00> : vector<24x32xf32>
    %21 = tpu.matmul %18, %20, %cst_25 {dimension_numbers = #tpu.dot_dimension_numbers<[1], [0], [0], [1], [0, 0, 1, 1], [], []>} : vector<24x33xbf16>, vector<33x32xbf16>, vector<24x32xf32> -> vector<24x32xf32>
    %22 = arith.addf %16, %21 : vector<24x32xf32>
    %c0_26 = arith.constant 0 : index
    %c0_27 = arith.constant 0 : index
    %c7 = arith.constant 7 : index
    %c0_28 = arith.constant 0 : index
    %23 = vector.load %arg2[%c0_26, %c0_27, %c7, %c0_28] : memref<1x1x40x33xbf16, #tpu.memory_space<vmem>>, vector<1x1x24x33xbf16>
    %24 = vector.shape_cast %23 : vector<1x1x24x33xbf16> to vector<24x33xbf16>
    %c4 = arith.constant 4 : index
    %c0_29 = arith.constant 0 : index
    %c0_30 = arith.constant 0 : index
    %25 = vector.load %arg3[%c4, %c0_29, %c0_30] : memref<9x33x32xbf16, #tpu.memory_space<vmem>>, vector<1x33x32xbf16>
    %26 = vector.shape_cast %25 : vector<1x33x32xbf16> to vector<33x32xbf16>
    %cst_31 = arith.constant dense<0.000000e+00> : vector<24x32xf32>
    %27 = tpu.matmul %24, %26, %cst_31 {dimension_numbers = #tpu.dot_dimension_numbers<[1], [0], [0], [1], [0, 0, 1, 1], [], []>} : vector<24x33xbf16>, vector<33x32xbf16>, vector<24x32xf32> -> vector<24x32xf32>
    %28 = arith.addf %22, %27 : vector<24x32xf32>
    %c0_32 = arith.constant 0 : index
    %c0_33 = arith.constant 0 : index
    %c8 = arith.constant 8 : index
    %c0_34 = arith.constant 0 : index
    %29 = vector.load %arg2[%c0_32, %c0_33, %c8, %c0_34] : memref<1x1x40x33xbf16, #tpu.memory_space<vmem>>, vector<1x1x24x33xbf16>
    %30 = vector.shape_cast %29 : vector<1x1x24x33xbf16> to vector<24x33xbf16>
    %c5 = arith.constant 5 : index
    %c0_35 = arith.constant 0 : index
    %c0_36 = arith.constant 0 : index
    %31 = vector.load %arg3[%c5, %c0_35, %c0_36] : memref<9x33x32xbf16, #tpu.memory_space<vmem>>, vector<1x33x32xbf16>
    %32 = vector.shape_cast %31 : vector<1x33x32xbf16> to vector<33x32xbf16>
    %cst_37 = arith.constant dense<0.000000e+00> : vector<24x32xf32>
    %33 = tpu.matmul %30, %32, %cst_37 {dimension_numbers = #tpu.dot_dimension_numbers<[1], [0], [0], [1], [0, 0, 1, 1], [], []>} : vector<24x33xbf16>, vector<33x32xbf16>, vector<24x32xf32> -> vector<24x32xf32>
    %34 = arith.addf %28, %33 : vector<24x32xf32>
    %c0_38 = arith.constant 0 : index
    %c0_39 = arith.constant 0 : index
    %c12 = arith.constant 12 : index
    %c0_40 = arith.constant 0 : index
    %35 = vector.load %arg2[%c0_38, %c0_39, %c12, %c0_40] : memref<1x1x40x33xbf16, #tpu.memory_space<vmem>>, vector<1x1x24x33xbf16>
    %36 = vector.shape_cast %35 : vector<1x1x24x33xbf16> to vector<24x33xbf16>
    %c6_41 = arith.constant 6 : index
    %c0_42 = arith.constant 0 : index
    %c0_43 = arith.constant 0 : index
    %37 = vector.load %arg3[%c6_41, %c0_42, %c0_43] : memref<9x33x32xbf16, #tpu.memory_space<vmem>>, vector<1x33x32xbf16>
    %38 = vector.shape_cast %37 : vector<1x33x32xbf16> to vector<33x32xbf16>
    %cst_44 = arith.constant dense<0.000000e+00> : vector<24x32xf32>
    %39 = tpu.matmul %36, %38, %cst_44 {dimension_numbers = #tpu.dot_dimension_numbers<[1], [0], [0], [1], [0, 0, 1, 1], [], []>} : vector<24x33xbf16>, vector<33x32xbf16>, vector<24x32xf32> -> vector<24x32xf32>
    %40 = arith.addf %34, %39 : vector<24x32xf32>
    %c0_45 = arith.constant 0 : index
    %c0_46 = arith.constant 0 : index
    %c13 = arith.constant 13 : index
    %c0_47 = arith.constant 0 : index
    %41 = vector.load %arg2[%c0_45, %c0_46, %c13, %c0_47] : memref<1x1x40x33xbf16, #tpu.memory_space<vmem>>, vector<1x1x24x33xbf16>
    %42 = vector.shape_cast %41 : vector<1x1x24x33xbf16> to vector<24x33xbf16>
    %c7_48 = arith.constant 7 : index
    %c0_49 = arith.constant 0 : index
    %c0_50 = arith.constant 0 : index
    %43 = vector.load %arg3[%c7_48, %c0_49, %c0_50] : memref<9x33x32xbf16, #tpu.memory_space<vmem>>, vector<1x33x32xbf16>
    %44 = vector.shape_cast %43 : vector<1x33x32xbf16> to vector<33x32xbf16>
    %cst_51 = arith.constant dense<0.000000e+00> : vector<24x32xf32>
    %45 = tpu.matmul %42, %44, %cst_51 {dimension_numbers = #tpu.dot_dimension_numbers<[1], [0], [0], [1], [0, 0, 1, 1], [], []>} : vector<24x33xbf16>, vector<33x32xbf16>, vector<24x32xf32> -> vector<24x32xf32>
    %46 = arith.addf %40, %45 : vector<24x32xf32>
    %c0_52 = arith.constant 0 : index
    %c0_53 = arith.constant 0 : index
    %c14 = arith.constant 14 : index
    %c0_54 = arith.constant 0 : index
    %47 = vector.load %arg2[%c0_52, %c0_53, %c14, %c0_54] : memref<1x1x40x33xbf16, #tpu.memory_space<vmem>>, vector<1x1x24x33xbf16>
    %48 = vector.shape_cast %47 : vector<1x1x24x33xbf16> to vector<24x33xbf16>
    %c8_55 = arith.constant 8 : index
    %c0_56 = arith.constant 0 : index
    %c0_57 = arith.constant 0 : index
    %49 = vector.load %arg3[%c8_55, %c0_56, %c0_57] : memref<9x33x32xbf16, #tpu.memory_space<vmem>>, vector<1x33x32xbf16>
    %50 = vector.shape_cast %49 : vector<1x33x32xbf16> to vector<33x32xbf16>
    %cst_58 = arith.constant dense<0.000000e+00> : vector<24x32xf32>
    %51 = tpu.matmul %48, %50, %cst_58 {dimension_numbers = #tpu.dot_dimension_numbers<[1], [0], [0], [1], [0, 0, 1, 1], [], []>} : vector<24x33xbf16>, vector<33x32xbf16>, vector<24x32xf32> -> vector<24x32xf32>
    %52 = arith.addf %46, %51 : vector<24x32xf32>
    %c0_59 = arith.constant 0 : index
    %c0_60 = arith.constant 0 : index
    %53 = vector.load %arg4[%c0_59, %c0_60] : memref<1x32xf32, #tpu.memory_space<vmem>>, vector<1x32xf32>
    %54 = vector.broadcast %53 : vector<1x32xf32> to vector<24x32xf32>
    %55 = arith.addf %52, %54 : vector<24x32xf32>
    %cst_61 = arith.constant 0.000000e+00 : f32
    %56 = vector.broadcast %cst_61 : f32 to vector<24x32xf32>
    %57 = arith.cmpf oge, %55, %56 : vector<24x32xf32>
    %cst_62 = arith.constant 2.000000e-01 : f32
    %58 = vector.broadcast %cst_62 : f32 to vector<24x32xf32>
    %59 = arith.mulf %58, %55 : vector<24x32xf32>
    %60 = arith.select %57, %55, %59 : vector<24x32xi1>, vector<24x32xf32>
    %cst_63 = arith.constant 1.41421354 : f32
    %61 = vector.broadcast %cst_63 : f32 to vector<24x32xf32>
    %62 = arith.mulf %60, %61 : vector<24x32xf32>
    %63 = arith.truncf %62 : vector<24x32xf32> to vector<24x32xbf16>
    %c0_64 = arith.constant 0 : index
    %c0_65 = arith.constant 0 : index
    %c0_66 = arith.constant 0 : index
    %64 = vector.load %arg5[%c0_64, %c0_65, %c0_66] : memref<1x24x32xbf16, #tpu.memory_space<vmem>>, vector<1x24x32xbf16>
    %65 = vector.shape_cast %64 : vector<1x24x32xbf16> to vector<24x32xbf16>
    %66 = vector.shape_cast %63 : vector<24x32xbf16> to vector<1x24x32xbf16>
    tpu.vector_store %arg5[%c0_64, %c0_65, %c0_66], %66 {strides = array<i32>} : memref<1x24x32xbf16, #tpu.memory_space<vmem>>, vector<1x24x32xbf16>,
    return
  }
  func.func @transform_0(%arg0: i32, %arg1: i32) -> (i32, i32, i32, i32) {
    %c0_i32 = arith.constant 0 : i32
    %c0_i32_0 = arith.constant 0 : i32
    %c0_i32_1 = arith.constant 0 : i32
    %c0_i32_2 = arith.constant 0 : i32
    return %arg0, %c0_i32, %c0_i32_0, %c0_i32_1 : i32, i32, i32, i32
  }
  func.func @transform_1(%arg0: i32, %arg1: i32) -> (i32, i32, i32) {
    %c0_i32 = arith.constant 0 : i32
    %c0_i32_0 = arith.constant 0 : i32
    %c0_i32_1 = arith.constant 0 : i32
    return %c0_i32, %c0_i32_0, %arg1 : i32, i32, i32
  }
  func.func @transform_2(%arg0: i32, %arg1: i32) -> (i32, i32) {
    %c0_i32 = arith.constant 0 : i32
    %c0_i32_0 = arith.constant 0 : i32
    return %c0_i32, %arg1 : i32, i32
  }
  func.func @transform_3(%arg0: i32, %arg1: i32) -> (i32, i32, i32) {
    %c0_i32 = arith.constant 0 : i32
    %c0_i32_0 = arith.constant 0 : i32
    return %arg0, %c0_i32, %arg1 : i32, i32, i32
  }
}

module attributes {stable_mosaic.version = 11 : i64} {
  func.func @_mm_kernel(%arg0: i32, %arg1: i32, %arg2: i32, %arg3: memref<2x512xbf16, #tpu.memory_space<vmem>>, %arg4: memref<512x32xbf16, #tpu.memory_space<vmem>>, %arg5: memref<1x32xf32, #tpu.memory_space<vmem>>, %arg6: memref<2x32xbf16, #tpu.memory_space<vmem>>, %arg7: memref<2x32xf32, #tpu.memory_space<vmem>>) attributes {dimension_semantics = [#tpu.dimension_semantics<parallel>, #tpu.dimension_semantics<parallel>, #tpu.dimension_semantics<arbitrary>], iteration_bounds = array<i64: 1, 1, 1>, scalar_prefetch = 0 : i64, scratch_operands = 1 : i64, tpu.core_type = #tpu.core_type<tc>, window_params = [{transform_indices = @transform_0, window_bounds = array<i64: 2, 512>}, {transform_indices = @transform_1, window_bounds = array<i64: 512, 32>}, {transform_indices = @transform_2, window_bounds = array<i64: 1, 32>}, {transform_indices = @transform_3, window_bounds = array<i64: 2, 32>}]} {
    %c0_i32 = arith.constant 0 : i32
    %0 = arith.cmpi eq, %arg2, %c0_i32 : i32
    %1 = arith.extui %0 : i1 to i32
    %c0_i32_0 = arith.constant 0 : i32
    %2 = arith.cmpi ne, %1, %c0_i32_0 : i32
    scf.if %2 {
      %cst_10 = arith.constant 0.000000e+00 : f32
      %12 = vector.broadcast %cst_10 : f32 to vector<2x32xf32>
      %c0_11 = arith.constant 0 : index
      %c0_12 = arith.constant 0 : index
      %13 = vector.load %arg7[%c0_11, %c0_12] : memref<2x32xf32, #tpu.memory_space<vmem>>, vector<2x32xf32>
      tpu.vector_store %arg7[%c0_11, %c0_12], %12 {strides = array<i32>} : memref<2x32xf32, #tpu.memory_space<vmem>>, vector<2x32xf32>,
    } else {
    }
    %c0 = arith.constant 0 : index
    %c0_1 = arith.constant 0 : index
    %3 = vector.load %arg7[%c0, %c0_1] : memref<2x32xf32, #tpu.memory_space<vmem>>, vector<2x32xf32>
    %c0_2 = arith.constant 0 : index
    %c0_3 = arith.constant 0 : index
    %4 = vector.load %arg3[%c0_2, %c0_3] : memref<2x512xbf16, #tpu.memory_space<vmem>>, vector<2x512xbf16>
    %c0_4 = arith.constant 0 : index
    %c0_5 = arith.constant 0 : index
    %5 = vector.load %arg4[%c0_4, %c0_5] : memref<512x32xbf16, #tpu.memory_space<vmem>>, vector<512x32xbf16>
    %cst = arith.constant dense<0.000000e+00> : vector<2x32xf32>
    %6 = tpu.matmul %4, %5, %cst {dimension_numbers = #tpu.dot_dimension_numbers<[1], [0], [0], [1], [0, 0, 1, 1], [], []>} : vector<2x512xbf16>, vector<512x32xbf16>, vector<2x32xf32> -> vector<2x32xf32>
    %7 = arith.addf %3, %6 : vector<2x32xf32>
    %c0_6 = arith.constant 0 : index
    %c0_7 = arith.constant 0 : index
    %8 = vector.load %arg7[%c0_6, %c0_7] : memref<2x32xf32, #tpu.memory_space<vmem>>, vector<2x32xf32>
    tpu.vector_store %arg7[%c0_6, %c0_7], %7 {strides = array<i32>} : memref<2x32xf32, #tpu.memory_space<vmem>>, vector<2x32xf32>,
    %c0_i32_8 = arith.constant 0 : i32
    %9 = arith.cmpi eq, %arg2, %c0_i32_8 : i32
    %10 = arith.extui %9 : i1 to i32
    %c0_i32_9 = arith.constant 0 : i32
    %11 = arith.cmpi ne, %10, %c0_i32_9 : i32
    scf.if %11 {
      %c0_10 = arith.constant 0 : index
      %c0_11 = arith.constant 0 : index
      %12 = vector.load %arg7[%c0_10, %c0_11] : memref<2x32xf32, #tpu.memory_space<vmem>>, vector<2x32xf32>
      %c0_12 = arith.constant 0 : index
      %c0_13 = arith.constant 0 : index
      %13 = vector.load %arg5[%c0_12, %c0_13] : memref<1x32xf32, #tpu.memory_space<vmem>>, vector<1x32xf32>
      %14 = vector.broadcast %13 : vector<1x32xf32> to vector<2x32xf32>
      %15 = arith.addf %12, %14 : vector<2x32xf32>
      %cst_14 = arith.constant 0.000000e+00 : f32
      %16 = vector.broadcast %cst_14 : f32 to vector<2x32xf32>
      %17 = arith.cmpf oge, %15, %16 : vector<2x32xf32>
      %cst_15 = arith.constant 2.000000e-01 : f32
      %18 = vector.broadcast %cst_15 : f32 to vector<2x32xf32>
      %19 = arith.mulf %18, %15 : vector<2x32xf32>
      %20 = arith.select %17, %15, %19 : vector<2x32xi1>, vector<2x32xf32>
      %cst_16 = arith.constant 1.41421354 : f32
      %21 = vector.broadcast %cst_16 : f32 to vector<2x32xf32>
      %22 = arith.mulf %20, %21 : vector<2x32xf32>
      %23 = arith.truncf %22 : vector<2x32xf32> to vector<2x32xbf16>
      %c0_17 = arith.constant 0 : index
      %c0_18 = arith.constant 0 : index
      %24 = vector.load %arg6[%c0_17, %c0_18] : memref<2x32xbf16, #tpu.memory_space<vmem>>, vector<2x32xbf16>
      tpu.vector_store %arg6[%c0_17, %c0_18], %23 {strides = array<i32>} : memref<2x32xbf16, #tpu.memory_space<vmem>>, vector<2x32xbf16>,
    } else {
    }
    return
  }
  func.func @transform_0(%arg0: i32, %arg1: i32, %arg2: i32) -> (i32, i32) {
    %c0_i32 = arith.constant 0 : i32
    return %arg0, %arg2 : i32, i32
  }
  func.func @transform_1(%arg0: i32, %arg1: i32, %arg2: i32) -> (i32, i32) {
    %c0_i32 = arith.constant 0 : i32
    return %arg2, %arg1 : i32, i32
  }
  func.func @transform_2(%arg0: i32, %arg1: i32, %arg2: i32) -> (i32, i32) {
    %c0_i32 = arith.constant 0 : i32
    %c0_i32_0 = arith.constant 0 : i32
    return %c0_i32, %arg1 : i32, i32
  }
  func.func @transform_3(%arg0: i32, %arg1: i32, %arg2: i32) -> (i32, i32) {
    %c0_i32 = arith.constant 0 : i32
    return %arg0, %arg1 : i32, i32
  }
}

module attributes {stable_mosaic.version = 11 : i64} {
  func.func @_mm_kernel(%arg0: i32, %arg1: i32, %arg2: i32, %arg3: memref<2x32xbf16, #tpu.memory_space<vmem>>, %arg4: memref<32x1xbf16, #tpu.memory_space<vmem>>, %arg5: memref<1x1xf32, #tpu.memory_space<vmem>>, %arg6: memref<2x1xf32, #tpu.memory_space<vmem>>, %arg7: memref<2x1xf32, #tpu.memory_space<vmem>>) attributes {dimension_semantics = [#tpu.dimension_semantics<parallel>, #tpu.dimension_semantics<parallel>, #tpu.dimension_semantics<arbitrary>], iteration_bounds = array<i64: 1, 1, 1>, scalar_prefetch = 0 : i64, scratch_operands = 1 : i64, tpu.core_type = #tpu.core_type<tc>, window_params = [{transform_indices = @transform_0, window_bounds = array<i64: 2, 32>}, {transform_indices = @transform_1, window_bounds = array<i64: 32, 1>}, {transform_indices = @transform_2, window_bounds = array<i64: 1, 1>}, {transform_indices = @transform_3, window_bounds = array<i64: 2, 1>}]} {
    %c0_i32 = arith.constant 0 : i32
    %0 = arith.cmpi eq, %arg2, %c0_i32 : i32
    %1 = arith.extui %0 : i1 to i32
    %c0_i32_0 = arith.constant 0 : i32
    %2 = arith.cmpi ne, %1, %c0_i32_0 : i32
    scf.if %2 {
      %cst_10 = arith.constant 0.000000e+00 : f32
      %12 = vector.broadcast %cst_10 : f32 to vector<2x1xf32>
      %c0_11 = arith.constant 0 : index
      %c0_12 = arith.constant 0 : index
      %13 = vector.load %arg7[%c0_11, %c0_12] : memref<2x1xf32, #tpu.memory_space<vmem>>, vector<2x1xf32>
      tpu.vector_store %arg7[%c0_11, %c0_12], %12 {strides = array<i32>} : memref<2x1xf32, #tpu.memory_space<vmem>>, vector<2x1xf32>,
    } else {
    }
    %c0 = arith.constant 0 : index
    %c0_1 = arith.constant 0 : index
    %3 = vector.load %arg7[%c0, %c0_1] : memref<2x1xf32, #tpu.memory_space<vmem>>, vector<2x1xf32>
    %c0_2 = arith.constant 0 : index
    %c0_3 = arith.constant 0 : index
    %4 = vector.load %arg3[%c0_2, %c0_3] : memref<2x32xbf16, #tpu.memory_space<vmem>>, vector<2x32xbf16>
    %c0_4 = arith.constant 0 : index
    %c0_5 = arith.constant 0 : index
    %5 = vector.load %arg4[%c0_4, %c0_5] : memref<32x1xbf16, #tpu.memory_space<vmem>>, vector<32x1xbf16>
    %cst = arith.constant dense<0.000000e+00> : vector<2x1xf32>
    %6 = tpu.matmul %4, %5, %cst {dimension_numbers = #tpu.dot_dimension_numbers<[1], [0], [0], [1], [0, 0, 1, 1], [], []>} : vector<2x32xbf16>, vector<32x1xbf16>, vector<2x1xf32> -> vector<2x1xf32>
    %7 = arith.addf %3, %6 : vector<2x1xf32>
    %c0_6 = arith.constant 0 : index
    %c0_7 = arith.constant 0 : index
    %8 = vector.load %arg7[%c0_6, %c0_7] : memref<2x1xf32, #tpu.memory_space<vmem>>, vector<2x1xf32>
    tpu.vector_store %arg7[%c0_6, %c0_7], %7 {strides = array<i32>} : memref<2x1xf32, #tpu.memory_space<vmem>>, vector<2x1xf32>,
    %c0_i32_8 = arith.constant 0 : i32
    %9 = arith.cmpi eq, %arg2, %c0_i32_8 : i32
    %10 = arith.extui %9 : i1 to i32
    %c0_i32_9 = arith.constant 0 : i32
    %11 = arith.cmpi ne, %10, %c0_i32_9 : i32
    scf.if %11 {
      %c0_10 = arith.constant 0 : index
      %c0_11 = arith.constant 0 : index
      %12 = vector.load %arg7[%c0_10, %c0_11] : memref<2x1xf32, #tpu.memory_space<vmem>>, vector<2x1xf32>
      %c0_12 = arith.constant 0 : index
      %c0_13 = arith.constant 0 : index
      %13 = vector.load %arg5[%c0_12, %c0_13] : memref<1x1xf32, #tpu.memory_space<vmem>>, vector<1x1xf32>
      %14 = vector.broadcast %13 : vector<1x1xf32> to vector<2x1xf32>
      %15 = arith.addf %12, %14 : vector<2x1xf32>
      %c0_14 = arith.constant 0 : index
      %c0_15 = arith.constant 0 : index
      %16 = vector.load %arg6[%c0_14, %c0_15] : memref<2x1xf32, #tpu.memory_space<vmem>>, vector<2x1xf32>
      tpu.vector_store %arg6[%c0_14, %c0_15], %15 {strides = array<i32>} : memref<2x1xf32, #tpu.memory_space<vmem>>, vector<2x1xf32>,
    } else {
    }
    return
  }
  func.func @transform_0(%arg0: i32, %arg1: i32, %arg2: i32) -> (i32, i32) {
    %c0_i32 = arith.constant 0 : i32
    return %arg0, %arg2 : i32, i32
  }
  func.func @transform_1(%arg0: i32, %arg1: i32, %arg2: i32) -> (i32, i32) {
    %c0_i32 = arith.constant 0 : i32
    return %arg2, %arg1 : i32, i32
  }
  func.func @transform_2(%arg0: i32, %arg1: i32, %arg2: i32) -> (i32, i32) {
    %c0_i32 = arith.constant 0 : i32
    %c0_i32_0 = arith.constant 0 : i32
    return %c0_i32, %arg1 : i32, i32
  }
  func.func @transform_3(%arg0: i32, %arg1: i32, %arg2: i32) -> (i32, i32) {
    %c0_i32 = arith.constant 0 : i32
    return %arg0, %arg1 : i32, i32
  }
}

</mosaic_0001>

<bundles_post_ra>
// kernel: discriminator_forward.11
= control target key start
LH: loop header
LB: loop body
LE: loop exit
PB: predicated region body
PF: predicated region fallthrough
CT: control target
= control target key end

     0   :  { %s1444_s12 = smov 0   ;;  %s1446_s13 = smov 0   ;;  %s1757_s0 = inlined_call_operand.vmem [shape: bf16[512,3], index: 0, kind: input, shape index: {}]   ;;  %s1758_s1 = inlined_call_operand.vmem [shape: bf16[3,32], index: 1, kind: input, shape index: {}]   ;;  %s1759_s2 = inlined_call_operand.vmem [shape: f32[1,32], index: 2, kind: input, shape index: {}]   ;;  %s1760_s3 = inlined_call_operand.vmem [shape: bf16[512,32], index: 3, kind: output, shape index: {}]  }
   0x1   :  { %s1448_s14 = smov 0  }
   0x2 LB: > { %s32_s15 = sadd.s32 1, %s1416_s13  ;;  %p1199_p0 = scmp.ge.s32.totalorder %s1420_s14, 1  ;;  %s1420_s14 = sphi %s1448_s14, %s13_s14   ;;  %s1416_s13 = sphi %s1446_s13, %s1763_s13   ;;  %s1412_s12 = sphi %s1444_s12, %s1762_s12  }
   0x3   : > { %p34_p1 = scmp.ge.s32.totalorder %s32_s15, 2  ;;  %p186_p2 = scmp.lt.s32.totalorder %s1420_s14, 3 }
   0x5   : > { %s1765_s15 = smov (%p34_p1, %s32_s15), 0  ;;  %p187_p3 = pnand %p1199_p0, %p186_p2 }
   0x6   : > { %v356_v0 = vld [vmem:[%s1758_s1] sm:$0x3] (!%p187_p3)  ;;  %vm486_vm0 = vcmask (!%p187_p3), 1040384   ;;  %vm487_vm1 = vcmask (!%p187_p3), 1041408   ;;  %s1200_s18 = sshll.u32 (!%p187_p3), %s1412_s12, 5  ;;  %v1422_v1 = vmov (!%p187_p3), 65535  }
   0x7   : > { %190 = sbr.rel (%p187_p3) target bundleno = 306 (0x132), region = 32  ;;  %v488_v2 = vsel (!%p187_p3), %vm486_vm0, 4294967295, %v1422_v1  ;;  %p1470_p4 = scmp.lt.s32.totalorder (!%p187_p3), %s1200_s18, 63  ;;  %vm259_vm2 = vcmask (!%p187_p3), 261120   ;;  %v1423_v4 = vmov (!%p187_p3), 0.0   ;;  %vm437_vm3 = vcmask (!%p187_p3), 23552  }
   0x8   : > { %v489_v3 = vsel (!%p187_p3), %vm487_vm1, %v488_v2, 0  ;;  %262 = vst.msk [vmem:[#allocation2 + $0x10] sm:$0xff] (!%p187_p3), %vm259_vm2, %v1423_v4  ;;  %260 = vst.msk [vmem:[#allocation2] sm:$0xff] (!%p187_p3), %vm259_vm2, %v1423_v4  ;;  %v1563_v49 = vld [vmem:[%s1759_s2] ss:$0 sm:$0xff] (!%p187_p3)  ;;  %vm1049_vm4 = vcmask (!%p187_p3), 257024  }
   0x9   : > { %261 = vst.msk [vmem:[#allocation2 + $0x8] sm:$0xff] (!%p187_p3), %vm259_vm2, %v1423_v4  ;;  %263 = vst.msk [vmem:[#allocation2 + $0x18] sm:$0xff] (!%p187_p3), %vm259_vm2, %v1423_v4  ;;  %v491_v5 = vand.u32 (!%p187_p3), %v489_v3, %v356_v0 }
   0xa   : > { %264 = vst.msk [vmem:[#allocation2 + $0x20] sm:$0xff] (!%p187_p3), %vm259_vm2, %v1423_v4  ;;  %265 = vst.msk [vmem:[#allocation2 + $0x28] sm:$0xff] (!%p187_p3), %vm259_vm2, %v1423_v4 }
   0xb   : > { %266 = vst.msk [vmem:[#allocation2 + $0x30] sm:$0xff] (!%p187_p3), %vm259_vm2, %v1423_v4  ;;  %267 = vst.msk [vmem:[#allocation2 + $0x38] sm:$0xff] (!%p187_p3), %vm259_vm2, %v1423_v4  ;;  %1320 = vmatprep.subr.bf16.mxu0 (!%p187_p3), %v491_v5  ;;  %1354 = vmatprep.subr.bf16.mxu1 (!%p187_p3), %v491_v5 }
   0xc   : > { %268 = vst.msk [vmem:[#allocation2 + $0x40] sm:$0xff] (!%p187_p3), %vm259_vm2, %v1423_v4  ;;  %269 = vst.msk [vmem:[#allocation2 + $0x48] sm:$0xff] (!%p187_p3), %vm259_vm2, %v1423_v4  ;;  %1321 = vmatpush3.bf16.msra.mxu0 (!%p187_p3), %v491_v5  ;;  %1355 = vmatpush3.bf16.msra.mxu1 (!%p187_p3), %v491_v5 }
   0xd   : > { %270 = vst.msk [vmem:[#allocation2 + $0x50] sm:$0xff] (!%p187_p3), %vm259_vm2, %v1423_v4  ;;  %271 = vst.msk [vmem:[#allocation2 + $0x58] sm:$0xff] (!%p187_p3), %vm259_vm2, %v1423_v4 }
   0xe   : > { %272 = vst.msk [vmem:[#allocation2 + $0x60] sm:$0xff] %vm259_vm2, %v1423_v4  ;;  %273 = vst.msk [vmem:[#allocation2 + $0x68] sm:$0xff] %vm259_vm2, %v1423_v4  ;;  %s1767_s18 = smov (!%p1470_p4, %s1200_s18), 63 }
   0xf   : > { %274 = vst.msk [vmem:[#allocation2 + $0x70] sm:$0xff] %vm259_vm2, %v1423_v4  ;;  %275 = vst.msk [vmem:[#allocation2 + $0x78] sm:$0xff] %vm259_vm2, %v1423_v4  ;;  %s1201_s20 = sshll.u32 %s1767_s18, 2  ;;  %v294_v22 = vld [vmem:[#allocation2 + $0x10] sm:$0xff]  ;;  %v292_v24 = vld [vmem:[#allocation2] sm:$0xff] }
  0x10   : > { %276 = vst.msk [vmem:[#allocation2 + $0x80] sm:$0xff] %vm259_vm2, %v1423_v4  ;;  %277 = vst.msk [vmem:[#allocation2 + $0x88] sm:$0xff] %vm259_vm2, %v1423_v4  ;;  %s1518_s23 = scalar_lea.vmem %s1757_s0, %s1201_s20  ;;  %v295_v27 = vld [vmem:[#allocation2 + $0x18] sm:$0xff]  ;;  %v293_v32 = vld [vmem:[#allocation2 + $0x8] sm:$0xff]  ;;  %s1586_s28 = scalar_lea.vmem %s1760_s3, %s1201_s20 }
  0x11   : > { %278 = vst.msk [vmem:[#allocation2 + $0x90] sm:$0xff] %vm259_vm2, %v1423_v4  ;;  %279 = vst.msk [vmem:[#allocation2 + $0x98] sm:$0xff] %vm259_vm2, %v1423_v4  ;;  %v1382_v6 = vld [vmem:[%s1518_s23] sm:$0xff]   ;;  %v1384_v8 = vld [vmem:[%s1518_s23 + $0x8] sm:$0xff]  }
  0x12   : > { %280 = vst.msk [vmem:[#allocation2 + $0xa0] sm:$0xff] %vm259_vm2, %v1423_v4  ;;  %281 = vst.msk [vmem:[#allocation2 + $0xa8] sm:$0xff] %vm259_vm2, %v1423_v4  ;;  %v1383_v7 = vld [vmem:[%s1518_s23 + $0x40] sm:$0xff]   ;;  %1322 = vmatprep.mubr.msk.bf16.mxu0 %vm437_vm3, %v1382_v6  ;;  %v1385_v9 = vld [vmem:[%s1518_s23 + $0x48] sm:$0xff]  }
  0x13   : > { %282 = vst.msk [vmem:[#allocation2 + $0xb0] sm:$0xff] %vm259_vm2, %v1423_v4  ;;  %283 = vst.msk [vmem:[#allocation2 + $0xb8] sm:$0xff] %vm259_vm2, %v1423_v4  ;;  %1338 = vmatprep.mubr.msk.bf16.mxu1 %vm437_vm3, %v1383_v7  ;;  %1323 = vmatmul.mubr.msk.bf16.vlgmr.msra.gmra.mrb[0].mxu0 %vm437_vm3, %v1384_v8  ;;  %v1386_v10 = vld [vmem:[%s1518_s23 + $0x10] sm:$0xff]   ;;  %v1388_v12 = vld [vmem:[%s1518_s23 + $0x18] sm:$0xff]  }
  0x14   : > { %284 = vst.msk [vmem:[#allocation2 + $0xc0] sm:$0xff] %vm259_vm2, %v1423_v4  ;;  %285 = vst.msk [vmem:[#allocation2 + $0xc8] sm:$0xff] %vm259_vm2, %v1423_v4  ;;  %1339 = vmatmul.mubr.msk.bf16.vlgmr.msra.gmra.mrb[0].mxu1 %vm437_vm3, %v1385_v9  ;;  %v1387_v11 = vld [vmem:[%s1518_s23 + $0x50] sm:$0xff]   ;;  %1326 = vmatprep.mubr.msk.bf16.mxu0 %vm437_vm3, %v1386_v10  ;;  %v1389_v13 = vld [vmem:[%s1518_s23 + $0x58] sm:$0xff]  }
  0x15   : > { %286 = vst.msk [vmem:[#allocation2 + $0xd0] sm:$0xff] %vm259_vm2, %v1423_v4  ;;  %287 = vst.msk [vmem:[#allocation2 + $0xd8] sm:$0xff] %vm259_vm2, %v1423_v4  ;;  %1342 = vmatprep.mubr.msk.bf16.mxu1 %vm437_vm3, %v1387_v11  ;;  %v1390_v14 = vld [vmem:[%s1518_s23 + $0x20] sm:$0xff]   ;;  %v1392_v16 = vld [vmem:[%s1518_s23 + $0x28] sm:$0xff]  }
  0x16   : > { %288 = vst.msk [vmem:[#allocation2 + $0xe0] sm:$0xff] %vm259_vm2, %v1423_v4  ;;  %289 = vst.msk [vmem:[#allocation2 + $0xe8] sm:$0xff] %vm259_vm2, %v1423_v4  ;;  %v1391_v15 = vld [vmem:[%s1518_s23 + $0x60] sm:$0xff]   ;;  %v1393_v17 = vld [vmem:[%s1518_s23 + $0x68] sm:$0xff]  }
  0x17   : > { %290 = vst.msk [vmem:[#allocation2 + $0xf0] sm:$0xff] %vm259_vm2, %v1423_v4  ;;  %291 = vst.msk [vmem:[#allocation2 + $0xf8] sm:$0xff] %vm259_vm2, %v1423_v4  ;;  %v1394_v18 = vld [vmem:[%s1518_s23 + $0x30] sm:$0xff]   ;;  %v1396_v20 = vld [vmem:[%s1518_s23 + $0x38] sm:$0xff]  }
  0x18   : > { %v1395_v19 = vld [vmem:[%s1518_s23 + $0x70] sm:$0xff]   ;;  %v1397_v21 = vld [vmem:[%s1518_s23 + $0x78] sm:$0xff]   ;;  %v308_v26 = vld [vmem:[#allocation2 + $0x80] sm:$0xff] }
  0x19   : > { %v310_v23 = vld [vmem:[#allocation2 + $0x90] sm:$0xff]  ;;  %v311_v31 = vld [vmem:[#allocation2 + $0x98] sm:$0xff]  ;;  %v309_v37 = vld [vmem:[#allocation2 + $0x88] sm:$0xff] }
  0x1a   : > { %v298_v46 = vld [vmem:[#allocation2 + $0x30] sm:$0xff]  ;;  %v296_v48 = vld [vmem:[#allocation2 + $0x20] sm:$0xff]  ;;  %v299_v52 = vld [vmem:[#allocation2 + $0x38] sm:$0xff] }
  0x1b   : > { %1327 = vmatmul.mubr.msk.bf16.gmra.mrb[4].mxu0 %vm437_vm3, %v1388_v12  ;;  %v314_v47 = vld [vmem:[#allocation2 + $0xb0] sm:$0xff]  ;;  %v312_v51 = vld [vmem:[#allocation2 + $0xa0] sm:$0xff]  ;;  %v315_v56 = vld [vmem:[#allocation2 + $0xb8] sm:$0xff] }
  0x1c   : > { %1343 = vmatmul.mubr.msk.bf16.gmra.mrb[4].mxu1 %vm437_vm3, %v1389_v13  ;;  %1330 = vmatprep.mubr.msk.bf16.mxu0 %vm437_vm3, %v1390_v14  ;;  %v297_v57 = vld [vmem:[#allocation2 + $0x28] sm:$0xff] }
  0x1d   : > { %1346 = vmatprep.mubr.msk.bf16.mxu1 %vm437_vm3, %v1391_v15 }
  0x23   : > { %1331 = vmatmul.mubr.msk.bf16.gmra.mrb[8].mxu0 %vm437_vm3, %v1392_v16 }
  0x24   : > { %1347 = vmatmul.mubr.msk.bf16.gmra.mrb[8].mxu1 %vm437_vm3, %v1393_v17  ;;  %1334 = vmatprep.mubr.msk.bf16.mxu0 %vm437_vm3, %v1394_v18 }
  0x25   : > { %1350 = vmatprep.mubr.msk.bf16.mxu1 %vm437_vm3, %v1395_v19 }
  0x2b   : > { %1335 = vmatmul.mubr.msk.bf16.gmra.mrb[12].mxu0 %vm437_vm3, %v1396_v20 }
  0x2c   : > { %1351 = vmatmul.mubr.msk.bf16.gmra.mrb[12].mxu1 %vm437_vm3, %v1397_v21 }
  0xe6   : > { %v1324_v25 = vpop.f32.mrb[0].mxu0 }
  0xe7   : > { %v656_v28 = vadd.f32 %v1324_v25, %v294_v22  ;;  %v1340_v29 = vpop.f32.mrb[0].mxu1  ;;  %v527_v30 = vpop.f32.mrb[1].mxu0 }
  0xe8   : > { %v672_v33 = vadd.f32 %v1340_v29, %v310_v23  ;;  %v654_v34 = vadd.f32 %v527_v30, %v292_v24  ;;  %v591_v35 = vpop.f32.mrb[1].mxu1  ;;  %v1325_v36 = vpop.f32.mrb[2].mxu0 }
  0xe9   : > { %689 = vst.msk [vmem:[#allocation2 + $0x10] sm:$0xff] %vm259_vm2, %v656_v28  ;;  %v670_v38 = vadd.f32 %v591_v35, %v308_v26  ;;  %v657_v39 = vadd.f32 %v1325_v36, %v295_v27  ;;  %v1341_v40 = vpop.f32.mrb[2].mxu1  ;;  %v530_v41 = vpop.f32.mrb[3].mxu0 }
  0xea   : > { %705 = vst.msk [vmem:[#allocation2 + $0x90] sm:$0xff] %vm259_vm2, %v672_v33  ;;  %687 = vst.msk [vmem:[#allocation2] sm:$0xff] %vm259_vm2, %v654_v34  ;;  %v673_v42 = vadd.f32 %v1341_v40, %v311_v31  ;;  %v655_v43 = vadd.f32 %v530_v41, %v293_v32  ;;  %v594_v44 = vpop.f32.mrb[3].mxu1 }
  0xeb   : > { %703 = vst.msk [vmem:[#allocation2 + $0x80] sm:$0xff] %vm259_vm2, %v670_v38  ;;  %690 = vst.msk [vmem:[#allocation2 + $0x18] sm:$0xff] %vm259_vm2, %v657_v39  ;;  %v671_v45 = vadd.f32 %v594_v44, %v309_v37 }
  0xec   : > { %706 = vst.msk [vmem:[#allocation2 + $0x98] sm:$0xff] %vm259_vm2, %v673_v42  ;;  %688 = vst.msk [vmem:[#allocation2 + $0x8] sm:$0xff] %vm259_vm2, %v655_v43 }
  0xed   : > { %704 = vst.msk [vmem:[#allocation2 + $0x88] sm:$0xff] %vm259_vm2, %v671_v45 }
  0xee   : > { %v1328_v50 = vpop.f32.mrb[4].mxu0 }
  0xef   : > { %v660_v53 = vadd.f32 %v1328_v50, %v298_v46  ;;  %v1344_v54 = vpop.f32.mrb[4].mxu1  ;;  %v543_v55 = vpop.f32.mrb[5].mxu0 }
  0xf0   : > { %v724_v58 = vld [vmem:[#allocation2 + $0x10] sm:$0xff]  ;;  %v676_v59 = vadd.f32 %v1344_v54, %v314_v47  ;;  %v658_v60 = vadd.f32 %v543_v55, %v296_v48  ;;  %v607_v61 = vpop.f32.mrb[5].mxu1  ;;  %v1329_v62 = vpop.f32.mrb[6].mxu0 }
  0xf1   : > { %v763_v63 = vadd.f32 %v1563_v49, %v724_v58  ;;  %v740_v0 = vld [vmem:[#allocation2 + $0x90] sm:$0xff]  ;;  %v722_v1 = vld [vmem:[#allocation2] sm:$0xff]  ;;  %693 = vst.msk [vmem:[#allocation2 + $0x30] sm:$0xff] %vm259_vm2, %v660_v53  ;;  %v674_v2 = vadd.f32 %v607_v61, %v312_v51  ;;  %v661_v3 = vadd.f32 %v1329_v62, %v299_v52  ;;  %v1345_v4 = vpop.f32.mrb[6].mxu1  ;;  %v546_v5 = vpop.f32.mrb[7].mxu0 }
  0xf2   : > { %v779_v6 = vadd.f32 %v1563_v49, %v740_v0  ;;  %v761_v7 = vadd.f32 %v1563_v49, %v722_v1  ;;  %v738_v8 = vld [vmem:[#allocation2 + $0x80] sm:$0xff]  ;;  %v725_v9 = vld [vmem:[#allocation2 + $0x18] sm:$0xff]  ;;  %709 = vst.msk [vmem:[#allocation2 + $0xb0] sm:$0xff] %vm259_vm2, %v676_v59  ;;  %691 = vst.msk [vmem:[#allocation2 + $0x20] sm:$0xff] %vm259_vm2, %v658_v60  ;;  %v677_v10 = vadd.f32 %v1345_v4, %v315_v56  ;;  %v1571_v12 = vpop.f32.mrb[7].mxu1 }
  0xf3   : > { %v659_v11 = vadd.f32 %v546_v5, %v297_v57  ;;  %vm795_vm5 = vcmp.ge.f32.partialorder %v763_v63, 0.0  ;;  %v827_v13 = vmul.f32 0.2, %v763_v63  ;;  %v777_v14 = vadd.f32 %v1563_v49, %v738_v8  ;;  %v741_v16 = vld [vmem:[#allocation2 + $0x98] sm:$0xff]  ;;  %707 = vst.msk [vmem:[#allocation2 + $0xa0] sm:$0xff] %vm259_vm2, %v674_v2  ;;  %694 = vst.msk [vmem:[#allocation2 + $0x38] sm:$0xff] %vm259_vm2, %v661_v3 }
  0xf4   : > { %v764_v15 = vadd.f32 %v1563_v49, %v725_v9  ;;  %vm811_vm6 = vcmp.ge.f32.partialorder %v779_v6, 0.0  ;;  %v843_v17 = vmul.f32 0.2, %v779_v6  ;;  %vm793_vm7 = vcmp.ge.f32.partialorder %v761_v7, 0.0  ;;  %710 = vst.msk [vmem:[#allocation2 + $0xb8] sm:$0xff] %vm259_vm2, %v677_v10  ;;  %v723_v21 = vld [vmem:[#allocation2 + $0x8] sm:$0xff] }
  0xf5   : > { %v825_v18 = vmul.f32 0.2, %v761_v7  ;;  %692 = vst.msk [vmem:[#allocation2 + $0x28] sm:$0xff] %vm259_vm2, %v659_v11  ;;  %v859_v19 = vsel %vm795_vm5, %v763_v63, %v827_v13  ;;  %vm809_vm8 = vcmp.ge.f32.partialorder %v777_v14, 0.0  ;;  %v841_v20 = vmul.f32 0.2, %v777_v14 }
  0xf6   : > { %vm796_vm9 = vcmp.ge.f32.partialorder %v764_v15, 0.0  ;;  %v891_v22 = vmul.f32 1.4142135, %v859_v19  ;;  %v875_v23 = vsel %vm811_vm6, %v779_v6, %v843_v17  ;;  %v828_v25 = vmul.f32 0.2, %v764_v15  ;;  %v1579_v26 = vpop.f32.mrb[8].mxu0 }
  0xf7   : > { %v857_v24 = vsel %vm793_vm7, %v761_v7, %v825_v18  ;;  %v907_v27 = vmul.f32 1.4142135, %v875_v23  ;;  %v873_v29 = vsel %vm809_vm8, %v777_v14, %v841_v20  ;;  %v780_v30 = vadd.f32 %v1563_v49, %v741_v16  ;;  %v1589_v31 = vpop.f32.mrb[8].mxu1  ;;  %v1591_v32 = vpop.f32.mrb[9].mxu0  ;;  %v739_v37 = vld [vmem:[#allocation2 + $0x88] sm:$0xff] }
  0xf8   : > { %v889_v28 = vmul.f32 1.4142135, %v857_v24  ;;  %v1273_v33 = vpack.c.bf16 %v891_v22, %v891_v22  ;;  %v905_v34 = vmul.f32 1.4142135, %v873_v29  ;;  %v860_v35 = vsel %vm796_vm9, %v764_v15, %v828_v25  ;;  %v728_v38 = vld [vmem:[#allocation2 + $0x30] sm:$0xff]  ;;  %v1595_v39 = vpop.f32.mrb[9].mxu1 }
  0xf9   : > { %v762_v36 = vadd.f32 %v1563_v49, %v723_v21  ;;  %v1597_v40 = vpop.f32.mrb[10].mxu0  ;;  %v1289_v41 = vpack.c.bf16 %v907_v27, %v907_v27  ;;  %v892_v43 = vmul.f32 1.4142135, %v860_v35  ;;  %vm812_vm10 = vcmp.ge.f32.partialorder %v780_v30, 0.0  ;;  %v744_v44 = vld [vmem:[#allocation2 + $0xb0] sm:$0xff]  ;;  %v726_v45 = vld [vmem:[#allocation2 + $0x20] sm:$0xff] }
  0xfa   : > { %v1271_v42 = vpack.c.bf16 %v889_v28, %v889_v28  ;;  %v1599_v46 = vpop.f32.mrb[10].mxu1  ;;  %1052 = vst.msk [vmem:[%s1586_s28 + $0x8] sm:$0xf] %vm1049_vm4, %v1273_v33  ;;  %v1287_v47 = vpack.c.bf16 %v905_v34, %v905_v34  ;;  %v844_v48 = vmul.f32 0.2, %v780_v30  ;;  %v742_v51 = vld [vmem:[#allocation2 + $0xa0] sm:$0xff]  ;;  %v778_v53 = vadd.f32 %v1563_v49, %v739_v37 }
  0xfb   : > { %vm794_vm11 = vcmp.ge.f32.partialorder %v762_v36, 0.0  ;;  %v826_v50 = vmul.f32 0.2, %v762_v36  ;;  %1068 = vst.msk [vmem:[%s1586_s28 + $0x48] sm:$0xf] %vm1049_vm4, %v1289_v41  ;;  %v1274_v52 = vpack.c.bf16 %v892_v43, %v892_v43  ;;  %v767_v54 = vadd.f32 %v1563_v49, %v728_v38  ;;  %v1610_v56 = vpop.f32.mrb[11].mxu0 }
  0xfc   : > { %1050 = vst.msk [vmem:[%s1586_s28] sm:$0xf] %vm1049_vm4, %v1271_v42  ;;  %v783_v55 = vadd.f32 %v1563_v49, %v744_v44  ;;  %v1612_v57 = vpop.f32.mrb[11].mxu1  ;;  %1066 = vst.msk [vmem:[%s1586_s28 + $0x40] sm:$0xf] %vm1049_vm4, %v1287_v47  ;;  %v876_v58 = vsel %vm812_vm10, %v780_v30, %v844_v48  ;;  %v765_v60 = vadd.f32 %v1563_v49, %v726_v45  ;;  %vm810_vm12 = vcmp.ge.f32.partialorder %v778_v53, 0.0 }
  0xfd   : > { %v858_v59 = vsel %vm794_vm11, %v762_v36, %v826_v50  ;;  %v781_v61 = vadd.f32 %v1563_v49, %v742_v51  ;;  %1053 = vst.msk [vmem:[%s1586_s28 + $0xc] sm:$0xf] %vm1049_vm4, %v1274_v52  ;;  %v908_v62 = vmul.f32 1.4142135, %v876_v58  ;;  %vm799_vm13 = vcmp.ge.f32.partialorder %v767_v54, 0.0  ;;  %v729_v0 = vld [vmem:[#allocation2 + $0x38] sm:$0xff] }
  0xfe   : > { %v890_v63 = vmul.f32 1.4142135, %v858_v59  ;;  %v842_v1 = vmul.f32 0.2, %v778_v53  ;;  %v831_v2 = vmul.f32 0.2, %v767_v54  ;;  %v768_v27 = vadd.f32 %v1563_v49, %v729_v0 }
  0xff   : > { %vm815_vm14 = vcmp.ge.f32.partialorder %v783_v55, 0.0  ;;  %vm797_vm15 = vcmp.ge.f32.partialorder %v765_v60, 0.0  ;;  %v745_v3 = vld [vmem:[#allocation2 + $0xb8] sm:$0xff]  ;;  %v1290_v4 = vpack.c.bf16 %v908_v62, %v908_v62  ;;  %v847_v6 = vmul.f32 0.2, %v783_v55  ;;  %v1621_v8 = vpop.f32.mrb[12].mxu0 }
 0x100   : > { %v1272_v5 = vpack.c.bf16 %v890_v63, %v890_v63  ;;  %v829_v7 = vmul.f32 0.2, %v765_v60  ;;  %v1623_v9 = vpop.f32.mrb[12].mxu1  ;;  %v874_v10 = vsel %vm810_vm12, %v778_v53, %v842_v1  ;;  %v863_v11 = vsel %vm799_vm13, %v767_v54, %v831_v2  ;;  %v727_v14 = vld [vmem:[#allocation2 + $0x28] sm:$0xff]  ;;  %v1625_v15 = vpop.f32.mrb[13].mxu0  ;;  %v302_v37 = vld [vmem:[#allocation2 + $0x50] sm:$0xff] }
 0x101   : > { %vm813_vm0 = vcmp.ge.f32.partialorder %v781_v61, 0.0  ;;  %v845_v13 = vmul.f32 0.2, %v781_v61  ;;  %v1627_v16 = vpop.f32.mrb[13].mxu1  ;;  %1069 = vst.msk [vmem:[%s1586_s28 + $0x4c] sm:$0xf] %vm1049_vm4, %v1290_v4  ;;  %v879_v19 = vsel %vm815_vm14, %v783_v55, %v847_v6  ;;  %v784_v35 = vadd.f32 %v1563_v49, %v745_v3 }
 0x102   : > { %1051 = vst.msk [vmem:[%s1586_s28 + $0x4] sm:$0xf] %vm1049_vm4, %v1272_v5  ;;  %v906_v17 = vmul.f32 1.4142135, %v874_v10  ;;  %v895_v18 = vmul.f32 1.4142135, %v863_v11  ;;  %v861_v20 = vsel %vm797_vm15, %v765_v60, %v829_v7  ;;  %v766_v48 = vadd.f32 %v1563_v49, %v727_v14 }
 0x103   : > { %v1635_v21 = vpop.f32.mrb[14].mxu0  ;;  %v1637_v22 = vpop.f32.mrb[14].mxu1  ;;  %v911_v23 = vmul.f32 1.4142135, %v879_v19  ;;  %v893_v24 = vmul.f32 1.4142135, %v861_v20  ;;  %v877_v25 = vsel %vm813_vm0, %v781_v61, %v845_v13  ;;  %v664_v55 = vadd.f32 %v1579_v26, %v302_v37 }
 0x104   : > { %v1640_v28 = vpop.f32.mrb[15].mxu0  ;;  %v1642_v29 = vpop.f32.mrb[15].mxu1  ;;  %v1288_v30 = vpack.c.bf16 %v906_v17, %v906_v17  ;;  %v1277_v33 = vpack.c.bf16 %v895_v18, %v895_v18  ;;  %v909_v34 = vmul.f32 1.4142135, %v877_v25  ;;  %v313_v36 = vld [vmem:[#allocation2 + $0xa8] sm:$0xff]  ;;  %v318_v38 = vld [vmem:[#allocation2 + $0xd0] sm:$0xff] }
 0x105   : > { %v1293_v41 = vpack.c.bf16 %v911_v23, %v911_v23  ;;  %v1275_v42 = vpack.c.bf16 %v893_v24, %v893_v24  ;;  %vm800_vm1 = vcmp.ge.f32.partialorder %v768_v27, 0.0  ;;  %v832_v43 = vmul.f32 0.2, %v768_v27  ;;  %v300_v44 = vld [vmem:[#allocation2 + $0x40] sm:$0xff]  ;;  %v303_v51 = vld [vmem:[#allocation2 + $0x58] sm:$0xff]  ;;  %v301_v59 = vld [vmem:[#allocation2 + $0x48] sm:$0xff] }
 0x106   : > { %1067 = vst.msk [vmem:[%s1586_s28 + $0x44] sm:$0xf] %vm1049_vm4, %v1288_v30  ;;  %1056 = vst.msk [vmem:[%s1586_s28 + $0x18] sm:$0xf] %vm1049_vm4, %v1277_v33  ;;  %v1291_v45 = vpack.c.bf16 %v909_v34, %v909_v34  ;;  %vm816_vm3 = vcmp.ge.f32.partialorder %v784_v35, 0.0  ;;  %v316_v50 = vld [vmem:[#allocation2 + $0xc0] sm:$0xff]  ;;  %v675_v54 = vadd.f32 %v1571_v12, %v313_v36  ;;  %v680_v58 = vadd.f32 %v1589_v31, %v318_v38 }
 0x107   : > { %v848_v47 = vmul.f32 0.2, %v784_v35  ;;  %v319_v52 = vld [vmem:[#allocation2 + $0xd8] sm:$0xff]  ;;  %1072 = vst.msk [vmem:[%s1586_s28 + $0x58] sm:$0xf] %vm1049_vm4, %v1293_v41  ;;  %v864_v53 = vsel %vm800_vm1, %v768_v27, %v832_v43  ;;  %v317_v60 = vld [vmem:[#allocation2 + $0xc8] sm:$0xff]  ;;  %v662_v12 = vadd.f32 %v1591_v32, %v300_v44  ;;  %v678_v26 = vadd.f32 %v1595_v39, %v316_v50 }
 0x108   : > { %1054 = vst.msk [vmem:[%s1586_s28 + $0x10] sm:$0xf] %vm1049_vm4, %v1275_v42  ;;  %v306_v61 = vld [vmem:[#allocation2 + $0x70] sm:$0xff]  ;;  %1070 = vst.msk [vmem:[%s1586_s28 + $0x50] sm:$0xf] %vm1049_vm4, %v1291_v45  ;;  %vm798_vm5 = vcmp.ge.f32.partialorder %v766_v48, 0.0  ;;  %v665_v31 = vadd.f32 %v1597_v40, %v303_v51  ;;  %v681_v10 = vadd.f32 %v1599_v46, %v319_v52  ;;  %v663_v11 = vadd.f32 %v1610_v56, %v301_v59 }
 0x109   : > { %v896_v62 = vmul.f32 1.4142135, %v864_v53  ;;  %v880_v63 = vsel %vm816_vm3, %v784_v35, %v848_v47  ;;  %v830_v0 = vmul.f32 0.2, %v766_v48  ;;  %v322_v1 = vld [vmem:[#allocation2 + $0xf0] sm:$0xff]  ;;  %708 = vst.msk [vmem:[#allocation2 + $0xa8] sm:$0xff] %vm259_vm2, %v675_v54  ;;  %v679_v39 = vadd.f32 %v1612_v57, %v317_v60 }
 0x10a   : > { %v912_v2 = vmul.f32 1.4142135, %v880_v63  ;;  %697 = vst.msk [vmem:[#allocation2 + $0x50] sm:$0xff] %vm259_vm2, %v664_v55  ;;  %713 = vst.msk [vmem:[#allocation2 + $0xd0] sm:$0xff] %vm259_vm2, %v680_v58  ;;  %v304_v3 = vld [vmem:[#allocation2 + $0x60] sm:$0xff]  ;;  %v307_v5 = vld [vmem:[#allocation2 + $0x78] sm:$0xff]  ;;  %v668_v40 = vadd.f32 %v1621_v8, %v306_v61  ;;  %v684_v46 = vadd.f32 %v1623_v9, %v322_v1 }
 0x10b   : > { %v320_v4 = vld [vmem:[#allocation2 + $0xe0] sm:$0xff]  ;;  %v1278_v6 = vpack.c.bf16 %v896_v62, %v896_v62  ;;  %v862_v7 = vsel %vm798_vm5, %v766_v48, %v830_v0  ;;  %v323_v13 = vld [vmem:[#allocation2 + $0xf8] sm:$0xff]  ;;  %v305_v14 = vld [vmem:[#allocation2 + $0x68] sm:$0xff]  ;;  %695 = vst.msk [vmem:[#allocation2 + $0x40] sm:$0xff] %vm259_vm2, %v662_v12  ;;  %v666_v56 = vadd.f32 %v1625_v15, %v304_v3  ;;  %v669_v20 = vadd.f32 %v1635_v21, %v307_v5 }
 0x10c   : > { %v321_v17 = vld [vmem:[#allocation2 + $0xe8] sm:$0xff]  ;;  %v1294_v18 = vpack.c.bf16 %v912_v2, %v912_v2  ;;  %v894_v32 = vmul.f32 1.4142135, %v862_v7  ;;  %711 = vst.msk [vmem:[#allocation2 + $0xc0] sm:$0xff] %vm259_vm2, %v678_v26  ;;  %698 = vst.msk [vmem:[#allocation2 + $0x58] sm:$0xff] %vm259_vm2, %v665_v31  ;;  %v682_v19 = vadd.f32 %v1627_v16, %v320_v4  ;;  %v685_v8 = vadd.f32 %v1637_v22, %v323_v13 }
 0x10d   : > { %1057 = vst.msk [vmem:[%s1586_s28 + $0x1c] sm:$0xf] %vm1049_vm4, %v1278_v6  ;;  %v667_v23 = vadd.f32 %v1640_v28, %v305_v14  ;;  %v683_v24 = vadd.f32 %v1642_v29, %v321_v17 }
 0x10e   : > { %714 = vst.msk [vmem:[#allocation2 + $0xd8] sm:$0xff] %vm259_vm2, %v681_v10  ;;  %696 = vst.msk [vmem:[#allocation2 + $0x48] sm:$0xff] %vm259_vm2, %v663_v11  ;;  %v1276_v57 = vpack.c.bf16 %v894_v32, %v894_v32 }
 0x10f   : > { %1073 = vst.msk [vmem:[%s1586_s28 + $0x5c] sm:$0xf] %vm1049_vm4, %v1294_v18 }
 0x110   : > { %712 = vst.msk [vmem:[#allocation2 + $0xc8] sm:$0xff] %vm259_vm2, %v679_v39  ;;  %701 = vst.msk [vmem:[#allocation2 + $0x70] sm:$0xff] %vm259_vm2, %v668_v40  ;;  %v743_v9 = vld [vmem:[#allocation2 + $0xa8] sm:$0xff] }
 0x111   : > { %717 = vst.msk [vmem:[#allocation2 + $0xf0] sm:$0xff] %vm259_vm2, %v684_v46  ;;  %699 = vst.msk [vmem:[#allocation2 + $0x60] sm:$0xff] %vm259_vm2, %v666_v56  ;;  %v732_v15 = vld [vmem:[#allocation2 + $0x50] sm:$0xff]  ;;  %v782_v21 = vadd.f32 %v1563_v49, %v743_v9 }
 0x112   : > { %715 = vst.msk [vmem:[#allocation2 + $0xe0] sm:$0xff] %vm259_vm2, %v682_v19  ;;  %702 = vst.msk [vmem:[#allocation2 + $0x78] sm:$0xff] %vm259_vm2, %v669_v20  ;;  %v748_v16 = vld [vmem:[#allocation2 + $0xd0] sm:$0xff]  ;;  %v771_v22 = vadd.f32 %v1563_v49, %v732_v15  ;;  %v730_v27 = vld [vmem:[#allocation2 + $0x40] sm:$0xff] }
 0x113   : > { %1055 = vst.msk [vmem:[%s1586_s28 + $0x14] sm:$0xf] %vm1049_vm4, %v1276_v57  ;;  %v787_v25 = vadd.f32 %v1563_v49, %v748_v16  ;;  %v746_v28 = vld [vmem:[#allocation2 + $0xc0] sm:$0xff]  ;;  %v733_v29 = vld [vmem:[#allocation2 + $0x58] sm:$0xff]  ;;  %vm814_vm6 = vcmp.ge.f32.partialorder %v782_v21, 0.0  ;;  %v769_v35 = vadd.f32 %v1563_v49, %v730_v27 }
 0x114   : > { %718 = vst.msk [vmem:[#allocation2 + $0xf8] sm:$0xff] %vm259_vm2, %v685_v8  ;;  %700 = vst.msk [vmem:[#allocation2 + $0x68] sm:$0xff] %vm259_vm2, %v667_v23  ;;  %v846_v30 = vmul.f32 0.2, %v782_v21  ;;  %vm803_vm7 = vcmp.ge.f32.partialorder %v771_v22, 0.0  ;;  %v785_v36 = vadd.f32 %v1563_v49, %v746_v28  ;;  %v772_v42 = vadd.f32 %v1563_v49, %v733_v29 }
 0x115   : > { %716 = vst.msk [vmem:[#allocation2 + $0xe8] sm:$0xff] %vm259_vm2, %v683_v24  ;;  %v835_v33 = vmul.f32 0.2, %v771_v22  ;;  %vm819_vm8 = vcmp.ge.f32.partialorder %v787_v25, 0.0  ;;  %v851_v34 = vmul.f32 0.2, %v787_v25 }
 0x116   : > { %v749_v37 = vld [vmem:[#allocation2 + $0xd8] sm:$0xff]  ;;  %v878_v38 = vsel %vm814_vm6, %v782_v21, %v846_v30  ;;  %vm801_vm2 = vcmp.ge.f32.partialorder %v769_v35, 0.0  ;;  %v731_v48 = vld [vmem:[#allocation2 + $0x48] sm:$0xff]  ;;  %v833_v51 = vmul.f32 0.2, %v769_v35  ;;  %vm817_vm9 = vcmp.ge.f32.partialorder %v785_v36, 0.0 }
 0x117   : > { %v867_v41 = vsel %vm803_vm7, %v771_v22, %v835_v33  ;;  %v788_v43 = vadd.f32 %v1563_v49, %v749_v37  ;;  %v910_v44 = vmul.f32 1.4142135, %v878_v38  ;;  %v883_v47 = vsel %vm819_vm8, %v787_v25, %v851_v34  ;;  %v747_v58 = vld [vmem:[#allocation2 + $0xc8] sm:$0xff]  ;;  %v736_v2 = vld [vmem:[#allocation2 + $0x70] sm:$0xff] }
 0x118   : > { %v899_v45 = vmul.f32 1.4142135, %v867_v41  ;;  %v915_v50 = vmul.f32 1.4142135, %v883_v47  ;;  %vm804_vm10 = vcmp.ge.f32.partialorder %v772_v42, 0.0  ;;  %v865_v60 = vsel %vm801_vm2, %v769_v35, %v833_v51  ;;  %v752_v4 = vld [vmem:[#allocation2 + $0xf0] sm:$0xff] }
 0x119   : > { %v1292_v52 = vpack.c.bf16 %v910_v44, %v910_v44  ;;  %v849_v54 = vmul.f32 0.2, %v785_v36  ;;  %v836_v55 = vmul.f32 0.2, %v772_v42  ;;  %vm820_vm11 = vcmp.ge.f32.partialorder %v788_v43, 0.0  ;;  %v734_v5 = vld [vmem:[#allocation2 + $0x60] sm:$0xff] }
 0x11a   : > { %v1281_v53 = vpack.c.bf16 %v899_v45, %v899_v45  ;;  %v1297_v59 = vpack.c.bf16 %v915_v50, %v915_v50  ;;  %v852_v61 = vmul.f32 0.2, %v788_v43  ;;  %v897_v62 = vmul.f32 1.4142135, %v865_v60  ;;  %v750_v11 = vld [vmem:[#allocation2 + $0xe0] sm:$0xff]  ;;  %v737_v57 = vld [vmem:[#allocation2 + $0x78] sm:$0xff] }
 0x11b   : > { %1071 = vst.msk [vmem:[%s1586_s28 + $0x54] sm:$0xf] %vm1049_vm4, %v1292_v52  ;;  %v881_v63 = vsel %vm817_vm9, %v785_v36, %v849_v54  ;;  %v868_v0 = vsel %vm804_vm10, %v772_v42, %v836_v55  ;;  %v770_v1 = vadd.f32 %v1563_v49, %v731_v48  ;;  %v786_v3 = vadd.f32 %v1563_v49, %v747_v58  ;;  %v753_v16 = vld [vmem:[#allocation2 + $0xf8] sm:$0xff]  ;;  %v735_v37 = vld [vmem:[#allocation2 + $0x68] sm:$0xff] }
 0x11c   : > { %1060 = vst.msk [vmem:[%s1586_s28 + $0x28] sm:$0xf] %vm1049_vm4, %v1281_v53  ;;  %1076 = vst.msk [vmem:[%s1586_s28 + $0x68] sm:$0xf] %vm1049_vm4, %v1297_v59  ;;  %v913_v12 = vmul.f32 1.4142135, %v881_v63  ;;  %v884_v31 = vsel %vm820_vm11, %v788_v43, %v852_v61  ;;  %v1279_v6 = vpack.c.bf16 %v897_v62, %v897_v62  ;;  %v775_v39 = vadd.f32 %v1563_v49, %v736_v2 }
 0x11d   : > { %v900_v26 = vmul.f32 1.4142135, %v868_v0  ;;  %v916_v7 = vmul.f32 1.4142135, %v884_v31  ;;  %vm802_vm12 = vcmp.ge.f32.partialorder %v770_v1, 0.0  ;;  %vm818_vm13 = vcmp.ge.f32.partialorder %v786_v3, 0.0 }
 0x11e   : > { %v834_v10 = vmul.f32 0.2, %v770_v1  ;;  %v1295_v13 = vpack.c.bf16 %v913_v12, %v913_v12  ;;  %v850_v17 = vmul.f32 0.2, %v786_v3  ;;  %1058 = vst.msk [vmem:[%s1586_s28 + $0x20] sm:$0xf] %vm1049_vm4, %v1279_v6  ;;  %v791_v40 = vadd.f32 %v1563_v49, %v752_v4 }
 0x11f   : > { %v1282_v14 = vpack.c.bf16 %v900_v26, %v900_v26  ;;  %v1298_v18 = vpack.c.bf16 %v916_v7, %v916_v7  ;;  %v773_v19 = vadd.f32 %v1563_v49, %v734_v5  ;;  %v789_v20 = vadd.f32 %v1563_v49, %v750_v11  ;;  %v751_v38 = vld [vmem:[#allocation2 + $0xe8] sm:$0xff] }
 0x120   : > { %v866_v32 = vsel %vm802_vm12, %v770_v1, %v834_v10  ;;  %1074 = vst.msk [vmem:[%s1586_s28 + $0x60] sm:$0xf] %vm1049_vm4, %v1295_v13  ;;  %v882_v56 = vsel %vm818_vm13, %v786_v3, %v850_v17  ;;  %vm807_vm14 = vcmp.ge.f32.partialorder %v775_v39, 0.0  ;;  %v839_v23 = vmul.f32 0.2, %v775_v39 }
 0x121   : > { %1061 = vst.msk [vmem:[%s1586_s28 + $0x2c] sm:$0xf] %vm1049_vm4, %v1282_v14  ;;  %v898_v46 = vmul.f32 1.4142135, %v866_v32  ;;  %1077 = vst.msk [vmem:[%s1586_s28 + $0x6c] sm:$0xf] %vm1049_vm4, %v1298_v18  ;;  %v776_v30 = vadd.f32 %v1563_v49, %v737_v57  ;;  %v792_v36 = vadd.f32 %v1563_v49, %v753_v16  ;;  %v774_v51 = vadd.f32 %v1563_v49, %v735_v37 }
 0x122   : > { %v914_v8 = vmul.f32 1.4142135, %v882_v56  ;;  %vm823_vm15 = vcmp.ge.f32.partialorder %v791_v40, 0.0  ;;  %v855_v9 = vmul.f32 0.2, %v791_v40  ;;  %vm805_vm0 = vcmp.ge.f32.partialorder %v773_v19, 0.0 }
 0x123   : > { %v1280_v24 = vpack.c.bf16 %v898_v46, %v898_v46  ;;  %v837_v15 = vmul.f32 0.2, %v773_v19  ;;  %v871_v22 = vsel %vm807_vm14, %v775_v39, %v839_v23  ;;  %vm821_vm1 = vcmp.ge.f32.partialorder %v789_v20, 0.0 }
 0x124   : > { %v1296_v21 = vpack.c.bf16 %v914_v8, %v914_v8  ;;  %v853_v25 = vmul.f32 0.2, %v789_v20  ;;  %v903_v27 = vmul.f32 1.4142135, %v871_v22  ;;  %v887_v28 = vsel %vm823_vm15, %v791_v40, %v855_v9 }
 0x125   : > { %1059 = vst.msk [vmem:[%s1586_s28 + $0x24] sm:$0xf] %vm1049_vm4, %v1280_v24  ;;  %v869_v29 = vsel %vm805_vm0, %v773_v19, %v837_v15  ;;  %v919_v33 = vmul.f32 1.4142135, %v887_v28  ;;  %vm808_vm3 = vcmp.ge.f32.partialorder %v776_v30, 0.0  ;;  %vm824_vm5 = vcmp.ge.f32.partialorder %v792_v36, 0.0 }
 0x126   : > { %1075 = vst.msk [vmem:[%s1586_s28 + $0x64] sm:$0xf] %vm1049_vm4, %v1296_v21  ;;  %v901_v34 = vmul.f32 1.4142135, %v869_v29  ;;  %v885_v35 = vsel %vm821_vm1, %v789_v20, %v853_v25  ;;  %v1285_v41 = vpack.c.bf16 %v903_v27, %v903_v27  ;;  %v840_v43 = vmul.f32 0.2, %v776_v30 }
 0x127   : > { %v917_v42 = vmul.f32 1.4142135, %v885_v35  ;;  %v1301_v44 = vpack.c.bf16 %v919_v33, %v919_v33  ;;  %v856_v47 = vmul.f32 0.2, %v792_v36  ;;  %v790_v52 = vadd.f32 %v1563_v49, %v751_v38 }
 0x128   : > { %v1283_v45 = vpack.c.bf16 %v901_v34, %v901_v34  ;;  %1064 = vst.msk [vmem:[%s1586_s28 + $0x38] sm:$0xf] %vm1049_vm4, %v1285_v41  ;;  %v872_v50 = vsel %vm808_vm3, %v776_v30, %v840_v43  ;;  %vm806_vm6 = vcmp.ge.f32.partialorder %v774_v51, 0.0  ;;  %v838_v58 = vmul.f32 0.2, %v774_v51 }
 0x129   : > { %v1299_v48 = vpack.c.bf16 %v917_v42, %v917_v42  ;;  %1080 = vst.msk [vmem:[%s1586_s28 + $0x78] sm:$0xf] %vm1049_vm4, %v1301_v44  ;;  %v904_v53 = vmul.f32 1.4142135, %v872_v50  ;;  %v888_v54 = vsel %vm824_vm5, %v792_v36, %v856_v47  ;;  %vm822_vm7 = vcmp.ge.f32.partialorder %v790_v52, 0.0 }
 0x12a   : > { %1062 = vst.msk [vmem:[%s1586_s28 + $0x30] sm:$0xf] %vm1049_vm4, %v1283_v45  ;;  %v920_v55 = vmul.f32 1.4142135, %v888_v54  ;;  %v854_v60 = vmul.f32 0.2, %v790_v52  ;;  %v870_v62 = vsel %vm806_vm6, %v774_v51, %v838_v58 }
 0x12b   : > { %1078 = vst.msk [vmem:[%s1586_s28 + $0x70] sm:$0xf] %vm1049_vm4, %v1299_v48  ;;  %v1286_v59 = vpack.c.bf16 %v904_v53, %v904_v53  ;;  %v902_v49 = vmul.f32 1.4142135, %v870_v62 }
 0x12c   : > { %v1302_v61 = vpack.c.bf16 %v920_v55, %v920_v55  ;;  %v886_v63 = vsel %vm822_vm7, %v790_v52, %v854_v60 }
 0x12d   : > { %1065 = vst.msk [vmem:[%s1586_s28 + $0x3c] sm:$0xf] %vm1049_vm4, %v1286_v59  ;;  %v918_v0 = vmul.f32 1.4142135, %v886_v63  ;;  %v1284_v1 = vpack.c.bf16 %v902_v49, %v902_v49 }
 0x12e   : > { %1081 = vst.msk [vmem:[%s1586_s28 + $0x7c] sm:$0xf] %vm1049_vm4, %v1302_v61 }
 0x12f   : > { %v1300_v2 = vpack.c.bf16 %v918_v0, %v918_v0  ;;  %1063 = vst.msk [vmem:[%s1586_s28 + $0x34] sm:$0xf] %vm1049_vm4, %v1284_v1 }
 0x131   : > { %1079 = vst.msk [vmem:[%s1586_s28 + $0x74] sm:$0xf] %vm1049_vm4, %v1300_v2 }
 0x132 PF: > { %s13_s14 = sadd.s32 1, %s1420_s14   ;;  %s1762_s12 = smov %s1416_s13 }
 0x133   : > { %p10_p5 = scmp.ge.s32.totalorder %s13_s14, 4   ;;  %s1763_s13 = smov %s1765_s15 }
 0x135   :  { %12 = sbr.rel (!%p10_p5) target bundleno = 2 (0x2), region = 76 }

// kernel: discriminator_forward.12
= control target key start
LH: loop header
LB: loop body
LE: loop exit
PB: predicated region body
PF: predicated region fallthrough
CT: control target
= control target key end

     0   :  { %s5603_s12 = smov 0   ;;  %s5605_s13 = smov 0   ;;  %s6651_s0 = inlined_call_operand.vmem [shape: bf16[2,1,328,32], index: 0, kind: input, shape index: {}]   ;;  %s6652_s1 = inlined_call_operand.vmem [shape: bf16[9,32,32], index: 1, kind: input, shape index: {}]   ;;  %s6653_s2 = inlined_call_operand.vmem [shape: f32[1,32], index: 2, kind: input, shape index: {}]   ;;  %s6654_s3 = inlined_call_operand.vmem [shape: bf16[2,288,32], index: 3, kind: output, shape index: {}]  }
   0x1   :  { %s5607_s14 = smov 0  }
   0x2 LB: > { %s25_s15 = sadd.s32 1, %s5577_s13  ;;  %p4257_p0 = scmp.ge.s32.totalorder %s5581_s14, 1  ;;  %s5581_s14 = sphi %s5607_s14, %s13_s14   ;;  %s5577_s13 = sphi %s5605_s13, %s6656_s13   ;;  %s5573_s12 = sphi %s5603_s12, %s6655_s12  }
   0x3   : > { %p27_p1 = scmp.ge.s32.totalorder %s25_s15, 2  ;;  %p168_p2 = scmp.lt.s32.totalorder %s5581_s14, 3 }
   0x5   : > { %s6658_s15 = smov (%p27_p1, %s25_s15), 0  ;;  %p169_p3 = pnand %p4257_p0, %p168_p2 }
   0x6   : > { %v5467_v0 = vld [vmem:[%s6652_s1 + $0x40] sm:$0xff] (!%p169_p3)   ;;  %p202_p4 = scmp.lt.s32.totalorder (!%p169_p3), %s5573_s12, 1  ;;  %v5468_v1 = vld [vmem:[%s6652_s1 + $0x10] sm:$0xff] (!%p169_p3)   ;;  %v5469_v2 = vld [vmem:[%s6652_s1 + $0x48] sm:$0xff] (!%p169_p3)   ;;  %vm362_vm0 = vsmask.f32 (!%p169_p3), 7424 }
   0x7   : > { %172 = sbr.rel (%p169_p3) target bundleno = 580 (0x244), region = 32  ;;  %4949 = vmatprep.subr.bf16.mxu0 (!%p169_p3), %v5467_v0  ;;  %4789 = vmatprep.subr.bf16.mxu1 (!%p169_p3), %v5468_v1  ;;  %v5470_v3 = vld [vmem:[%s6652_s1 + $0x18] sm:$0xff] (!%p169_p3)   ;;  %v5639_v4 = vld [vmem:[%s6652_s1 + $0x50] sm:$0xff] (!%p169_p3)   ;;  %v5479_v5 = vld [vmem:[%s6652_s1] sm:$0xff] (!%p169_p3)   ;;  %vm523_vm1 = vcmask (!%p169_p3), 261120   ;;  %vm2225_vm3 = vcmask (!%p169_p3), 1045504  }
   0x8   : > { %4950 = vmatpush3.bf16.msra.mxu0 (!%p169_p3), %v5467_v0  ;;  %4790 = vmatpush3.bf16.msra.mxu1 (!%p169_p3), %v5468_v1  ;;  %vm1766_vm2 = vsmask.f32 (!%p169_p3), 6400  ;;  %vm989_vm4 = vcmask (!%p169_p3), 1046528   ;;  %vm3002_vm5 = vsmask.f32 (!%p169_p3), 5376  ;;  %vm3461_vm6 = vcmask (!%p169_p3), 1044480  }
   0x9   : > { %4951 = vmatprep.subr.bf16.mxu0 (!%p169_p3), %v5469_v2  ;;  %4791 = vmatprep.subr.bf16.mxu1 (!%p169_p3), %v5470_v3  ;;  %vm4109_vm11 = vcmask (!%p169_p3), 257024  }
   0xc   : > { %4952 = vmatpush3.bf16.msra.mxu0 (!%p169_p3), %v5469_v2  ;;  %4792 = vmatpush3.bf16.msra.mxu1 (!%p169_p3), %v5470_v3 }
   0xd   : > { %4989 = vmatprep.subr.bf16.mxu0 (!%p169_p3), %v5639_v4  ;;  %4829 = vmatprep.subr.bf16.mxu1 (!%p169_p3), %v5479_v5 }
   0xe   : > { %s6660_s12 = smov (!%p202_p4, %s5573_s12), 1 }
   0xf   : > { %s5441_s24 = smul.u32 164, %s6660_s12 }
  0x10   : > { %s5442_s16 = smul.u32 144, %s6660_s12 }
  0x11   : > { %s5644_s29 = scalar_lea.vmem %s6651_s0, %s5441_s24 }
  0x12   : > { %v223_v6 = vld [vmem:[%s5644_s29] sm:$0xf]  ;;  %v5651_v7 = vld [vmem:[%s5644_s29 + $0x4] sm:$0xf]  ;;  %v5657_v9 = vld [vmem:[%s5644_s29 + $0x8] sm:$0xff]   ;;  %s6476_s12 = scalar_lea.vmem %s6654_s3, %s5442_s16 }
  0x13   : > { %v5654_v8 = vcombine.low %v223_v6, %v5651_v7  ;;  %v1306_v10 = vld [vmem:[%s5644_s29 + $0x8] sm:$0xe]  ;;  %v5662_v11 = vld [vmem:[%s5644_s29 + $0xc] sm:$0xf]  ;;  %v371_v14 = vshll.u32 %v5657_v9, 16  ;;  %v375_v15 = vshrl.u32 %v5657_v9, 16 }
  0x14   : > { %v5669_v16 = vld [vmem:[%s5644_s29 + $0x10] sm:$0xff]   ;;  %v5675_v18 = vcombine.low %v1306_v10, %v5662_v11  ;;  %v5683_v26 = vld [vmem:[%s5644_s29 + $0x18] sm:$0xff]   ;;  %v5689_v32 = vld [vmem:[%s5644_s29 + $0x20] sm:$0xff]  }
  0x15   : > { %v364_v12 = vshrl.u32 %v5654_v8, 16  ;;  %v366_v13 = vshll.u32 %v5654_v8, 16  ;;  %v5672_v17 = vld [vmem:[%s5644_s29 + $0x10] sm:$0xff]   ;;  %v373_v20 = vrot.slane %v371_v14, 1  ;;  %v1776_v21 = vshrl.u32 %v5669_v16, 16  ;;  %v5686_v31 = vld [vmem:[%s5644_s29 + $0x18] sm:$0xff]  }
  0x16   : > { %v1779_v22 = vshll.u32 %v5669_v16, 16  ;;  %v1768_v23 = vshrl.u32 %v5675_v18, 16  ;;  %v1771_v24 = vshll.u32 %v5675_v18, 16  ;;  %v379_v25 = vshll.u32 %v5672_v17, 16  ;;  %v5699_v45 = vld [vmem:[%s5644_s29 + $0x20] sm:$0xff]   ;;  %v5702_v46 = vld [vmem:[%s5644_s29 + $0x28] sm:$0xff]  }
  0x17   : > { %v368_v19 = vrot.slane %v366_v13, 1  ;;  %v377_v28 = vor.u32 %v375_v15, %v373_v20  ;;  %v1778_v29 = vrot.slane %v1776_v21, 1  ;;  %v1785_v36 = vshrl.u32 %v5683_v26, 16  ;;  %v5708_v51 = vld [vmem:[%s5644_s29 + $0x28] sm:$0xff]   ;;  %v5714_v56 = vld [vmem:[%s5644_s29 + $0x30] sm:$0xff]   ;;  %v5731_v15 = vld [vmem:[%s5644_s29 + $0x38] sm:$0xff]  }
  0x18   : > { %v1781_v30 = vrot.slane %v1779_v22, 2  ;;  %v1770_v33 = vrot.slane %v1768_v23, 1  ;;  %v1773_v34 = vrot.slane %v1771_v24, 2  ;;  %v381_v35 = vrot.slane %v379_v25, 1  ;;  %v5719_v61 = vld [vmem:[%s5644_s29 + $0x30] sm:$0xff]  }
  0x19   : > { %v369_v27 = vor.u32 %v368_v19, %v364_v12  ;;  %v1788_v39 = vshll.u32 %v5683_v26, 16  ;;  %v383_v40 = vshrl.u32 %v5672_v17, 16  ;;  %v1787_v43 = vrot.slane %v1785_v36, 1 }
  0x1a   : > { %v1782_v38 = vor.u32 %v1781_v30, %v1778_v29  ;;  %v1774_v41 = vor.u32 %v1773_v34, %v1770_v33  ;;  %v382_v42 = vsel %vm362_vm0, %v377_v28, %v381_v35  ;;  %v387_v44 = vshll.u32 %v5686_v31, 16  ;;  %v5487_v28 = vld [vmem:[%s6652_s1 + $0x58] sm:$0xff]  }
  0x1b   : > { %v374_v37 = vsel %vm362_vm0, %v369_v27, %v373_v20  ;;  %v1790_v47 = vrot.slane %v1788_v39, 2  ;;  %v385_v48 = vor.u32 %v383_v40, %v381_v35  ;;  %v1794_v49 = vshrl.u32 %v5689_v32, 16  ;;  %v5746_v33 = vld [vmem:[%s5644_s29 + $0x38] sm:$0xff]  }
  0x1c   : > { %4793 = vmatprep.mubr.msk.bf16.mxu1 %vm523_vm1, %v374_v37  ;;  %v1797_v50 = vshll.u32 %v5689_v32, 16  ;;  %v1783_v52 = vsel %vm1766_vm2, %v1774_v41, %v1782_v38  ;;  %v389_v53 = vrot.slane %v387_v44, 1  ;;  %v391_v54 = vshrl.u32 %v5686_v31, 16 }
  0x1d   : > { %4794 = vmatmul.mubr.msk.bf16.vlgmr.msra.gmra.mrb[0].mxu1 %vm523_vm1, %v382_v42  ;;  %v395_v55 = vshll.u32 %v5699_v45, 16  ;;  %4953 = vmatprep.mubr.msk.bf16.mxu0 %vm523_vm1, %v1783_v52  ;;  %v1791_v57 = vor.u32 %v1790_v47, %v1787_v43  ;;  %v1796_v58 = vrot.slane %v1794_v49, 1  ;;  %v1803_v60 = vshrl.u32 %v5702_v46, 16  ;;  %v5756_v43 = vld [vmem:[%s5644_s29 + $0x40] sm:$0xff]   ;;  %v5762_v49 = vld [vmem:[%s5644_s29 + $0x48] sm:$0xff]  }
  0x1e   : > { %4830 = vmatpush3.bf16.msra.mxu1 %v5479_v5  ;;  %v1799_v59 = vrot.slane %v1797_v50, 2  ;;  %v390_v62 = vsel %vm362_vm0, %v385_v48, %v389_v53  ;;  %v393_v63 = vor.u32 %v391_v54, %v389_v53  ;;  %v1806_v1 = vshll.u32 %v5702_v46, 16 }
  0x1f   : > { %v397_v0 = vrot.slane %v395_v55, 1  ;;  %v1792_v2 = vsel %vm1766_vm2, %v1782_v38, %v1791_v57  ;;  %4797 = vmatprep.mubr.msk.bf16.mxu1 %vm523_vm1, %v390_v62  ;;  %v1805_v5 = vrot.slane %v1803_v60, 1  ;;  %v399_v6 = vshrl.u32 %v5699_v45, 16  ;;  %v5751_v38 = vld [vmem:[%s5644_s29 + $0x40] sm:$0xff]   ;;  %v5768_v55 = vld [vmem:[%s5644_s29 + $0x48] sm:$0xff]  }
  0x20   : > { %v1800_v3 = vor.u32 %v1799_v59, %v1796_v58  ;;  %4954 = vmatmul.mubr.msk.bf16.vlgmr.msra.gmra.mrb[0].mxu0 %vm523_vm1, %v1792_v2  ;;  %v1808_v12 = vrot.slane %v1806_v1, 2  ;;  %v403_v13 = vshll.u32 %v5708_v51, 16  ;;  %v1812_v14 = vshrl.u32 %v5714_v56, 16 }
  0x21   : > { %v398_v10 = vsel %vm362_vm0, %v393_v63, %v397_v0  ;;  %4990 = vmatpush3.bf16.msra.mxu0 %v5639_v4  ;;  %v401_v20 = vor.u32 %v399_v6, %v397_v0  ;;  %v1815_v21 = vshll.u32 %v5714_v56, 16  ;;  %v407_v22 = vshrl.u32 %v5708_v51, 16 }
  0x22   : > { %v1801_v19 = vsel %vm1766_vm2, %v1791_v57, %v1800_v3  ;;  %v1809_v23 = vor.u32 %v1808_v12, %v1805_v5  ;;  %v405_v24 = vrot.slane %v403_v13, 1  ;;  %v1814_v25 = vrot.slane %v1812_v14, 1  ;;  %4991 = vmatprep.subr.bf16.mxu0 %v5487_v28 }
  0x23   : > { %4957 = vmatprep.mubr.msk.bf16.mxu0 %vm523_vm1, %v1801_v19  ;;  %v411_v27 = vshll.u32 %v5719_v61, 16  ;;  %v1817_v4 = vrot.slane %v1815_v21, 2  ;;  %v1821_v29 = vshrl.u32 %v5731_v15, 16  ;;  %v1824_v30 = vshll.u32 %v5731_v15, 16  ;;  %v5789_v21 = vld [vmem:[%s5644_s29 + $0x58] sm:$0xff]  }
  0x24   : > { %v1810_v34 = vsel %vm1766_vm2, %v1800_v3, %v1809_v23  ;;  %v406_v35 = vsel %vm362_vm0, %v401_v20, %v405_v24  ;;  %v409_v36 = vor.u32 %v407_v22, %v405_v24  ;;  %v415_v42 = vshrl.u32 %v5719_v61, 16  ;;  %v5777_v3 = vld [vmem:[%s5644_s29 + $0x50] sm:$0xff]  }
  0x25   : > { %4798 = vmatmul.mubr.msk.bf16.gmra.mrb[4].mxu1 %vm523_vm1, %v398_v10  ;;  %v413_v37 = vrot.slane %v411_v27, 1  ;;  %v1818_v39 = vor.u32 %v1817_v4, %v1814_v25  ;;  %v1823_v40 = vrot.slane %v1821_v29, 1  ;;  %v1826_v41 = vrot.slane %v1824_v30, 2  ;;  %4992 = vmatpush3.bf16.msra.mxu0 %v5487_v28  ;;  %v5786_v20 = vld [vmem:[%s5644_s29 + $0x50] sm:$0xff]  }
  0x26   : > { %4801 = vmatprep.mubr.msk.bf16.mxu1 %vm523_vm1, %v406_v35  ;;  %v419_v44 = vshll.u32 %v5746_v33, 16  ;;  %v1830_v47 = vshrl.u32 %v5751_v38, 16  ;;  %v1833_v48 = vshll.u32 %v5751_v38, 16  ;;  %v423_v54 = vshrl.u32 %v5746_v33, 16  ;;  %v5797_v35 = vld [vmem:[%s5644_s29 + $0x58] sm:$0xff]  }
  0x27   : > { %v1819_v50 = vsel %vm1766_vm2, %v1809_v23, %v1818_v39  ;;  %v414_v52 = vsel %vm362_vm0, %v409_v36, %v413_v37  ;;  %v417_v53 = vor.u32 %v415_v42, %v413_v37  ;;  %v427_v60 = vshll.u32 %v5756_v43, 16 }
  0x28   : > { %4958 = vmatmul.mubr.msk.bf16.gmra.mrb[4].mxu0 %vm523_vm1, %v1810_v34  ;;  %v421_v57 = vrot.slane %v419_v44, 1  ;;  %v1832_v58 = vrot.slane %v1830_v47, 1  ;;  %v1835_v59 = vrot.slane %v1833_v48, 2  ;;  %v1827_v62 = vor.u32 %v1826_v41, %v1823_v40  ;;  %v2216_v47 = vld [vmem:[%s5644_s29 + $0x8] sm:$0xc] }
  0x29   : > { %4961 = vmatprep.mubr.msk.bf16.mxu0 %vm523_vm1, %v1819_v50  ;;  %v1839_v63 = vshrl.u32 %v5762_v49, 16  ;;  %v1842_v0 = vshll.u32 %v5762_v49, 16  ;;  %v429_v5 = vrot.slane %v427_v60, 1  ;;  %v431_v10 = vshrl.u32 %v5756_v43, 16  ;;  %v5500_v50 = vld [vmem:[%s6652_s1 + $0x8] sm:$0xff]  }
  0x2a   : > { %v422_v1 = vsel %vm362_vm0, %v417_v53, %v421_v57  ;;  %v1836_v2 = vor.u32 %v1835_v59, %v1832_v58  ;;  %v435_v12 = vshll.u32 %v5768_v55, 16  ;;  %v425_v13 = vor.u32 %v423_v54, %v421_v57  ;;  %v5818_v57 = vld [vmem:[%s5644_s29 + $0x60] sm:$0xff]   ;;  %4831 = vmatprep.subr.bf16.mxu1 %v5500_v50  ;;  %v5822_v60 = vld [vmem:[%s5644_s29 + $0x68] sm:$0xff]  }
  0x2b   : > { %v1841_v6 = vrot.slane %v1839_v63, 1  ;;  %v1848_v14 = vshrl.u32 %v5777_v3, 16  ;;  %v1851_v19 = vshll.u32 %v5777_v3, 16  ;;  %v1828_v22 = vsel %vm1766_vm2, %v1818_v39, %v1827_v62  ;;  %v5805_v39 = vld [vmem:[%s6652_s1 + $0x60] sm:$0xff]   ;;  %4832 = vmatpush3.bf16.msra.mxu1 %v5500_v50 }
  0x2c   : > { %v1844_v23 = vrot.slane %v1842_v0, 2  ;;  %v433_v24 = vor.u32 %v431_v10, %v429_v5  ;;  %v437_v25 = vrot.slane %v435_v12, 1  ;;  %v1837_v27 = vsel %vm1766_vm2, %v1827_v62, %v1836_v2  ;;  %5029 = vmatprep.subr.bf16.mxu0 %v5805_v39 }
  0x2d   : > { %4802 = vmatmul.mubr.msk.bf16.gmra.mrb[8].mxu1 %vm523_vm1, %v414_v52  ;;  %v1850_v28 = vrot.slane %v1848_v14, 1  ;;  %v1853_v4 = vrot.slane %v1851_v19, 2  ;;  %v443_v29 = vshll.u32 %v5786_v20, 16  ;;  %v1857_v30 = vshrl.u32 %v5789_v21, 16 }
  0x2e   : > { %4805 = vmatprep.mubr.msk.bf16.mxu1 %vm523_vm1, %v422_v1  ;;  %v1860_v34 = vshll.u32 %v5789_v21, 16  ;;  %v430_v36 = vsel %vm362_vm0, %v425_v13, %v429_v5  ;;  %v439_v37 = vshrl.u32 %v5768_v55, 16  ;;  %v1845_v40 = vor.u32 %v1844_v23, %v1841_v6  ;;  %v5840_v23 = vld [vmem:[%s5644_s29 + $0x70] sm:$0xff]  }
  0x2f   : > { %v438_v41 = vsel %vm362_vm0, %v433_v24, %v437_v25  ;;  %v447_v42 = vshrl.u32 %v5786_v20, 16  ;;  %v451_v44 = vshll.u32 %v5797_v35, 16  ;;  %v1854_v48 = vor.u32 %v1853_v4, %v1850_v28 }
  0x30   : > { %4962 = vmatmul.mubr.msk.bf16.gmra.mrb[8].mxu0 %vm523_vm1, %v1828_v22  ;;  %v445_v52 = vrot.slane %v443_v29, 1  ;;  %v1859_v53 = vrot.slane %v1857_v30, 1  ;;  %v1862_v54 = vrot.slane %v1860_v34, 2  ;;  %v441_v58 = vor.u32 %v439_v37, %v437_v25  ;;  %v5844_v25 = vld [vmem:[%s5644_s29 + $0x78] sm:$0xff]  }
  0x31   : > { %4965 = vmatprep.mubr.msk.bf16.mxu0 %vm523_vm1, %v1837_v27  ;;  %v453_v59 = vrot.slane %v451_v44, 1  ;;  %v1846_v62 = vsel %vm1766_vm2, %v1836_v2, %v1845_v40  ;;  %v1855_v0 = vsel %vm1766_vm2, %v1845_v40, %v1854_v48  ;;  %v4420_v1 = vcombine.low %v2216_v47, %v5662_v11 }
  0x32   : > { %v449_v63 = vor.u32 %v447_v42, %v445_v52  ;;  %v459_v5 = vshll.u32 %v5818_v57, 16  ;;  %v446_v6 = vsel %vm362_vm0, %v441_v58, %v445_v52  ;;  %v455_v10 = vshrl.u32 %v5797_v35, 16 }
  0x33   : > { %v5832_v12 = vor.u32 %v1862_v54, %v1859_v53  ;;  %v463_v13 = vshrl.u32 %v5818_v57, 16  ;;  %v467_v14 = vshll.u32 %v5822_v60, 16  ;;  %v2226_v11 = vrot.slane %v4420_v1, 2  ;;  %v5872_v54 = vld [vmem:[%s5644_s29 + $0x88] sm:$0xff]  }
  0x34   : > { %v454_v2 = vsel %vm362_vm0, %v449_v63, %v453_v59  ;;  %v2227_v19 = vrot.slane %v5669_v16, 2  ;;  %v461_v22 = vrot.slane %v459_v5, 1  ;;  %v457_v24 = vor.u32 %v455_v10, %v453_v59  ;;  %v5851_v16 = vld [vmem:[%s6652_s1 + $0x20] sm:$0xff]  }
  0x35   : > { %4806 = vmatmul.mubr.msk.bf16.gmra.mrb[12].mxu1 %vm523_vm1, %v430_v36  ;;  %v1864_v27 = vsel %vm1766_vm2, %v1854_v48, %v5832_v12  ;;  %v469_v4 = vrot.slane %v467_v14, 1  ;;  %v475_v30 = vshll.u32 %v5840_v23, 16  ;;  %4869 = vmatprep.subr.bf16.mxu1 %v5851_v16  ;;  %v2229_v36 = vrot.slane %v5683_v26, 2  ;;  %v5867_v48 = vld [vmem:[%s5644_s29 + $0x80] sm:$0xff]  }
  0x36   : > { %4809 = vmatprep.mubr.msk.bf16.mxu1 %vm523_vm1, %v438_v41  ;;  %v465_v28 = vor.u32 %v463_v13, %v461_v22  ;;  %v2228_v29 = vsel %vm2225_vm3, %v2226_v11, %v2227_v19  ;;  %v462_v34 = vsel %vm362_vm0, %v457_v24, %v461_v22  ;;  %v471_v37 = vshrl.u32 %v5822_v60, 16 }
  0x37   : > { %v479_v41 = vshrl.u32 %v5840_v23, 16  ;;  %v483_v42 = vshll.u32 %v5844_v25, 16  ;;  %v2231_v44 = vrot.slane %v5689_v32, 2  ;;  %v477_v47 = vrot.slane %v475_v30, 1  ;;  %v5507_v32 = vld [vmem:[%s6652_s1 + $0x68] sm:$0xff]  }
  0x38   : > { %4966 = vmatmul.mubr.msk.bf16.gmra.mrb[12].mxu0 %vm523_vm1, %v1846_v62  ;;  %v470_v40 = vsel %vm362_vm0, %v465_v28, %v469_v4  ;;  %v473_v26 = vor.u32 %v471_v37, %v469_v4  ;;  %v2230_v50 = vsel %vm2225_vm3, %v2227_v19, %v2229_v36  ;;  %v491_v59 = vshll.u32 %v5867_v48, 16 }
  0x39   : > { %4969 = vmatprep.mubr.msk.bf16.mxu0 %vm523_vm1, %v1855_v0  ;;  %v481_v52 = vor.u32 %v479_v41, %v477_v47  ;;  %v485_v53 = vrot.slane %v483_v42, 1  ;;  %v2232_v58 = vsel %vm2225_vm3, %v2229_v36, %v2231_v44  ;;  %v2233_v63 = vrot.slane %v5702_v46, 2  ;;  %v5895_v46 = vld [vmem:[%s6652_s1 + $0x70] sm:$0xff]  }
  0x3a   : > { %v478_v62 = vsel %vm362_vm0, %v473_v26, %v477_v47  ;;  %v487_v0 = vshrl.u32 %v5844_v25, 16  ;;  %v495_v5 = vshrl.u32 %v5867_v48, 16  ;;  %v2235_v10 = vrot.slane %v5714_v56, 2  ;;  %v5941_v26 = vld [vmem:[%s5644_s29 + $0x68] sm:$0xff]  }
  0x3b   : > { %v486_v1 = vsel %vm362_vm0, %v481_v52, %v485_v53  ;;  %v2234_v14 = vsel %vm2225_vm3, %v2231_v44, %v2233_v63  ;;  %v503_v24 = vshrl.u32 %v5872_v54, 16  ;;  %v2237_v28 = vrot.slane %v5731_v15, 2  ;;  %v5925_v44 = vld [vmem:[%s5644_s29 + $0x60] sm:$0xff]   ;;  %v5950_v52 = vld [vmem:[%s5644_s29 + $0x70] sm:$0xff]  }
  0x3c   : > { %v489_v13 = vor.u32 %v487_v0, %v485_v53  ;;  %v2236_v56 = vsel %vm2225_vm3, %v2233_v63, %v2235_v10  ;;  %v2241_v15 = vrot.slane %v5762_v49, 2  ;;  %v2245_v49 = vrot.slane %v5789_v21, 2  ;;  %v5946_v21 = vld [vmem:[%s6652_s1 + $0x30] sm:$0xff]  }
  0x3d   : > { %4810 = vmatmul.mubr.msk.bf16.gmra.mrb[16].mxu1 %vm523_vm1, %v446_v6  ;;  %v499_v6 = vshll.u32 %v5872_v54, 16  ;;  %v2238_v36 = vsel %vm2225_vm3, %v2235_v10, %v2237_v28  ;;  %v2247_v47 = vrot.slane %v5925_v44, 2  ;;  %v2251_v53 = vrot.slane %v5950_v52, 2  ;;  %v5983_v10 = vld [vmem:[%s5644_s29 + $0x90] sm:$0xff]  }
  0x3e   : > { %4813 = vmatprep.mubr.msk.bf16.mxu1 %vm523_vm1, %v454_v2  ;;  %v5890_v2 = vld [vmem:[%s5644_s29 + $0x90] ss:$0 sps:$4 sm:$0x11]  }
  0x3f   : > { %v501_v19 = vrot.slane %v499_v6, 1 }
  0x40   : > { %4970 = vmatmul.mubr.msk.bf16.gmra.mrb[16].mxu0 %vm523_vm1, %v1864_v27  ;;  %v507_v27 = vshll.u32 %v5890_v2, 16 }
  0x41   : > { %4993 = vmatprep.mubr.msk.bf16.mxu0 %vm523_vm1, %v2228_v29  ;;  %v2239_v29 = vrot.slane %v5751_v38, 2  ;;  %v505_v30 = vor.u32 %v503_v24, %v501_v19  ;;  %v2243_v38 = vrot.slane %v5777_v3, 2  ;;  %v5521_v3 = vld [vmem:[%s6652_s1 + $0x28] sm:$0xff]  }
  0x43   : > { %v2240_v37 = vsel %vm2225_vm3, %v2237_v28, %v2239_v29  ;;  %v2242_v41 = vsel %vm2225_vm3, %v2239_v29, %v2241_v15  ;;  %v2244_v42 = vsel %vm2225_vm3, %v2241_v15, %v2243_v38 }
  0x45   : > { %4814 = vmatmul.mubr.msk.bf16.gmra.mrb[20].mxu1 %vm523_vm1, %v462_v34  ;;  %v509_v34 = vrot.slane %v507_v27, 1  ;;  %v6006_v27 = vld [vmem:[%s5644_s29 + $0x18] sm:$0xff]  }
  0x46   : > { %4817 = vmatprep.mubr.msk.bf16.mxu1 %vm523_vm1, %v470_v40  ;;  %v2678_v29 = vrot.slane %v6006_v27, 2 }
  0x47   : > { %v510_v40 = vsel %vm362_vm0, %v505_v30, %v509_v34  ;;  %v6019_v34 = vld [vmem:[%s5644_s29 + $0x20] sm:$0xff]  }
  0x48   : > { %4994 = vmatmul.mubr.msk.bf16.vlgmr.msra.gmra.mrb[0].mxu0 %vm523_vm1, %v2230_v50  ;;  %v2248_v50 = vsel %vm2225_vm3, %v2245_v49, %v2247_v47 }
  0x49   : > { %5030 = vmatpush3.bf16.msra.mxu0 %v5805_v39  ;;  %4997 = vmatprep.mubr.msk.bf16.mxu0 %vm523_vm1, %v2232_v58  ;;  %v493_v39 = vrot.slane %v491_v59, 1 }
  0x4a   : > { %5031 = vmatprep.subr.bf16.mxu0 %v5507_v32 }
  0x4b   : > { %v497_v11 = vor.u32 %v495_v5, %v493_v39  ;;  %v494_v22 = vsel %vm362_vm0, %v489_v13, %v493_v39  ;;  %v5979_v5 = vld [vmem:[%s5644_s29 + $0x88] sm:$0xff]   ;;  %v2259_v13 = vrot.slane %v5983_v10, 2 }
  0x4c   : > { %v2257_v39 = vrot.slane %v5979_v5, 2 }
  0x4d   : > { %4818 = vmatmul.mubr.msk.bf16.gmra.mrb[24].mxu1 %vm523_vm1, %v478_v62  ;;  %5032 = vmatpush3.bf16.msra.mxu0 %v5507_v32  ;;  %v502_v4 = vsel %vm362_vm0, %v497_v11, %v501_v19  ;;  %v5963_v32 = vld [vmem:[%s5644_s29 + $0x78] sm:$0xff]   ;;  %v5967_v62 = vld [vmem:[%s5644_s29 + $0x80] sm:$0xff]   ;;  %v5993_v11 = vld [vmem:[%s5644_s29 + $0x14] sm:$0xf] }
  0x4e   : > { %4821 = vmatprep.mubr.msk.bf16.mxu1 %vm523_vm1, %v486_v1  ;;  %5069 = vmatprep.subr.bf16.mxu0 %v5895_v46  ;;  %v2253_v63 = vrot.slane %v5963_v32, 2  ;;  %v2255_v0 = vrot.slane %v5967_v62, 2 }
  0x50   : > { %4998 = vmatmul.mubr.msk.bf16.gmra.mrb[4].mxu0 %vm523_vm1, %v2234_v14  ;;  %v2254_v1 = vsel %vm2225_vm3, %v2251_v53, %v2253_v63  ;;  %v2256_v6 = vsel %vm2225_vm3, %v2253_v63, %v2255_v0  ;;  %v2542_v14 = vld [vmem:[%s5644_s29 + $0x10] sm:$0xc]  ;;  %v2258_v19 = vsel %vm2225_vm3, %v2255_v0, %v2257_v39 }
  0x51   : > { %5001 = vmatprep.mubr.msk.bf16.mxu0 %vm523_vm1, %v2236_v56  ;;  %v5999_v56 = vld [vmem:[%s5644_s29 + $0x98] ss:$0 sps:$4 sm:$0x33]   ;;  %v6003_v24 = vcombine.low %v2542_v14, %v5993_v11  ;;  %v991_v14 = vrot.slane %v5657_v9, 1 }
  0x52   : > { %v2261_v28 = vrot.slane %v5999_v56, 2 }
  0x54   : > { %v2262_v30 = vsel %vm2225_vm3, %v2259_v13, %v2261_v28 }
  0x55   : > { %4822 = vmatmul.mubr.msk.bf16.gmra.mrb[28].mxu1 %vm523_vm1, %v494_v22  ;;  %v2260_v22 = vsel %vm2225_vm3, %v2257_v39, %v2259_v13  ;;  %v6079_v39 = vld [vmem:[%s5644_s29 + $0x50] sm:$0xff]  }
  0x56   : > { %4825 = vmatprep.mubr.msk.bf16.mxu1 %vm523_vm1, %v502_v4  ;;  %v2677_v4 = vrot.slane %v6003_v24, 2 }
  0x58   : > { %5002 = vmatmul.mubr.msk.bf16.gmra.mrb[8].mxu0 %vm523_vm1, %v2238_v36  ;;  %v2679_v36 = vsel %vm2225_vm3, %v2677_v4, %v2678_v29 }
  0x59   : > { %5005 = vmatprep.mubr.msk.bf16.mxu0 %vm523_vm1, %v2240_v37  ;;  %v6023_v37 = vld [vmem:[%s5644_s29 + $0x28] sm:$0xff]  }
  0x5a   : > { %v2682_v15 = vrot.slane %v6023_v37, 2 }
  0x5d   : > { %4826 = vmatmul.mubr.msk.bf16.gmra.mrb[32].mxu1 %vm523_vm1, %v510_v40  ;;  %v2680_v40 = vrot.slane %v6019_v34, 2 }
  0x5e   : > { %4833 = vmatprep.mubr.msk.bf16.mxu1 %vm523_vm1, %v5654_v8  ;;  %v2246_v8 = vsel %vm2225_vm3, %v2243_v38, %v2245_v49  ;;  %v6039_v49 = vld [vmem:[%s5644_s29 + $0x38] sm:$0xff]  }
  0x5f   : > { %v2681_v38 = vsel %vm2225_vm3, %v2678_v29, %v2680_v40 }
  0x60   : > { %5006 = vmatmul.mubr.msk.bf16.gmra.mrb[12].mxu0 %vm523_vm1, %v2242_v41  ;;  %v6035_v41 = vld [vmem:[%s5644_s29 + $0x30] sm:$0xff]  }
  0x61   : > { %5009 = vmatprep.mubr.msk.bf16.mxu0 %vm523_vm1, %v2244_v42  ;;  %v2683_v42 = vsel %vm2225_vm3, %v2680_v40, %v2682_v15 }
  0x65   : > { %4834 = vmatmul.mubr.msk.bf16.vlgmr.msra.gmra.mrb[0].mxu1 %vm523_vm1, %v5657_v9  ;;  %v993_v9 = vrot.slane %v5672_v17, 1 }
  0x66   : > { %4837 = vmatprep.mubr.msk.bf16.mxu1 %vm523_vm1, %v5672_v17  ;;  %4870 = vmatpush3.bf16.msra.mxu1 %v5851_v16  ;;  %v2249_v16 = vrot.slane %v5941_v26, 2 }
  0x67   : > { %4871 = vmatprep.subr.bf16.mxu1 %v5521_v3 }
  0x68   : > { %5010 = vmatmul.mubr.msk.bf16.gmra.mrb[16].mxu0 %vm523_vm1, %v2246_v8  ;;  %v2250_v58 = vsel %vm2225_vm3, %v2247_v47, %v2249_v16  ;;  %v2252_v59 = vsel %vm2225_vm3, %v2249_v16, %v2251_v53  ;;  %v2684_v47 = vrot.slane %v6035_v41, 2  ;;  %v2686_v8 = vrot.slane %v6039_v49, 2  ;;  %v6060_v16 = vld [vmem:[%s5644_s29 + $0x40] sm:$0xff]  }
  0x69   : > { %5013 = vmatprep.mubr.msk.bf16.mxu0 %vm523_vm1, %v2248_v50  ;;  %v6052_v50 = vld [vmem:[%s6652_s1 + $0x80] sm:$0xff]   ;;  %v2688_v63 = vrot.slane %v6060_v16, 2 }
  0x6a   : > { %4872 = vmatpush3.bf16.msra.mxu1 %v5521_v3  ;;  %v5531_v3 = vld [vmem:[%s6652_s1 + $0x78] sm:$0xff]   ;;  %v2687_v53 = vsel %vm2225_vm3, %v2684_v47, %v2686_v8 }
  0x6b   : > { %4909 = vmatprep.subr.bf16.mxu1 %v5946_v21 }
  0x6d   : > { %4838 = vmatmul.mubr.msk.bf16.gmra.mrb[4].mxu1 %vm523_vm1, %v5686_v31 }
  0x6e   : > { %4841 = vmatprep.mubr.msk.bf16.mxu1 %vm523_vm1, %v5699_v45 }
  0x70   : > { %5014 = vmatmul.mubr.msk.bf16.gmra.mrb[20].mxu0 %vm523_vm1, %v2250_v58  ;;  %v6064_v58 = vld [vmem:[%s5644_s29 + $0x48] sm:$0xff]  }
  0x71   : > { %5017 = vmatprep.mubr.msk.bf16.mxu0 %vm523_vm1, %v2252_v59  ;;  %v980_v59 = vld [vmem:[%s5644_s29] sm:$0xe] }
  0x72   : > { %v4327_v0 = vcombine.low %v980_v59, %v5651_v7  ;;  %v6084_v7 = vld [vmem:[%s5644_s29 + $0x58] sm:$0xff]  }
  0x73   : > { %v2694_v4 = vrot.slane %v6084_v7, 2 }
  0x74   : > { %v990_v13 = vrot.slane %v4327_v0, 1 }
  0x75   : > { %4842 = vmatmul.mubr.msk.bf16.gmra.mrb[8].mxu1 %vm523_vm1, %v5708_v51 }
  0x76   : > { %4845 = vmatprep.mubr.msk.bf16.mxu1 %vm523_vm1, %v5719_v61  ;;  %v992_v28 = vsel %vm989_vm4, %v990_v13, %v991_v14 }
  0x78   : > { %5018 = vmatmul.mubr.msk.bf16.gmra.mrb[24].mxu0 %vm523_vm1, %v2254_v1  ;;  %v2690_v1 = vrot.slane %v6064_v58, 2 }
  0x79   : > { %5021 = vmatprep.mubr.msk.bf16.mxu0 %vm523_vm1, %v2256_v6  ;;  %v2689_v6 = vsel %vm2225_vm3, %v2686_v8, %v2688_v63 }
  0x7d   : > { %4846 = vmatmul.mubr.msk.bf16.gmra.mrb[12].mxu1 %vm523_vm1, %v5746_v33 }
  0x7e   : > { %4849 = vmatprep.mubr.msk.bf16.mxu1 %vm523_vm1, %v5756_v43 }
  0x80   : > { %5022 = vmatmul.mubr.msk.bf16.gmra.mrb[28].mxu0 %vm523_vm1, %v2258_v19  ;;  %v2691_v19 = vsel %vm2225_vm3, %v2688_v63, %v2690_v1  ;;  %v6124_v63 = vld [vmem:[%s5644_s29 + $0x78] sm:$0xff]  }
  0x81   : > { %5025 = vmatprep.mubr.msk.bf16.mxu0 %vm523_vm1, %v2260_v22  ;;  %v2692_v22 = vrot.slane %v6079_v39, 2 }
  0x83   : > { %v2693_v29 = vsel %vm2225_vm3, %v2690_v1, %v2692_v22  ;;  %v2695_v40 = vsel %vm2225_vm3, %v2692_v22, %v2694_v4  ;;  %v2702_v1 = vrot.slane %v6124_v63, 2 }
  0x85   : > { %4850 = vmatmul.mubr.msk.bf16.gmra.mrb[16].mxu1 %vm523_vm1, %v5768_v55 }
  0x86   : > { %4853 = vmatprep.mubr.msk.bf16.mxu1 %vm523_vm1, %v5786_v20 }
  0x88   : > { %5026 = vmatmul.mubr.msk.bf16.gmra.mrb[32].mxu0 %vm523_vm1, %v2262_v30  ;;  %v6097_v30 = vld [vmem:[%s5644_s29 + $0x60] sm:$0xff]  }
  0x89   : > { %5033 = vmatprep.mubr.msk.bf16.mxu0 %vm523_vm1, %v2679_v36  ;;  %v995_v36 = vrot.slane %v5686_v31, 1  ;;  %v2696_v17 = vrot.slane %v6097_v30, 2 }
  0x8b   : > { %v2697_v8 = vsel %vm2225_vm3, %v2694_v4, %v2696_v17 }
  0x8d   : > { %4854 = vmatmul.mubr.msk.bf16.gmra.mrb[20].mxu1 %vm523_vm1, %v5797_v35 }
  0x8e   : > { %4857 = vmatprep.mubr.msk.bf16.mxu1 %vm523_vm1, %v5818_v57 }
  0x90   : > { %5034 = vmatmul.mubr.msk.bf16.vlgmr.msra.gmra.mrb[0].mxu0 %vm523_vm1, %v2681_v38  ;;  %v994_v38 = vsel %vm989_vm4, %v991_v14, %v993_v9  ;;  %v6143_v14 = vld [vmem:[%s5644_s29 + $0x80] sm:$0xff]  }
  0x91   : > { %5070 = vmatpush3.bf16.msra.mxu0 %v5895_v46  ;;  %5037 = vmatprep.mubr.msk.bf16.mxu0 %vm523_vm1, %v2683_v42  ;;  %v2685_v46 = vsel %vm2225_vm3, %v2682_v15, %v2684_v47  ;;  %v6102_v15 = vld [vmem:[%s5644_s29 + $0x68] sm:$0xff]   ;;  %v996_v42 = vsel %vm989_vm4, %v993_v9, %v995_v36  ;;  %v997_v47 = vrot.slane %v5699_v45, 1 }
  0x92   : > { %5071 = vmatprep.subr.bf16.mxu0 %v5531_v3  ;;  %v2698_v31 = vrot.slane %v6102_v15, 2 }
  0x93   : > { %v998_v0 = vsel %vm989_vm4, %v995_v36, %v997_v47 }
  0x94   : > { %v2699_v59 = vsel %vm2225_vm3, %v2696_v17, %v2698_v31  ;;  %v6165_v17 = vld [vmem:[%s5644_s29 + $0x98] sm:$0xff]  }
  0x95   : > { %4858 = vmatmul.mubr.msk.bf16.gmra.mrb[24].mxu1 %vm523_vm1, %v5822_v60  ;;  %5072 = vmatpush3.bf16.msra.mxu0 %v5531_v3  ;;  %v5542_v3 = vld [vmem:[%s6652_s1 + $0x38] sm:$0xff]  }
  0x96   : > { %4861 = vmatprep.mubr.msk.bf16.mxu1 %vm523_vm1, %v5840_v23  ;;  %5109 = vmatprep.subr.bf16.mxu0 %v6052_v50 }
  0x98   : > { %5038 = vmatmul.mubr.msk.bf16.gmra.mrb[4].mxu0 %vm523_vm1, %v2685_v46  ;;  %v6119_v46 = vld [vmem:[%s5644_s29 + $0x70] sm:$0xff]  }
  0x99   : > { %5041 = vmatprep.mubr.msk.bf16.mxu0 %vm523_vm1, %v2687_v53  ;;  %v999_v53 = vrot.slane %v5708_v51, 1  ;;  %v2700_v45 = vrot.slane %v6119_v46, 2  ;;  %v6134_v51 = vld [vmem:[%s6652_s1 + $0x40] sm:$0xff]  }
  0x9b   : > { %v2701_v13 = vsel %vm2225_vm3, %v2698_v31, %v2700_v45  ;;  %v2703_v22 = vsel %vm2225_vm3, %v2700_v45, %v2702_v1 }
  0x9d   : > { %4862 = vmatmul.mubr.msk.bf16.gmra.mrb[28].mxu1 %vm523_vm1, %v5844_v25 }
  0x9e   : > { %4865 = vmatprep.mubr.msk.bf16.mxu1 %vm523_vm1, %v5867_v48 }
  0xa0   : > { %5042 = vmatmul.mubr.msk.bf16.gmra.mrb[8].mxu0 %vm523_vm1, %v2689_v6  ;;  %v1001_v6 = vrot.slane %v5719_v61, 1  ;;  %v2704_v61 = vrot.slane %v6143_v14, 2 }
  0xa1   : > { %5045 = vmatprep.mubr.msk.bf16.mxu0 %vm523_vm1, %v2691_v19  ;;  %v1003_v19 = vrot.slane %v5746_v33, 1  ;;  %v1005_v33 = vrot.slane %v5756_v43, 1 }
  0xa2   : > { %v1002_v4 = vsel %vm989_vm4, %v999_v53, %v1001_v6  ;;  %v2705_v36 = vsel %vm2225_vm3, %v2702_v1, %v2704_v61  ;;  %v5540_v1 = vld [vmem:[%s5644_s29 + $0xa0] ss:$0 sps:$4 sm:$0x33]  }
  0xa3   : > { %v1004_v9 = vsel %vm989_vm4, %v1001_v6, %v1003_v19  ;;  %v1011_v6 = vrot.slane %v5797_v35, 1  ;;  %v3030_v35 = vshrl.u32 %v6023_v37, 16 }
  0xa5   : > { %4866 = vmatmul.mubr.msk.bf16.gmra.mrb[32].mxu1 %vm523_vm1, %v5872_v54 }
  0xa6   : > { %4873 = vmatprep.mubr.msk.bf16.mxu1 %vm523_vm1, %v992_v28  ;;  %v6148_v28 = vld [vmem:[%s5644_s29 + $0x88] sm:$0xff]  }
  0xa8   : > { %5046 = vmatmul.mubr.msk.bf16.gmra.mrb[12].mxu0 %vm523_vm1, %v2693_v29  ;;  %v2706_v29 = vrot.slane %v6148_v28, 2 }
  0xa9   : > { %5049 = vmatprep.mubr.msk.bf16.mxu0 %vm523_vm1, %v2695_v40  ;;  %v6161_v40 = vld [vmem:[%s5644_s29 + $0x90] sm:$0xff]  }
  0xaa   : > { %v2708_v31 = vrot.slane %v6161_v40, 2 }
  0xac   : > { %v2709_v45 = vsel %vm2225_vm3, %v2706_v29, %v2708_v31 }
  0xad   : > { %4874 = vmatmul.mubr.msk.bf16.vlgmr.msra.gmra.mrb[0].mxu1 %vm523_vm1, %v994_v38  ;;  %v1007_v38 = vrot.slane %v5768_v55, 1  ;;  %v3007_v55 = vshll.u32 %v6003_v24, 16 }
  0xae   : > { %4877 = vmatprep.mubr.msk.bf16.mxu1 %vm523_vm1, %v996_v42  ;;  %4910 = vmatpush3.bf16.msra.mxu1 %v5946_v21  ;;  %v1000_v21 = vsel %vm989_vm4, %v997_v47, %v999_v53  ;;  %v2707_v42 = vsel %vm2225_vm3, %v2704_v61, %v2706_v29  ;;  %v2710_v47 = vrot.slane %v6165_v17, 2  ;;  %v3012_v53 = vshrl.u32 %v6006_v27, 16 }
  0xaf   : > { %4911 = vmatprep.subr.bf16.mxu1 %v5542_v3  ;;  %v1008_v43 = vsel %vm989_vm4, %v1005_v33, %v1007_v38  ;;  %v2712_v61 = vrot.slane %v5540_v1, 2  ;;  %v3024_v29 = vshll.u32 %v6019_v34, 16 }
  0xb0   : > { %5050 = vmatmul.mubr.msk.bf16.gmra.mrb[16].mxu0 %vm523_vm1, %v2697_v8  ;;  %v3004_v8 = vshrl.u32 %v6003_v24, 16  ;;  %v3014_v24 = vrot.slane %v3012_v53, 2  ;;  %v3032_v53 = vrot.slane %v3030_v35, 2  ;;  %v3060_v35 = vshll.u32 %v6060_v16, 16 }
  0xb1   : > { %5053 = vmatprep.mubr.msk.bf16.mxu0 %vm523_vm1, %v2699_v59  ;;  %v3015_v59 = vshll.u32 %v6006_v27, 16 }
  0xb2   : > { %4912 = vmatpush3.bf16.msra.mxu1 %v5542_v3  ;;  %v1006_v3 = vsel %vm989_vm4, %v1003_v19, %v1005_v33  ;;  %v3009_v19 = vrot.slane %v3007_v55, 3 }
  0xb3   : > { %5149 = vmatprep.subr.bf16.mxu1 %v6134_v51 }
  0xb5   : > { %4878 = vmatmul.mubr.msk.bf16.gmra.mrb[4].mxu1 %vm523_vm1, %v998_v0  ;;  %v1009_v0 = vrot.slane %v5786_v20, 1 }
  0xb6   : > { %4881 = vmatprep.mubr.msk.bf16.mxu1 %vm523_vm1, %v1000_v21  ;;  %v2711_v21 = vsel %vm2225_vm3, %v2708_v31, %v2710_v47 }
  0xb7   : > { %v1012_v20 = vsel %vm989_vm4, %v1009_v0, %v1011_v6 }
  0xb8   : > { %5054 = vmatmul.mubr.msk.bf16.gmra.mrb[20].mxu0 %vm523_vm1, %v2701_v13  ;;  %v3006_v13 = vrot.slane %v3004_v8, 2  ;;  %v1015_v8 = vrot.slane %v5822_v60, 1  ;;  %v3048_v60 = vshrl.u32 %v6039_v49, 16 }
  0xb9   : > { %5057 = vmatprep.mubr.msk.bf16.mxu0 %vm523_vm1, %v2703_v22  ;;  %v3017_v22 = vrot.slane %v3015_v59, 3 }
  0xba   : > { %v3010_v33 = vor.u32 %v3009_v19, %v3006_v13  ;;  %v3051_v13 = vshll.u32 %v6039_v49, 16 }
  0xbd   : > { %4882 = vmatmul.mubr.msk.bf16.gmra.mrb[8].mxu1 %vm523_vm1, %v1002_v4  ;;  %v1010_v4 = vsel %vm989_vm4, %v1007_v38, %v1009_v0  ;;  %v1013_v38 = vrot.slane %v5818_v57, 1  ;;  %v3039_v57 = vshrl.u32 %v6035_v41, 16 }
  0xbe   : > { %4885 = vmatprep.mubr.msk.bf16.mxu1 %vm523_vm1, %v1004_v9  ;;  %v3021_v9 = vshrl.u32 %v6019_v34, 16 }
  0xbf   : > { %v1014_v0 = vsel %vm989_vm4, %v1011_v6, %v1013_v38  ;;  %v1017_v6 = vrot.slane %v5840_v23, 1 }
  0xc0   : > { %5058 = vmatmul.mubr.msk.bf16.gmra.mrb[24].mxu0 %vm523_vm1, %v2705_v36  ;;  %v3018_v36 = vor.u32 %v3017_v22, %v3014_v24  ;;  %v3023_v31 = vrot.slane %v3021_v9, 2  ;;  %v3041_v24 = vrot.slane %v3039_v57, 2  ;;  %v3053_v9 = vrot.slane %v3051_v13, 3 }
  0xc1   : > { %5061 = vmatprep.mubr.msk.bf16.mxu0 %vm523_vm1, %v2707_v42  ;;  %v3033_v42 = vshll.u32 %v6023_v37, 16  ;;  %v3075_v57 = vshrl.u32 %v6079_v39, 16  ;;  %v1025_v13 = vrot.slane %v5890_v2, 1 }
  0xc2   : > { %v3019_v55 = vsel %vm3002_vm5, %v3010_v33, %v3018_v36  ;;  %v1018_v33 = vsel %vm989_vm4, %v1015_v8, %v1017_v6 }
  0xc3   : > { %v3035_v59 = vrot.slane %v3033_v42, 3 }
  0xc5   : > { %4886 = vmatmul.mubr.msk.bf16.gmra.mrb[12].mxu1 %vm523_vm1, %v1006_v3  ;;  %v2713_v3 = vsel %vm2225_vm3, %v2710_v47, %v2712_v61  ;;  %v3042_v47 = vshll.u32 %v6035_v41, 16  ;;  %v3036_v1 = vor.u32 %v3035_v59, %v3032_v53 }
  0xc6   : > { %4889 = vmatprep.mubr.msk.bf16.mxu1 %vm523_vm1, %v1008_v43  ;;  %v3026_v43 = vrot.slane %v3024_v29, 3  ;;  %v5543_v29 = vld [vmem:[%s6652_s1 + $0x88] sm:$0xff]  }
  0xc7   : > { %v3044_v22 = vrot.slane %v3042_v47, 3  ;;  %v3078_v47 = vshll.u32 %v6079_v39, 16 }
  0xc8   : > { %5062 = vmatmul.mubr.msk.bf16.gmra.mrb[28].mxu0 %vm523_vm1, %v2709_v45  ;;  %v3027_v45 = vor.u32 %v3026_v43, %v3023_v31 }
  0xc9   : > { %5065 = vmatprep.mubr.msk.bf16.mxu0 %vm523_vm1, %v2711_v21  ;;  %v1016_v21 = vsel %vm989_vm4, %v1013_v38, %v1015_v8  ;;  %v3045_v23 = vor.u32 %v3044_v22, %v3041_v24  ;;  %v3066_v38 = vshrl.u32 %v6064_v58, 16  ;;  %v3062_v8 = vrot.slane %v3060_v35, 3 }
  0xca   : > { %v3028_v19 = vsel %vm3002_vm5, %v3018_v36, %v3027_v45  ;;  %v3037_v61 = vsel %vm3002_vm5, %v3027_v45, %v3036_v1  ;;  %v3077_v24 = vrot.slane %v3075_v57, 2  ;;  %v3080_v22 = vrot.slane %v3078_v47, 3 }
  0xcb   : > { %v3046_v31 = vsel %vm3002_vm5, %v3036_v1, %v3045_v23  ;;  %v3068_v59 = vrot.slane %v3066_v38, 2  ;;  %v3084_v1 = vshrl.u32 %v6084_v7, 16  ;;  %v3102_v35 = vshrl.u32 %v6102_v15, 16  ;;  %v5549_v38 = vld [vmem:[%s5644_s29 + $0x18] sm:$0xff]  }
  0xcc   : > { %v3081_v2 = vor.u32 %v3080_v22, %v3077_v24  ;;  %v3111_v57 = vshrl.u32 %v6119_v46, 16  ;;  %v3114_v47 = vshll.u32 %v6119_v46, 16 }
  0xcd   : > { %4890 = vmatmul.mubr.msk.bf16.gmra.mrb[16].mxu1 %vm523_vm1, %v1010_v4  ;;  %v1019_v4 = vrot.slane %v5844_v25, 1  ;;  %v3057_v25 = vshrl.u32 %v6060_v16, 16 }
  0xce   : > { %4893 = vmatprep.mubr.msk.bf16.mxu1 %vm523_vm1, %v1012_v20  ;;  %v3050_v20 = vrot.slane %v3048_v60, 2  ;;  %v3087_v60 = vshll.u32 %v6084_v7, 16  ;;  %v3113_v24 = vrot.slane %v3111_v57, 2  ;;  %v3116_v22 = vrot.slane %v3114_v47, 3 }
  0xcf   : > { %v1020_v36 = vsel %vm989_vm4, %v1017_v6, %v1019_v4  ;;  %v3059_v43 = vrot.slane %v3057_v25, 2  ;;  %v1441_v6 = vrot.slane %v5675_v18, 1  ;;  %v3147_v57 = vshrl.u32 %v6161_v40, 16 }
  0xd0   : > { %5066 = vmatmul.mubr.msk.bf16.gmra.mrb[32].mxu0 %vm523_vm1, %v2713_v3  ;;  %v3054_v42 = vor.u32 %v3053_v9, %v3050_v20  ;;  %v3069_v3 = vshll.u32 %v6064_v58, 16  ;;  %v3086_v9 = vrot.slane %v3084_v1, 2  ;;  %v3120_v1 = vshrl.u32 %v6124_v63, 16 }
  0xd1   : > { %5073 = vmatprep.mubr.msk.bf16.mxu0 %vm523_vm1, %v3019_v55  ;;  %v1023_v55 = vrot.slane %v5872_v54, 1  ;;  %v3150_v47 = vshll.u32 %v6161_v40, 16 }
  0xd2   : > { %v3055_v53 = vsel %vm3002_vm5, %v3045_v23, %v3054_v42  ;;  %v3093_v23 = vshrl.u32 %v6097_v30, 16 }
  0xd5   : > { %4894 = vmatmul.mubr.msk.bf16.gmra.mrb[20].mxu1 %vm523_vm1, %v1014_v0  ;;  %v3071_v0 = vrot.slane %v3069_v3, 3  ;;  %v1444_v3 = vrot.slane %v5549_v38, 1  ;;  %v5554_v38 = vld [vmem:[%s5644_s29 + $0x38] sm:$0xff]  }
  0xd6   : > { %4897 = vmatprep.mubr.msk.bf16.mxu1 %vm523_vm1, %v1016_v21  ;;  %v3063_v21 = vor.u32 %v3062_v8, %v3059_v43  ;;  %v5550_v8 = vld [vmem:[%s5644_s29 + $0x20] sm:$0xff]  }
  0xd7   : > { %v3072_v54 = vor.u32 %v3071_v0, %v3068_v59  ;;  %v3104_v59 = vrot.slane %v3102_v35, 2  ;;  %v3138_v35 = vshrl.u32 %v6148_v28, 16 }
  0xd8   : > { %5074 = vmatmul.mubr.msk.bf16.vlgmr.msra.gmra.mrb[0].mxu0 %vm523_vm1, %v3028_v19  ;;  %v3064_v19 = vsel %vm3002_vm5, %v3054_v42, %v3063_v21  ;;  %v3105_v42 = vshll.u32 %v6102_v15, 16 }
  0xd9   : > { %5110 = vmatpush3.bf16.msra.mxu0 %v6052_v50  ;;  %5077 = vmatprep.mubr.msk.bf16.mxu0 %vm523_vm1, %v3037_v61  ;;  %v1021_v50 = vrot.slane %v5867_v48, 1  ;;  %v3073_v20 = vsel %vm3002_vm5, %v3063_v21, %v3072_v54 }
  0xda   : > { %5111 = vmatprep.subr.bf16.mxu0 %v5543_v29  ;;  %v3107_v0 = vrot.slane %v3105_v42, 3  ;;  %v3141_v42 = vshll.u32 %v6148_v28, 16 }
  0xdb   : > { %v1022_v45 = vsel %vm989_vm4, %v1019_v4, %v1021_v50  ;;  %v1024_v48 = vsel %vm989_vm4, %v1021_v50, %v1023_v55  ;;  %v5548_v4 = vld [vmem:[%s5644_s29 + $0x10] sm:$0xff]   ;;  %v3082_v50 = vsel %vm3002_vm5, %v3072_v54, %v3081_v2 }
  0xdc   : > { %v1442_v61 = vrot.slane %v5548_v4, 1  ;;  %v3108_v54 = vor.u32 %v3107_v0, %v3104_v59  ;;  %v5552_v4 = vld [vmem:[%s5644_s29 + $0x30] sm:$0xff]   ;;  %v3140_v59 = vrot.slane %v3138_v35, 2  ;;  %v3143_v0 = vrot.slane %v3141_v42, 3  ;;  %v5558_v42 = vld [vmem:[%s5644_s29 + $0x58] sm:$0xff]  }
  0xdd   : > { %4898 = vmatmul.mubr.msk.bf16.gmra.mrb[24].mxu1 %vm523_vm1, %v1018_v33  ;;  %5112 = vmatpush3.bf16.msra.mxu0 %v5543_v29  ;;  %v3089_v29 = vrot.slane %v3087_v60, 3  ;;  %v1026_v33 = vsel %vm989_vm4, %v1023_v55, %v1025_v13  ;;  %v1446_v55 = vrot.slane %v5550_v8, 1  ;;  %v3123_v60 = vshll.u32 %v6124_v63, 16  ;;  %v5551_v13 = vld [vmem:[%s5644_s29 + $0x28] sm:$0xff]   ;;  %v5555_v8 = vld [vmem:[%s5644_s29 + $0x40] sm:$0xff]  }
  0xde   : > { %4901 = vmatprep.mubr.msk.bf16.mxu1 %vm523_vm1, %v1020_v36  ;;  %v1443_v18 = vsel %vm989_vm4, %v1441_v6, %v1442_v61  ;;  %v3096_v36 = vshll.u32 %v6097_v30, 16  ;;  %v1448_v6 = vrot.slane %v5551_v13, 1  ;;  %v5556_v13 = vld [vmem:[%s5644_s29 + $0x48] sm:$0xff]   ;;  %v3452_v35 = vld [vmem:[%s5644_s29 + $0x10] sm:$0x8] }
  0xdf   : > { %v3090_v25 = vor.u32 %v3089_v29, %v3086_v9  ;;  %v3122_v29 = vrot.slane %v3120_v1, 2  ;;  %v3156_v1 = vshrl.u32 %v6165_v17, 16 }
  0xe0   : > { %5078 = vmatmul.mubr.msk.bf16.gmra.mrb[4].mxu0 %vm523_vm1, %v3046_v31  ;;  %v3095_v31 = vrot.slane %v3093_v23, 2  ;;  %v3098_v43 = vrot.slane %v3096_v36, 3  ;;  %v3129_v23 = vshrl.u32 %v6143_v14, 16  ;;  %v3132_v36 = vshll.u32 %v6143_v14, 16 }
  0xe1   : > { %5081 = vmatprep.mubr.msk.bf16.mxu0 %vm523_vm1, %v3055_v53  ;;  %v3091_v53 = vsel %vm3002_vm5, %v3081_v2, %v3090_v25  ;;  %v3117_v2 = vor.u32 %v3116_v22, %v3113_v24  ;;  %v3149_v24 = vrot.slane %v3147_v57, 2  ;;  %v3152_v22 = vrot.slane %v3150_v47, 3 }
  0xe2   : > { %v3099_v21 = vor.u32 %v3098_v43, %v3095_v31  ;;  %v3131_v31 = vrot.slane %v3129_v23, 2  ;;  %v3134_v43 = vrot.slane %v3132_v36, 3  ;;  %v1466_v57 = vrot.slane %v5950_v52, 1 }
  0xe4   : > { %v3109_v9 = vsel %vm3002_vm5, %v3099_v21, %v3108_v54 }
  0xe5   : > { %4902 = vmatmul.mubr.msk.bf16.gmra.mrb[28].mxu1 %vm523_vm1, %v1022_v45  ;;  %v1445_v45 = vsel %vm989_vm4, %v1442_v61, %v1444_v3  ;;  %v1450_v61 = vrot.slane %v5552_v4, 1  ;;  %v5557_v4 = vld [vmem:[%s5644_s29 + $0x50] sm:$0xff]  }
  0xe6   : > { %4905 = vmatprep.mubr.msk.bf16.mxu1 %vm523_vm1, %v1024_v48  ;;  %v1447_v48 = vsel %vm989_vm4, %v1444_v3, %v1446_v55  ;;  %v1452_v3 = vrot.slane %v5554_v38, 1  ;;  %v1460_v38 = vrot.slane %v5558_v42, 1  ;;  %v1875_v42 = vshrl.u32 %v5941_v26, 16 }
  0xe8   : > { %5082 = vmatmul.mubr.msk.bf16.gmra.mrb[8].mxu0 %vm523_vm1, %v3064_v19  ;;  %v3100_v19 = vsel %vm3002_vm5, %v3090_v25, %v3099_v21  ;;  %v3135_v21 = vor.u32 %v3134_v43, %v3131_v31  ;;  %v1462_v43 = vrot.slane %v5925_v44, 1 }
  0xe9   : > { %5085 = vmatprep.mubr.msk.bf16.mxu0 %vm523_vm1, %v3073_v20  ;;  %v5553_v20 = vld [vmem:[%s6652_s1 + $0x48] sm:$0xff]  }
  0xed   : > { %4906 = vmatmul.mubr.msk.bf16.gmra.mrb[32].mxu1 %vm523_vm1, %v1026_v33  ;;  %v3125_v33 = vrot.slane %v3123_v60, 3  ;;  %v3159_v60 = vshll.u32 %v6165_v17, 16 }
  0xee   : > { %4913 = vmatprep.mubr.msk.bf16.mxu1 %vm523_vm1, %v1443_v18  ;;  %v1451_v18 = vsel %vm989_vm4, %v1448_v6, %v1450_v61 }
  0xef   : > { %v3126_v25 = vor.u32 %v3125_v33, %v3122_v29  ;;  %v3158_v29 = vrot.slane %v3156_v1, 2  ;;  %v3161_v33 = vrot.slane %v3159_v60, 3  ;;  %v3467_v60 = vrot.slane %v6023_v37, 3 }
  0xf0   : > { %5086 = vmatmul.mubr.msk.bf16.gmra.mrb[12].mxu0 %vm523_vm1, %v3082_v50  ;;  %v3118_v50 = vsel %vm3002_vm5, %v3108_v54, %v3117_v2  ;;  %v3144_v54 = vor.u32 %v3143_v0, %v3140_v59  ;;  %v1463_v0 = vsel %vm989_vm4, %v1460_v38, %v1462_v43  ;;  %v3469_v37 = vrot.slane %v6035_v41, 3 }
  0xf1   : > { %5089 = vmatprep.mubr.msk.bf16.mxu0 %vm523_vm1, %v3091_v53  ;;  %v3127_v53 = vsel %vm3002_vm5, %v3117_v2, %v3126_v25  ;;  %v3153_v2 = vor.u32 %v3152_v22, %v3149_v24 }
  0xf5   : > { %4914 = vmatmul.mubr.msk.bf16.vlgmr.msra.gmra.mrb[0].mxu1 %vm523_vm1, %v1445_v45  ;;  %v1453_v45 = vsel %vm989_vm4, %v1450_v61, %v1452_v3  ;;  %v1458_v61 = vrot.slane %v5557_v4, 1  ;;  %v3471_v4 = vrot.slane %v6039_v49, 3 }
  0xf6   : > { %4917 = vmatprep.mubr.msk.bf16.mxu1 %vm523_vm1, %v1447_v48  ;;  %5151 = vmatpush3.bf16.msra.mxu1 %v6134_v51  ;;  %v1449_v51 = vsel %vm989_vm4, %v1446_v55, %v1448_v6  ;;  %v1454_v55 = vrot.slane %v5555_v8, 1  ;;  %v1456_v6 = vrot.slane %v5556_v13, 1  ;;  %v1468_v13 = vrot.slane %v5963_v32, 1 }
  0xf7   : > { %5150 = vmatprep.subr.bf16.mxu1 %v5553_v20  ;;  %v3472_v41 = vsel %vm3461_vm6, %v3469_v37, %v3471_v4 }
  0xf8   : > { %5090 = vmatmul.mubr.msk.bf16.gmra.mrb[16].mxu0 %vm523_vm1, %v3100_v19  ;;  %v1455_v48 = vsel %vm989_vm4, %v1452_v3, %v1454_v55  ;;  %v3136_v19 = vsel %vm3002_vm5, %v3126_v25, %v3135_v21  ;;  %v3162_v25 = vor.u32 %v3161_v33, %v3158_v29  ;;  %v3154_v3 = vsel %vm3002_vm5, %v3144_v54, %v3153_v2 }
  0xf9   : > { %5093 = vmatprep.mubr.msk.bf16.mxu0 %vm523_vm1, %v3109_v9  ;;  %v3145_v9 = vsel %vm3002_vm5, %v3135_v21, %v3144_v54  ;;  %v3463_v21 = vrot.slane %v6006_v27, 3  ;;  %v3465_v27 = vrot.slane %v6019_v34, 3  ;;  %v1469_v34 = vsel %vm989_vm4, %v1466_v57, %v1468_v13 }
  0xfa   : > { %5152 = vmatpush3.bf16.msra.mxu1 %v5553_v20  ;;  %v6306_v20 = vld [vmem:[%s5644_s29 + $0xa0] ss:$0 sps:$4 sm:$0x77]   ;;  %v3163_v8 = vsel %vm3002_vm5, %v3153_v2, %v3162_v25  ;;  %v1474_v29 = vrot.slane %v5983_v10, 1  ;;  %v1866_v33 = vshrl.u32 %v5925_v44, 16 }
  0xfb   : > { %v3165_v23 = vshrl.u32 %v6306_v20, 16  ;;  %v3168_v36 = vshll.u32 %v6306_v20, 16  ;;  %v3468_v24 = vsel %vm3461_vm6, %v3465_v27, %v3467_v60  ;;  %v5546_v2 = vld [vmem:[%s5644_s29 + $0x98] ss:$0 sps:$4 sm:$0x11]  }
  0xfd   : > { %4918 = vmatmul.mubr.msk.bf16.gmra.mrb[4].mxu1 %vm523_vm1, %v1449_v51  ;;  %v1457_v51 = vsel %vm989_vm4, %v1454_v55, %v1456_v6  ;;  %v3170_v31 = vrot.slane %v3168_v36, 3  ;;  %v4513_v55 = vcombine.low %v3452_v35, %v5993_v11  ;;  %v1868_v36 = vrot.slane %v1866_v33, 1 }
  0xfe   : > { %4921 = vmatprep.mubr.msk.bf16.mxu1 %vm523_vm1, %v1451_v18  ;;  %v1459_v18 = vsel %vm989_vm4, %v1456_v6, %v1458_v61  ;;  %v3466_v6 = vsel %vm3461_vm6, %v3463_v21, %v3465_v27  ;;  %v3475_v35 = vrot.slane %v6064_v58, 3 }
 0x100   : > { %5094 = vmatmul.mubr.msk.bf16.gmra.mrb[20].mxu0 %vm523_vm1, %v3118_v50  ;;  %v3167_v50 = vrot.slane %v3165_v23, 2 }
 0x101   : > { %5097 = vmatprep.mubr.msk.bf16.mxu0 %vm523_vm1, %v3127_v53  ;;  %v1461_v53 = vsel %vm989_vm4, %v1458_v61, %v1460_v38  ;;  %v1472_v61 = vrot.slane %v5979_v5, 1  ;;  %v1878_v38 = vshll.u32 %v5941_v26, 16 }
 0x102   : > { %v3171_v59 = vor.u32 %v3170_v31, %v3167_v50  ;;  %v1887_v31 = vshll.u32 %v5950_v52, 16 }
 0x103   : > { %v1475_v23 = vsel %vm989_vm4, %v1472_v61, %v1474_v29 }
 0x104   : > { %v3172_v11 = vsel %vm3002_vm5, %v3162_v25, %v3171_v59 }
 0x105   : > { %4922 = vmatmul.mubr.msk.bf16.gmra.mrb[8].mxu1 %vm523_vm1, %v1453_v45  ;;  %v3462_v45 = vrot.slane %v4513_v55, 3  ;;  %v1880_v55 = vrot.slane %v1878_v38, 2 }
 0x106   : > { %4925 = vmatprep.mubr.msk.bf16.mxu1 %vm523_vm1, %v1455_v48  ;;  %v1464_v48 = vrot.slane %v5941_v26, 1 }
 0x107   : > { %v3464_v47 = vsel %vm3461_vm6, %v3462_v45, %v3463_v21  ;;  %v3479_v45 = vrot.slane %v6084_v7, 3  ;;  %v1893_v21 = vshrl.u32 %v5963_v32, 16 }
 0x108   : > { %5098 = vmatmul.mubr.msk.bf16.gmra.mrb[24].mxu0 %vm523_vm1, %v3136_v19  ;;  %v1465_v54 = vsel %vm989_vm4, %v1462_v43, %v1464_v48  ;;  %v1467_v1 = vsel %vm989_vm4, %v1464_v48, %v1466_v57  ;;  %v1470_v19 = vrot.slane %v5967_v62, 1  ;;  %v1896_v48 = vshll.u32 %v5963_v32, 16 }
 0x109   : > { %5101 = vmatprep.mubr.msk.bf16.mxu0 %vm523_vm1, %v3145_v9  ;;  %v3470_v9 = vsel %vm3461_vm6, %v3467_v60, %v3469_v37 }
 0x10a   : > { %v1471_v22 = vsel %vm989_vm4, %v1468_v13, %v1470_v19  ;;  %v1473_v49 = vsel %vm989_vm4, %v1470_v19, %v1472_v61  ;;  %v1898_v27 = vrot.slane %v1896_v48, 2  ;;  %v1911_v19 = vshrl.u32 %v5979_v5, 16 }
 0x10c   : > { %v1913_v61 = vrot.slane %v1911_v19, 1 }
 0x10d   : > { %4926 = vmatmul.mubr.msk.bf16.gmra.mrb[12].mxu1 %vm523_vm1, %v1457_v51  ;;  %v1869_v51 = vshll.u32 %v5925_v44, 16  ;;  %v1476_v44 = vrot.slane %v5546_v2, 1  ;;  %v1932_v2 = vshll.u32 %v5999_v56, 16 }
 0x10e   : > { %4929 = vmatprep.mubr.msk.bf16.mxu1 %vm523_vm1, %v1459_v18  ;;  %v3473_v18 = vrot.slane %v6060_v16, 3  ;;  %v1884_v16 = vshrl.u32 %v5950_v52, 16 }
 0x10f   : > { %v1871_v25 = vrot.slane %v1869_v51, 2  ;;  %v1477_v58 = vsel %vm989_vm4, %v1474_v29, %v1476_v44  ;;  %v3485_v29 = vrot.slane %v6119_v46, 3 }
 0x110   : > { %5102 = vmatmul.mubr.msk.bf16.gmra.mrb[28].mxu0 %vm523_vm1, %v3154_v3  ;;  %v3474_v3 = vsel %vm3461_vm6, %v3471_v4, %v3473_v18  ;;  %v3476_v43 = vsel %vm3461_vm6, %v3473_v18, %v3475_v35  ;;  %v1886_v59 = vrot.slane %v1884_v16, 1  ;;  %v3495_v16 = vrot.slane %v6165_v17, 3 }
 0x111   : > { %5105 = vmatprep.mubr.msk.bf16.mxu0 %vm523_vm1, %v3163_v8  ;;  %v1872_v50 = vor.u32 %v1871_v25, %v1868_v36  ;;  %v1877_v8 = vrot.slane %v1875_v42, 1  ;;  %v3491_v42 = vrot.slane %v6148_v28, 3 }
 0x113   : > { %v1873_v26 = vsel %vm1766_vm2, %v5832_v12, %v1872_v50  ;;  %v1881_v52 = vor.u32 %v1880_v55, %v1877_v8  ;;  %v1905_v12 = vshll.u32 %v5967_v62, 16 }
 0x115   : > { %4930 = vmatmul.mubr.msk.bf16.gmra.mrb[16].mxu1 %vm523_vm1, %v1461_v53  ;;  %v3477_v53 = vrot.slane %v6079_v39, 3  ;;  %v1902_v39 = vshrl.u32 %v5967_v62, 16  ;;  %v1882_v7 = vsel %vm1766_vm2, %v1872_v50, %v1881_v52  ;;  %v1907_v13 = vrot.slane %v1905_v12, 2 }
 0x116   : > { %4933 = vmatprep.mubr.msk.bf16.mxu1 %vm523_vm1, %v1463_v0  ;;  %v1889_v0 = vrot.slane %v1887_v31, 2 }
 0x117   : > { %v1904_v60 = vrot.slane %v1902_v39, 1 }
 0x118   : > { %5106 = vmatmul.mubr.msk.bf16.gmra.mrb[32].mxu0 %vm523_vm1, %v3172_v11  ;;  %v3478_v11 = vsel %vm3461_vm6, %v3475_v35, %v3477_v53  ;;  %v1890_v57 = vor.u32 %v1889_v0, %v1886_v59  ;;  %v3489_v35 = vrot.slane %v6143_v14, 3  ;;  %v3493_v14 = vrot.slane %v6161_v40, 3 }
 0x119   : > { %5113 = vmatprep.mubr.msk.bf16.mxu0 %vm523_vm1, %v3464_v47  ;;  %v3480_v47 = vsel %vm3461_vm6, %v3477_v53, %v3479_v45  ;;  %v1908_v37 = vor.u32 %v1907_v13, %v1904_v60 }
 0x11a   : > { %v1891_v32 = vsel %vm1766_vm2, %v1881_v52, %v1890_v57  ;;  %v3494_v28 = vsel %vm3461_vm6, %v3491_v42, %v3493_v14  ;;  %v3496_v31 = vsel %vm3461_vm6, %v3493_v14, %v3495_v16 }
 0x11d   : > { %4934 = vmatmul.mubr.msk.bf16.gmra.mrb[20].mxu1 %vm523_vm1, %v1465_v54  ;;  %v1895_v54 = vrot.slane %v1893_v21, 1 }
 0x11e   : > { %4937 = vmatprep.mubr.msk.bf16.mxu1 %vm523_vm1, %v1467_v1  ;;  %v3481_v1 = vrot.slane %v6097_v30, 3  ;;  %v1920_v30 = vshrl.u32 %v5983_v10, 16 }
 0x11f   : > { %v1899_v62 = vor.u32 %v1898_v27, %v1895_v54 }
 0x120   : > { %5114 = vmatmul.mubr.msk.bf16.vlgmr.msra.gmra.mrb[0].mxu0 %vm523_vm1, %v3466_v6  ;;  %v3483_v6 = vrot.slane %v6102_v15, 3  ;;  %v1922_v33 = vrot.slane %v1920_v30, 1 }
 0x121   : > { %5117 = vmatprep.mubr.msk.bf16.mxu0 %vm523_vm1, %v3468_v24  ;;  %v1914_v24 = vshll.u32 %v5979_v5, 16  ;;  %v1900_v15 = vsel %vm1766_vm2, %v1890_v57, %v1899_v62  ;;  %v1909_v5 = vsel %vm1766_vm2, %v1899_v62, %v1908_v37 }
 0x122   : > { %v3484_v4 = vsel %vm3461_vm6, %v3481_v1, %v3483_v6  ;;  %v3486_v18 = vsel %vm3461_vm6, %v3483_v6, %v3485_v29 }
 0x125   : > { %4938 = vmatmul.mubr.msk.bf16.gmra.mrb[24].mxu1 %vm523_vm1, %v1469_v34  ;;  %v3482_v34 = vsel %vm3461_vm6, %v3479_v45, %v3481_v1  ;;  %v6466_v1 = vld [vmem:[%s6653_s2] ss:$0 sm:$0xff] }
 0x126   : > { %4941 = vmatprep.mubr.msk.bf16.mxu1 %vm523_vm1, %v1471_v22  ;;  %v1923_v22 = vshll.u32 %v5983_v10, 16 }
 0x128   : > { %5118 = vmatmul.mubr.msk.bf16.gmra.mrb[4].mxu0 %vm523_vm1, %v3470_v9  ;;  %v1916_v9 = vrot.slane %v1914_v24, 2  ;;  %v1925_v51 = vrot.slane %v1923_v22, 2 }
 0x129   : > { %5121 = vmatprep.mubr.msk.bf16.mxu0 %vm523_vm1, %v3472_v41  ;;  %v3487_v41 = vrot.slane %v6124_v63, 3  ;;  %v1934_v63 = vrot.slane %v1932_v2, 2 }
 0x12a   : > { %v1917_v10 = vor.u32 %v1916_v9, %v1913_v61 }
 0x12b   : > { %v3488_v46 = vsel %vm3461_vm6, %v3485_v29, %v3487_v41  ;;  %v3490_v38 = vsel %vm3461_vm6, %v3487_v41, %v3489_v35 }
 0x12c   : > { %v1918_v36 = vsel %vm1766_vm2, %v1908_v37, %v1917_v10 }
 0x12d   : > { %4942 = vmatmul.mubr.msk.bf16.gmra.mrb[28].mxu1 %vm523_vm1, %v1473_v49  ;;  %v1929_v49 = vshrl.u32 %v5999_v56, 16 }
 0x12e   : > { %4945 = vmatprep.mubr.msk.bf16.mxu1 %vm523_vm1, %v1475_v23  ;;  %v1926_v23 = vor.u32 %v1925_v51, %v1922_v33 }
 0x12f   : > { %v1931_v25 = vrot.slane %v1929_v49, 1 }
 0x130   : > { %5122 = vmatmul.mubr.msk.bf16.gmra.mrb[8].mxu0 %vm523_vm1, %v3474_v3  ;;  %v1927_v44 = vsel %vm1766_vm2, %v1917_v10, %v1926_v23  ;;  %v3492_v3 = vsel %vm3461_vm6, %v3489_v35, %v3491_v42 }
 0x131   : > { %5125 = vmatprep.mubr.msk.bf16.mxu0 %vm523_vm1, %v3476_v43  ;;  %v1935_v56 = vor.u32 %v1934_v63, %v1931_v25  ;;  %v3497_v43 = vrot.slane %v6306_v20, 3 }
 0x133   : > { %v1936_v50 = vsel %vm1766_vm2, %v1926_v23, %v1935_v56 }
 0x135   : > { %4946 = vmatmul.mubr.msk.bf16.gmra.mrb[32].mxu1 %vm523_vm1, %v1477_v58  ;;  %v3498_v58 = vsel %vm3461_vm6, %v3495_v16, %v3497_v43 }
 0x136   : > { %4973 = vmatprep.mubr.msk.bf16.mxu1 %vm523_vm1, %v1873_v26 }
 0x138   : > { %5126 = vmatmul.mubr.msk.bf16.gmra.mrb[12].mxu0 %vm523_vm1, %v3478_v11 }
 0x139   : > { %5129 = vmatprep.mubr.msk.bf16.mxu0 %vm523_vm1, %v3480_v47 }
 0x13d   : > { %4974 = vmatmul.mubr.msk.bf16.vlgmr.msra.gmra.mrb[20].mxu1 %vm523_vm1, %v1882_v7 }
 0x13e   : > { %4977 = vmatprep.mubr.msk.bf16.mxu1 %vm523_vm1, %v1891_v32 }
 0x140   : > { %5130 = vmatmul.mubr.msk.bf16.gmra.mrb[16].mxu0 %vm523_vm1, %v3482_v34 }
 0x141   : > { %5133 = vmatprep.mubr.msk.bf16.mxu0 %vm523_vm1, %v3484_v4 }
 0x145   : > { %4978 = vmatmul.mubr.msk.bf16.gmra.mrb[24].mxu1 %vm523_vm1, %v1900_v15 }
 0x146   : > { %4981 = vmatprep.mubr.msk.bf16.mxu1 %vm523_vm1, %v1909_v5 }
 0x148   : > { %5134 = vmatmul.mubr.msk.bf16.gmra.mrb[20].mxu0 %vm523_vm1, %v3486_v18 }
 0x149   : > { %5137 = vmatprep.mubr.msk.bf16.mxu0 %vm523_vm1, %v3488_v46 }
 0x14d   : > { %4982 = vmatmul.mubr.msk.bf16.gmra.mrb[28].mxu1 %vm523_vm1, %v1918_v36 }
 0x14e   : > { %4985 = vmatprep.mubr.msk.bf16.mxu1 %vm523_vm1, %v1927_v44 }
 0x150   : > { %5138 = vmatmul.mubr.msk.bf16.gmra.mrb[24].mxu0 %vm523_vm1, %v3490_v38 }
 0x151   : > { %5141 = vmatprep.mubr.msk.bf16.mxu0 %vm523_vm1, %v3492_v3 }
 0x155   : > { %4986 = vmatmul.mubr.msk.bf16.gmra.mrb[32].mxu1 %vm523_vm1, %v1936_v50 }
 0x158   : > { %5142 = vmatmul.mubr.msk.bf16.gmra.mrb[28].mxu0 %vm523_vm1, %v3494_v28 }
 0x159   : > { %5145 = vmatprep.mubr.msk.bf16.mxu0 %vm523_vm1, %v3496_v31 }
 0x160   : > { %5146 = vmatmul.mubr.msk.bf16.gmra.mrb[32].mxu0 %vm523_vm1, %v3498_v58 }
 0x1c8   : > { %v4915_v8 = vpop.f32.mrb[0].mxu1 }
 0x1c9   : > { %v1578_v40 = vpop.f32.mrb[1].mxu1 }
 0x1ca   : > { %v4916_v55 = vpop.f32.mrb[2].mxu1 }
 0x1cb   : > { %v1581_v17 = vpop.f32.mrb[3].mxu1 }
 0x1d0   : > { %v4919_v53 = vpop.f32.mrb[4].mxu1 }
 0x1d1   : > { %v1594_v26 = vpop.f32.mrb[5].mxu1 }
 0x1d2   : > { %v4920_v59 = vpop.f32.mrb[6].mxu1 }
 0x1d3   : > { %v1597_v0 = vpop.f32.mrb[7].mxu1 }
 0x1d8   : > { %v6439_v45 = vpop.f32.mrb[8].mxu1 }
 0x1d9   : > { %v6441_v52 = vpop.f32.mrb[9].mxu1 }
 0x1da   : > { %v6443_v21 = vpop.f32.mrb[10].mxu1 }
 0x1db   : > { %v6445_v48 = vpop.f32.mrb[11].mxu1 }
 0x1e0   : > { %v6447_v20 = vpop.f32.mrb[12].mxu1 }
 0x1e1   : > { %v6449_v11 = vpop.f32.mrb[13].mxu1 }
 0x1e2   : > { %v6451_v57 = vpop.f32.mrb[14].mxu1 }
 0x1e3   : > { %v6453_v39 = vpop.f32.mrb[15].mxu1 }
 0x1e8   : > { %v6455_v12 = vpop.f32.mrb[16].mxu1 }
 0x1e9   : > { %v6457_v47 = vpop.f32.mrb[17].mxu1 }
 0x1ea   : > { %v6459_v7 = vpop.f32.mrb[18].mxu1 }
 0x1eb   : > { %v6461_v54 = vpop.f32.mrb[19].mxu1 }
 0x1f3   : > { %v5115_v27 = vpop.f32.mrb[0].mxu0 }
 0x1f4   : > { %v5153_v32 = vadd.f32 %v5115_v27, %v4915_v8  ;;  %v3599_v60 = vpop.f32.mrb[1].mxu0 }
 0x1f5   : > { %v5154_v13 = vadd.f32 %v3599_v60, %v1578_v40  ;;  %v5116_v6 = vpop.f32.mrb[2].mxu0 }
 0x1f6   : > { %v3787_v62 = vadd.f32 %v5153_v32, %v6466_v1  ;;  %v5155_v19 = vadd.f32 %v5116_v6, %v4916_v55  ;;  %v3602_v24 = vpop.f32.mrb[3].mxu0 }
 0x1f7   : > { %v3785_v34 = vadd.f32 %v5154_v13, %v6466_v1  ;;  %v5156_v37 = vadd.f32 %v3602_v24, %v1581_v17 }
 0x1f8   : > { %vm3823_vm7 = vcmp.ge.f32.partialorder %v3787_v62, 0.0  ;;  %v3859_v30 = vmul.f32 0.2, %v3787_v62  ;;  %v3788_v22 = vadd.f32 %v5155_v19, %v6466_v1 }
 0x1f9   : > { %vm3821_vm8 = vcmp.ge.f32.partialorder %v3785_v34, 0.0  ;;  %v3857_v4 = vmul.f32 0.2, %v3785_v34  ;;  %v3786_v15 = vadd.f32 %v5156_v37, %v6466_v1 }
 0x1fa   : > { %v3895_v61 = vsel %vm3823_vm7, %v3787_v62, %v3859_v30  ;;  %vm3824_vm9 = vcmp.ge.f32.partialorder %v3788_v22, 0.0  ;;  %v3860_v9 = vmul.f32 0.2, %v3788_v22 }
 0x1fb   : > { %v3931_v29 = vmul.f32 1.4142135, %v3895_v61  ;;  %v3893_v5 = vsel %vm3821_vm8, %v3785_v34, %v3857_v4  ;;  %vm3822_vm10 = vcmp.ge.f32.partialorder %v3786_v15, 0.0  ;;  %v3858_v33 = vmul.f32 0.2, %v3786_v15  ;;  %v5119_v51 = vpop.f32.mrb[4].mxu0 }
 0x1fc   : > { %v3929_v41 = vmul.f32 1.4142135, %v3893_v5  ;;  %v3896_v10 = vsel %vm3824_vm9, %v3788_v22, %v3860_v9  ;;  %v5157_v49 = vadd.f32 %v5119_v51, %v4919_v53  ;;  %v3615_v2 = vpop.f32.mrb[5].mxu0 }
 0x1fd   : > { %v4575_v18 = vpack.c.bf16 %v3931_v29, %v3931_v29  ;;  %v3932_v23 = vmul.f32 1.4142135, %v3896_v10  ;;  %v3894_v46 = vsel %vm3822_vm10, %v3786_v15, %v3858_v33  ;;  %v5158_v36 = vadd.f32 %v3615_v2, %v1594_v26  ;;  %v5120_v25 = vpop.f32.mrb[6].mxu0 }
 0x1fe   : > { %v4573_v63 = vpack.c.bf16 %v3929_v41, %v3929_v41  ;;  %v3930_v35 = vmul.f32 1.4142135, %v3894_v46  ;;  %v3791_v44 = vadd.f32 %v5157_v49, %v6466_v1  ;;  %v5159_v42 = vadd.f32 %v5120_v25, %v4920_v59  ;;  %v3618_v56 = vpop.f32.mrb[7].mxu0 }
 0x1ff   : > { %4112 = vst.msk [vmem:[%s6476_s12 + $0x8] sm:$0xf] %vm4109_vm11, %v4575_v18  ;;  %v4576_v38 = vpack.c.bf16 %v3932_v23, %v3932_v23  ;;  %v3789_v3 = vadd.f32 %v5158_v36, %v6466_v1  ;;  %v5160_v50 = vadd.f32 %v3618_v56, %v1597_v0 }
 0x200   : > { %4110 = vst.msk [vmem:[%s6476_s12] sm:$0xf] %vm4109_vm11, %v4573_v63  ;;  %v4574_v14 = vpack.c.bf16 %v3930_v35, %v3930_v35  ;;  %vm3827_vm12 = vcmp.ge.f32.partialorder %v3791_v44, 0.0  ;;  %v3863_v16 = vmul.f32 0.2, %v3791_v44  ;;  %v3792_v28 = vadd.f32 %v5159_v42, %v6466_v1 }
 0x201   : > { %4113 = vst.msk [vmem:[%s6476_s12 + $0xc] sm:$0xf] %vm4109_vm11, %v4576_v38  ;;  %vm3825_vm13 = vcmp.ge.f32.partialorder %v3789_v3, 0.0  ;;  %v3861_v31 = vmul.f32 0.2, %v3789_v3  ;;  %v3790_v43 = vadd.f32 %v5160_v50, %v6466_v1 }
 0x202   : > { %4111 = vst.msk [vmem:[%s6476_s12 + $0x4] sm:$0xf] %vm4109_vm11, %v4574_v14  ;;  %v3899_v58 = vsel %vm3827_vm12, %v3791_v44, %v3863_v16  ;;  %vm3828_vm14 = vcmp.ge.f32.partialorder %v3792_v28, 0.0  ;;  %v3864_v8 = vmul.f32 0.2, %v3792_v28 }
 0x203   : > { %v3935_v40 = vmul.f32 1.4142135, %v3899_v58  ;;  %v3897_v55 = vsel %vm3825_vm13, %v3789_v3, %v3861_v31  ;;  %vm3826_vm15 = vcmp.ge.f32.partialorder %v3790_v43, 0.0  ;;  %v3862_v17 = vmul.f32 0.2, %v3790_v43  ;;  %v5123_v53 = vpop.f32.mrb[8].mxu0 }
 0x204   : > { %v3933_v26 = vmul.f32 1.4142135, %v3897_v55  ;;  %v3900_v59 = vsel %vm3828_vm14, %v3792_v28, %v3864_v8  ;;  %v5161_v0 = vadd.f32 %v5123_v53, %v6439_v45  ;;  %v3631_v27 = vpop.f32.mrb[9].mxu0 }
 0x205   : > { %v4579_v32 = vpack.c.bf16 %v3935_v40, %v3935_v40  ;;  %v3936_v60 = vmul.f32 1.4142135, %v3900_v59  ;;  %v3898_v13 = vsel %vm3826_vm15, %v3790_v43, %v3862_v17  ;;  %v5162_v6 = vadd.f32 %v3631_v27, %v6441_v52  ;;  %v5124_v62 = vpop.f32.mrb[10].mxu0 }
 0x206   : > { %v4577_v19 = vpack.c.bf16 %v3933_v26, %v3933_v26  ;;  %v3934_v24 = vmul.f32 1.4142135, %v3898_v13  ;;  %v3795_v34 = vadd.f32 %v5161_v0, %v6466_v1  ;;  %v5163_v37 = vadd.f32 %v5124_v62, %v6443_v21  ;;  %v3634_v30 = vpop.f32.mrb[11].mxu0 }
 0x207   : > { %4116 = vst.msk [vmem:[%s6476_s12 + $0x18] sm:$0xf] %vm4109_vm11, %v4579_v32  ;;  %v4580_v45 = vpack.c.bf16 %v3936_v60, %v3936_v60  ;;  %v3793_v22 = vadd.f32 %v5162_v6, %v6466_v1  ;;  %v5164_v4 = vadd.f32 %v3634_v30, %v6445_v48 }
 0x208   : > { %4114 = vst.msk [vmem:[%s6476_s12 + $0x10] sm:$0xf] %vm4109_vm11, %v4577_v19  ;;  %v4578_v52 = vpack.c.bf16 %v3934_v24, %v3934_v24  ;;  %vm3831_vm0 = vcmp.ge.f32.partialorder %v3795_v34, 0.0  ;;  %v3867_v15 = vmul.f32 0.2, %v3795_v34  ;;  %v3796_v61 = vadd.f32 %v5163_v37, %v6466_v1 }
 0x209   : > { %4117 = vst.msk [vmem:[%s6476_s12 + $0x1c] sm:$0xf] %vm4109_vm11, %v4580_v45  ;;  %vm3829_vm1 = vcmp.ge.f32.partialorder %v3793_v22, 0.0  ;;  %v3865_v9 = vmul.f32 0.2, %v3793_v22  ;;  %v3794_v21 = vadd.f32 %v5164_v4, %v6466_v1 }
 0x20a   : > { %4115 = vst.msk [vmem:[%s6476_s12 + $0x14] sm:$0xf] %vm4109_vm11, %v4578_v52  ;;  %v3903_v29 = vsel %vm3831_vm0, %v3795_v34, %v3867_v15  ;;  %vm3832_vm2 = vcmp.ge.f32.partialorder %v3796_v61, 0.0  ;;  %v3868_v5 = vmul.f32 0.2, %v3796_v61 }
 0x20b   : > { %v3939_v33 = vmul.f32 1.4142135, %v3903_v29  ;;  %v3901_v48 = vsel %vm3829_vm1, %v3793_v22, %v3865_v9  ;;  %vm3830_vm3 = vcmp.ge.f32.partialorder %v3794_v21, 0.0  ;;  %v3866_v51 = vmul.f32 0.2, %v3794_v21  ;;  %v5127_v41 = vpop.f32.mrb[12].mxu0 }
 0x20c   : > { %v3937_v10 = vmul.f32 1.4142135, %v3901_v48  ;;  %v3904_v49 = vsel %vm3832_vm2, %v3796_v61, %v3868_v5  ;;  %v5165_v2 = vadd.f32 %v5127_v41, %v6447_v20  ;;  %v3647_v18 = vpop.f32.mrb[13].mxu0 }
 0x20d   : > { %v4583_v23 = vpack.c.bf16 %v3939_v33, %v3939_v33  ;;  %v3940_v46 = vmul.f32 1.4142135, %v3904_v49  ;;  %v3902_v36 = vsel %vm3830_vm3, %v3794_v21, %v3866_v51  ;;  %v5166_v25 = vadd.f32 %v3647_v18, %v6449_v11  ;;  %v5128_v63 = vpop.f32.mrb[14].mxu0 }
 0x20e   : > { %v4581_v35 = vpack.c.bf16 %v3937_v10, %v3937_v10  ;;  %v3938_v44 = vmul.f32 1.4142135, %v3902_v36  ;;  %v3799_v42 = vadd.f32 %v5165_v2, %v6466_v1  ;;  %v5167_v56 = vadd.f32 %v5128_v63, %v6451_v57  ;;  %v3650_v38 = vpop.f32.mrb[15].mxu0 }
 0x20f   : > { %4120 = vst.msk [vmem:[%s6476_s12 + $0x28] sm:$0xf] %vm4109_vm11, %v4583_v23  ;;  %v4584_v20 = vpack.c.bf16 %v3940_v46, %v3940_v46  ;;  %v3797_v50 = vadd.f32 %v5166_v25, %v6466_v1  ;;  %v5168_v14 = vadd.f32 %v3650_v38, %v6453_v39 }
 0x210   : > { %v6510_v3 = vpop.f32.mrb[20].mxu1  ;;  %4118 = vst.msk [vmem:[%s6476_s12 + $0x20] sm:$0xf] %vm4109_vm11, %v4581_v35  ;;  %v4582_v16 = vpack.c.bf16 %v3938_v44, %v3938_v44  ;;  %vm3835_vm4 = vcmp.ge.f32.partialorder %v3799_v42, 0.0  ;;  %v3871_v28 = vmul.f32 0.2, %v3799_v42  ;;  %v3800_v57 = vadd.f32 %v5167_v56, %v6466_v1 }
 0x211   : > { %v6516_v11 = vpop.f32.mrb[21].mxu1  ;;  %4121 = vst.msk [vmem:[%s6476_s12 + $0x2c] sm:$0xf] %vm4109_vm11, %v4584_v20  ;;  %vm3833_vm5 = vcmp.ge.f32.partialorder %v3797_v50, 0.0  ;;  %v3869_v43 = vmul.f32 0.2, %v3797_v50  ;;  %v3798_v58 = vadd.f32 %v5168_v14, %v6466_v1 }
 0x212   : > { %v6521_v31 = vpop.f32.mrb[22].mxu1  ;;  %4119 = vst.msk [vmem:[%s6476_s12 + $0x24] sm:$0xf] %vm4109_vm11, %v4582_v16  ;;  %v3907_v39 = vsel %vm3835_vm4, %v3799_v42, %v3871_v28  ;;  %vm3836_vm6 = vcmp.ge.f32.partialorder %v3800_v57, 0.0  ;;  %v3872_v40 = vmul.f32 0.2, %v3800_v57 }
 0x213   : > { %v6526_v8 = vpop.f32.mrb[23].mxu1  ;;  %v3943_v55 = vmul.f32 1.4142135, %v3907_v39  ;;  %v3905_v17 = vsel %vm3833_vm5, %v3797_v50, %v3869_v43  ;;  %vm3834_vm7 = vcmp.ge.f32.partialorder %v3798_v58, 0.0  ;;  %v3870_v53 = vmul.f32 0.2, %v3798_v58 }
 0x214   : > { %v5131_v26 = vpop.f32.mrb[16].mxu0  ;;  %v3941_v59 = vmul.f32 1.4142135, %v3905_v17  ;;  %v3908_v0 = vsel %vm3836_vm6, %v3800_v57, %v3872_v40 }
 0x215   : > { %v5169_v27 = vadd.f32 %v5131_v26, %v6455_v12  ;;  %v3663_v32 = vpop.f32.mrb[17].mxu0  ;;  %v4587_v60 = vpack.c.bf16 %v3943_v55, %v3943_v55  ;;  %v3944_v13 = vmul.f32 1.4142135, %v3908_v0  ;;  %v3906_v6 = vsel %vm3834_vm7, %v3798_v58, %v3870_v53 }
 0x216   : > { %v5170_v62 = vadd.f32 %v3663_v32, %v6457_v47  ;;  %v5132_v19 = vpop.f32.mrb[18].mxu0  ;;  %v4585_v24 = vpack.c.bf16 %v3941_v59, %v3941_v59  ;;  %v3942_v34 = vmul.f32 1.4142135, %v3906_v6 }
 0x217   : > { %v3803_v37 = vadd.f32 %v5169_v27, %v6466_v1  ;;  %v5171_v30 = vadd.f32 %v5132_v19, %v6459_v7  ;;  %v3666_v45 = vpop.f32.mrb[19].mxu0  ;;  %4124 = vst.msk [vmem:[%s6476_s12 + $0x38] sm:$0xf] %vm4109_vm11, %v4587_v60  ;;  %v4588_v12 = vpack.c.bf16 %v3944_v13, %v3944_v13 }
 0x218   : > { %v6534_v22 = vpop.f32.mrb[24].mxu1  ;;  %v3801_v4 = vadd.f32 %v5170_v62, %v6466_v1  ;;  %v5172_v52 = vadd.f32 %v3666_v45, %v6461_v54  ;;  %4122 = vst.msk [vmem:[%s6476_s12 + $0x30] sm:$0xf] %vm4109_vm11, %v4585_v24  ;;  %v4586_v15 = vpack.c.bf16 %v3942_v34, %v3942_v34 }
 0x219   : > { %v6540_v47 = vpop.f32.mrb[25].mxu1  ;;  %vm3839_vm8 = vcmp.ge.f32.partialorder %v3803_v37, 0.0  ;;  %v3875_v61 = vmul.f32 0.2, %v3803_v37  ;;  %v3804_v7 = vadd.f32 %v5171_v30, %v6466_v1  ;;  %4125 = vst.msk [vmem:[%s6476_s12 + $0x3c] sm:$0xf] %vm4109_vm11, %v4588_v12 }
 0x21a   : > { %v6545_v9 = vpop.f32.mrb[26].mxu1  ;;  %vm3837_vm9 = vcmp.ge.f32.partialorder %v3801_v4, 0.0  ;;  %v3873_v21 = vmul.f32 0.2, %v3801_v4  ;;  %v3802_v29 = vadd.f32 %v5172_v52, %v6466_v1  ;;  %4123 = vst.msk [vmem:[%s6476_s12 + $0x34] sm:$0xf] %vm4109_vm11, %v4586_v15 }
 0x21b   : > { %v6550_v5 = vpop.f32.mrb[27].mxu1  ;;  %v3911_v54 = vsel %vm3839_vm8, %v3803_v37, %v3875_v61  ;;  %vm3840_vm10 = vcmp.ge.f32.partialorder %v3804_v7, 0.0  ;;  %v3876_v33 = vmul.f32 0.2, %v3804_v7  ;;  %v5135_v10 = vpop.f32.mrb[20].mxu0 }
 0x21c   : > { %v3947_v48 = vmul.f32 1.4142135, %v3911_v54  ;;  %v3909_v51 = vsel %vm3837_vm9, %v3801_v4, %v3873_v21  ;;  %vm3838_vm12 = vcmp.ge.f32.partialorder %v3802_v29, 0.0  ;;  %v3874_v41 = vmul.f32 0.2, %v3802_v29  ;;  %v3679_v23 = vpop.f32.mrb[21].mxu0 }
 0x21d   : > { %v3945_v49 = vmul.f32 1.4142135, %v3909_v51  ;;  %v3912_v2 = vsel %vm3840_vm10, %v3804_v7, %v3876_v33  ;;  %v5173_v18 = vadd.f32 %v5135_v10, %v6510_v3  ;;  %v5174_v63 = vadd.f32 %v3679_v23, %v6516_v11  ;;  %v5136_v35 = vpop.f32.mrb[22].mxu0 }
 0x21e   : > { %v4591_v46 = vpack.c.bf16 %v3947_v48, %v3947_v48  ;;  %v3948_v36 = vmul.f32 1.4142135, %v3912_v2  ;;  %v3910_v25 = vsel %vm3838_vm12, %v3802_v29, %v3874_v41  ;;  %v5175_v38 = vadd.f32 %v5136_v35, %v6521_v31  ;;  %v3682_v20 = vpop.f32.mrb[23].mxu0 }
 0x21f   : > { %v4589_v44 = vpack.c.bf16 %v3945_v49, %v3945_v49  ;;  %v3946_v42 = vmul.f32 1.4142135, %v3910_v25  ;;  %v3807_v56 = vadd.f32 %v5173_v18, %v6466_v1  ;;  %v3805_v14 = vadd.f32 %v5174_v63, %v6466_v1 }
 0x220   : > { %v6558_v50 = vpop.f32.mrb[28].mxu1  ;;  %4128 = vst.msk [vmem:[%s6476_s12 + $0x48] sm:$0xf] %vm4109_vm11, %v4591_v46  ;;  %v4592_v3 = vpack.c.bf16 %v3948_v36, %v3948_v36  ;;  %v5176_v16 = vadd.f32 %v3682_v20, %v6526_v8  ;;  %v3808_v31 = vadd.f32 %v5175_v38, %v6466_v1 }
 0x221   : > { %v6564_v11 = vpop.f32.mrb[29].mxu1  ;;  %4126 = vst.msk [vmem:[%s6476_s12 + $0x40] sm:$0xf] %vm4109_vm11, %v4589_v44  ;;  %v4590_v28 = vpack.c.bf16 %v3946_v42, %v3946_v42  ;;  %vm3843_vm13 = vcmp.ge.f32.partialorder %v3807_v56, 0.0  ;;  %v3879_v57 = vmul.f32 0.2, %v3807_v56 }
 0x222   : > { %v6569_v43 = vpop.f32.mrb[30].mxu1  ;;  %4129 = vst.msk [vmem:[%s6476_s12 + $0x4c] sm:$0xf] %vm4109_vm11, %v4592_v3  ;;  %vm3841_vm14 = vcmp.ge.f32.partialorder %v3805_v14, 0.0  ;;  %v3877_v58 = vmul.f32 0.2, %v3805_v14  ;;  %v3806_v39 = vadd.f32 %v5176_v16, %v6466_v1 }
 0x223   : > { %v6574_v40 = vpop.f32.mrb[31].mxu1  ;;  %4127 = vst.msk [vmem:[%s6476_s12 + $0x44] sm:$0xf] %vm4109_vm11, %v4590_v28  ;;  %v3915_v8 = vsel %vm3843_vm13, %v3807_v56, %v3879_v57  ;;  %vm3844_vm15 = vcmp.ge.f32.partialorder %v3808_v31, 0.0  ;;  %v3880_v55 = vmul.f32 0.2, %v3808_v31 }
 0x224   : > { %v3951_v17 = vmul.f32 1.4142135, %v3915_v8  ;;  %v3913_v53 = vsel %vm3841_vm14, %v3805_v14, %v3877_v58  ;;  %vm3842_vm0 = vcmp.ge.f32.partialorder %v3806_v39, 0.0  ;;  %v3878_v26 = vmul.f32 0.2, %v3806_v39  ;;  %v5139_v59 = vpop.f32.mrb[24].mxu0 }
 0x225   : > { %v3949_v0 = vmul.f32 1.4142135, %v3913_v53  ;;  %v3916_v27 = vsel %vm3844_vm15, %v3808_v31, %v3880_v55  ;;  %v5177_v32 = vadd.f32 %v5139_v59, %v6534_v22  ;;  %v3695_v60 = vpop.f32.mrb[25].mxu0 }
 0x226   : > { %v4595_v13 = vpack.c.bf16 %v3951_v17, %v3951_v17  ;;  %v3952_v6 = vmul.f32 1.4142135, %v3916_v27  ;;  %v3914_v62 = vsel %vm3842_vm0, %v3806_v39, %v3878_v26  ;;  %v5178_v19 = vadd.f32 %v3695_v60, %v6540_v47  ;;  %v5140_v24 = vpop.f32.mrb[26].mxu0 }
 0x227   : > { %v4593_v34 = vpack.c.bf16 %v3949_v0, %v3949_v0  ;;  %v3950_v37 = vmul.f32 1.4142135, %v3914_v62  ;;  %v3811_v30 = vadd.f32 %v5177_v32, %v6466_v1  ;;  %v5179_v45 = vadd.f32 %v5140_v24, %v6545_v9  ;;  %v3698_v12 = vpop.f32.mrb[27].mxu0 }
 0x228   : > { %v6582_v4 = vpop.f32.mrb[32].mxu1  ;;  %4132 = vst.msk [vmem:[%s6476_s12 + $0x58] sm:$0xf] %vm4109_vm11, %v4595_v13  ;;  %v4596_v22 = vpack.c.bf16 %v3952_v6, %v3952_v6  ;;  %v3809_v52 = vadd.f32 %v5178_v19, %v6466_v1  ;;  %v5180_v15 = vadd.f32 %v3698_v12, %v6550_v5 }
 0x229   : > { %v6588_v47 = vpop.f32.mrb[33].mxu1  ;;  %4130 = vst.msk [vmem:[%s6476_s12 + $0x50] sm:$0xf] %vm4109_vm11, %v4593_v34  ;;  %v4594_v61 = vpack.c.bf16 %v3950_v37, %v3950_v37  ;;  %vm3847_vm1 = vcmp.ge.f32.partialorder %v3811_v30, 0.0  ;;  %v3883_v7 = vmul.f32 0.2, %v3811_v30  ;;  %v3812_v9 = vadd.f32 %v5179_v45, %v6466_v1 }
 0x22a   : > { %v6593_v21 = vpop.f32.mrb[34].mxu1  ;;  %4133 = vst.msk [vmem:[%s6476_s12 + $0x5c] sm:$0xf] %vm4109_vm11, %v4596_v22  ;;  %vm3845_vm2 = vcmp.ge.f32.partialorder %v3809_v52, 0.0  ;;  %v3881_v29 = vmul.f32 0.2, %v3809_v52  ;;  %v3810_v54 = vadd.f32 %v5180_v15, %v6466_v1 }
 0x22b   : > { %v6598_v33 = vpop.f32.mrb[35].mxu1  ;;  %4131 = vst.msk [vmem:[%s6476_s12 + $0x54] sm:$0xf] %vm4109_vm11, %v4594_v61  ;;  %v3919_v5 = vsel %vm3847_vm1, %v3811_v30, %v3883_v7  ;;  %vm3848_vm3 = vcmp.ge.f32.partialorder %v3812_v9, 0.0  ;;  %v3884_v48 = vmul.f32 0.2, %v3812_v9 }
 0x22c   : > { %v3955_v51 = vmul.f32 1.4142135, %v3919_v5  ;;  %v3917_v41 = vsel %vm3845_vm2, %v3809_v52, %v3881_v29  ;;  %vm3846_vm4 = vcmp.ge.f32.partialorder %v3810_v54, 0.0  ;;  %v3882_v10 = vmul.f32 0.2, %v3810_v54  ;;  %v5143_v49 = vpop.f32.mrb[28].mxu0 }
 0x22d   : > { %v3953_v2 = vmul.f32 1.4142135, %v3917_v41  ;;  %v3920_v18 = vsel %vm3848_vm3, %v3812_v9, %v3884_v48  ;;  %v5181_v23 = vadd.f32 %v5143_v49, %v6558_v50  ;;  %v3711_v46 = vpop.f32.mrb[29].mxu0 }
 0x22e   : > { %v4599_v36 = vpack.c.bf16 %v3955_v51, %v3955_v51  ;;  %v3956_v25 = vmul.f32 1.4142135, %v3920_v18  ;;  %v3918_v63 = vsel %vm3846_vm4, %v3810_v54, %v3882_v10  ;;  %v5182_v35 = vadd.f32 %v3711_v46, %v6564_v11  ;;  %v5144_v44 = vpop.f32.mrb[30].mxu0 }
 0x22f   : > { %v4597_v42 = vpack.c.bf16 %v3953_v2, %v3953_v2  ;;  %v3954_v56 = vmul.f32 1.4142135, %v3918_v63  ;;  %v3815_v38 = vadd.f32 %v5181_v23, %v6466_v1  ;;  %v5183_v20 = vadd.f32 %v5144_v44, %v6569_v43  ;;  %v3714_v3 = vpop.f32.mrb[31].mxu0 }
 0x230   : > { %4136 = vst.msk [vmem:[%s6476_s12 + $0x68] sm:$0xf] %vm4109_vm11, %v4599_v36  ;;  %v4600_v50 = vpack.c.bf16 %v3956_v25, %v3956_v25  ;;  %v3813_v14 = vadd.f32 %v5182_v35, %v6466_v1  ;;  %v5184_v16 = vadd.f32 %v3714_v3, %v6574_v40 }
 0x231   : > { %4134 = vst.msk [vmem:[%s6476_s12 + $0x60] sm:$0xf] %vm4109_vm11, %v4597_v42  ;;  %v4598_v11 = vpack.c.bf16 %v3954_v56, %v3954_v56  ;;  %vm3851_vm5 = vcmp.ge.f32.partialorder %v3815_v38, 0.0  ;;  %v3887_v28 = vmul.f32 0.2, %v3815_v38  ;;  %v3816_v57 = vadd.f32 %v5183_v20, %v6466_v1 }
 0x232   : > { %4137 = vst.msk [vmem:[%s6476_s12 + $0x6c] sm:$0xf] %vm4109_vm11, %v4600_v50  ;;  %vm3849_vm6 = vcmp.ge.f32.partialorder %v3813_v14, 0.0  ;;  %v3885_v31 = vmul.f32 0.2, %v3813_v14  ;;  %v3814_v43 = vadd.f32 %v5184_v16, %v6466_v1 }
 0x233   : > { %4135 = vst.msk [vmem:[%s6476_s12 + $0x64] sm:$0xf] %vm4109_vm11, %v4598_v11  ;;  %v3923_v58 = vsel %vm3851_vm5, %v3815_v38, %v3887_v28  ;;  %vm3852_vm7 = vcmp.ge.f32.partialorder %v3816_v57, 0.0  ;;  %v3888_v39 = vmul.f32 0.2, %v3816_v57  ;;  %v5147_v17 = vpop.f32.mrb[32].mxu0 }
 0x234   : > { %v3959_v8 = vmul.f32 1.4142135, %v3923_v58  ;;  %v3921_v40 = vsel %vm3849_vm6, %v3813_v14, %v3885_v31  ;;  %vm3850_vm8 = vcmp.ge.f32.partialorder %v3814_v43, 0.0  ;;  %v3886_v55 = vmul.f32 0.2, %v3814_v43  ;;  %v3727_v0 = vpop.f32.mrb[33].mxu0 }
 0x235   : > { %v3957_v53 = vmul.f32 1.4142135, %v3921_v40  ;;  %v3924_v26 = vsel %vm3852_vm7, %v3816_v57, %v3888_v39  ;;  %v5185_v59 = vadd.f32 %v5147_v17, %v6582_v4  ;;  %v5186_v13 = vadd.f32 %v3727_v0, %v6588_v47  ;;  %v5148_v6 = vpop.f32.mrb[34].mxu0 }
 0x236   : > { %v4603_v27 = vpack.c.bf16 %v3959_v8, %v3959_v8  ;;  %v3960_v32 = vmul.f32 1.4142135, %v3924_v26  ;;  %v3922_v60 = vsel %vm3850_vm8, %v3814_v43, %v3886_v55  ;;  %v5187_v34 = vadd.f32 %v5148_v6, %v6593_v21  ;;  %v3730_v37 = vpop.f32.mrb[35].mxu0 }
 0x237   : > { %v4601_v62 = vpack.c.bf16 %v3957_v53, %v3957_v53  ;;  %v3958_v19 = vmul.f32 1.4142135, %v3922_v60  ;;  %v3819_v24 = vadd.f32 %v5185_v59, %v6466_v1  ;;  %v3817_v45 = vadd.f32 %v5186_v13, %v6466_v1 }
 0x238   : > { %4140 = vst.msk [vmem:[%s6476_s12 + $0x78] sm:$0xf] %vm4109_vm11, %v4603_v27  ;;  %v4604_v30 = vpack.c.bf16 %v3960_v32, %v3960_v32  ;;  %v5188_v12 = vadd.f32 %v3730_v37, %v6598_v33  ;;  %v3820_v52 = vadd.f32 %v5187_v34, %v6466_v1 }
 0x239   : > { %4138 = vst.msk [vmem:[%s6476_s12 + $0x70] sm:$0xf] %vm4109_vm11, %v4601_v62  ;;  %v4602_v4 = vpack.c.bf16 %v3958_v19, %v3958_v19  ;;  %vm3855_vm9 = vcmp.ge.f32.partialorder %v3819_v24, 0.0  ;;  %v3891_v22 = vmul.f32 0.2, %v3819_v24  ;;  %vm3853_vm10 = vcmp.ge.f32.partialorder %v3817_v45, 0.0 }
 0x23a   : > { %4141 = vst.msk [vmem:[%s6476_s12 + $0x7c] sm:$0xf] %vm4109_vm11, %v4604_v30  ;;  %v3889_v15 = vmul.f32 0.2, %v3817_v45  ;;  %v3818_v47 = vadd.f32 %v5188_v12, %v6466_v1  ;;  %vm3856_vm12 = vcmp.ge.f32.partialorder %v3820_v52, 0.0 }
 0x23b   : > { %4139 = vst.msk [vmem:[%s6476_s12 + $0x74] sm:$0xf] %vm4109_vm11, %v4602_v4  ;;  %v3927_v61 = vsel %vm3855_vm9, %v3819_v24, %v3891_v22  ;;  %v3892_v7 = vmul.f32 0.2, %v3820_v52 }
 0x23c   : > { %v3963_v9 = vmul.f32 1.4142135, %v3927_v61  ;;  %v3925_v21 = vsel %vm3853_vm10, %v3817_v45, %v3889_v15  ;;  %vm3854_vm13 = vcmp.ge.f32.partialorder %v3818_v47, 0.0  ;;  %v3890_v29 = vmul.f32 0.2, %v3818_v47 }
 0x23d   : > { %v3961_v54 = vmul.f32 1.4142135, %v3925_v21  ;;  %v3928_v33 = vsel %vm3856_vm12, %v3820_v52, %v3892_v7 }
 0x23e   : > { %v4607_v5 = vpack.c.bf16 %v3963_v9, %v3963_v9  ;;  %v3964_v48 = vmul.f32 1.4142135, %v3928_v33  ;;  %v3926_v51 = vsel %vm3854_vm13, %v3818_v47, %v3890_v29 }
 0x23f   : > { %v4605_v41 = vpack.c.bf16 %v3961_v54, %v3961_v54  ;;  %v3962_v1 = vmul.f32 1.4142135, %v3926_v51 }
 0x240   : > { %4144 = vst.msk [vmem:[%s6476_s12 + $0x88] sm:$0xf] %vm4109_vm11, %v4607_v5  ;;  %v4608_v10 = vpack.c.bf16 %v3964_v48, %v3964_v48 }
 0x241   : > { %4142 = vst.msk [vmem:[%s6476_s12 + $0x80] sm:$0xf] %vm4109_vm11, %v4605_v41  ;;  %v4606_v49 = vpack.c.bf16 %v3962_v1, %v3962_v1 }
 0x242   : > { %4145 = vst.msk [vmem:[%s6476_s12 + $0x8c] sm:$0xf] %vm4109_vm11, %v4608_v10 }
 0x243   : > { %4143 = vst.msk [vmem:[%s6476_s12 + $0x84] sm:$0xf] %vm4109_vm11, %v4606_v49 }
 0x244 PF: > { %s13_s14 = sadd.s32 1, %s5581_s14   ;;  %s6655_s12 = smov %s5577_s13 }
 0x245   : > { %p10_p5 = scmp.ge.s32.totalorder %s13_s14, 4   ;;  %s6656_s13 = smov %s6658_s15 }
 0x247   :  { %12 = sbr.rel (!%p10_p5) target bundleno = 2 (0x2), region = 76 }

// kernel: discriminator_forward.14
= control target key start
LH: loop header
LB: loop body
LE: loop exit
PB: predicated region body
PF: predicated region fallthrough
CT: control target
= control target key end

     0   :  { %vm22_vm0 = vcmask 261120   ;;  %v607_v1 = vmov 0.0   ;;  %vm451_vm1 = vcmask 257024   ;;  %s872_s1 = inlined_call_operand.vmem [shape: bf16[32,32], index: 1, kind: input, shape index: {}]   ;;  %s873_s0 = inlined_call_operand.vmem [shape: bf16[128,32], index: 0, kind: input, shape index: {}]   ;;  %s874_s3 = inlined_call_operand.vmem [shape: bf16[128,32], index: 3, kind: input, shape index: {}]   ;;  %s875_s2 = inlined_call_operand.vmem [shape: f32[1,32], index: 2, kind: input, shape index: {}]   ;;  %s876_s4 = inlined_call_operand.vmem [shape: bf16[128,32], index: 4, kind: output, shape index: {}]  }
   0x1   :  { %v597_v0 = vld [vmem:[%s872_s1] sm:$0xff]   ;;  %25 = vst.msk [vmem:[#allocation2 + $0x10] sm:$0xff] %vm22_vm0, %v607_v1  ;;  %23 = vst.msk [vmem:[#allocation2] sm:$0xff] %vm22_vm0, %v607_v1  ;;  %v598_v2 = vld [vmem:[%s872_s1 + $0x8] sm:$0xff]  }
   0x2   :  { %24 = vst.msk [vmem:[#allocation2 + $0x8] sm:$0xff] %vm22_vm0, %v607_v1  ;;  %26 = vst.msk [vmem:[#allocation2 + $0x18] sm:$0xff] %vm22_vm0, %v607_v1  ;;  %572 = vmatprep.subr.bf16.mxu0 %v597_v0  ;;  %592 = vmatprep.subr.bf16.mxu1 %v597_v0  ;;  %v599_v3 = vld [vmem:[%s873_s0] sm:$0xff]   ;;  %v601_v5 = vld [vmem:[%s873_s0 + $0x8] sm:$0xff]  }
   0x3   :  { %27 = vst.msk [vmem:[#allocation2 + $0x20] sm:$0xff] %vm22_vm0, %v607_v1  ;;  %28 = vst.msk [vmem:[#allocation2 + $0x28] sm:$0xff] %vm22_vm0, %v607_v1  ;;  %573 = vmatpush3.bf16.msra.mxu0 %v597_v0  ;;  %594 = vmatpush3.bf16.msra.mxu1 %v597_v0  ;;  %v600_v4 = vld [vmem:[%s873_s0 + $0x20] sm:$0xff]   ;;  %v602_v6 = vld [vmem:[%s873_s0 + $0x28] sm:$0xff]  }
   0x4   :  { %29 = vst.msk [vmem:[#allocation2 + $0x30] sm:$0xff] %vm22_vm0, %v607_v1  ;;  %30 = vst.msk [vmem:[#allocation2 + $0x38] sm:$0xff] %vm22_vm0, %v607_v1  ;;  %574 = vmatprep.subr.bf16.mxu0 %v598_v2  ;;  %593 = vmatprep.subr.bf16.mxu1 %v598_v2  ;;  %v603_v7 = vld [vmem:[%s873_s0 + $0x10] sm:$0xff]   ;;  %v605_v9 = vld [vmem:[%s873_s0 + $0x18] sm:$0xff]  }
   0x5   :  { %31 = vst.msk [vmem:[#allocation2 + $0x40] sm:$0xff] %vm22_vm0, %v607_v1  ;;  %32 = vst.msk [vmem:[#allocation2 + $0x48] sm:$0xff] %vm22_vm0, %v607_v1  ;;  %576 = vmatprep.mubr.msk.bf16.mxu0 %vm22_vm0, %v599_v3  ;;  %584 = vmatprep.mubr.msk.bf16.mxu1 %vm22_vm0, %v600_v4  ;;  %v604_v8 = vld [vmem:[%s873_s0 + $0x30] sm:$0xff]   ;;  %v606_v10 = vld [vmem:[%s873_s0 + $0x38] sm:$0xff]  }
   0x6   :  { %33 = vst.msk [vmem:[#allocation2 + $0x50] sm:$0xff] %vm22_vm0, %v607_v1  ;;  %34 = vst.msk [vmem:[#allocation2 + $0x58] sm:$0xff] %vm22_vm0, %v607_v1  ;;  %v690_v25 = vld [vmem:[%s874_s3 + $0x8] sm:$0xff]   ;;  %v702_v31 = vld [vmem:[%s874_s3] sm:$0xff]  }
   0x7   :  { %35 = vst.msk [vmem:[#allocation2 + $0x60] sm:$0xff] %vm22_vm0, %v607_v1  ;;  %36 = vst.msk [vmem:[#allocation2 + $0x68] sm:$0xff] %vm22_vm0, %v607_v1  ;;  %575 = vmatpush3.bf16.msra.mxu0 %v598_v2  ;;  %595 = vmatpush3.bf16.msra.mxu1 %v598_v2  ;;  %v697_v30 = vld [vmem:[%s874_s3 + $0x28] sm:$0xff]   ;;  %v707_v32 = vld [vmem:[%s874_s3 + $0x20] sm:$0xff]   ;;  %v529_v43 = vunpack.c.l.bf16 %v690_v25  ;;  %v525_v45 = vunpack.c.l.bf16 %v702_v31  ;;  %v530_v49 = vunpack.c.h.bf16 %v690_v25  ;;  %v526_v51 = vunpack.c.h.bf16 %v702_v31 }
   0x8   :  { %37 = vst.msk [vmem:[#allocation2 + $0x70] sm:$0xff] %vm22_vm0, %v607_v1  ;;  %38 = vst.msk [vmem:[#allocation2 + $0x78] sm:$0xff] %vm22_vm0, %v607_v1  ;;  %v41_v11 = vld [vmem:[#allocation2 + $0x10] sm:$0xff]  ;;  %v39_v13 = vld [vmem:[#allocation2] sm:$0xff]  ;;  %v545_v44 = vunpack.c.l.bf16 %v697_v30  ;;  %v541_v46 = vunpack.c.l.bf16 %v707_v32  ;;  %v546_v50 = vunpack.c.h.bf16 %v697_v30  ;;  %v542_v52 = vunpack.c.h.bf16 %v707_v32 }
   0x9   :  { %v42_v17 = vld [vmem:[#allocation2 + $0x18] sm:$0xff]  ;;  %v40_v23 = vld [vmem:[#allocation2 + $0x8] sm:$0xff]  ;;  %v726_v41 = vld [vmem:[%s874_s3 + $0x10] sm:$0xff]  }
   0xa   :  { %577 = vmatmul.mubr.msk.bf16.vlgmr.msra.gmra.mrb[0].mxu0 %vm22_vm0, %v601_v5  ;;  %585 = vmatmul.mubr.msk.bf16.vlgmr.msra.gmra.mrb[0].mxu1 %vm22_vm0, %v602_v6  ;;  %v714_v39 = vld [vmem:[%s874_s3 + $0x18] sm:$0xff]   ;;  %v731_v42 = vld [vmem:[%s874_s3 + $0x30] sm:$0xff]   ;;  %v43_v53 = vld [vmem:[#allocation2 + $0x20] sm:$0xff]  ;;  %v533_v60 = vunpack.c.l.bf16 %v726_v41 }
   0xb   :  { %580 = vmatprep.mubr.msk.bf16.mxu0 %vm22_vm0, %v603_v7  ;;  %588 = vmatprep.mubr.msk.bf16.mxu1 %vm22_vm0, %v604_v8  ;;  %v721_v40 = vld [vmem:[%s874_s3 + $0x38] sm:$0xff]   ;;  %v45_v47 = vld [vmem:[#allocation2 + $0x30] sm:$0xff]  ;;  %v746_v55 = vld [vmem:[%s875_s2] ss:$0 sm:$0xff]  ;;  %v537_v57 = vunpack.c.l.bf16 %v714_v39  ;;  %v549_v61 = vunpack.c.l.bf16 %v731_v42  ;;  %v538_v4 = vunpack.c.h.bf16 %v714_v39 }
   0xc   :  { %v47_v14 = vld [vmem:[#allocation2 + $0x40] sm:$0xff]  ;;  %v48_v24 = vld [vmem:[#allocation2 + $0x48] sm:$0xff]  ;;  %v553_v59 = vunpack.c.l.bf16 %v721_v40  ;;  %v46_v62 = vld [vmem:[#allocation2 + $0x38] sm:$0xff]  ;;  %v554_v5 = vunpack.c.h.bf16 %v721_v40 }
   0xd   :  { %v49_v12 = vld [vmem:[#allocation2 + $0x50] sm:$0xff]  ;;  %v50_v18 = vld [vmem:[#allocation2 + $0x58] sm:$0xff]  ;;  %v44_v6 = vld [vmem:[#allocation2 + $0x28] sm:$0xff] }
   0xe   :  { %v51_v54 = vld [vmem:[#allocation2 + $0x60] sm:$0xff]  ;;  %v52_v7 = vld [vmem:[#allocation2 + $0x68] sm:$0xff] }
   0xf   :  { %v53_v48 = vld [vmem:[#allocation2 + $0x70] sm:$0xff]  ;;  %v54_v63 = vld [vmem:[#allocation2 + $0x78] sm:$0xff] }
  0x12   :  { %581 = vmatmul.mubr.msk.bf16.gmra.mrb[4].mxu0 %vm22_vm0, %v605_v9  ;;  %589 = vmatmul.mubr.msk.bf16.gmra.mrb[4].mxu1 %vm22_vm0, %v606_v10 }
  0xdd   :  { %v578_v15 = vpop.f32.mrb[0].mxu0  ;;  %v586_v16 = vpop.f32.mrb[0].mxu1 }
  0xde   :  { %v251_v19 = vadd.f32 %v578_v15, %v41_v11  ;;  %v259_v20 = vadd.f32 %v586_v16, %v49_v12  ;;  %v186_v21 = vpop.f32.mrb[1].mxu0  ;;  %v218_v22 = vpop.f32.mrb[1].mxu1  ;;  %v550_v15 = vunpack.c.h.bf16 %v731_v42 }
  0xdf   :  { %v249_v26 = vadd.f32 %v186_v21, %v39_v13  ;;  %v257_v27 = vadd.f32 %v218_v22, %v47_v14  ;;  %v579_v28 = vpop.f32.mrb[2].mxu0  ;;  %v587_v29 = vpop.f32.mrb[2].mxu1  ;;  %v534_v14 = vunpack.c.h.bf16 %v726_v41 }
  0xe0   :  { %267 = vst.msk [vmem:[#allocation2 + $0x10] sm:$0xff] %vm22_vm0, %v251_v19  ;;  %275 = vst.msk [vmem:[#allocation2 + $0x50] sm:$0xff] %vm22_vm0, %v259_v20  ;;  %v252_v33 = vadd.f32 %v579_v28, %v42_v17  ;;  %v260_v34 = vadd.f32 %v587_v29, %v50_v18  ;;  %v189_v35 = vpop.f32.mrb[3].mxu0  ;;  %v221_v36 = vpop.f32.mrb[3].mxu1 }
  0xe1   :  { %265 = vst.msk [vmem:[#allocation2] sm:$0xff] %vm22_vm0, %v249_v26  ;;  %273 = vst.msk [vmem:[#allocation2 + $0x40] sm:$0xff] %vm22_vm0, %v257_v27  ;;  %v250_v37 = vadd.f32 %v189_v35, %v40_v23  ;;  %v258_v38 = vadd.f32 %v221_v36, %v48_v24 }
  0xe2   :  { %268 = vst.msk [vmem:[#allocation2 + $0x18] sm:$0xff] %vm22_vm0, %v252_v33  ;;  %276 = vst.msk [vmem:[#allocation2 + $0x58] sm:$0xff] %vm22_vm0, %v260_v34 }
  0xe3   :  { %266 = vst.msk [vmem:[#allocation2 + $0x8] sm:$0xff] %vm22_vm0, %v250_v37  ;;  %274 = vst.msk [vmem:[#allocation2 + $0x48] sm:$0xff] %vm22_vm0, %v258_v38 }
  0xe5   :  { %v582_v56 = vpop.f32.mrb[4].mxu0  ;;  %v590_v58 = vpop.f32.mrb[4].mxu1 }
  0xe6   :  { %v255_v0 = vadd.f32 %v582_v56, %v45_v47  ;;  %v263_v1 = vadd.f32 %v590_v58, %v53_v48  ;;  %v202_v2 = vpop.f32.mrb[5].mxu0  ;;  %v234_v3 = vpop.f32.mrb[5].mxu1 }
  0xe7   :  { %v286_v8 = vld [vmem:[#allocation2 + $0x10] sm:$0xff]  ;;  %v253_v10 = vadd.f32 %v202_v2, %v43_v53  ;;  %v261_v11 = vadd.f32 %v234_v3, %v51_v54  ;;  %v583_v12 = vpop.f32.mrb[6].mxu0  ;;  %v591_v13 = vpop.f32.mrb[6].mxu1 }
  0xe8   :  { %v294_v9 = vld [vmem:[#allocation2 + $0x50] sm:$0xff]  ;;  %v309_v16 = vadd.f32 %v746_v55, %v286_v8  ;;  %v284_v18 = vld [vmem:[#allocation2] sm:$0xff]  ;;  %271 = vst.msk [vmem:[#allocation2 + $0x30] sm:$0xff] %vm22_vm0, %v255_v0  ;;  %279 = vst.msk [vmem:[#allocation2 + $0x70] sm:$0xff] %vm22_vm0, %v263_v1  ;;  %v256_v20 = vadd.f32 %v583_v12, %v46_v62  ;;  %v264_v21 = vadd.f32 %v591_v13, %v54_v63  ;;  %v205_v22 = vpop.f32.mrb[7].mxu0  ;;  %v237_v23 = vpop.f32.mrb[7].mxu1 }
  0xe9   :  { %v317_v17 = vadd.f32 %v746_v55, %v294_v9  ;;  %v292_v19 = vld [vmem:[#allocation2 + $0x40] sm:$0xff]  ;;  %v307_v24 = vadd.f32 %v746_v55, %v284_v18  ;;  %v287_v27 = vld [vmem:[#allocation2 + $0x18] sm:$0xff]  ;;  %269 = vst.msk [vmem:[#allocation2 + $0x20] sm:$0xff] %vm22_vm0, %v253_v10  ;;  %277 = vst.msk [vmem:[#allocation2 + $0x60] sm:$0xff] %vm22_vm0, %v261_v11  ;;  %v254_v29 = vadd.f32 %v205_v22, %v44_v6 }
  0xea   :  { %v315_v26 = vadd.f32 %v746_v55, %v292_v19  ;;  %v295_v28 = vld [vmem:[#allocation2 + $0x58] sm:$0xff]  ;;  %v262_v33 = vadd.f32 %v237_v23, %v52_v7  ;;  %v357_v34 = vadd.f32 %v529_v43, %v309_v16  ;;  %v310_v36 = vadd.f32 %v746_v55, %v287_v27  ;;  %v285_v38 = vld [vmem:[#allocation2 + $0x8] sm:$0xff]  ;;  %272 = vst.msk [vmem:[#allocation2 + $0x38] sm:$0xff] %vm22_vm0, %v256_v20 }
  0xeb   :  { %v365_v35 = vadd.f32 %v545_v44, %v317_v17  ;;  %v318_v37 = vadd.f32 %v746_v55, %v295_v28  ;;  %v293_v47 = vld [vmem:[#allocation2 + $0x48] sm:$0xff]  ;;  %280 = vst.msk [vmem:[#allocation2 + $0x78] sm:$0xff] %vm22_vm0, %v264_v21  ;;  %v355_v48 = vadd.f32 %v525_v45, %v307_v24  ;;  %v308_v54 = vadd.f32 %v746_v55, %v285_v38 }
  0xec   :  { %v363_v53 = vadd.f32 %v541_v46, %v315_v26  ;;  %v316_v43 = vadd.f32 %v746_v55, %v293_v47  ;;  %270 = vst.msk [vmem:[#allocation2 + $0x28] sm:$0xff] %vm22_vm0, %v254_v29  ;;  %278 = vst.msk [vmem:[#allocation2 + $0x68] sm:$0xff] %vm22_vm0, %v262_v33  ;;  %v373_v44 = vmul.f32 0.70710677, %v357_v34  ;;  %v358_v58 = vadd.f32 %v530_v49, %v310_v36 }
  0xed   :  { %v381_v56 = vmul.f32 0.70710677, %v365_v35  ;;  %v366_v62 = vadd.f32 %v546_v50, %v318_v37  ;;  %v371_v45 = vmul.f32 0.70710677, %v355_v48  ;;  %v356_v46 = vadd.f32 %v526_v51, %v308_v54 }
  0xee   :  { %v379_v63 = vmul.f32 0.70710677, %v363_v53  ;;  %v364_v0 = vadd.f32 %v542_v52, %v316_v43  ;;  %v509_v1 = vpack.c.bf16 %v373_v44, %v373_v44  ;;  %v374_v3 = vmul.f32 0.70710677, %v358_v58 }
  0xef   :  { %v517_v2 = vpack.c.bf16 %v381_v56, %v381_v56  ;;  %v382_v6 = vmul.f32 0.70710677, %v366_v62  ;;  %v507_v7 = vpack.c.bf16 %v371_v45, %v371_v45  ;;  %v372_v9 = vmul.f32 0.70710677, %v356_v46  ;;  %v290_v49 = vld [vmem:[#allocation2 + $0x30] sm:$0xff] }
  0xf0   :  { %v515_v8 = vpack.c.bf16 %v379_v63, %v379_v63  ;;  %v380_v25 = vmul.f32 0.70710677, %v364_v0  ;;  %v298_v10 = vld [vmem:[#allocation2 + $0x70] sm:$0xff]  ;;  %454 = vst.msk [vmem:[%s876_s4 + $0x8] sm:$0xf] %vm451_vm1, %v509_v1  ;;  %v510_v30 = vpack.c.bf16 %v374_v3, %v374_v3  ;;  %v313_v32 = vadd.f32 %v746_v55, %v290_v49  ;;  %v288_v51 = vld [vmem:[#allocation2 + $0x20] sm:$0xff] }
  0xf1   :  { %462 = vst.msk [vmem:[%s876_s4 + $0x28] sm:$0xf] %vm451_vm1, %v517_v2  ;;  %v518_v31 = vpack.c.bf16 %v382_v6, %v382_v6  ;;  %v321_v50 = vadd.f32 %v746_v55, %v298_v10  ;;  %v296_v52 = vld [vmem:[#allocation2 + $0x60] sm:$0xff]  ;;  %452 = vst.msk [vmem:[%s876_s4] sm:$0xf] %vm451_vm1, %v507_v7  ;;  %v508_v11 = vpack.c.bf16 %v372_v9, %v372_v9  ;;  %v291_v17 = vld [vmem:[#allocation2 + $0x38] sm:$0xff] }
  0xf2   :  { %460 = vst.msk [vmem:[%s876_s4 + $0x20] sm:$0xf] %vm451_vm1, %v515_v8  ;;  %v516_v12 = vpack.c.bf16 %v380_v25, %v380_v25  ;;  %v311_v13 = vadd.f32 %v746_v55, %v288_v51  ;;  %v319_v16 = vadd.f32 %v746_v55, %v296_v52  ;;  %v299_v18 = vld [vmem:[#allocation2 + $0x78] sm:$0xff]  ;;  %455 = vst.msk [vmem:[%s876_s4 + $0xc] sm:$0xf] %vm451_vm1, %v510_v30 }
  0xf3   :  { %463 = vst.msk [vmem:[%s876_s4 + $0x2c] sm:$0xf] %vm451_vm1, %v518_v31  ;;  %v361_v19 = vadd.f32 %v537_v57, %v313_v32  ;;  %v369_v20 = vadd.f32 %v553_v59, %v321_v50  ;;  %v314_v21 = vadd.f32 %v746_v55, %v291_v17  ;;  %v322_v22 = vadd.f32 %v746_v55, %v299_v18  ;;  %v289_v23 = vld [vmem:[#allocation2 + $0x28] sm:$0xff] }
  0xf4   :  { %v297_v24 = vld [vmem:[#allocation2 + $0x68] sm:$0xff]  ;;  %453 = vst.msk [vmem:[%s876_s4 + $0x4] sm:$0xf] %vm451_vm1, %v508_v11  ;;  %461 = vst.msk [vmem:[%s876_s4 + $0x24] sm:$0xf] %vm451_vm1, %v516_v12  ;;  %v359_v57 = vadd.f32 %v533_v60, %v311_v13  ;;  %v367_v59 = vadd.f32 %v549_v61, %v319_v16  ;;  %v312_v26 = vadd.f32 %v746_v55, %v289_v23 }
  0xf5   :  { %v320_v27 = vadd.f32 %v746_v55, %v297_v24  ;;  %v377_v28 = vmul.f32 0.70710677, %v361_v19  ;;  %v385_v29 = vmul.f32 0.70710677, %v369_v20  ;;  %v362_v33 = vadd.f32 %v538_v4, %v314_v21 }
  0xf6   :  { %v370_v34 = vadd.f32 %v554_v5, %v322_v22  ;;  %v375_v35 = vmul.f32 0.70710677, %v359_v57  ;;  %v383_v36 = vmul.f32 0.70710677, %v367_v59  ;;  %v360_v60 = vadd.f32 %v534_v14, %v312_v26 }
  0xf7   :  { %v368_v61 = vadd.f32 %v550_v15, %v320_v27  ;;  %v513_v37 = vpack.c.bf16 %v377_v28, %v377_v28  ;;  %v521_v38 = vpack.c.bf16 %v385_v29, %v385_v29  ;;  %v378_v47 = vmul.f32 0.70710677, %v362_v33 }
  0xf8   :  { %v386_v55 = vmul.f32 0.70710677, %v370_v34  ;;  %v511_v48 = vpack.c.bf16 %v375_v35, %v375_v35  ;;  %v519_v53 = vpack.c.bf16 %v383_v36, %v383_v36  ;;  %v376_v54 = vmul.f32 0.70710677, %v360_v60 }
  0xf9   :  { %v384_v39 = vmul.f32 0.70710677, %v368_v61  ;;  %458 = vst.msk [vmem:[%s876_s4 + $0x18] sm:$0xf] %vm451_vm1, %v513_v37  ;;  %466 = vst.msk [vmem:[%s876_s4 + $0x38] sm:$0xf] %vm451_vm1, %v521_v38  ;;  %v514_v40 = vpack.c.bf16 %v378_v47, %v378_v47 }
  0xfa   :  { %v522_v41 = vpack.c.bf16 %v386_v55, %v386_v55  ;;  %456 = vst.msk [vmem:[%s876_s4 + $0x10] sm:$0xf] %vm451_vm1, %v511_v48  ;;  %464 = vst.msk [vmem:[%s876_s4 + $0x30] sm:$0xf] %vm451_vm1, %v519_v53  ;;  %v512_v42 = vpack.c.bf16 %v376_v54, %v376_v54 }
  0xfb   :  { %v520_v4 = vpack.c.bf16 %v384_v39, %v384_v39  ;;  %459 = vst.msk [vmem:[%s876_s4 + $0x1c] sm:$0xf] %vm451_vm1, %v514_v40 }
  0xfc   :  { %467 = vst.msk [vmem:[%s876_s4 + $0x3c] sm:$0xf] %vm451_vm1, %v522_v41  ;;  %457 = vst.msk [vmem:[%s876_s4 + $0x14] sm:$0xf] %vm451_vm1, %v512_v42 }
  0xfd   :  { %465 = vst.msk [vmem:[%s876_s4 + $0x34] sm:$0xf] %vm451_vm1, %v520_v4 }

// kernel: discriminator_forward.13
= control target key start
LH: loop header
LB: loop body
LE: loop exit
PB: predicated region body
PF: predicated region fallthrough
CT: control target
= control target key end

     0   :  { %s2497_s12 = smov 0   ;;  %s2499_s13 = smov 0   ;;  %s2944_s0 = inlined_call_operand.vmem [shape: bf16[2,4,88,32], index: 0, kind: input, shape index: {}]   ;;  %s2945_s1 = inlined_call_operand.vmem [shape: bf16[9,32,32], index: 1, kind: input, shape index: {}]   ;;  %s2946_s2 = inlined_call_operand.vmem [shape: f32[1,32], index: 2, kind: input, shape index: {}]   ;;  %s2947_s3 = inlined_call_operand.vmem [shape: bf16[2,72,32], index: 3, kind: output, shape index: {}]  }
   0x1   :  { %s2501_s14 = smov 0  }
   0x2 LB: > { %s25_s15 = sadd.s32 1, %s2469_s13  ;;  %p1874_p0 = scmp.ge.s32.totalorder %s2473_s14, 1  ;;  %s2473_s14 = sphi %s2501_s14, %s13_s14   ;;  %s2469_s13 = sphi %s2499_s13, %s2949_s13   ;;  %s2465_s12 = sphi %s2497_s12, %s2948_s12  }
   0x3   : > { %p27_p1 = scmp.ge.s32.totalorder %s25_s15, 2  ;;  %p168_p2 = scmp.lt.s32.totalorder %s2473_s14, 3 }
   0x5   : > { %s2951_s15 = smov (%p27_p1, %s25_s15), 0  ;;  %p169_p3 = pnand %p1874_p0, %p168_p2 }
   0x6   : > { %v2392_v0 = vld [vmem:[%s2945_s1 + $0x10] sm:$0xff] (!%p169_p3)   ;;  %v2475_v1 = vmov (!%p169_p3), 0.0   ;;  %v2393_v2 = vld [vmem:[%s2945_s1 + $0x18] sm:$0xff] (!%p169_p3)   ;;  %p202_p4 = scmp.lt.s32.totalorder (!%p169_p3), %s2465_s12, 1  ;;  %vm2476_vm0 = vmmov (!%p169_p3), 0   ;;  %vm286_vm1 = vcmask (!%p169_p3), 261120  }
   0x7   : > { %172 = sbr.rel (%p169_p3) target bundleno = 419 (0x1a3), region = 32  ;;  %2144 = vmatprep.subr.bf16.mxu0 (!%p169_p3), %v2475_v1  ;;  %2360 = vmatprep.subr.bf16.mxu1 (!%p169_p3), %v2475_v1  ;;  %v2396_v3 = vld [vmem:[%s2945_s1 + $0x20] sm:$0xff] (!%p169_p3)   ;;  %v2401_v7 = vld [vmem:[%s2945_s1 + $0x28] sm:$0xff] (!%p169_p3)   ;;  %v2404_v19 = vld [vmem:[%s2945_s1 + $0x30] sm:$0xff] (!%p169_p3)   ;;  %vm536_vm2 = vsmask.f32 (!%p169_p3), 7424 }
   0x8   : > { %2145 = vmatpush3.bf16.msra.mxu0 (!%p169_p3), %v2392_v0  ;;  %2362 = vmatpush3.bf16.msra.mxu1 (!%p169_p3), %v2392_v0  ;;  %v2397_v4 = vld [vmem:[%s2945_s1] sm:$0xff] (!%p169_p3)   ;;  %v2400_v8 = vld [vmem:[%s2945_s1 + $0x8] sm:$0xff] (!%p169_p3)   ;;  %v2413_v23 = vld [vmem:[%s2945_s1 + $0x38] sm:$0xff] (!%p169_p3)   ;;  %vm1546_vm3 = vcmask (!%p169_p3), 1046528   ;;  %vm1753_vm6 = vcmask (!%p169_p3), 257024  }
   0x9   : > { %2146 = vmatprep.subr.bf16.mxu0 (!%p169_p3), %v2475_v1  ;;  %2361 = vmatprep.subr.bf16.mxu1 (!%p169_p3), %v2475_v1  ;;  %v2408_v24 = vld [vmem:[%s2945_s1 + $0x40] sm:$0xff] (!%p169_p3)   ;;  %v2414_v31 = vld [vmem:[%s2945_s1 + $0x48] sm:$0xff] (!%p169_p3)  }
   0xa   : > { %2148 = vmatprep.mubr.msk.bf16.mxu0 (!%p169_p3), %vm2476_vm0, %v2475_v1  ;;  %2160 = vmatprep.mubr.msk.bf16.mxu1 (!%p169_p3), %vm2476_vm0, %v2475_v1 }
   0xc   : > { %2147 = vmatpush3.bf16.msra.mxu0 (!%p169_p3), %v2393_v2  ;;  %2363 = vmatpush3.bf16.msra.mxu1 (!%p169_p3), %v2393_v2 }
   0xd   : > { %2192 = vmatprep.subr.bf16.mxu0 (!%p169_p3), %v2475_v1  ;;  %2168 = vmatprep.subr.bf16.mxu1 (!%p169_p3), %v2475_v1 }
   0xe   : > { %s2953_s12 = smov (!%p202_p4, %s2465_s12), 1 }
   0xf   : > { %s2364_s20 = smul.u32 176, %s2953_s12 }
  0x10   : > { %s2365_s8 = smul.u32 36, %s2953_s12 }
  0x11   : > { %s2540_s25 = scalar_lea.vmem %s2944_s0, %s2364_s20 }
  0x12   : > { %v2394_v5 = vld [vmem:[%s2540_s25 + $0x2c] sm:$0xff]   ;;  %v2395_v6 = vld [vmem:[%s2540_s25 + $0x44] sm:$0xff]   ;;  %v2398_v9 = vld [vmem:[%s2540_s25 + $0x34] sm:$0xff]   ;;  %s2903_s11 = scalar_lea.vmem %s2947_s3, %s2365_s8 }
  0x13   : > { %2149 = vmatmul.mubr.msk.bf16.vlgmr.msra.gmra.mrb[0].mxu0 %vm286_vm1, %v2394_v5  ;;  %2161 = vmatmul.mubr.msk.bf16.vlgmr.msra.gmra.mrb[0].mxu1 %vm286_vm1, %v2395_v6  ;;  %v2399_v10 = vld [vmem:[%s2540_s25 + $0x4c] ss:$0 sps:$4 sm:$0xff]   ;;  %v2406_v11 = vld [vmem:[%s2540_s25] sm:$0xff]   ;;  %v2410_v21 = vld [vmem:[%s2540_s25 + $0x10] sm:$0xff]  }
  0x14   : > { %2193 = vmatpush3.bf16.msra.mxu0 %v2396_v3  ;;  %2152 = vmatprep.mubr.msk.bf16.mxu0 %vm2476_vm0, %v2475_v1  ;;  %v2407_v12 = vld [vmem:[%s2540_s25 + $0x8] sm:$0xff]   ;;  %v540_v13 = vshll.u32 %v2406_v11, 16  ;;  %v2402_v14 = vld [vmem:[%s2540_s25 + $0x3c] sm:$0xff]   ;;  %v538_v17 = vshrl.u32 %v2406_v11, 16  ;;  %v553_v25 = vshll.u32 %v2410_v21, 16  ;;  %v2409_v35 = vld [vmem:[%s2540_s25 + $0x10] sm:$0xff]  }
  0x15   : > { %2164 = vmatprep.mubr.msk.bf16.mxu1 %vm2476_vm0, %v2475_v1  ;;  %2169 = vmatpush3.bf16.msra.mxu1 %v2397_v4  ;;  %v2403_v15 = vld [vmem:[%s2540_s25] sm:$0xff]   ;;  %v545_v16 = vshll.u32 %v2407_v12, 16  ;;  %v2405_v26 = vld [vmem:[%s2540_s25 + $0x8] sm:$0xff]   ;;  %v549_v28 = vshrl.u32 %v2407_v12, 16  ;;  %v2412_v29 = vld [vmem:[%s2540_s25 + $0x18] sm:$0xff]   ;;  %v557_v36 = vshrl.u32 %v2410_v21, 16 }
  0x16   : > { %2194 = vmatprep.subr.bf16.mxu0 %v2475_v1  ;;  %2170 = vmatprep.subr.bf16.mxu1 %v2475_v1  ;;  %v542_v18 = vrot.slane %v540_v13, 1  ;;  %v555_v30 = vrot.slane %v553_v25, 1  ;;  %v2602_v33 = vld [vmem:[%s2540_s25 + $0x20] sm:$0x1f]   ;;  %v561_v34 = vshll.u32 %v2412_v29, 16  ;;  %v2431_v39 = vld [vmem:[%s2540_s25 + $0x58] sm:$0xff]  }
  0x17   : > { %v547_v20 = vrot.slane %v545_v16, 1  ;;  %v569_v38 = vshll.u32 %v2602_v33, 16  ;;  %v2432_v40 = vld [vmem:[%s2540_s25 + $0x60] sm:$0xff]   ;;  %v565_v42 = vshrl.u32 %v2412_v29, 16  ;;  %v1017_v43 = vshrl.u32 %v2431_v39, 16  ;;  %v2434_v46 = vld [vmem:[%s2540_s25 + $0x68] sm:$0xff]  }
  0x18   : > { %2195 = vmatpush3.bf16.msra.mxu0 %v2401_v7  ;;  %v543_v22 = vor.u32 %v542_v18, %v538_v17  ;;  %v563_v41 = vrot.slane %v561_v34, 1  ;;  %v1019_v44 = vshll.u32 %v2431_v39, 16  ;;  %v1024_v45 = vshll.u32 %v2432_v40, 16  ;;  %v1163_v49 = vld [vmem:[%s2540_s25 + $0x4] sm:$0xf]  ;;  %v2619_v50 = vld [vmem:[%s2540_s25 + $0xc] sm:$0xff]  }
  0x19   : > { %2240 = vmatprep.subr.bf16.mxu0 %v2475_v1  ;;  %2171 = vmatpush3.bf16.msra.mxu1 %v2400_v8  ;;  %v551_v32 = vor.u32 %v549_v28, %v547_v20  ;;  %v559_v47 = vor.u32 %v557_v36, %v555_v30  ;;  %v1028_v48 = vshrl.u32 %v2432_v40, 16  ;;  %v2624_v51 = vrot.slane %v569_v38, 1  ;;  %v2627_v55 = vld [vmem:[%s2540_s25 + $0x8] sm:$0xf]  ;;  %v2438_v58 = vld [vmem:[%s2540_s25 + $0x70] sm:$0xff]   ;;  %v2411_v59 = vld [vmem:[%s2540_s25 + $0x18] sm:$0xff]  }
  0x1a   : > { %2216 = vmatprep.subr.bf16.mxu1 %v2475_v1  ;;  %v548_v27 = vsel %vm536_vm2, %v543_v22, %v547_v20  ;;  %v1021_v52 = vrot.slane %v1019_v44, 1  ;;  %v1026_v53 = vrot.slane %v1024_v45, 1  ;;  %v1032_v54 = vshll.u32 %v2434_v46, 16  ;;  %v2643_v11 = vld [vmem:[%s2540_s25 + $0x14] sm:$0xff]   ;;  %v2650_v16 = vld [vmem:[%s2540_s25 + $0x1c] sm:$0xff]  }
  0x1b   : > { %2153 = vmatmul.mubr.msk.bf16.gmra.mrb[4].mxu0 %vm286_vm1, %v2398_v9  ;;  %2165 = vmatmul.mubr.msk.bf16.gmra.mrb[4].mxu1 %vm286_vm1, %v2399_v10  ;;  %v556_v37 = vsel %vm536_vm2, %v551_v32, %v555_v30  ;;  %v2010_v56 = vcombine.low %v1163_v49, %v2627_v55  ;;  %v1211_v57 = vshll.u32 %v2619_v50, 16  ;;  %v1036_v63 = vshrl.u32 %v2434_v46, 16  ;;  %v2675_v32 = vld [vmem:[%s2540_s25 + $0x24] sm:$0x1f]  }
  0x1c   : > { %2156 = vmatprep.mubr.msk.bf16.mxu0 %vm2476_vm0, %v2475_v1  ;;  %2172 = vmatprep.mubr.msk.bf16.mxu1 %vm2476_vm0, %v2475_v1  ;;  %v1022_v60 = vor.u32 %v1021_v52, %v1017_v43  ;;  %v1030_v61 = vor.u32 %v1028_v48, %v1026_v53  ;;  %v1034_v62 = vrot.slane %v1032_v54, 1  ;;  %v1040_v4 = vshll.u32 %v2438_v58, 16  ;;  %v2447_v43 = vld [vmem:[%s2540_s25 + $0x40] sm:$0xff]  }
  0x1d   : > { %v1204_v0 = vshrl.u32 %v2010_v56, 16  ;;  %v1206_v2 = vshll.u32 %v2010_v56, 16  ;;  %v1213_v3 = vrot.slane %v1211_v57, 1  ;;  %v564_v5 = vsel %vm536_vm2, %v559_v47, %v563_v41  ;;  %v2449_v56 = vld [vmem:[%s2540_s25 + $0x48] sm:$0xff]  }
  0x1e   : > { %v2637_v6 = vsel %vm536_vm2, %v1022_v60, %v1026_v53  ;;  %v2640_v7 = vsel %vm536_vm2, %v1030_v61, %v1034_v62  ;;  %v1038_v8 = vor.u32 %v1036_v63, %v1034_v62  ;;  %v1042_v10 = vrot.slane %v1040_v4, 1  ;;  %v2707_v62 = vld [vmem:[%s2540_s25 + $0x50] sm:$0x1f]  }
  0x1f   : > { %v1208_v9 = vrot.slane %v1206_v2, 1  ;;  %v1215_v12 = vshrl.u32 %v2619_v50, 16  ;;  %v567_v13 = vor.u32 %v565_v42, %v563_v41  ;;  %v1219_v20 = vshll.u32 %v2643_v11, 16  ;;  %v2446_v42 = vld [vmem:[%s2540_s25 + $0x38] sm:$0xff]   ;;  %v2418_v4 = vld [vmem:[%s2945_s1 + $0x50] sm:$0xff]  }
  0x20   : > { %v2654_v18 = vsel %vm536_vm2, %v1038_v8, %v1042_v10  ;;  %v1231_v34 = vshrl.u32 %v2650_v16, 16  ;;  %v573_v38 = vshrl.u32 %v2602_v33, 16  ;;  %v1235_v41 = vshll.u32 %v2675_v32, 16 }
  0x21   : > { %v1209_v17 = vor.u32 %v1208_v9, %v1204_v0  ;;  %v572_v36 = vsel %vm536_vm2, %v567_v13, %v2624_v51  ;;  %v1398_v47 = vshll.u32 %v2446_v42, 16  ;;  %v1402_v48 = vshrl.u32 %v2446_v42, 16  ;;  %v2417_v0 = vld [vmem:[%s2540_s25 + $0x58] sm:$0xff]  }
  0x22   : > { %v2693_v46 = vrot.slane %v1235_v41, 1  ;;  %v1406_v49 = vshll.u32 %v2447_v43, 16  ;;  %v1414_v61 = vshll.u32 %v2449_v56, 16  ;;  %v1418_v63 = vshrl.u32 %v2449_v56, 16  ;;  %v2426_v13 = vld [vmem:[%s2945_s1 + $0x58] sm:$0xff]  }
  0x23   : > { %2157 = vmatmul.mubr.msk.bf16.gmra.mrb[8].mxu0 %vm286_vm1, %v2402_v14  ;;  %2173 = vmatmul.mubr.msk.bf16.vlgmr.msra.gmra.mrb[8].mxu1 %vm286_vm1, %v2403_v15  ;;  %v2647_v14 = vld [vmem:[%s2540_s25 + $0x78] sm:$0x1f]   ;;  %v1044_v15 = vshrl.u32 %v2438_v58, 16  ;;  %v2666_v25 = vsel %vm536_vm2, %v1209_v17, %v1213_v3  ;;  %v1400_v53 = vrot.slane %v1398_v47, 1  ;;  %v1410_v58 = vshrl.u32 %v2447_v43, 16  ;;  %v2420_v17 = vld [vmem:[%s2540_s25 + $0x84] sm:$0xff]  }
  0x24   : > { %2196 = vmatprep.mubr.msk.bf16.mxu0 %vm2476_vm0, %v2475_v1  ;;  %2176 = vmatprep.mubr.msk.bf16.mxu1 %vm2476_vm0, %v2475_v1  ;;  %v1048_v22 = vshll.u32 %v2647_v14, 16  ;;  %v1408_v54 = vrot.slane %v1406_v49, 1  ;;  %v1422_v8 = vshll.u32 %v2707_v62, 16  ;;  %v1426_v41 = vshrl.u32 %v2707_v62, 16 }
  0x25   : > { %2217 = vmatpush3.bf16.msra.mxu1 %v2404_v19  ;;  %v1217_v19 = vor.u32 %v1215_v12, %v1213_v3  ;;  %v1046_v21 = vor.u32 %v1044_v15, %v1042_v10  ;;  %v1404_v60 = vor.u32 %v1402_v48, %v1400_v53  ;;  %v1554_v42 = vrot.slane %v2675_v32, 1 }
  0x26   : > { %2218 = vmatprep.subr.bf16.mxu1 %v2475_v1  ;;  %v2669_v28 = vrot.slane %v1048_v22, 1  ;;  %v1412_v3 = vor.u32 %v1410_v58, %v1408_v54  ;;  %v2724_v12 = vrot.slane %v1422_v8, 1  ;;  %v2423_v22 = vld [vmem:[%s2540_s25 + $0x8c] sm:$0xff]  }
  0x29   : > { %2219 = vmatpush3.bf16.msra.mxu1 %v2413_v23  ;;  %v1223_v23 = vshrl.u32 %v2643_v11, 16 }
  0x2a   : > { %2264 = vmatprep.subr.bf16.mxu1 %v2475_v1 }
  0x2b   : > { %2197 = vmatmul.mubr.msk.bf16.vlgmr.msra.gmra.mrb[12].mxu0 %vm286_vm1, %v548_v27  ;;  %2177 = vmatmul.mubr.msk.bf16.gmra.mrb[12].mxu1 %vm286_vm1, %v2405_v26  ;;  %v1221_v26 = vrot.slane %v1219_v20, 1  ;;  %v2415_v27 = vld [vmem:[%s2540_s25 + $0x20] ss:$0 sps:$4 sm:$0xff]  }
  0x2c   : > { %2241 = vmatpush3.bf16.msra.mxu0 %v2408_v24  ;;  %2180 = vmatprep.mubr.msk.bf16.mxu1 %vm2476_vm0, %v2475_v1  ;;  %v1227_v24 = vshll.u32 %v2650_v16, 16  ;;  %v2421_v20 = vld [vmem:[%s2945_s1 + $0x60] sm:$0xff]  }
  0x2d   : > { %2200 = vmatprep.mubr.msk.bf16.mxu0 %vm2476_vm0, %v2475_v1  ;;  %2242 = vmatprep.subr.bf16.mxu0 %v2475_v1  ;;  %v2672_v30 = vsel %vm536_vm2, %v1217_v19, %v1221_v26  ;;  %v2419_v19 = vld [vmem:[%s2540_s25 + $0x60] sm:$0xff]  }
  0x2e   : > { %v1229_v29 = vrot.slane %v1227_v24, 1  ;;  %v2425_v24 = vld [vmem:[%s2540_s25 + $0x94] sm:$0xff]  }
  0x30   : > { %2243 = vmatpush3.bf16.msra.mxu0 %v2414_v31  ;;  %v1225_v31 = vor.u32 %v1223_v23, %v1221_v26  ;;  %v1233_v40 = vor.u32 %v1231_v34, %v1229_v29  ;;  %v2422_v23 = vld [vmem:[%s2540_s25 + $0x68] sm:$0xff]   ;;  %v2424_v26 = vld [vmem:[%s2540_s25 + $0x70] sm:$0xff]  }
  0x31   : > { %2288 = vmatprep.subr.bf16.mxu0 %v2475_v1  ;;  %v2433_v34 = vld [vmem:[%s2945_s1 + $0x70] sm:$0xff]  }
  0x32   : > { %v2687_v39 = vsel %vm536_vm2, %v1225_v31, %v1229_v29  ;;  %v2702_v52 = vsel %vm536_vm2, %v1233_v40, %v2693_v46  ;;  %v2428_v29 = vld [vmem:[%s2540_s25 + $0x78] ss:$0 sps:$4 sm:$0xff]   ;;  %v2430_v31 = vld [vmem:[%s2540_s25 + $0xa4] ss:$0 sps:$4 sm:$0xff]   ;;  %v1552_v40 = vrot.slane %v2650_v16, 1  ;;  %v1428_v16 = vor.u32 %v1426_v41, %v2724_v12 }
  0x33   : > { %2201 = vmatmul.mubr.msk.bf16.gmra.mrb[16].mxu0 %vm286_vm1, %v556_v37  ;;  %2181 = vmatmul.mubr.msk.bf16.gmra.mrb[16].mxu1 %vm286_vm1, %v2409_v35  ;;  %v2445_v35 = vld [vmem:[%s2540_s25 + $0x30] sm:$0xff]   ;;  %v2683_v37 = vsel %vm536_vm2, %v1046_v21, %v2669_v28  ;;  %v2427_v21 = vld [vmem:[%s2945_s1 + $0x68] sm:$0xff]  }
  0x34   : > { %2204 = vmatprep.mubr.msk.bf16.mxu0 %vm2476_vm0, %v2475_v1  ;;  %2184 = vmatprep.mubr.msk.bf16.mxu1 %vm2476_vm0, %v2475_v1  ;;  %v1391_v44 = vshrl.u32 %v2445_v35, 16  ;;  %v1393_v45 = vshll.u32 %v2445_v35, 16  ;;  %v2442_v35 = vld [vmem:[%s2945_s1 + $0x78] sm:$0xff]   ;;  %v1555_v43 = vsel %vm1546_vm3, %v1552_v40, %v1554_v42 }
  0x36   : > { %v1395_v33 = vrot.slane %v1393_v45, 1 }
  0x38   : > { %v1396_v57 = vor.u32 %v1395_v33, %v1391_v44 }
  0x3a   : > { %v2711_v2 = vsel %vm536_vm2, %v1396_v57, %v1400_v53 }
  0x3b   : > { %2205 = vmatmul.mubr.msk.bf16.gmra.mrb[20].mxu0 %vm286_vm1, %v564_v5  ;;  %2185 = vmatmul.mubr.msk.bf16.gmra.mrb[20].mxu1 %vm286_vm1, %v2411_v59  ;;  %v575_v59 = vor.u32 %v573_v38, %v2624_v51  ;;  %v2717_v5 = vsel %vm536_vm2, %v1404_v60, %v1408_v54  ;;  %v1416_v51 = vrot.slane %v1414_v61, 1  ;;  %v1548_v38 = vrot.slane %v2619_v50, 1 }
  0x3c   : > { %2208 = vmatprep.mubr.msk.bf16.mxu0 %vm2476_vm0, %v2475_v1  ;;  %2188 = vmatprep.mubr.msk.bf16.mxu1 %vm2476_vm0, %v2475_v1 }
  0x3d   : > { %v2722_v9 = vsel %vm536_vm2, %v1412_v3, %v1416_v51  ;;  %v1420_v10 = vor.u32 %v1418_v63, %v1416_v51 }
  0x3f   : > { %v2736_v15 = vsel %vm536_vm2, %v1420_v10, %v2724_v12 }
  0x43   : > { %2209 = vmatmul.mubr.msk.bf16.gmra.mrb[24].mxu0 %vm286_vm1, %v572_v36  ;;  %2189 = vmatmul.mubr.msk.bf16.gmra.mrb[24].mxu1 %vm286_vm1, %v2415_v27  ;;  %v2429_v27 = vld [vmem:[%s2540_s25 + $0x9c] sm:$0xff]  }
  0x44   : > { %2212 = vmatprep.mubr.msk.bf16.mxu0 %vm2476_vm0, %v2475_v1  ;;  %2220 = vmatprep.mubr.msk.bf16.mxu1 %vm2476_vm0, %v2475_v1  ;;  %v2437_v36 = vld [vmem:[%s2945_s1 + $0x80] sm:$0xff]  }
  0x4b   : > { %2213 = vmatmul.mubr.msk.bf16.gmra.mrb[28].mxu0 %vm286_vm1, %v575_v59  ;;  %2221 = vmatmul.mubr.msk.bf16.vlgmr.msra.gmra.mrb[28].mxu1 %vm286_vm1, %v2417_v0 }
  0x4c   : > { %2244 = vmatprep.mubr.msk.bf16.mxu0 %vm2476_vm0, %v2475_v1  ;;  %2224 = vmatprep.mubr.msk.bf16.mxu1 %vm2476_vm0, %v2475_v1 }
  0x4d   : > { %2265 = vmatpush3.bf16.msra.mxu1 %v2418_v4 }
  0x4e   : > { %2266 = vmatprep.subr.bf16.mxu1 %v2475_v1 }
  0x51   : > { %2267 = vmatpush3.bf16.msra.mxu1 %v2426_v13 }
  0x52   : > { %2312 = vmatprep.subr.bf16.mxu1 %v2475_v1 }
  0x53   : > { %2245 = vmatmul.mubr.msk.bf16.vlgmr.msra.gmra.mrb[32].mxu0 %vm286_vm1, %v2420_v17  ;;  %2225 = vmatmul.mubr.msk.bf16.gmra.mrb[32].mxu1 %vm286_vm1, %v2419_v19 }
  0x54   : > { %2289 = vmatpush3.bf16.msra.mxu0 %v2421_v20  ;;  %2228 = vmatprep.mubr.msk.bf16.mxu1 %vm2476_vm0, %v2475_v1 }
  0x55   : > { %2248 = vmatprep.mubr.msk.bf16.mxu0 %vm2476_vm0, %v2475_v1  ;;  %2290 = vmatprep.subr.bf16.mxu0 %v2475_v1 }
  0x58   : > { %2291 = vmatpush3.bf16.msra.mxu0 %v2427_v21 }
  0x59   : > { %2336 = vmatprep.subr.bf16.mxu0 %v2475_v1 }
  0x5b   : > { %2249 = vmatmul.mubr.msk.bf16.gmra.mrb[36].mxu0 %vm286_vm1, %v2423_v22  ;;  %2229 = vmatmul.mubr.msk.bf16.gmra.mrb[36].mxu1 %vm286_vm1, %v2422_v23 }
  0x5c   : > { %2252 = vmatprep.mubr.msk.bf16.mxu0 %vm2476_vm0, %v2475_v1  ;;  %2232 = vmatprep.mubr.msk.bf16.mxu1 %vm2476_vm0, %v2475_v1 }
  0x63   : > { %2253 = vmatmul.mubr.msk.bf16.gmra.mrb[40].mxu0 %vm286_vm1, %v2425_v24  ;;  %2233 = vmatmul.mubr.msk.bf16.gmra.mrb[40].mxu1 %vm286_vm1, %v2424_v26 }
  0x64   : > { %2256 = vmatprep.mubr.msk.bf16.mxu0 %vm2476_vm0, %v2475_v1  ;;  %2236 = vmatprep.mubr.msk.bf16.mxu1 %vm2476_vm0, %v2475_v1 }
  0x6b   : > { %2257 = vmatmul.mubr.msk.bf16.gmra.mrb[44].mxu0 %vm286_vm1, %v2429_v27  ;;  %2237 = vmatmul.mubr.msk.bf16.gmra.mrb[44].mxu1 %vm286_vm1, %v2428_v29 }
  0x6c   : > { %2260 = vmatprep.mubr.msk.bf16.mxu0 %vm2476_vm0, %v2475_v1  ;;  %2268 = vmatprep.mubr.msk.bf16.mxu1 %vm2476_vm0, %v2475_v1 }
  0x73   : > { %2261 = vmatmul.mubr.msk.bf16.gmra.mrb[48].mxu0 %vm286_vm1, %v2430_v31  ;;  %2269 = vmatmul.mubr.msk.bf16.vlgmr.msra.gmra.mrb[48].mxu1 %vm286_vm1, %v2637_v6  ;;  %v2443_v6 = vld [vmem:[%s2945_s1 + $0x88] sm:$0xff]  }
  0x74   : > { %2292 = vmatprep.mubr.msk.bf16.mxu0 %vm2476_vm0, %v2475_v1  ;;  %2272 = vmatprep.mubr.msk.bf16.mxu1 %vm2476_vm0, %v2475_v1 }
  0x75   : > { %2313 = vmatpush3.bf16.msra.mxu1 %v2433_v34 }
  0x76   : > { %2314 = vmatprep.subr.bf16.mxu1 %v2475_v1 }
  0x79   : > { %2315 = vmatpush3.bf16.msra.mxu1 %v2442_v35 }
  0x7b   : > { %2293 = vmatmul.mubr.msk.bf16.vlgmr.msra.gmra.mrb[52].mxu0 %vm286_vm1, %v2666_v25  ;;  %2273 = vmatmul.mubr.msk.bf16.gmra.mrb[52].mxu1 %vm286_vm1, %v2640_v7  ;;  %v1052_v7 = vshrl.u32 %v2647_v14, 16  ;;  %v1239_v25 = vshrl.u32 %v2675_v32, 16 }
  0x7c   : > { %2337 = vmatpush3.bf16.msra.mxu0 %v2437_v36  ;;  %2276 = vmatprep.mubr.msk.bf16.mxu1 %vm2476_vm0, %v2475_v1 }
  0x7d   : > { %2296 = vmatprep.mubr.msk.bf16.mxu0 %vm2476_vm0, %v2475_v1  ;;  %2338 = vmatprep.subr.bf16.mxu0 %v2475_v1  ;;  %v1241_v14 = vor.u32 %v1239_v25, %v2693_v46 }
  0x80   : > { %2339 = vmatpush3.bf16.msra.mxu0 %v2443_v6 }
  0x83   : > { %2297 = vmatmul.mubr.msk.bf16.gmra.mrb[56].mxu0 %vm286_vm1, %v2672_v30  ;;  %2277 = vmatmul.mubr.msk.bf16.gmra.mrb[56].mxu1 %vm286_vm1, %v2654_v18  ;;  %v1054_v18 = vor.u32 %v1052_v7, %v2669_v28  ;;  %v1537_v30 = vld [vmem:[%s2540_s25 + $0x4] sm:$0xe] }
  0x84   : > { %2300 = vmatprep.mubr.msk.bf16.mxu0 %vm2476_vm0, %v2475_v1  ;;  %2280 = vmatprep.mubr.msk.bf16.mxu1 %vm2476_vm0, %v2475_v1 }
  0x8b   : > { %2301 = vmatmul.mubr.msk.bf16.gmra.mrb[60].mxu0 %vm286_vm1, %v2687_v39  ;;  %2281 = vmatmul.mubr.msk.bf16.gmra.mrb[60].mxu1 %vm286_vm1, %v2683_v37  ;;  %v2052_v37 = vcombine.low %v1537_v30, %v2627_v55  ;;  %v1550_v55 = vrot.slane %v2643_v11, 1 }
  0x8c   : > { %2304 = vmatprep.mubr.msk.bf16.mxu0 %vm2476_vm0, %v2475_v1  ;;  %2284 = vmatprep.mubr.msk.bf16.mxu1 %vm2476_vm0, %v2475_v1 }
  0x8d   : > { %v1547_v28 = vrot.slane %v2052_v37, 1  ;;  %v1551_v50 = vsel %vm1546_vm3, %v1548_v38, %v1550_v55  ;;  %v1553_v11 = vsel %vm1546_vm3, %v1550_v55, %v1552_v40 }
  0x8f   : > { %v1549_v39 = vsel %vm1546_vm3, %v1547_v28, %v1548_v38 }
  0x93   : > { %2305 = vmatmul.mubr.msk.bf16.gmra.mrb[64].mxu0 %vm286_vm1, %v2702_v52  ;;  %2285 = vmatmul.mubr.msk.bf16.gmra.mrb[64].mxu1 %vm286_vm1, %v1054_v18 }
  0x94   : > { %2308 = vmatprep.mubr.msk.bf16.mxu0 %vm2476_vm0, %v2475_v1  ;;  %2316 = vmatprep.mubr.msk.bf16.mxu1 %vm2476_vm0, %v2475_v1 }
  0x9b   : > { %2309 = vmatmul.mubr.msk.bf16.gmra.mrb[68].mxu0 %vm286_vm1, %v1241_v14  ;;  %2317 = vmatmul.mubr.msk.bf16.vlgmr.msra.gmra.mrb[68].mxu1 %vm286_vm1, %v2711_v2 }
  0x9c   : > { %2340 = vmatprep.mubr.msk.bf16.mxu0 %vm2476_vm0, %v2475_v1  ;;  %2320 = vmatprep.mubr.msk.bf16.mxu1 %vm2476_vm0, %v2475_v1 }
  0xa3   : > { %2341 = vmatmul.mubr.msk.bf16.vlgmr.msra.gmra.mrb[72].mxu0 %vm286_vm1, %v1549_v39  ;;  %2321 = vmatmul.mubr.msk.bf16.gmra.mrb[72].mxu1 %vm286_vm1, %v2717_v5 }
  0xa4   : > { %2344 = vmatprep.mubr.msk.bf16.mxu0 %vm2476_vm0, %v2475_v1  ;;  %2324 = vmatprep.mubr.msk.bf16.mxu1 %vm2476_vm0, %v2475_v1 }
  0xab   : > { %2345 = vmatmul.mubr.msk.bf16.gmra.mrb[76].mxu0 %vm286_vm1, %v1551_v50  ;;  %2325 = vmatmul.mubr.msk.bf16.gmra.mrb[76].mxu1 %vm286_vm1, %v2722_v9 }
  0xac   : > { %2348 = vmatprep.mubr.msk.bf16.mxu0 %vm2476_vm0, %v2475_v1  ;;  %2328 = vmatprep.mubr.msk.bf16.mxu1 %vm2476_vm0, %v2475_v1 }
  0xb3   : > { %2349 = vmatmul.mubr.msk.bf16.gmra.mrb[80].mxu0 %vm286_vm1, %v1553_v11  ;;  %2329 = vmatmul.mubr.msk.bf16.gmra.mrb[80].mxu1 %vm286_vm1, %v2736_v15 }
  0xb4   : > { %2352 = vmatprep.mubr.msk.bf16.mxu0 %vm2476_vm0, %v2475_v1  ;;  %2332 = vmatprep.mubr.msk.bf16.mxu1 %vm2476_vm0, %v2475_v1 }
  0xbb   : > { %2353 = vmatmul.mubr.msk.bf16.gmra.mrb[84].mxu0 %vm286_vm1, %v1555_v43  ;;  %2333 = vmatmul.mubr.msk.bf16.gmra.mrb[84].mxu1 %vm286_vm1, %v1428_v16 }
  0xbc   : > { %2356 = vmatprep.mubr.msk.bf16.mxu0 %vm2476_vm0, %v2475_v1 }
  0xc3   : > { %2357 = vmatmul.mubr.msk.bf16.gmra.mrb[88].mxu0 %vm286_vm1, %v1554_v42 }
  0xe6   : > { %v336_v44 = vpop.f32.mrb[0].mxu0  ;;  %v360_v46 = vpop.f32.mrb[0].mxu1 }
  0xe7   : > { %v2150_v45 = vpop.f32.mrb[1].mxu0  ;;  %v2162_v47 = vpop.f32.mrb[1].mxu1 }
  0xe8   : > { %v339_v32 = vpop.f32.mrb[2].mxu0  ;;  %v363_v49 = vpop.f32.mrb[2].mxu1 }
  0xe9   : > { %v2151_v48 = vpop.f32.mrb[3].mxu0  ;;  %v2163_v33 = vpop.f32.mrb[3].mxu1 }
  0xee   : > { %v344_v52 = vpop.f32.mrb[4].mxu0  ;;  %v368_v54 = vpop.f32.mrb[4].mxu1 }
  0xef   : > { %v2154_v53 = vpop.f32.mrb[5].mxu0  ;;  %v2166_v57 = vpop.f32.mrb[5].mxu1 }
  0xf0   : > { %v347_v56 = vpop.f32.mrb[6].mxu0  ;;  %v371_v59 = vpop.f32.mrb[6].mxu1 }
  0xf1   : > { %v2155_v58 = vpop.f32.mrb[7].mxu0  ;;  %v2167_v60 = vpop.f32.mrb[7].mxu1 }
  0xf6   : > { %v352_v61 = vpop.f32.mrb[8].mxu0  ;;  %v458_v1 = vpop.f32.mrb[8].mxu1 }
  0xf7   : > { %v2158_v62 = vpop.f32.mrb[9].mxu0  ;;  %v459_v63 = vadd.f32 %v458_v1, %v336_v44  ;;  %v2174_v0 = vpop.f32.mrb[9].mxu1 }
  0xf8   : > { %v355_v2 = vpop.f32.mrb[10].mxu0  ;;  %v461_v3 = vpop.f32.mrb[10].mxu1 }
  0xf9   : > { %v2159_v4 = vpop.f32.mrb[11].mxu0  ;;  %v462_v5 = vadd.f32 %v461_v3, %v339_v32  ;;  %v2175_v51 = vpop.f32.mrb[11].mxu1 }
  0xfe   : > { %v637_v8 = vpop.f32.mrb[12].mxu0  ;;  %v466_v9 = vpop.f32.mrb[12].mxu1 }
  0xff   : > { %v675_v10 = vadd.f32 %v637_v8, %v459_v63  ;;  %v2198_v12 = vpop.f32.mrb[13].mxu0  ;;  %v467_v13 = vadd.f32 %v466_v9, %v344_v52  ;;  %v2178_v15 = vpop.f32.mrb[13].mxu1 }
 0x100   : > { %v640_v17 = vpop.f32.mrb[14].mxu0  ;;  %v469_v19 = vpop.f32.mrb[14].mxu1 }
 0x101   : > { %v676_v20 = vadd.f32 %v640_v17, %v462_v5  ;;  %v2199_v21 = vpop.f32.mrb[15].mxu0  ;;  %v470_v22 = vadd.f32 %v469_v19, %v347_v56  ;;  %v2179_v23 = vpop.f32.mrb[15].mxu1 }
 0x106   : > { %v645_v24 = vpop.f32.mrb[16].mxu0  ;;  %v474_v26 = vpop.f32.mrb[16].mxu1 }
 0x107   : > { %v677_v27 = vadd.f32 %v645_v24, %v467_v13  ;;  %v2202_v29 = vpop.f32.mrb[17].mxu0  ;;  %v475_v31 = vadd.f32 %v474_v26, %v352_v61  ;;  %v2182_v34 = vpop.f32.mrb[17].mxu1 }
 0x108   : > { %v648_v35 = vpop.f32.mrb[18].mxu0  ;;  %v477_v36 = vpop.f32.mrb[18].mxu1 }
 0x109   : > { %v678_v6 = vadd.f32 %v648_v35, %v470_v22  ;;  %v2203_v7 = vpop.f32.mrb[19].mxu0  ;;  %v478_v18 = vadd.f32 %v477_v36, %v355_v2  ;;  %v2183_v25 = vpop.f32.mrb[19].mxu1 }
 0x10e   : > { %v653_v30 = vpop.f32.mrb[20].mxu0  ;;  %v482_v14 = vpop.f32.mrb[20].mxu1 }
 0x10f   : > { %v679_v37 = vadd.f32 %v653_v30, %v475_v31  ;;  %v2206_v28 = vpop.f32.mrb[21].mxu0  ;;  %v483_v38 = vadd.f32 %v482_v14, %v360_v46  ;;  %v2186_v39 = vpop.f32.mrb[21].mxu1 }
 0x110   : > { %v656_v55 = vpop.f32.mrb[22].mxu0  ;;  %v485_v50 = vpop.f32.mrb[22].mxu1 }
 0x111   : > { %v680_v40 = vadd.f32 %v656_v55, %v478_v18  ;;  %v2207_v11 = vpop.f32.mrb[23].mxu0  ;;  %v486_v41 = vadd.f32 %v485_v50, %v363_v49  ;;  %v2187_v42 = vpop.f32.mrb[23].mxu1 }
 0x116   : > { %v661_v16 = vpop.f32.mrb[24].mxu0  ;;  %v490_v43 = vpop.f32.mrb[24].mxu1 }
 0x117   : > { %v681_v44 = vadd.f32 %v661_v16, %v483_v38  ;;  %v2210_v45 = vpop.f32.mrb[25].mxu0  ;;  %v491_v32 = vadd.f32 %v490_v43, %v368_v54  ;;  %v2190_v48 = vpop.f32.mrb[25].mxu1 }
 0x118   : > { %v664_v47 = vpop.f32.mrb[26].mxu0  ;;  %v493_v53 = vpop.f32.mrb[26].mxu1 }
 0x119   : > { %v682_v33 = vadd.f32 %v664_v47, %v486_v41  ;;  %v2211_v52 = vpop.f32.mrb[27].mxu0  ;;  %v2191_v56 = vpop.f32.mrb[27].mxu1 }
 0x11e   : > { %v669_v57 = vpop.f32.mrb[28].mxu0  ;;  %v783_v58 = vpop.f32.mrb[28].mxu1 }
 0x11f   : > { %v683_v46 = vadd.f32 %v669_v57, %v491_v32  ;;  %v2214_v59 = vpop.f32.mrb[29].mxu0  ;;  %v821_v60 = vadd.f32 %v783_v58, %v675_v10  ;;  %v2222_v61 = vpop.f32.mrb[29].mxu1 }
 0x120   : > { %v672_v1 = vpop.f32.mrb[30].mxu0  ;;  %v786_v49 = vpop.f32.mrb[30].mxu1 }
 0x121   : > { %v2215_v62 = vpop.f32.mrb[31].mxu0  ;;  %v822_v63 = vadd.f32 %v786_v49, %v676_v20  ;;  %v2223_v0 = vpop.f32.mrb[31].mxu1 }
 0x126   : > { %v929_v2 = vpop.f32.mrb[32].mxu0  ;;  %v791_v3 = vpop.f32.mrb[32].mxu1 }
 0x127   : > { %v967_v54 = vadd.f32 %v929_v2, %v821_v60  ;;  %v2246_v4 = vpop.f32.mrb[33].mxu0  ;;  %v823_v5 = vadd.f32 %v791_v3, %v677_v27  ;;  %v2226_v51 = vpop.f32.mrb[33].mxu1 }
 0x128   : > { %v932_v8 = vpop.f32.mrb[34].mxu0  ;;  %v794_v9 = vpop.f32.mrb[34].mxu1 }
 0x129   : > { %v968_v12 = vadd.f32 %v932_v8, %v822_v63  ;;  %v2247_v13 = vpop.f32.mrb[35].mxu0  ;;  %v824_v15 = vadd.f32 %v794_v9, %v678_v6  ;;  %v2227_v17 = vpop.f32.mrb[35].mxu1 }
 0x12e   : > { %v937_v19 = vpop.f32.mrb[36].mxu0  ;;  %v799_v10 = vpop.f32.mrb[36].mxu1 }
 0x12f   : > { %v969_v21 = vadd.f32 %v937_v19, %v823_v5  ;;  %v2250_v22 = vpop.f32.mrb[37].mxu0  ;;  %v825_v23 = vadd.f32 %v799_v10, %v679_v37  ;;  %v2230_v24 = vpop.f32.mrb[37].mxu1 }
 0x130   : > { %v940_v20 = vpop.f32.mrb[38].mxu0  ;;  %v802_v26 = vpop.f32.mrb[38].mxu1 }
 0x131   : > { %v970_v29 = vadd.f32 %v940_v20, %v824_v15  ;;  %v2251_v31 = vpop.f32.mrb[39].mxu0  ;;  %v826_v34 = vadd.f32 %v802_v26, %v680_v40  ;;  %v2231_v35 = vpop.f32.mrb[39].mxu1 }
 0x136   : > { %v945_v27 = vpop.f32.mrb[40].mxu0  ;;  %v807_v36 = vpop.f32.mrb[40].mxu1 }
 0x137   : > { %v971_v7 = vadd.f32 %v945_v27, %v825_v23  ;;  %v2254_v18 = vpop.f32.mrb[41].mxu0  ;;  %v827_v25 = vadd.f32 %v807_v36, %v681_v44  ;;  %v2234_v30 = vpop.f32.mrb[41].mxu1 }
 0x138   : > { %v948_v6 = vpop.f32.mrb[42].mxu0  ;;  %v810_v14 = vpop.f32.mrb[42].mxu1 }
 0x139   : > { %v972_v28 = vadd.f32 %v948_v6, %v826_v34  ;;  %v2255_v38 = vpop.f32.mrb[43].mxu0  ;;  %v828_v39 = vadd.f32 %v810_v14, %v682_v33  ;;  %v2235_v55 = vpop.f32.mrb[43].mxu1 }
 0x13e   : > { %v953_v37 = vpop.f32.mrb[44].mxu0  ;;  %v815_v50 = vpop.f32.mrb[44].mxu1 }
 0x13f   : > { %v973_v11 = vadd.f32 %v953_v37, %v827_v25  ;;  %v2258_v41 = vpop.f32.mrb[45].mxu0  ;;  %v829_v42 = vadd.f32 %v815_v50, %v683_v46  ;;  %v2238_v40 = vpop.f32.mrb[45].mxu1 }
 0x140   : > { %v956_v16 = vpop.f32.mrb[46].mxu0  ;;  %v818_v32 = vpop.f32.mrb[46].mxu1 }
 0x141   : > { %v974_v43 = vadd.f32 %v956_v16, %v828_v39  ;;  %v2259_v45 = vpop.f32.mrb[47].mxu0  ;;  %v2239_v47 = vpop.f32.mrb[47].mxu1 }
 0x146   : > { %v961_v48 = vpop.f32.mrb[48].mxu0  ;;  %v1116_v52 = vpop.f32.mrb[48].mxu1 }
 0x147   : > { %v975_v44 = vadd.f32 %v961_v48, %v829_v42  ;;  %v2262_v53 = vpop.f32.mrb[49].mxu0  ;;  %v1154_v56 = vadd.f32 %v1116_v52, %v967_v54  ;;  %v2270_v57 = vpop.f32.mrb[49].mxu1 }
 0x148   : > { %v964_v58 = vpop.f32.mrb[50].mxu0  ;;  %v1119_v33 = vpop.f32.mrb[50].mxu1 }
 0x149   : > { %v2263_v59 = vpop.f32.mrb[51].mxu0  ;;  %v1155_v60 = vadd.f32 %v1119_v33, %v968_v12  ;;  %v2271_v61 = vpop.f32.mrb[51].mxu1  ;;  %v2895_v58 = vld [vmem:[%s2946_s2] ss:$0 sm:$0xff] }
 0x14e   : > { %v1303_v1 = vpop.f32.mrb[52].mxu0  ;;  %v1124_v49 = vpop.f32.mrb[52].mxu1 }
 0x14f   : > { %v1341_v46 = vadd.f32 %v1303_v1, %v1154_v56  ;;  %v2294_v62 = vpop.f32.mrb[53].mxu0  ;;  %v1156_v63 = vadd.f32 %v1124_v49, %v969_v21  ;;  %v2274_v0 = vpop.f32.mrb[53].mxu1 }
 0x150   : > { %v1306_v2 = vpop.f32.mrb[54].mxu0  ;;  %v1127_v3 = vpop.f32.mrb[54].mxu1 }
 0x151   : > { %v1342_v4 = vadd.f32 %v1306_v2, %v1155_v60  ;;  %v2295_v5 = vpop.f32.mrb[55].mxu0  ;;  %v1157_v51 = vadd.f32 %v1127_v3, %v970_v29  ;;  %v2275_v8 = vpop.f32.mrb[55].mxu1 }
 0x156   : > { %v1311_v9 = vpop.f32.mrb[56].mxu0  ;;  %v1132_v54 = vpop.f32.mrb[56].mxu1 }
 0x157   : > { %v1343_v13 = vadd.f32 %v1311_v9, %v1156_v63  ;;  %v2298_v15 = vpop.f32.mrb[57].mxu0  ;;  %v1158_v17 = vadd.f32 %v1132_v54, %v971_v7  ;;  %v2278_v19 = vpop.f32.mrb[57].mxu1 }
 0x158   : > { %v1314_v12 = vpop.f32.mrb[58].mxu0  ;;  %v1135_v10 = vpop.f32.mrb[58].mxu1 }
 0x159   : > { %v1344_v22 = vadd.f32 %v1314_v12, %v1157_v51  ;;  %v2299_v23 = vpop.f32.mrb[59].mxu0  ;;  %v1159_v24 = vadd.f32 %v1135_v10, %v972_v28  ;;  %v2279_v20 = vpop.f32.mrb[59].mxu1 }
 0x15e   : > { %v1319_v21 = vpop.f32.mrb[60].mxu0  ;;  %v1140_v26 = vpop.f32.mrb[60].mxu1 }
 0x15f   : > { %v2882_v31 = vadd.f32 %v1319_v21, %v1158_v17  ;;  %v2302_v34 = vpop.f32.mrb[61].mxu0  ;;  %v1160_v35 = vadd.f32 %v1140_v26, %v973_v11  ;;  %v2282_v29 = vpop.f32.mrb[61].mxu1 }
 0x160   : > { %v1322_v27 = vpop.f32.mrb[62].mxu0  ;;  %v1143_v36 = vpop.f32.mrb[62].mxu1 }
 0x161   : > { %v2884_v18 = vadd.f32 %v1322_v27, %v1159_v24  ;;  %v2303_v25 = vpop.f32.mrb[63].mxu0  ;;  %v1161_v7 = vadd.f32 %v1143_v36, %v974_v43  ;;  %v2283_v30 = vpop.f32.mrb[63].mxu1 }
 0x166   : > { %v1327_v6 = vpop.f32.mrb[64].mxu0  ;;  %v1148_v14 = vpop.f32.mrb[64].mxu1 }
 0x167   : > { %v2886_v38 = vadd.f32 %v1327_v6, %v1160_v35  ;;  %v2306_v28 = vpop.f32.mrb[65].mxu0  ;;  %v1162_v39 = vadd.f32 %v1148_v14, %v975_v44  ;;  %v2286_v37 = vpop.f32.mrb[65].mxu1 }
 0x168   : > { %v1330_v55 = vpop.f32.mrb[66].mxu0  ;;  %v1151_v11 = vpop.f32.mrb[66].mxu1 }
 0x169   : > { %v2888_v50 = vadd.f32 %v1330_v55, %v1161_v7  ;;  %v2307_v41 = vpop.f32.mrb[67].mxu0  ;;  %v2287_v42 = vpop.f32.mrb[67].mxu1 }
 0x16e   : > { %v1335_v16 = vpop.f32.mrb[68].mxu0  ;;  %v1490_v45 = vpop.f32.mrb[68].mxu1 }
 0x16f   : > { %v2890_v40 = vadd.f32 %v1335_v16, %v1162_v39  ;;  %v2310_v32 = vpop.f32.mrb[69].mxu0  ;;  %v1528_v43 = vadd.f32 %v1490_v45, %v1341_v46  ;;  %v2318_v47 = vpop.f32.mrb[69].mxu1 }
 0x170   : > { %v1338_v48 = vpop.f32.mrb[70].mxu0  ;;  %v1493_v52 = vpop.f32.mrb[70].mxu1 }
 0x171   : > { %v2311_v53 = vpop.f32.mrb[71].mxu0  ;;  %v1529_v56 = vadd.f32 %v1493_v52, %v1342_v4  ;;  %v2319_v44 = vpop.f32.mrb[71].mxu1 }
 0x176   : > { %v1617_v57 = vpop.f32.mrb[72].mxu0  ;;  %v1498_v33 = vpop.f32.mrb[72].mxu1 }
 0x177   : > { %v1655_v59 = vadd.f32 %v1617_v57, %v1528_v43  ;;  %v2342_v60 = vpop.f32.mrb[73].mxu0  ;;  %v1530_v61 = vadd.f32 %v1498_v33, %v1343_v13  ;;  %v2322_v1 = vpop.f32.mrb[73].mxu1 }
 0x178   : > { %v1620_v49 = vpop.f32.mrb[74].mxu0  ;;  %v1501_v62 = vpop.f32.mrb[74].mxu1 }
 0x179   : > { %v1671_v46 = vadd.f32 %v2895_v58, %v1655_v59  ;;  %v1656_v63 = vadd.f32 %v1620_v49, %v1529_v56  ;;  %v2343_v0 = vpop.f32.mrb[75].mxu0  ;;  %v1531_v2 = vadd.f32 %v1501_v62, %v1344_v22  ;;  %v2323_v3 = vpop.f32.mrb[75].mxu1 }
 0x17b   : > { %vm1680_vm4 = vcmp.ge.f32.partialorder %v1671_v46, 0.0  ;;  %v1689_v4 = vmul.f32 0.2, %v1671_v46  ;;  %v1672_v5 = vadd.f32 %v2895_v58, %v1656_v63 }
 0x17d   : > { %v1698_v51 = vsel %vm1680_vm4, %v1671_v46, %v1689_v4  ;;  %vm1681_vm5 = vcmp.ge.f32.partialorder %v1672_v5, 0.0  ;;  %v1690_v8 = vmul.f32 0.2, %v1672_v5 }
 0x17e   : > { %v1707_v9 = vmul.f32 1.4142135, %v1698_v51  ;;  %v1625_v54 = vpop.f32.mrb[76].mxu0  ;;  %v1506_v15 = vpop.f32.mrb[76].mxu1 }
 0x17f   : > { %v1699_v13 = vsel %vm1681_vm5, %v1672_v5, %v1690_v8  ;;  %v1657_v17 = vadd.f32 %v1625_v54, %v1530_v61  ;;  %v2346_v19 = vpop.f32.mrb[77].mxu0  ;;  %v1532_v22 = vadd.f32 %v1506_v15, %v2882_v31  ;;  %v2326_v23 = vpop.f32.mrb[77].mxu1 }
 0x180   : > { %v2072_v12 = vpack.c.bf16 %v1707_v9, %v1707_v9  ;;  %v1708_v10 = vmul.f32 1.4142135, %v1699_v13  ;;  %v1628_v24 = vpop.f32.mrb[78].mxu0  ;;  %v1509_v21 = vpop.f32.mrb[78].mxu1 }
 0x181   : > { %v1673_v20 = vadd.f32 %v2895_v58, %v1657_v17  ;;  %v1658_v26 = vadd.f32 %v1628_v24, %v1531_v2  ;;  %v2347_v34 = vpop.f32.mrb[79].mxu0  ;;  %v1533_v29 = vadd.f32 %v1509_v21, %v2884_v18  ;;  %v2327_v27 = vpop.f32.mrb[79].mxu1 }
 0x182   : > { %1754 = vst.msk [vmem:[%s2903_s11] sm:$0xf] %vm1753_vm6, %v2072_v12  ;;  %v2073_v35 = vpack.c.bf16 %v1708_v10, %v1708_v10 }
 0x183   : > { %vm1682_vm7 = vcmp.ge.f32.partialorder %v1673_v20, 0.0  ;;  %v1691_v36 = vmul.f32 0.2, %v1673_v20  ;;  %v1674_v25 = vadd.f32 %v2895_v58, %v1658_v26 }
 0x184   : > { %1755 = vst.msk [vmem:[%s2903_s11 + $0x4] sm:$0xf] %vm1753_vm6, %v2073_v35 }
 0x185   : > { %v1700_v31 = vsel %vm1682_vm7, %v1673_v20, %v1691_v36  ;;  %vm1683_vm8 = vcmp.ge.f32.partialorder %v1674_v25, 0.0  ;;  %v1692_v7 = vmul.f32 0.2, %v1674_v25 }
 0x186   : > { %v1709_v30 = vmul.f32 1.4142135, %v1700_v31  ;;  %v1633_v6 = vpop.f32.mrb[80].mxu0  ;;  %v1514_v28 = vpop.f32.mrb[80].mxu1 }
 0x187   : > { %v1701_v14 = vsel %vm1683_vm8, %v1674_v25, %v1692_v7  ;;  %v1659_v39 = vadd.f32 %v1633_v6, %v1532_v22  ;;  %v2350_v55 = vpop.f32.mrb[81].mxu0  ;;  %v1534_v41 = vadd.f32 %v1514_v28, %v2886_v38  ;;  %v2330_v11 = vpop.f32.mrb[81].mxu1 }
 0x188   : > { %v2074_v37 = vpack.c.bf16 %v1709_v30, %v1709_v30  ;;  %v1710_v18 = vmul.f32 1.4142135, %v1701_v14  ;;  %v1636_v42 = vpop.f32.mrb[82].mxu0  ;;  %v1517_v45 = vpop.f32.mrb[82].mxu1 }
 0x189   : > { %v1675_v16 = vadd.f32 %v2895_v58, %v1659_v39  ;;  %v1660_v32 = vadd.f32 %v1636_v42, %v1533_v29  ;;  %v2351_v43 = vpop.f32.mrb[83].mxu0  ;;  %v1535_v48 = vadd.f32 %v1517_v45, %v2888_v50  ;;  %v2331_v52 = vpop.f32.mrb[83].mxu1 }
 0x18a   : > { %1756 = vst.msk [vmem:[%s2903_s11 + $0x8] sm:$0xf] %vm1753_vm6, %v2074_v37  ;;  %v2075_v47 = vpack.c.bf16 %v1710_v18, %v1710_v18 }
 0x18b   : > { %vm1684_vm9 = vcmp.ge.f32.partialorder %v1675_v16, 0.0  ;;  %v1693_v53 = vmul.f32 0.2, %v1675_v16  ;;  %v1676_v56 = vadd.f32 %v2895_v58, %v1660_v32 }
 0x18c   : > { %1757 = vst.msk [vmem:[%s2903_s11 + $0xc] sm:$0xf] %vm1753_vm6, %v2075_v47 }
 0x18d   : > { %v1702_v38 = vsel %vm1684_vm9, %v1675_v16, %v1693_v53  ;;  %vm1685_vm10 = vcmp.ge.f32.partialorder %v1676_v56, 0.0  ;;  %v1694_v44 = vmul.f32 0.2, %v1676_v56 }
 0x18e   : > { %v1711_v57 = vmul.f32 1.4142135, %v1702_v38  ;;  %v1641_v33 = vpop.f32.mrb[84].mxu0  ;;  %v1522_v60 = vpop.f32.mrb[84].mxu1 }
 0x18f   : > { %v1703_v59 = vsel %vm1685_vm10, %v1676_v56, %v1694_v44  ;;  %v1661_v61 = vadd.f32 %v1641_v33, %v1534_v41  ;;  %v2354_v1 = vpop.f32.mrb[85].mxu0  ;;  %v1536_v46 = vadd.f32 %v1522_v60, %v2890_v40  ;;  %v2334_v63 = vpop.f32.mrb[85].mxu1 }
 0x190   : > { %v2076_v49 = vpack.c.bf16 %v1711_v57, %v1711_v57  ;;  %v1712_v50 = vmul.f32 1.4142135, %v1703_v59  ;;  %v1644_v62 = vpop.f32.mrb[86].mxu0  ;;  %v1525_v4 = vpop.f32.mrb[86].mxu1 }
 0x191   : > { %v1677_v0 = vadd.f32 %v2895_v58, %v1661_v61  ;;  %v1662_v2 = vadd.f32 %v1644_v62, %v1535_v48  ;;  %v2355_v3 = vpop.f32.mrb[87].mxu0  ;;  %v2335_v51 = vpop.f32.mrb[87].mxu1 }
 0x192   : > { %1758 = vst.msk [vmem:[%s2903_s11 + $0x10] sm:$0xf] %vm1753_vm6, %v2076_v49  ;;  %v2077_v5 = vpack.c.bf16 %v1712_v50, %v1712_v50 }
 0x193   : > { %vm1686_vm11 = vcmp.ge.f32.partialorder %v1677_v0, 0.0  ;;  %v1695_v8 = vmul.f32 0.2, %v1677_v0  ;;  %v1678_v9 = vadd.f32 %v2895_v58, %v1662_v2 }
 0x194   : > { %1759 = vst.msk [vmem:[%s2903_s11 + $0x14] sm:$0xf] %vm1753_vm6, %v2077_v5 }
 0x195   : > { %v1704_v54 = vsel %vm1686_vm11, %v1677_v0, %v1695_v8  ;;  %vm1687_vm12 = vcmp.ge.f32.partialorder %v1678_v9, 0.0  ;;  %v1696_v40 = vmul.f32 0.2, %v1678_v9 }
 0x196   : > { %v1713_v13 = vmul.f32 1.4142135, %v1704_v54  ;;  %v1649_v15 = vpop.f32.mrb[88].mxu0 }
 0x197   : > { %v1705_v17 = vsel %vm1687_vm12, %v1678_v9, %v1696_v40  ;;  %v1663_v19 = vadd.f32 %v1649_v15, %v1536_v46  ;;  %v2358_v12 = vpop.f32.mrb[89].mxu0 }
 0x198   : > { %v2078_v10 = vpack.c.bf16 %v1713_v13, %v1713_v13  ;;  %v1714_v22 = vmul.f32 1.4142135, %v1705_v17  ;;  %v1652_v23 = vpop.f32.mrb[90].mxu0 }
 0x199   : > { %v1679_v24 = vadd.f32 %v2895_v58, %v1663_v19  ;;  %v2359_v20 = vpop.f32.mrb[91].mxu0 }
 0x19a   : > { %1760 = vst.msk [vmem:[%s2903_s11 + $0x18] sm:$0xf] %vm1753_vm6, %v2078_v10  ;;  %v2079_v21 = vpack.c.bf16 %v1714_v22, %v1714_v22 }
 0x19b   : > { %vm1688_vm13 = vcmp.ge.f32.partialorder %v1679_v24, 0.0  ;;  %v1697_v26 = vmul.f32 0.2, %v1679_v24 }
 0x19c   : > { %1761 = vst.msk [vmem:[%s2903_s11 + $0x1c] sm:$0xf] %vm1753_vm6, %v2079_v21 }
 0x19d   : > { %v1706_v34 = vsel %vm1688_vm13, %v1679_v24, %v1697_v26 }
 0x19e   : > { %v1715_v35 = vmul.f32 1.4142135, %v1706_v34 }
 0x1a0   : > { %v2080_v29 = vpack.c.bf16 %v1715_v35, %v1715_v35 }
 0x1a2   : > { %1762 = vst.msk [vmem:[%s2903_s11 + $0x20] sm:$0xf] %vm1753_vm6, %v2080_v29 }
 0x1a3 PF: > { %s13_s14 = sadd.s32 1, %s2473_s14   ;;  %s2948_s12 = smov %s2469_s13 }
 0x1a4   : > { %p10_p5 = scmp.ge.s32.totalorder %s13_s14, 4   ;;  %s2949_s13 = smov %s2951_s15 }
 0x1a6   :  { %12 = sbr.rel (!%p10_p5) target bundleno = 2 (0x2), region = 79 }

// kernel: discriminator_forward.15
= control target key start
LH: loop header
LB: loop body
LE: loop exit
PB: predicated region body
PF: predicated region fallthrough
CT: control target
= control target key end

     0   :  { %s2342_s12 = smov 0   ;;  %s2344_s13 = smov 0   ;;  %s2816_s0 = inlined_call_operand.vmem [shape: bf16[2,1,104,32], index: 0, kind: input, shape index: {}]   ;;  %s2817_s1 = inlined_call_operand.vmem [shape: bf16[9,32,32], index: 1, kind: input, shape index: {}]   ;;  %s2818_s2 = inlined_call_operand.vmem [shape: f32[1,32], index: 2, kind: input, shape index: {}]   ;;  %s2819_s3 = inlined_call_operand.vmem [shape: bf16[2,80,32], index: 3, kind: output, shape index: {}]  }
   0x1   :  { %s2346_s14 = smov 0  }
   0x2 LB: > { %s25_s15 = sadd.s32 1, %s2314_s13  ;;  %p1800_p0 = scmp.ge.s32.totalorder %s2318_s14, 1  ;;  %s2318_s14 = sphi %s2346_s14, %s13_s14   ;;  %s2314_s13 = sphi %s2344_s13, %s2821_s13   ;;  %s2310_s12 = sphi %s2342_s12, %s2820_s12  }
   0x3   : > { %p27_p1 = scmp.ge.s32.totalorder %s25_s15, 2  ;;  %p168_p2 = scmp.lt.s32.totalorder %s2318_s14, 3 }
   0x5   : > { %s2823_s15 = smov (%p27_p1, %s25_s15), 0  ;;  %p169_p3 = pnand %p1800_p0, %p168_p2 }
   0x6   : > { %v2255_v0 = vld [vmem:[%s2817_s1 + $0x10] sm:$0xff] (!%p169_p3)   ;;  %v2320_v1 = vmov (!%p169_p3), 0.0   ;;  %v2256_v2 = vld [vmem:[%s2817_s1 + $0x18] sm:$0xff] (!%p169_p3)   ;;  %p202_p4 = scmp.lt.s32.totalorder (!%p169_p3), %s2310_s12, 1  ;;  %vm2321_vm0 = vmmov (!%p169_p3), 0   ;;  %vm328_vm2 = vcmask (!%p169_p3), 261120  }
   0x7   : > { %172 = sbr.rel (%p169_p3) target bundleno = 430 (0x1ae), region = 32  ;;  %2007 = vmatprep.subr.bf16.mxu0 (!%p169_p3), %v2320_v1  ;;  %2223 = vmatprep.subr.bf16.mxu1 (!%p169_p3), %v2320_v1  ;;  %vm271_vm1 = vsmask.f32 (!%p169_p3), 7424  ;;  %v2261_v21 = vld [vmem:[%s2817_s1 + $0x20] sm:$0xff] (!%p169_p3)   ;;  %v2265_v33 = vld [vmem:[%s2817_s1 + $0x28] sm:$0xff] (!%p169_p3)   ;;  %v2267_v48 = vld [vmem:[%s2817_s1 + $0x30] sm:$0xff] (!%p169_p3)  }
   0x8   : > { %2008 = vmatpush3.bf16.msra.mxu0 (!%p169_p3), %v2255_v0  ;;  %2225 = vmatpush3.bf16.msra.mxu1 (!%p169_p3), %v2255_v0  ;;  %v2262_v27 = vld [vmem:[%s2817_s1] sm:$0xff] (!%p169_p3)   ;;  %v2266_v36 = vld [vmem:[%s2817_s1 + $0x8] sm:$0xff] (!%p169_p3)   ;;  %vm521_vm3 = vcmask (!%p169_p3), 1046528   ;;  %v2270_v52 = vld [vmem:[%s2817_s1 + $0x38] sm:$0xff] (!%p169_p3)   ;;  %vm817_vm4 = vsmask.f32 (!%p169_p3), 6400 }
   0x9   : > { %2009 = vmatprep.subr.bf16.mxu0 (!%p169_p3), %v2320_v1  ;;  %2224 = vmatprep.subr.bf16.mxu1 (!%p169_p3), %v2320_v1  ;;  %v2269_v54 = vld [vmem:[%s2817_s1 + $0x40] sm:$0xff] (!%p169_p3)   ;;  %v2271_v56 = vld [vmem:[%s2817_s1 + $0x48] sm:$0xff] (!%p169_p3)   ;;  %vm990_vm5 = vcmask (!%p169_p3), 1045504   ;;  %vm1286_vm6 = vsmask.f32 (!%p169_p3), 5376  ;;  %vm1459_vm7 = vcmask (!%p169_p3), 1044480  }
   0xa   : > { %2011 = vmatprep.mubr.msk.bf16.mxu0 (!%p169_p3), %vm2321_vm0, %v2320_v1  ;;  %2023 = vmatprep.mubr.msk.bf16.mxu1 (!%p169_p3), %vm2321_vm0, %v2320_v1  ;;  %vm1678_vm10 = vcmask (!%p169_p3), 257024  }
   0xc   : > { %2010 = vmatpush3.bf16.msra.mxu0 (!%p169_p3), %v2256_v2  ;;  %2226 = vmatpush3.bf16.msra.mxu1 (!%p169_p3), %v2256_v2 }
   0xd   : > { %2055 = vmatprep.subr.bf16.mxu0 (!%p169_p3), %v2320_v1  ;;  %2031 = vmatprep.subr.bf16.mxu1 (!%p169_p3), %v2320_v1 }
   0xe   : > { %s2825_s12 = smov (!%p202_p4, %s2310_s12), 1 }
   0xf   : > { %s2227_s20 = smul.u32 52, %s2825_s12 }
  0x10   : > { %s2228_s8 = smul.u32 40, %s2825_s12 }
  0x11   : > { %s2382_s23 = scalar_lea.vmem %s2816_s0, %s2227_s20 }
  0x12   : > { %v223_v3 = vld [vmem:[%s2382_s23] sm:$0xf]  ;;  %v2386_v4 = vld [vmem:[%s2382_s23 + $0x4] sm:$0xf]  ;;  %v2392_v6 = vld [vmem:[%s2382_s23 + $0x8] sm:$0xff]   ;;  %s2771_s11 = scalar_lea.vmem %s2819_s3, %s2228_s8 }
  0x13   : > { %v2389_v5 = vcombine.low %v223_v3, %v2386_v4  ;;  %v280_v9 = vshll.u32 %v2392_v6, 16  ;;  %v2398_v10 = vld [vmem:[%s2382_s23 + $0x18] sm:$0xff]   ;;  %v2401_v11 = vld [vmem:[%s2382_s23 + $0x20] sm:$0xff]   ;;  %v2404_v12 = vld [vmem:[%s2382_s23 + $0x10] sm:$0xff]   ;;  %v284_v22 = vshrl.u32 %v2392_v6, 16  ;;  %v523_v51 = vrot.slane %v2392_v6, 1 }
  0x14   : > { %v296_v15 = vshll.u32 %v2398_v10, 16  ;;  %v300_v16 = vshrl.u32 %v2398_v10, 16  ;;  %v304_v17 = vshll.u32 %v2401_v11, 16  ;;  %v2410_v18 = vld [vmem:[%s2382_s23 + $0x28] ss:$0 sps:$4 sm:$0x11]  }
  0x15   : > { %v273_v7 = vshrl.u32 %v2389_v5, 16  ;;  %v275_v8 = vshll.u32 %v2389_v5, 16  ;;  %v282_v14 = vrot.slane %v280_v9, 1  ;;  %v288_v23 = vshll.u32 %v2404_v12, 16  ;;  %v512_v41 = vld [vmem:[%s2382_s23] sm:$0xe] }
  0x16   : > { %v298_v20 = vrot.slane %v296_v15, 1  ;;  %v306_v24 = vrot.slane %v304_v17, 1  ;;  %v308_v28 = vshrl.u32 %v2401_v11, 16  ;;  %v312_v29 = vshll.u32 %v2410_v18, 16  ;;  %v2449_v42 = vld [vmem:[%s2382_s23 + $0x24] sm:$0xff]   ;;  %v2520_v2 = vld [vmem:[%s2382_s23 + $0xc] sm:$0xff]  }
  0x17   : > { %v277_v13 = vrot.slane %v275_v8, 1  ;;  %v286_v31 = vor.u32 %v284_v22, %v282_v14  ;;  %v290_v32 = vrot.slane %v288_v23, 1  ;;  %v292_v38 = vshrl.u32 %v2404_v12, 16  ;;  %v2281_v43 = vld [vmem:[%s2382_s23 + $0x2c] ss:$0 sps:$4 sm:$0x11]  }
  0x18   : > { %v302_v26 = vor.u32 %v300_v16, %v298_v20  ;;  %v310_v34 = vor.u32 %v308_v28, %v306_v24  ;;  %v314_v35 = vrot.slane %v312_v29, 1  ;;  %v1831_v45 = vcombine.low %v512_v41, %v2386_v4  ;;  %v643_v61 = vld [vmem:[%s2382_s23 + $0x4] sm:$0xe]  ;;  %v2515_v62 = vld [vmem:[%s2382_s23 + $0x8] sm:$0xf]  ;;  %v2274_v17 = vld [vmem:[%s2817_s1 + $0x50] sm:$0xff]  }
  0x19   : > { %v278_v19 = vor.u32 %v277_v13, %v273_v7  ;;  %v291_v37 = vsel %vm271_vm1, %v286_v31, %v290_v32  ;;  %v294_v40 = vor.u32 %v292_v38, %v290_v32  ;;  %v694_v46 = vrot.slane %v2449_v42, 1  ;;  %v2279_v23 = vld [vmem:[%s2817_s1 + $0x58] sm:$0xff]  }
  0x1a   : > { %v307_v30 = vsel %vm271_vm1, %v302_v26, %v306_v24  ;;  %v315_v39 = vsel %vm271_vm1, %v310_v34, %v314_v35  ;;  %v696_v47 = vrot.slane %v2281_v43, 1  ;;  %v522_v50 = vrot.slane %v1831_v45, 1  ;;  %v2560_v29 = vld [vmem:[%s2382_s23 + $0x1c] sm:$0xff]  }
  0x1b   : > { %v283_v25 = vsel %vm271_vm1, %v278_v19, %v282_v14  ;;  %2024 = vmatmul.mubr.msk.bf16.vlgmr.msra.gmra.mrb[0].mxu1 %vm328_vm2, %v307_v30  ;;  %v299_v44 = vsel %vm271_vm1, %v294_v40, %v298_v20  ;;  %v525_v55 = vrot.slane %v2404_v12, 1  ;;  %v527_v58 = vrot.slane %v2398_v10, 1 }
  0x1c   : > { %2012 = vmatmul.mubr.msk.bf16.vlgmr.msra.gmra.mrb[0].mxu0 %vm328_vm2, %v283_v25  ;;  %2032 = vmatpush3.bf16.msra.mxu1 %v2262_v27  ;;  %v2464_v49 = vsel %vm521_vm3, %v694_v46, %v696_v47  ;;  %v524_v53 = vsel %vm521_vm3, %v522_v50, %v523_v51  ;;  %v529_v60 = vrot.slane %v2401_v11, 1  ;;  %v1843_v0 = vcombine.low %v643_v61, %v2515_v62  ;;  %v2276_v25 = vld [vmem:[%s2817_s1 + $0x60] sm:$0xff]   ;;  %v2589_v47 = vld [vmem:[%s2382_s23 + $0x2c] ss:$0 sps:$4 sm:$0x33]  }
  0x1d   : > { %2056 = vmatpush3.bf16.msra.mxu0 %v2261_v21  ;;  %2015 = vmatprep.mubr.msk.bf16.mxu0 %vm2321_vm0, %v2320_v1  ;;  %v526_v57 = vsel %vm521_vm3, %v523_v51, %v525_v55  ;;  %v528_v59 = vsel %vm521_vm3, %v525_v55, %v527_v58  ;;  %v531_v3 = vrot.slane %v2410_v18, 1  ;;  %v830_v7 = vshll.u32 %v2520_v2, 16  ;;  %v2539_v18 = vld [vmem:[%s2382_s23 + $0x14] sm:$0xff]  }
  0x1e   : > { %2057 = vmatprep.subr.bf16.mxu0 %v2320_v1  ;;  %2027 = vmatprep.mubr.msk.bf16.mxu1 %vm2321_vm0, %v2320_v1  ;;  %v530_v63 = vsel %vm521_vm3, %v527_v58, %v529_v60  ;;  %v819_v4 = vshrl.u32 %v1843_v0, 16  ;;  %v687_v8 = vrot.slane %v1843_v0, 1  ;;  %v688_v9 = vrot.slane %v2520_v2, 1  ;;  %v1112_v58 = vld [vmem:[%s2382_s23 + $0x8] sm:$0xc] }
  0x1f   : > { %2033 = vmatprep.subr.bf16.mxu1 %v2320_v1  ;;  %v832_v15 = vrot.slane %v830_v7, 2  ;;  %v836_v20 = vshrl.u32 %v2539_v18, 16  ;;  %v839_v21 = vshll.u32 %v2539_v18, 16  ;;  %v690_v22 = vrot.slane %v2539_v18, 1 }
  0x20   : > { %2034 = vmatpush3.bf16.msra.mxu1 %v2266_v36  ;;  %v689_v16 = vsel %vm521_vm3, %v687_v8, %v688_v9  ;;  %v845_v31 = vshrl.u32 %v2560_v29, 16  ;;  %v848_v32 = vshll.u32 %v2560_v29, 16  ;;  %v692_v34 = vrot.slane %v2560_v29, 1  ;;  %v2287_v8 = vld [vmem:[%s2817_s1 + $0x80] sm:$0xff]  }
  0x21   : > { %2058 = vmatpush3.bf16.msra.mxu0 %v2265_v33  ;;  %2079 = vmatprep.subr.bf16.mxu1 %v2320_v1  ;;  %v838_v26 = vrot.slane %v836_v20, 1  ;;  %v841_v27 = vrot.slane %v839_v21, 2  ;;  %v691_v28 = vsel %vm521_vm3, %v688_v9, %v690_v22  ;;  %v2280_v33 = vld [vmem:[%s2817_s1 + $0x68] sm:$0xff]   ;;  %v854_v40 = vshrl.u32 %v2449_v42, 16  ;;  %v2643_v9 = vld [vmem:[%s2382_s23 + $0x18] sm:$0xff]  }
  0x22   : > { %2103 = vmatprep.subr.bf16.mxu0 %v2320_v1  ;;  %v847_v36 = vrot.slane %v845_v31, 1  ;;  %v693_v38 = vsel %vm521_vm3, %v690_v22, %v692_v34  ;;  %v857_v41 = vshll.u32 %v2449_v42, 16  ;;  %v863_v51 = vshrl.u32 %v2589_v47, 16  ;;  %v2673_v20 = vld [vmem:[%s2382_s23 + $0x28] sm:$0xff]  }
  0x23   : > { %2028 = vmatmul.mubr.msk.bf16.gmra.mrb[4].mxu1 %vm328_vm2, %v315_v39  ;;  %v842_v30 = vor.u32 %v841_v27, %v838_v26  ;;  %v992_v61 = vrot.slane %v2520_v2, 2  ;;  %v1163_v22 = vrot.slane %v2673_v20, 2 }
  0x24   : > { %2016 = vmatmul.mubr.msk.bf16.gmra.mrb[4].mxu0 %vm328_vm2, %v291_v37  ;;  %2035 = vmatprep.mubr.msk.bf16.mxu1 %vm2321_vm0, %v2320_v1  ;;  %v850_v37 = vrot.slane %v848_v32, 2  ;;  %v859_v45 = vrot.slane %v857_v41, 2 }
  0x25   : > { %2019 = vmatprep.mubr.msk.bf16.mxu0 %vm2321_vm0, %v2320_v1 }
  0x26   : > { %v851_v39 = vor.u32 %v850_v37, %v847_v36 }
  0x28   : > { %v852_v43 = vsel %vm817_vm4, %v842_v30, %v851_v39 }
  0x2b   : > { %2036 = vmatmul.mubr.msk.bf16.vlgmr.msra.gmra.mrb[8].mxu1 %vm328_vm2, %v2389_v5  ;;  %v822_v5 = vshll.u32 %v1843_v0, 16  ;;  %v2620_v0 = vld [vmem:[%s2382_s23 + $0x10] sm:$0xff]  }
  0x2c   : > { %2020 = vmatmul.mubr.msk.bf16.gmra.mrb[8].mxu0 %vm328_vm2, %v299_v44  ;;  %2080 = vmatpush3.bf16.msra.mxu1 %v2267_v48  ;;  %v856_v44 = vrot.slane %v854_v40, 1  ;;  %v695_v48 = vsel %vm521_vm3, %v692_v34, %v694_v46  ;;  %v1299_v26 = vshll.u32 %v2620_v0, 16 }
  0x2d   : > { %2059 = vmatprep.mubr.msk.bf16.mxu0 %vm2321_vm0, %v2320_v1  ;;  %2039 = vmatprep.mubr.msk.bf16.mxu1 %vm2321_vm0, %v2320_v1  ;;  %v824_v13 = vrot.slane %v822_v5, 2  ;;  %v994_v5 = vrot.slane %v2539_v18, 2 }
  0x2e   : > { %2081 = vmatprep.subr.bf16.mxu1 %v2320_v1  ;;  %v860_v50 = vor.u32 %v859_v45, %v856_v44 }
  0x30   : > { %2082 = vmatpush3.bf16.msra.mxu1 %v2270_v52  ;;  %v866_v52 = vshll.u32 %v2589_v47, 16  ;;  %v861_v46 = vsel %vm817_vm4, %v851_v39, %v860_v50  ;;  %v1308_v39 = vshll.u32 %v2643_v9, 16 }
  0x31   : > { %2127 = vmatprep.subr.bf16.mxu1 %v2320_v1 }
  0x32   : > { %v868_v55 = vrot.slane %v866_v52, 2  ;;  %v1310_v45 = vrot.slane %v1308_v39, 3 }
  0x33   : > { %2040 = vmatmul.mubr.msk.bf16.gmra.mrb[12].mxu1 %vm328_vm2, %v2392_v6  ;;  %v827_v6 = vshrl.u32 %v2520_v2, 16 }
  0x34   : > { %2060 = vmatmul.mubr.msk.bf16.vlgmr.msra.gmra.mrb[12].mxu0 %vm328_vm2, %v524_v53  ;;  %2043 = vmatprep.mubr.msk.bf16.mxu1 %vm2321_vm0, %v2320_v1  ;;  %v981_v53 = vld [vmem:[%s2382_s23 + $0x4] sm:$0xc] }
  0x35   : > { %2104 = vmatpush3.bf16.msra.mxu0 %v2269_v54  ;;  %2063 = vmatprep.mubr.msk.bf16.mxu0 %vm2321_vm0, %v2320_v1  ;;  %v829_v14 = vrot.slane %v827_v6, 1  ;;  %v865_v54 = vrot.slane %v863_v51, 1  ;;  %v2290_v6 = vld [vmem:[%s2817_s1 + $0x78] sm:$0xff]  }
  0x36   : > { %2105 = vmatprep.subr.bf16.mxu0 %v2320_v1 }
  0x37   : > { %v833_v19 = vor.u32 %v832_v15, %v829_v14  ;;  %v996_v14 = vrot.slane %v2560_v29, 2 }
  0x39   : > { %2106 = vmatpush3.bf16.msra.mxu0 %v2271_v56  ;;  %v843_v35 = vsel %vm817_vm4, %v833_v19, %v842_v30  ;;  %v1872_v56 = vcombine.low %v981_v53, %v2515_v62 }
  0x3a   : > { %2151 = vmatprep.subr.bf16.mxu0 %v2320_v1 }
  0x3b   : > { %2044 = vmatmul.mubr.msk.bf16.gmra.mrb[16].mxu1 %vm328_vm2, %v2404_v12  ;;  %v821_v12 = vrot.slane %v819_v4, 1  ;;  %v1157_v4 = vrot.slane %v2620_v0, 2 }
  0x3c   : > { %2064 = vmatmul.mubr.msk.bf16.gmra.mrb[16].mxu0 %vm328_vm2, %v526_v57  ;;  %2047 = vmatprep.mubr.msk.bf16.mxu1 %vm2321_vm0, %v2320_v1  ;;  %v869_v57 = vor.u32 %v868_v55, %v865_v54 }
  0x3d   : > { %2067 = vmatprep.mubr.msk.bf16.mxu0 %vm2321_vm0, %v2320_v1 }
  0x3e   : > { %v870_v62 = vsel %vm817_vm4, %v860_v50, %v869_v57 }
  0x43   : > { %2048 = vmatmul.mubr.msk.bf16.gmra.mrb[20].mxu1 %vm328_vm2, %v2398_v10  ;;  %v532_v10 = vsel %vm521_vm3, %v529_v60, %v531_v3  ;;  %v991_v60 = vrot.slane %v1872_v56, 2  ;;  %v1463_v56 = vrot.slane %v2643_v9, 3 }
  0x44   : > { %2068 = vmatmul.mubr.msk.bf16.gmra.mrb[20].mxu0 %vm328_vm2, %v528_v59  ;;  %2051 = vmatprep.mubr.msk.bf16.mxu1 %vm2321_vm0, %v2320_v1  ;;  %v2612_v59 = vld [vmem:[%s2382_s23 + $0xc] sm:$0xf] }
  0x45   : > { %2071 = vmatprep.mubr.msk.bf16.mxu0 %vm2321_vm0, %v2320_v1  ;;  %v993_v3 = vsel %vm990_vm5, %v991_v60, %v992_v61 }
  0x4b   : > { %2052 = vmatmul.mubr.msk.bf16.gmra.mrb[24].mxu1 %vm328_vm2, %v2401_v11  ;;  %v825_v11 = vor.u32 %v824_v13, %v821_v12  ;;  %v1159_v12 = vrot.slane %v2643_v9, 2  ;;  %v2291_v13 = vld [vmem:[%s2817_s1 + $0x88] sm:$0xff]  }
  0x4c   : > { %2072 = vmatmul.mubr.msk.bf16.gmra.mrb[24].mxu0 %vm328_vm2, %v530_v63  ;;  %2083 = vmatprep.mubr.msk.bf16.mxu1 %vm2321_vm0, %v2320_v1  ;;  %v1884_v63 = vcombine.low %v1112_v58, %v2612_v59  ;;  %v1323_v58 = vshrl.u32 %v2673_v20, 16 }
  0x4d   : > { %2075 = vmatprep.mubr.msk.bf16.mxu0 %vm2321_vm0, %v2320_v1  ;;  %v834_v24 = vsel %vm817_vm4, %v825_v11, %v833_v19  ;;  %v1160_v15 = vsel %vm990_vm5, %v1157_v4, %v1159_v12  ;;  %v998_v11 = vrot.slane %v2449_v42, 2 }
  0x4e   : > { %v1156_v2 = vrot.slane %v1884_v63, 2  ;;  %v1288_v42 = vshrl.u32 %v1884_v63, 16 }
  0x4f   : > { %v999_v21 = vsel %vm990_vm5, %v996_v14, %v998_v11 }
  0x50   : > { %v1158_v7 = vsel %vm990_vm5, %v1156_v2, %v1157_v4  ;;  %v1290_v30 = vrot.slane %v1288_v42, 2 }
  0x53   : > { %2084 = vmatmul.mubr.msk.bf16.vlgmr.msra.gmra.mrb[28].mxu1 %vm328_vm2, %v689_v16  ;;  %v2660_v16 = vld [vmem:[%s2382_s23 + $0x20] sm:$0xff]  }
  0x54   : > { %2076 = vmatmul.mubr.msk.bf16.gmra.mrb[28].mxu0 %vm328_vm2, %v532_v10  ;;  %2128 = vmatpush3.bf16.msra.mxu1 %v2274_v17  ;;  %v995_v10 = vsel %vm990_vm5, %v992_v61, %v994_v5  ;;  %v997_v17 = vsel %vm990_vm5, %v994_v5, %v996_v14  ;;  %v1161_v18 = vrot.slane %v2660_v16, 2  ;;  %v1314_v51 = vshrl.u32 %v2660_v16, 16 }
  0x55   : > { %2107 = vmatprep.mubr.msk.bf16.mxu0 %vm2321_vm0, %v2320_v1  ;;  %2087 = vmatprep.mubr.msk.bf16.mxu1 %vm2321_vm0, %v2320_v1  ;;  %v1317_v52 = vshll.u32 %v2660_v16, 16 }
  0x56   : > { %2129 = vmatprep.subr.bf16.mxu1 %v2320_v1  ;;  %v1162_v19 = vsel %vm990_vm5, %v1159_v12, %v1161_v18  ;;  %v1164_v27 = vsel %vm990_vm5, %v1161_v18, %v1163_v22  ;;  %v1316_v54 = vrot.slane %v1314_v51, 2 }
  0x57   : > { %v1319_v55 = vrot.slane %v1317_v52, 3 }
  0x58   : > { %2130 = vmatpush3.bf16.msra.mxu1 %v2279_v23  ;;  %v1000_v23 = vrot.slane %v2589_v47, 2 }
  0x59   : > { %2175 = vmatprep.subr.bf16.mxu1 %v2320_v1  ;;  %v1320_v57 = vor.u32 %v1319_v55, %v1316_v54 }
  0x5a   : > { %v1001_v29 = vsel %vm990_vm5, %v998_v11, %v1000_v23 }
  0x5b   : > { %2088 = vmatmul.mubr.msk.bf16.gmra.mrb[32].mxu1 %vm328_vm2, %v691_v28  ;;  %v2293_v28 = vld [vmem:[%s2382_s23 + $0x30] ss:$0 sps:$4 sm:$0x33]  }
  0x5c   : > { %2108 = vmatmul.mubr.msk.bf16.vlgmr.msra.gmra.mrb[32].mxu0 %vm328_vm2, %v834_v24  ;;  %2091 = vmatprep.mubr.msk.bf16.mxu1 %vm2321_vm0, %v2320_v1  ;;  %v1291_v24 = vshll.u32 %v1884_v63, 16  ;;  %v1165_v34 = vrot.slane %v2293_v28, 2 }
  0x5d   : > { %2152 = vmatpush3.bf16.msra.mxu0 %v2276_v25  ;;  %2111 = vmatprep.mubr.msk.bf16.mxu0 %vm2321_vm0, %v2320_v1  ;;  %v1296_v25 = vshrl.u32 %v2620_v0, 16 }
  0x5e   : > { %2153 = vmatprep.subr.bf16.mxu0 %v2320_v1  ;;  %v1293_v31 = vrot.slane %v1291_v24, 3  ;;  %v1166_v40 = vsel %vm990_vm5, %v1163_v22, %v1165_v34 }
  0x5f   : > { %v1298_v32 = vrot.slane %v1296_v25, 2 }
  0x60   : > { %v1294_v36 = vor.u32 %v1293_v31, %v1290_v30 }
  0x61   : > { %2154 = vmatpush3.bf16.msra.mxu0 %v2280_v33  ;;  %v1301_v33 = vrot.slane %v1299_v26, 3 }
  0x62   : > { %2199 = vmatprep.subr.bf16.mxu0 %v2320_v1 }
  0x63   : > { %2092 = vmatmul.mubr.msk.bf16.gmra.mrb[36].mxu1 %vm328_vm2, %v693_v38  ;;  %v1302_v37 = vor.u32 %v1301_v33, %v1298_v32  ;;  %v1305_v38 = vshrl.u32 %v2643_v9, 16  ;;  %v1467_v9 = vrot.slane %v2673_v20, 3 }
  0x64   : > { %2112 = vmatmul.mubr.msk.bf16.gmra.mrb[36].mxu0 %vm328_vm2, %v843_v35  ;;  %2095 = vmatprep.mubr.msk.bf16.mxu1 %vm2321_vm0, %v2320_v1  ;;  %v1450_v35 = vld [vmem:[%s2382_s23 + $0x8] sm:$0x8] }
  0x65   : > { %2115 = vmatprep.mubr.msk.bf16.mxu0 %vm2321_vm0, %v2320_v1  ;;  %v1913_v41 = vcombine.low %v1450_v35, %v2612_v59  ;;  %v1307_v44 = vrot.slane %v1305_v38, 2  ;;  %v1326_v59 = vshll.u32 %v2673_v20, 16 }
  0x67   : > { %v1460_v47 = vrot.slane %v1913_v41, 3  ;;  %v1311_v50 = vor.u32 %v1310_v45, %v1307_v44  ;;  %v1328_v63 = vrot.slane %v1326_v59, 3 }
  0x69   : > { %v1321_v61 = vsel %vm1286_vm6, %v1311_v50, %v1320_v57 }
  0x6b   : > { %2096 = vmatmul.mubr.msk.bf16.gmra.mrb[40].mxu1 %vm328_vm2, %v695_v48  ;;  %v1461_v48 = vrot.slane %v2620_v0, 3  ;;  %v2295_v0 = vld [vmem:[%s2382_s23 + $0x30] ss:$0 sps:$4 sm:$0x77]  }
  0x6c   : > { %2116 = vmatmul.mubr.msk.bf16.gmra.mrb[40].mxu0 %vm328_vm2, %v852_v43  ;;  %2099 = vmatprep.mubr.msk.bf16.mxu1 %vm2321_vm0, %v2320_v1  ;;  %v1303_v43 = vsel %vm1286_vm6, %v1294_v36, %v1302_v37  ;;  %v1332_v2 = vshrl.u32 %v2295_v0, 16  ;;  %v1335_v4 = vshll.u32 %v2295_v0, 16  ;;  %v1469_v14 = vrot.slane %v2295_v0, 3 }
  0x6d   : > { %2119 = vmatprep.mubr.msk.bf16.mxu0 %vm2321_vm0, %v2320_v1  ;;  %v1462_v53 = vsel %vm1459_vm7, %v1460_v47, %v1461_v48  ;;  %v1464_v60 = vsel %vm1459_vm7, %v1461_v48, %v1463_v56 }
  0x73   : > { %2100 = vmatmul.mubr.msk.bf16.gmra.mrb[44].mxu1 %vm328_vm2, %v2464_v49  ;;  %v2284_v49 = vld [vmem:[%s2817_s1 + $0x70] sm:$0xff]  }
  0x74   : > { %2120 = vmatmul.mubr.msk.bf16.gmra.mrb[44].mxu0 %vm328_vm2, %v861_v46  ;;  %2131 = vmatprep.mubr.msk.bf16.mxu1 %vm2321_vm0, %v2320_v1  ;;  %v1312_v46 = vsel %vm1286_vm6, %v1302_v37, %v1311_v50 }
  0x75   : > { %2123 = vmatprep.mubr.msk.bf16.mxu0 %vm2321_vm0, %v2320_v1 }
  0x7b   : > { %2132 = vmatmul.mubr.msk.bf16.vlgmr.msra.gmra.mrb[48].mxu1 %vm328_vm2, %v993_v3  ;;  %v1465_v3 = vrot.slane %v2660_v16, 3 }
  0x7c   : > { %2124 = vmatmul.mubr.msk.bf16.gmra.mrb[48].mxu0 %vm328_vm2, %v870_v62  ;;  %2176 = vmatpush3.bf16.msra.mxu1 %v2284_v49  ;;  %v1325_v62 = vrot.slane %v1323_v58, 2 }
  0x7d   : > { %2155 = vmatprep.mubr.msk.bf16.mxu0 %vm2321_vm0, %v2320_v1  ;;  %2135 = vmatprep.mubr.msk.bf16.mxu1 %vm2321_vm0, %v2320_v1  ;;  %v1466_v5 = vsel %vm1459_vm7, %v1463_v56, %v1465_v3  ;;  %v1468_v12 = vsel %vm1459_vm7, %v1465_v3, %v1467_v9 }
  0x7e   : > { %2177 = vmatprep.subr.bf16.mxu1 %v2320_v1  ;;  %v1329_v49 = vor.u32 %v1328_v63, %v1325_v62 }
  0x80   : > { %2178 = vmatpush3.bf16.msra.mxu1 %v2290_v6  ;;  %v1330_v6 = vsel %vm1286_vm6, %v1320_v57, %v1329_v49 }
  0x83   : > { %2136 = vmatmul.mubr.msk.bf16.gmra.mrb[52].mxu1 %vm328_vm2, %v995_v10 }
  0x84   : > { %2156 = vmatmul.mubr.msk.bf16.vlgmr.msra.gmra.mrb[52].mxu0 %vm328_vm2, %v1158_v7  ;;  %2139 = vmatprep.mubr.msk.bf16.mxu1 %vm2321_vm0, %v2320_v1  ;;  %v1334_v7 = vrot.slane %v1332_v2, 2 }
  0x85   : > { %2200 = vmatpush3.bf16.msra.mxu0 %v2287_v8  ;;  %2159 = vmatprep.mubr.msk.bf16.mxu0 %vm2321_vm0, %v2320_v1  ;;  %v1337_v8 = vrot.slane %v1335_v4, 3 }
  0x86   : > { %2201 = vmatprep.subr.bf16.mxu0 %v2320_v1 }
  0x87   : > { %v1338_v10 = vor.u32 %v1337_v8, %v1334_v7 }
  0x89   : > { %2202 = vmatpush3.bf16.msra.mxu0 %v2291_v13  ;;  %v1339_v13 = vsel %vm1286_vm6, %v1329_v49, %v1338_v10 }
  0x8b   : > { %2140 = vmatmul.mubr.msk.bf16.gmra.mrb[56].mxu1 %vm328_vm2, %v997_v17 }
  0x8c   : > { %2160 = vmatmul.mubr.msk.bf16.gmra.mrb[56].mxu0 %vm328_vm2, %v1160_v15  ;;  %2143 = vmatprep.mubr.msk.bf16.mxu1 %vm2321_vm0, %v2320_v1  ;;  %v1470_v15 = vsel %vm1459_vm7, %v1467_v9, %v1469_v14 }
  0x8d   : > { %2163 = vmatprep.mubr.msk.bf16.mxu0 %vm2321_vm0, %v2320_v1 }
  0x93   : > { %2144 = vmatmul.mubr.msk.bf16.gmra.mrb[60].mxu1 %vm328_vm2, %v999_v21 }
  0x94   : > { %2164 = vmatmul.mubr.msk.bf16.gmra.mrb[60].mxu0 %vm328_vm2, %v1162_v19  ;;  %2147 = vmatprep.mubr.msk.bf16.mxu1 %vm2321_vm0, %v2320_v1 }
  0x95   : > { %2167 = vmatprep.mubr.msk.bf16.mxu0 %vm2321_vm0, %v2320_v1 }
  0x9b   : > { %2148 = vmatmul.mubr.msk.bf16.gmra.mrb[64].mxu1 %vm328_vm2, %v1001_v29 }
  0x9c   : > { %2168 = vmatmul.mubr.msk.bf16.gmra.mrb[64].mxu0 %vm328_vm2, %v1164_v27  ;;  %2179 = vmatprep.mubr.msk.bf16.mxu1 %vm2321_vm0, %v2320_v1 }
  0x9d   : > { %2171 = vmatprep.mubr.msk.bf16.mxu0 %vm2321_vm0, %v2320_v1 }
  0xa3   : > { %2180 = vmatmul.mubr.msk.bf16.vlgmr.msra.gmra.mrb[68].mxu1 %vm328_vm2, %v1303_v43 }
  0xa4   : > { %2172 = vmatmul.mubr.msk.bf16.gmra.mrb[68].mxu0 %vm328_vm2, %v1166_v40  ;;  %2183 = vmatprep.mubr.msk.bf16.mxu1 %vm2321_vm0, %v2320_v1 }
  0xa5   : > { %2203 = vmatprep.mubr.msk.bf16.mxu0 %vm2321_vm0, %v2320_v1 }
  0xab   : > { %2184 = vmatmul.mubr.msk.bf16.gmra.mrb[72].mxu1 %vm328_vm2, %v1312_v46 }
  0xac   : > { %2204 = vmatmul.mubr.msk.bf16.vlgmr.msra.gmra.mrb[72].mxu0 %vm328_vm2, %v1462_v53  ;;  %2187 = vmatprep.mubr.msk.bf16.mxu1 %vm2321_vm0, %v2320_v1 }
  0xad   : > { %2207 = vmatprep.mubr.msk.bf16.mxu0 %vm2321_vm0, %v2320_v1 }
  0xb3   : > { %2188 = vmatmul.mubr.msk.bf16.gmra.mrb[76].mxu1 %vm328_vm2, %v1321_v61 }
  0xb4   : > { %2208 = vmatmul.mubr.msk.bf16.gmra.mrb[76].mxu0 %vm328_vm2, %v1464_v60  ;;  %2191 = vmatprep.mubr.msk.bf16.mxu1 %vm2321_vm0, %v2320_v1 }
  0xb5   : > { %2211 = vmatprep.mubr.msk.bf16.mxu0 %vm2321_vm0, %v2320_v1 }
  0xbb   : > { %2192 = vmatmul.mubr.msk.bf16.gmra.mrb[80].mxu1 %vm328_vm2, %v1330_v6 }
  0xbc   : > { %2212 = vmatmul.mubr.msk.bf16.gmra.mrb[80].mxu0 %vm328_vm2, %v1466_v5  ;;  %2195 = vmatprep.mubr.msk.bf16.mxu1 %vm2321_vm0, %v2320_v1 }
  0xbd   : > { %2215 = vmatprep.mubr.msk.bf16.mxu0 %vm2321_vm0, %v2320_v1 }
  0xc3   : > { %2196 = vmatmul.mubr.msk.bf16.gmra.mrb[84].mxu1 %vm328_vm2, %v1339_v13 }
  0xc4   : > { %2216 = vmatmul.mubr.msk.bf16.gmra.mrb[84].mxu0 %vm328_vm2, %v1468_v12 }
  0xc5   : > { %2219 = vmatprep.mubr.msk.bf16.mxu0 %vm2321_vm0, %v2320_v1 }
  0xcc   : > { %2220 = vmatmul.mubr.msk.bf16.gmra.mrb[88].mxu0 %vm328_vm2, %v1470_v15 }
  0xee   : > { %v402_v11 = vpop.f32.mrb[0].mxu1 }
  0xef   : > { %v378_v16 = vpop.f32.mrb[0].mxu0  ;;  %v2025_v20 = vpop.f32.mrb[1].mxu1 }
  0xf0   : > { %v2013_v17 = vpop.f32.mrb[1].mxu0  ;;  %v405_v21 = vpop.f32.mrb[2].mxu1 }
  0xf1   : > { %v381_v18 = vpop.f32.mrb[2].mxu0  ;;  %v2026_v22 = vpop.f32.mrb[3].mxu1 }
  0xf2   : > { %v2014_v19 = vpop.f32.mrb[3].mxu0 }
  0xf6   : > { %v410_v25 = vpop.f32.mrb[4].mxu1 }
  0xf7   : > { %v386_v23 = vpop.f32.mrb[4].mxu0  ;;  %v2029_v26 = vpop.f32.mrb[5].mxu1 }
  0xf8   : > { %v2017_v42 = vpop.f32.mrb[5].mxu0  ;;  %v413_v27 = vpop.f32.mrb[6].mxu1 }
  0xf9   : > { %v389_v24 = vpop.f32.mrb[6].mxu0  ;;  %v2030_v28 = vpop.f32.mrb[7].mxu1 }
  0xfa   : > { %v2018_v1 = vpop.f32.mrb[7].mxu0 }
  0xfe   : > { %v473_v31 = vpop.f32.mrb[8].mxu1 }
  0xff   : > { %v394_v29 = vpop.f32.mrb[8].mxu0  ;;  %v474_v33 = vadd.f32 %v473_v31, %v378_v16  ;;  %v2037_v34 = vpop.f32.mrb[9].mxu1 }
 0x100   : > { %v2021_v30 = vpop.f32.mrb[9].mxu0  ;;  %v476_v36 = vpop.f32.mrb[10].mxu1 }
 0x101   : > { %v397_v32 = vpop.f32.mrb[10].mxu0  ;;  %v477_v37 = vadd.f32 %v476_v36, %v381_v18  ;;  %v2038_v38 = vpop.f32.mrb[11].mxu1 }
 0x102   : > { %v2022_v35 = vpop.f32.mrb[11].mxu0 }
 0x106   : > { %v481_v43 = vpop.f32.mrb[12].mxu1 }
 0x107   : > { %v594_v39 = vpop.f32.mrb[12].mxu0  ;;  %v482_v45 = vadd.f32 %v481_v43, %v386_v23  ;;  %v2041_v47 = vpop.f32.mrb[13].mxu1 }
 0x108   : > { %v633_v40 = vadd.f32 %v594_v39, %v474_v33  ;;  %v2061_v41 = vpop.f32.mrb[13].mxu0  ;;  %v484_v51 = vpop.f32.mrb[14].mxu1 }
 0x109   : > { %v597_v44 = vpop.f32.mrb[14].mxu0  ;;  %v485_v52 = vadd.f32 %v484_v51, %v389_v24  ;;  %v2042_v53 = vpop.f32.mrb[15].mxu1 }
 0x10a   : > { %v634_v48 = vadd.f32 %v597_v44, %v477_v37  ;;  %v2062_v50 = vpop.f32.mrb[15].mxu0 }
 0x10e   : > { %v489_v56 = vpop.f32.mrb[16].mxu1 }
 0x10f   : > { %v602_v46 = vpop.f32.mrb[16].mxu0  ;;  %v490_v58 = vadd.f32 %v489_v56, %v394_v29  ;;  %v2045_v59 = vpop.f32.mrb[17].mxu1 }
 0x110   : > { %v635_v54 = vadd.f32 %v602_v46, %v482_v45  ;;  %v2065_v55 = vpop.f32.mrb[17].mxu0  ;;  %v492_v62 = vpop.f32.mrb[18].mxu1 }
 0x111   : > { %v605_v57 = vpop.f32.mrb[18].mxu0  ;;  %v493_v63 = vadd.f32 %v492_v62, %v397_v32  ;;  %v2046_v0 = vpop.f32.mrb[19].mxu1 }
 0x112   : > { %v636_v60 = vadd.f32 %v605_v57, %v485_v52  ;;  %v2066_v61 = vpop.f32.mrb[19].mxu0 }
 0x116   : > { %v497_v4 = vpop.f32.mrb[20].mxu1 }
 0x117   : > { %v610_v3 = vpop.f32.mrb[20].mxu0  ;;  %v498_v6 = vadd.f32 %v497_v4, %v402_v11  ;;  %v2049_v7 = vpop.f32.mrb[21].mxu1 }
 0x118   : > { %v637_v49 = vadd.f32 %v610_v3, %v490_v58  ;;  %v2069_v2 = vpop.f32.mrb[21].mxu0  ;;  %v500_v10 = vpop.f32.mrb[22].mxu1 }
 0x119   : > { %v613_v5 = vpop.f32.mrb[22].mxu0  ;;  %v501_v12 = vadd.f32 %v500_v10, %v405_v21  ;;  %v2050_v13 = vpop.f32.mrb[23].mxu1 }
 0x11a   : > { %v638_v8 = vadd.f32 %v613_v5, %v493_v63  ;;  %v2070_v9 = vpop.f32.mrb[23].mxu0 }
 0x11e   : > { %v505_v17 = vpop.f32.mrb[24].mxu1 }
 0x11f   : > { %v618_v14 = vpop.f32.mrb[24].mxu0  ;;  %v506_v19 = vadd.f32 %v505_v17, %v410_v25  ;;  %v2053_v20 = vpop.f32.mrb[25].mxu1 }
 0x120   : > { %v639_v15 = vadd.f32 %v618_v14, %v498_v6  ;;  %v2073_v16 = vpop.f32.mrb[25].mxu0  ;;  %v508_v42 = vpop.f32.mrb[26].mxu1 }
 0x121   : > { %v621_v18 = vpop.f32.mrb[26].mxu0  ;;  %v509_v24 = vadd.f32 %v508_v42, %v413_v27  ;;  %v2054_v1 = vpop.f32.mrb[27].mxu1 }
 0x122   : > { %v640_v22 = vadd.f32 %v621_v18, %v501_v12  ;;  %v2074_v23 = vpop.f32.mrb[27].mxu0 }
 0x126   : > { %v759_v29 = vpop.f32.mrb[28].mxu1 }
 0x127   : > { %v626_v26 = vpop.f32.mrb[28].mxu0  ;;  %v798_v31 = vadd.f32 %v759_v29, %v633_v40  ;;  %v2085_v21 = vpop.f32.mrb[29].mxu1 }
 0x128   : > { %v641_v11 = vadd.f32 %v626_v26, %v506_v19  ;;  %v2077_v28 = vpop.f32.mrb[29].mxu0  ;;  %v762_v34 = vpop.f32.mrb[30].mxu1 }
 0x129   : > { %v629_v30 = vpop.f32.mrb[30].mxu0  ;;  %v799_v35 = vadd.f32 %v762_v34, %v634_v48  ;;  %v2086_v36 = vpop.f32.mrb[31].mxu1 }
 0x12a   : > { %v642_v32 = vadd.f32 %v629_v30, %v509_v24  ;;  %v2078_v33 = vpop.f32.mrb[31].mxu0 }
 0x12e   : > { %v767_v39 = vpop.f32.mrb[32].mxu1 }
 0x12f   : > { %v932_v37 = vpop.f32.mrb[32].mxu0  ;;  %v800_v43 = vadd.f32 %v767_v39, %v635_v54  ;;  %v2089_v27 = vpop.f32.mrb[33].mxu1 }
 0x130   : > { %v971_v25 = vadd.f32 %v932_v37, %v798_v31  ;;  %v2109_v38 = vpop.f32.mrb[33].mxu0  ;;  %v770_v47 = vpop.f32.mrb[34].mxu1 }
 0x131   : > { %v935_v41 = vpop.f32.mrb[34].mxu0  ;;  %v801_v50 = vadd.f32 %v770_v47, %v636_v60  ;;  %v2090_v51 = vpop.f32.mrb[35].mxu1 }
 0x132   : > { %v972_v44 = vadd.f32 %v935_v41, %v799_v35  ;;  %v2110_v45 = vpop.f32.mrb[35].mxu0 }
 0x136   : > { %v775_v46 = vpop.f32.mrb[36].mxu1 }
 0x137   : > { %v940_v52 = vpop.f32.mrb[36].mxu0  ;;  %v802_v56 = vadd.f32 %v775_v46, %v637_v49  ;;  %v2093_v48 = vpop.f32.mrb[37].mxu1 }
 0x138   : > { %v973_v40 = vadd.f32 %v940_v52, %v800_v43  ;;  %v2113_v53 = vpop.f32.mrb[37].mxu0  ;;  %v778_v59 = vpop.f32.mrb[38].mxu1 }
 0x139   : > { %v943_v55 = vpop.f32.mrb[38].mxu0  ;;  %v803_v61 = vadd.f32 %v778_v59, %v638_v8  ;;  %v2094_v62 = vpop.f32.mrb[39].mxu1 }
 0x13a   : > { %v974_v57 = vadd.f32 %v943_v55, %v801_v50  ;;  %v2114_v58 = vpop.f32.mrb[39].mxu0 }
 0x13e   : > { %v783_v3 = vpop.f32.mrb[40].mxu1 }
 0x13f   : > { %v948_v63 = vpop.f32.mrb[40].mxu0  ;;  %v804_v4 = vadd.f32 %v783_v3, %v639_v15  ;;  %v2097_v60 = vpop.f32.mrb[41].mxu1 }
 0x140   : > { %v975_v54 = vadd.f32 %v948_v63, %v802_v56  ;;  %v2117_v0 = vpop.f32.mrb[41].mxu0  ;;  %v786_v7 = vpop.f32.mrb[42].mxu1 }
 0x141   : > { %v951_v2 = vpop.f32.mrb[42].mxu0  ;;  %v805_v9 = vadd.f32 %v786_v7, %v640_v22  ;;  %v2098_v10 = vpop.f32.mrb[43].mxu1 }
 0x142   : > { %v976_v5 = vadd.f32 %v951_v2, %v803_v61  ;;  %v2118_v6 = vpop.f32.mrb[43].mxu0 }
 0x146   : > { %v791_v14 = vpop.f32.mrb[44].mxu1 }
 0x147   : > { %v956_v12 = vpop.f32.mrb[44].mxu0  ;;  %v806_v17 = vadd.f32 %v791_v14, %v641_v11  ;;  %v2101_v8 = vpop.f32.mrb[45].mxu1 }
 0x148   : > { %v977_v49 = vadd.f32 %v956_v12, %v804_v4  ;;  %v2121_v13 = vpop.f32.mrb[45].mxu0  ;;  %v794_v20 = vpop.f32.mrb[46].mxu1 }
 0x149   : > { %v959_v16 = vpop.f32.mrb[46].mxu0  ;;  %v807_v23 = vadd.f32 %v794_v20, %v642_v32  ;;  %v2102_v42 = vpop.f32.mrb[47].mxu1 }
 0x14a   : > { %v978_v18 = vadd.f32 %v959_v16, %v805_v9  ;;  %v2122_v19 = vpop.f32.mrb[47].mxu0 }
 0x14e   : > { %v1063_v26 = vpop.f32.mrb[48].mxu1 }
 0x14f   : > { %v964_v24 = vpop.f32.mrb[48].mxu0  ;;  %v1102_v29 = vadd.f32 %v1063_v26, %v971_v25  ;;  %v2133_v22 = vpop.f32.mrb[49].mxu1 }
 0x150   : > { %v979_v15 = vadd.f32 %v964_v24, %v806_v17  ;;  %v2125_v1 = vpop.f32.mrb[49].mxu0  ;;  %v1066_v21 = vpop.f32.mrb[50].mxu1 }
 0x151   : > { %v967_v28 = vpop.f32.mrb[50].mxu0  ;;  %v1103_v33 = vadd.f32 %v1066_v21, %v972_v44  ;;  %v2134_v34 = vpop.f32.mrb[51].mxu1 }
 0x152   : > { %v980_v30 = vadd.f32 %v967_v28, %v807_v23  ;;  %v2126_v31 = vpop.f32.mrb[51].mxu0 }
 0x156   : > { %v1071_v37 = vpop.f32.mrb[52].mxu1 }
 0x157   : > { %v1228_v35 = vpop.f32.mrb[52].mxu0  ;;  %v1104_v39 = vadd.f32 %v1071_v37, %v973_v40  ;;  %v2137_v32 = vpop.f32.mrb[53].mxu1 }
 0x158   : > { %v1267_v11 = vadd.f32 %v1228_v35, %v1102_v29  ;;  %v2157_v36 = vpop.f32.mrb[53].mxu0  ;;  %v1074_v27 = vpop.f32.mrb[54].mxu1 }
 0x159   : > { %v1231_v38 = vpop.f32.mrb[54].mxu0  ;;  %v1105_v45 = vadd.f32 %v1074_v27, %v974_v57  ;;  %v2138_v47 = vpop.f32.mrb[55].mxu1 }
 0x15a   : > { %v1268_v41 = vadd.f32 %v1231_v38, %v1103_v33  ;;  %v2158_v43 = vpop.f32.mrb[55].mxu0 }
 0x15e   : > { %v1079_v52 = vpop.f32.mrb[56].mxu1 }
 0x15f   : > { %v1236_v50 = vpop.f32.mrb[56].mxu0  ;;  %v1106_v46 = vadd.f32 %v1079_v52, %v975_v54  ;;  %v2141_v44 = vpop.f32.mrb[57].mxu1 }
 0x160   : > { %v1269_v25 = vadd.f32 %v1236_v50, %v1104_v39  ;;  %v2161_v51 = vpop.f32.mrb[57].mxu0  ;;  %v1082_v48 = vpop.f32.mrb[58].mxu1 }
 0x161   : > { %v1239_v53 = vpop.f32.mrb[58].mxu0  ;;  %v1107_v58 = vadd.f32 %v1082_v48, %v976_v5  ;;  %v2142_v59 = vpop.f32.mrb[59].mxu1 }
 0x162   : > { %v1270_v55 = vadd.f32 %v1239_v53, %v1105_v45  ;;  %v2162_v56 = vpop.f32.mrb[59].mxu0 }
 0x166   : > { %v1087_v63 = vpop.f32.mrb[60].mxu1 }
 0x167   : > { %v1244_v61 = vpop.f32.mrb[60].mxu0  ;;  %v1108_v57 = vadd.f32 %v1087_v63, %v977_v49  ;;  %v2145_v3 = vpop.f32.mrb[61].mxu1 }
 0x168   : > { %v2748_v40 = vadd.f32 %v1244_v61, %v1106_v46  ;;  %v2165_v62 = vpop.f32.mrb[61].mxu0  ;;  %v1090_v60 = vpop.f32.mrb[62].mxu1 }
 0x169   : > { %v1247_v0 = vpop.f32.mrb[62].mxu0  ;;  %v1109_v6 = vadd.f32 %v1090_v60, %v978_v18  ;;  %v2146_v54 = vpop.f32.mrb[63].mxu1 }
 0x16a   : > { %v2750_v2 = vadd.f32 %v1247_v0, %v1107_v58  ;;  %v2166_v4 = vpop.f32.mrb[63].mxu0 }
 0x16e   : > { %v1095_v5 = vpop.f32.mrb[64].mxu1 }
 0x16f   : > { %v1252_v7 = vpop.f32.mrb[64].mxu0  ;;  %v1110_v13 = vadd.f32 %v1095_v5, %v979_v15  ;;  %v2149_v14 = vpop.f32.mrb[65].mxu1 }
 0x170   : > { %v2752_v9 = vadd.f32 %v1252_v7, %v1108_v57  ;;  %v2169_v10 = vpop.f32.mrb[65].mxu0  ;;  %v1098_v8 = vpop.f32.mrb[66].mxu1 }
 0x171   : > { %v1255_v12 = vpop.f32.mrb[66].mxu0  ;;  %v1111_v49 = vadd.f32 %v1098_v8, %v980_v30  ;;  %v2150_v19 = vpop.f32.mrb[67].mxu1  ;;  %v2763_v30 = vld [vmem:[%s2818_s2] ss:$0 sm:$0xff] }
 0x172   : > { %v2754_v16 = vadd.f32 %v1255_v12, %v1109_v6  ;;  %v2170_v17 = vpop.f32.mrb[67].mxu0 }
 0x176   : > { %v1401_v18 = vpop.f32.mrb[68].mxu1 }
 0x177   : > { %v1260_v20 = vpop.f32.mrb[68].mxu0  ;;  %v1440_v1 = vadd.f32 %v1401_v18, %v1267_v11  ;;  %v2181_v26 = vpop.f32.mrb[69].mxu1 }
 0x178   : > { %v2756_v23 = vadd.f32 %v1260_v20, %v1110_v13  ;;  %v2173_v42 = vpop.f32.mrb[69].mxu0  ;;  %v1404_v15 = vpop.f32.mrb[70].mxu1 }
 0x179   : > { %v1263_v24 = vpop.f32.mrb[70].mxu0  ;;  %v1441_v22 = vadd.f32 %v1404_v15, %v1268_v41  ;;  %v2182_v31 = vpop.f32.mrb[71].mxu1 }
 0x17a   : > { %v2758_v28 = vadd.f32 %v1263_v24, %v1111_v49  ;;  %v2174_v29 = vpop.f32.mrb[71].mxu0 }
 0x17e   : > { %v1409_v35 = vpop.f32.mrb[72].mxu1 }
 0x17f   : > { %v1532_v21 = vpop.f32.mrb[72].mxu0  ;;  %v1442_v37 = vadd.f32 %v1409_v35, %v1269_v25  ;;  %v2185_v38 = vpop.f32.mrb[73].mxu1 }
 0x180   : > { %v1571_v33 = vadd.f32 %v1532_v21, %v1440_v1  ;;  %v2205_v34 = vpop.f32.mrb[73].mxu0  ;;  %v1412_v43 = vpop.f32.mrb[74].mxu1 }
 0x181   : > { %v1535_v36 = vpop.f32.mrb[74].mxu0  ;;  %v1443_v27 = vadd.f32 %v1412_v43, %v1270_v55  ;;  %v2186_v47 = vpop.f32.mrb[75].mxu1 }
 0x182   : > { %v1588_v11 = vadd.f32 %v2763_v30, %v1571_v33  ;;  %v1572_v39 = vadd.f32 %v1535_v36, %v1441_v22  ;;  %v2206_v32 = vpop.f32.mrb[75].mxu0 }
 0x184   : > { %vm1598_vm8 = vcmp.ge.f32.partialorder %v1588_v11, 0.0  ;;  %v1608_v41 = vmul.f32 0.2, %v1588_v11  ;;  %v1589_v45 = vadd.f32 %v2763_v30, %v1572_v39 }
 0x186   : > { %v1618_v50 = vsel %vm1598_vm8, %v1588_v11, %v1608_v41  ;;  %vm1599_vm9 = vcmp.ge.f32.partialorder %v1589_v45, 0.0  ;;  %v1609_v51 = vmul.f32 0.2, %v1589_v45  ;;  %v1417_v48 = vpop.f32.mrb[76].mxu1 }
 0x187   : > { %v1628_v52 = vmul.f32 1.4142135, %v1618_v50  ;;  %v1540_v53 = vpop.f32.mrb[76].mxu0  ;;  %v1444_v59 = vadd.f32 %v1417_v48, %v2748_v40  ;;  %v2189_v62 = vpop.f32.mrb[77].mxu1 }
 0x188   : > { %v1619_v25 = vsel %vm1599_vm9, %v1589_v45, %v1609_v51  ;;  %v1573_v46 = vadd.f32 %v1540_v53, %v1442_v37  ;;  %v2209_v44 = vpop.f32.mrb[77].mxu0  ;;  %v1420_v3 = vpop.f32.mrb[78].mxu1 }
 0x189   : > { %v1934_v56 = vpack.c.bf16 %v1628_v52, %v1628_v52  ;;  %v1629_v55 = vmul.f32 1.4142135, %v1619_v25  ;;  %v1543_v58 = vpop.f32.mrb[78].mxu0  ;;  %v1445_v60 = vadd.f32 %v1420_v3, %v2750_v2  ;;  %v2190_v54 = vpop.f32.mrb[79].mxu1 }
 0x18a   : > { %v1590_v61 = vadd.f32 %v2763_v30, %v1573_v46  ;;  %v1574_v63 = vadd.f32 %v1543_v58, %v1443_v27  ;;  %v2210_v0 = vpop.f32.mrb[79].mxu0 }
 0x18b   : > { %1679 = vst.msk [vmem:[%s2771_s11] sm:$0xf] %vm1678_vm10, %v1934_v56  ;;  %v1935_v57 = vpack.c.bf16 %v1629_v55, %v1629_v55 }
 0x18c   : > { %vm1600_vm11 = vcmp.ge.f32.partialorder %v1590_v61, 0.0  ;;  %v1610_v4 = vmul.f32 0.2, %v1590_v61  ;;  %v1591_v6 = vadd.f32 %v2763_v30, %v1574_v63 }
 0x18d   : > { %1680 = vst.msk [vmem:[%s2771_s11 + $0x4] sm:$0xf] %vm1678_vm10, %v1935_v57 }
 0x18e   : > { %v1620_v7 = vsel %vm1600_vm11, %v1590_v61, %v1610_v4  ;;  %vm1601_vm12 = vcmp.ge.f32.partialorder %v1591_v6, 0.0  ;;  %v1611_v40 = vmul.f32 0.2, %v1591_v6  ;;  %v1425_v49 = vpop.f32.mrb[80].mxu1 }
 0x18f   : > { %v1630_v10 = vmul.f32 1.4142135, %v1620_v7  ;;  %v1548_v5 = vpop.f32.mrb[80].mxu0  ;;  %v1446_v2 = vadd.f32 %v1425_v49, %v2752_v9  ;;  %v2193_v42 = vpop.f32.mrb[81].mxu1 }
 0x190   : > { %v1621_v12 = vsel %vm1601_vm12, %v1591_v6, %v1611_v40  ;;  %v1575_v13 = vadd.f32 %v1548_v5, %v1444_v59  ;;  %v2213_v14 = vpop.f32.mrb[81].mxu0  ;;  %v1428_v26 = vpop.f32.mrb[82].mxu1 }
 0x191   : > { %v1936_v17 = vpack.c.bf16 %v1630_v10, %v1630_v10  ;;  %v1631_v8 = vmul.f32 1.4142135, %v1621_v12  ;;  %v1551_v19 = vpop.f32.mrb[82].mxu0  ;;  %v1447_v15 = vadd.f32 %v1428_v26, %v2754_v16  ;;  %v2194_v31 = vpop.f32.mrb[83].mxu1 }
 0x192   : > { %v1592_v20 = vadd.f32 %v2763_v30, %v1575_v13  ;;  %v1576_v18 = vadd.f32 %v1551_v19, %v1445_v60  ;;  %v2214_v24 = vpop.f32.mrb[83].mxu0 }
 0x193   : > { %1681 = vst.msk [vmem:[%s2771_s11 + $0x8] sm:$0xf] %vm1678_vm10, %v1936_v17  ;;  %v1937_v1 = vpack.c.bf16 %v1631_v8, %v1631_v8 }
 0x194   : > { %vm1602_vm13 = vcmp.ge.f32.partialorder %v1592_v20, 0.0  ;;  %v1612_v29 = vmul.f32 0.2, %v1592_v20  ;;  %v1593_v22 = vadd.f32 %v2763_v30, %v1576_v18 }
 0x195   : > { %1682 = vst.msk [vmem:[%s2771_s11 + $0xc] sm:$0xf] %vm1678_vm10, %v1937_v1 }
 0x196   : > { %v1622_v21 = vsel %vm1602_vm13, %v1592_v20, %v1612_v29  ;;  %vm1603_vm14 = vcmp.ge.f32.partialorder %v1593_v22, 0.0  ;;  %v1613_v9 = vmul.f32 0.2, %v1593_v22  ;;  %v1433_v39 = vpop.f32.mrb[84].mxu1 }
 0x197   : > { %v1632_v33 = vmul.f32 1.4142135, %v1622_v21  ;;  %v1556_v34 = vpop.f32.mrb[84].mxu0  ;;  %v1448_v16 = vadd.f32 %v1433_v39, %v2756_v23  ;;  %v2197_v41 = vpop.f32.mrb[85].mxu1 }
 0x198   : > { %v1623_v35 = vsel %vm1603_vm14, %v1593_v22, %v1613_v9  ;;  %v1577_v36 = vadd.f32 %v1556_v34, %v1446_v2  ;;  %v2217_v37 = vpop.f32.mrb[85].mxu0  ;;  %v1436_v50 = vpop.f32.mrb[86].mxu1 }
 0x199   : > { %v1938_v11 = vpack.c.bf16 %v1632_v33, %v1632_v33  ;;  %v1633_v38 = vmul.f32 1.4142135, %v1623_v35  ;;  %v1559_v32 = vpop.f32.mrb[86].mxu0  ;;  %v1449_v52 = vadd.f32 %v1436_v50, %v2758_v28  ;;  %v2198_v25 = vpop.f32.mrb[87].mxu1 }
 0x19a   : > { %v1594_v43 = vadd.f32 %v2763_v30, %v1577_v36  ;;  %v1578_v27 = vadd.f32 %v1559_v32, %v1447_v15  ;;  %v2218_v45 = vpop.f32.mrb[87].mxu0 }
 0x19b   : > { %1683 = vst.msk [vmem:[%s2771_s11 + $0x10] sm:$0xf] %vm1678_vm10, %v1938_v11  ;;  %v1939_v47 = vpack.c.bf16 %v1633_v38, %v1633_v38 }
 0x19c   : > { %vm1604_vm15 = vcmp.ge.f32.partialorder %v1594_v43, 0.0  ;;  %v1614_v51 = vmul.f32 0.2, %v1594_v43  ;;  %v1595_v53 = vadd.f32 %v2763_v30, %v1578_v27 }
 0x19d   : > { %1684 = vst.msk [vmem:[%s2771_s11 + $0x14] sm:$0xf] %vm1678_vm10, %v1939_v47 }
 0x19e   : > { %v1624_v23 = vsel %vm1604_vm15, %v1594_v43, %v1614_v51  ;;  %vm1605_vm0 = vcmp.ge.f32.partialorder %v1595_v53, 0.0  ;;  %v1615_v46 = vmul.f32 0.2, %v1595_v53 }
 0x19f   : > { %v1634_v44 = vmul.f32 1.4142135, %v1624_v23  ;;  %v1564_v56 = vpop.f32.mrb[88].mxu0 }
 0x1a0   : > { %v1625_v55 = vsel %vm1605_vm0, %v1595_v53, %v1615_v46  ;;  %v1579_v48 = vadd.f32 %v1564_v56, %v1448_v16  ;;  %v2221_v58 = vpop.f32.mrb[89].mxu0 }
 0x1a1   : > { %v1940_v59 = vpack.c.bf16 %v1634_v44, %v1634_v44  ;;  %v1635_v61 = vmul.f32 1.4142135, %v1625_v55  ;;  %v1567_v62 = vpop.f32.mrb[90].mxu0 }
 0x1a2   : > { %v1596_v28 = vadd.f32 %v2763_v30, %v1579_v48  ;;  %v1580_v63 = vadd.f32 %v1567_v62, %v1449_v52  ;;  %v2222_v0 = vpop.f32.mrb[91].mxu0 }
 0x1a3   : > { %1685 = vst.msk [vmem:[%s2771_s11 + $0x18] sm:$0xf] %vm1678_vm10, %v1940_v59  ;;  %v1941_v57 = vpack.c.bf16 %v1635_v61, %v1635_v61 }
 0x1a4   : > { %vm1606_vm1 = vcmp.ge.f32.partialorder %v1596_v28, 0.0  ;;  %v1616_v3 = vmul.f32 0.2, %v1596_v28  ;;  %v1597_v4 = vadd.f32 %v2763_v30, %v1580_v63 }
 0x1a5   : > { %1686 = vst.msk [vmem:[%s2771_s11 + $0x1c] sm:$0xf] %vm1678_vm10, %v1941_v57 }
 0x1a6   : > { %v1626_v60 = vsel %vm1606_vm1, %v1596_v28, %v1616_v3  ;;  %vm1607_vm2 = vcmp.ge.f32.partialorder %v1597_v4, 0.0  ;;  %v1617_v6 = vmul.f32 0.2, %v1597_v4 }
 0x1a7   : > { %v1636_v54 = vmul.f32 1.4142135, %v1626_v60 }
 0x1a8   : > { %v1627_v7 = vsel %vm1607_vm2, %v1597_v4, %v1617_v6 }
 0x1a9   : > { %v1942_v40 = vpack.c.bf16 %v1636_v54, %v1636_v54  ;;  %v1637_v10 = vmul.f32 1.4142135, %v1627_v7 }
 0x1ab   : > { %1687 = vst.msk [vmem:[%s2771_s11 + $0x20] sm:$0xf] %vm1678_vm10, %v1942_v40  ;;  %v1943_v5 = vpack.c.bf16 %v1637_v10, %v1637_v10 }
 0x1ad   : > { %1688 = vst.msk [vmem:[%s2771_s11 + $0x24] sm:$0xf] %vm1678_vm10, %v1943_v5 }
 0x1ae PF: > { %s13_s14 = sadd.s32 1, %s2318_s14   ;;  %s2820_s12 = smov %s2314_s13 }
 0x1af   : > { %p10_p5 = scmp.ge.s32.totalorder %s13_s14, 4   ;;  %s2821_s13 = smov %s2823_s15 }
 0x1b1   :  { %12 = sbr.rel (!%p10_p5) target bundleno = 2 (0x2), region = 76 }

// kernel: discriminator_forward.17
= control target key start
LH: loop header
LB: loop body
LE: loop exit
PB: predicated region body
PF: predicated region fallthrough
CT: control target
= control target key end

     0   :  { %vm22_vm0 = vcmask 261120   ;;  %v225_v1 = vmov 0.0   ;;  %vm175_vm1 = vcmask 257024   ;;  %s294_s1 = inlined_call_operand.vmem [shape: bf16[32,32], index: 1, kind: input, shape index: {}]   ;;  %s295_s0 = inlined_call_operand.vmem [shape: bf16[32,32], index: 0, kind: input, shape index: {}]   ;;  %s296_s3 = inlined_call_operand.vmem [shape: bf16[32,32], index: 3, kind: input, shape index: {}]   ;;  %s297_s2 = inlined_call_operand.vmem [shape: f32[1,32], index: 2, kind: input, shape index: {}]   ;;  %s298_s4 = inlined_call_operand.vmem [shape: bf16[32,32], index: 4, kind: output, shape index: {}]  }
   0x1   :  { %v221_v0 = vld [vmem:[%s294_s1] sm:$0xff]   ;;  %25 = vst.msk [vmem:[#allocation2 + $0x10] sm:$0xff] %vm22_vm0, %v225_v1  ;;  %23 = vst.msk [vmem:[#allocation2] sm:$0xff] %vm22_vm0, %v225_v1  ;;  %v222_v2 = vld [vmem:[%s294_s1 + $0x8] sm:$0xff]  }
   0x2   :  { %24 = vst.msk [vmem:[#allocation2 + $0x8] sm:$0xff] %vm22_vm0, %v225_v1  ;;  %26 = vst.msk [vmem:[#allocation2 + $0x18] sm:$0xff] %vm22_vm0, %v225_v1  ;;  %212 = vmatprep.subr.bf16.mxu0 %v221_v0  ;;  %v223_v3 = vld [vmem:[%s295_s0] sm:$0xff]   ;;  %v224_v4 = vld [vmem:[%s295_s0 + $0x8] sm:$0xff]  }
   0x3   :  { %213 = vmatpush3.bf16.msra.mxu0 %v221_v0  ;;  %216 = vmatprep.mubr.msk.bf16.mxu0 %vm22_vm0, %v223_v3  ;;  %v207_v17 = vld [vmem:[%s296_s3 + $0x8] sm:$0xff]   ;;  %v200_v18 = vld [vmem:[%s296_s3] sm:$0xff]  }
   0x4   :  { %214 = vmatprep.subr.bf16.mxu0 %v222_v2  ;;  %v190_v19 = vld [vmem:[%s297_s2] ss:$0 sm:$0xff]  ;;  %v205_v20 = vunpack.c.l.bf16 %v207_v17  ;;  %v201_v22 = vunpack.c.l.bf16 %v200_v18  ;;  %v206_v25 = vunpack.c.h.bf16 %v207_v17  ;;  %v202_v28 = vunpack.c.h.bf16 %v200_v18 }
   0x7   :  { %215 = vmatpush3.bf16.msra.mxu0 %v222_v2 }
   0x8   :  { %v29_v5 = vld [vmem:[#allocation2 + $0x10] sm:$0xff]  ;;  %v27_v6 = vld [vmem:[#allocation2] sm:$0xff] }
   0x9   :  { %v30_v8 = vld [vmem:[#allocation2 + $0x18] sm:$0xff]  ;;  %v28_v11 = vld [vmem:[#allocation2 + $0x8] sm:$0xff] }
   0xa   :  { %217 = vmatmul.mubr.msk.bf16.vlgmr.msra.gmra.mrb[0].mxu0 %vm22_vm0, %v224_v4 }
  0xdd   :  { %v218_v7 = vpop.f32.mrb[0].mxu0 }
  0xde   :  { %v119_v9 = vadd.f32 %v218_v7, %v29_v5  ;;  %v102_v10 = vpop.f32.mrb[1].mxu0 }
  0xdf   :  { %v117_v12 = vadd.f32 %v102_v10, %v27_v6  ;;  %v219_v13 = vpop.f32.mrb[2].mxu0 }
  0xe0   :  { %123 = vst.msk [vmem:[#allocation2 + $0x10] sm:$0xff] %vm22_vm0, %v119_v9  ;;  %v120_v14 = vadd.f32 %v219_v13, %v30_v8  ;;  %v105_v15 = vpop.f32.mrb[3].mxu0 }
  0xe1   :  { %121 = vst.msk [vmem:[#allocation2] sm:$0xff] %vm22_vm0, %v117_v12  ;;  %v118_v16 = vadd.f32 %v105_v15, %v28_v11 }
  0xe2   :  { %124 = vst.msk [vmem:[#allocation2 + $0x18] sm:$0xff] %vm22_vm0, %v120_v14 }
  0xe3   :  { %122 = vst.msk [vmem:[#allocation2 + $0x8] sm:$0xff] %vm22_vm0, %v118_v16 }
  0xe7   :  { %v130_v21 = vld [vmem:[#allocation2 + $0x10] sm:$0xff] }
  0xe8   :  { %v141_v23 = vadd.f32 %v190_v19, %v130_v21  ;;  %v128_v24 = vld [vmem:[#allocation2] sm:$0xff] }
  0xe9   :  { %v139_v26 = vadd.f32 %v190_v19, %v128_v24  ;;  %v131_v27 = vld [vmem:[#allocation2 + $0x18] sm:$0xff] }
  0xea   :  { %v153_v29 = vadd.f32 %v205_v20, %v141_v23  ;;  %v142_v30 = vadd.f32 %v190_v19, %v131_v27  ;;  %v129_v31 = vld [vmem:[#allocation2 + $0x8] sm:$0xff] }
  0xeb   :  { %v151_v32 = vadd.f32 %v201_v22, %v139_v26  ;;  %v140_v33 = vadd.f32 %v190_v19, %v129_v31 }
  0xec   :  { %v157_v34 = vmul.f32 0.70710677, %v153_v29  ;;  %v154_v35 = vadd.f32 %v206_v25, %v142_v30 }
  0xed   :  { %v155_v36 = vmul.f32 0.70710677, %v151_v32  ;;  %v152_v37 = vadd.f32 %v202_v28, %v140_v33 }
  0xee   :  { %v197_v38 = vpack.c.bf16 %v157_v34, %v157_v34  ;;  %v158_v39 = vmul.f32 0.70710677, %v154_v35 }
  0xef   :  { %v195_v40 = vpack.c.bf16 %v155_v36, %v155_v36  ;;  %v156_v41 = vmul.f32 0.70710677, %v152_v37 }
  0xf0   :  { %178 = vst.msk [vmem:[%s298_s4 + $0x8] sm:$0xf] %vm175_vm1, %v197_v38  ;;  %v198_v42 = vpack.c.bf16 %v158_v39, %v158_v39 }
  0xf1   :  { %176 = vst.msk [vmem:[%s298_s4] sm:$0xf] %vm175_vm1, %v195_v40  ;;  %v196_v43 = vpack.c.bf16 %v156_v41, %v156_v41 }
  0xf2   :  { %179 = vst.msk [vmem:[%s298_s4 + $0xc] sm:$0xf] %vm175_vm1, %v198_v42 }
  0xf3   :  { %177 = vst.msk [vmem:[%s298_s4 + $0x4] sm:$0xf] %vm175_vm1, %v196_v43 }

// kernel: discriminator_forward.18
= control target key start
LH: loop header
LB: loop body
LE: loop exit
PB: predicated region body
PF: predicated region fallthrough
CT: control target
= control target key end

     0   :  { %v14_v0 = vlaneseq  ;;  %v217_v2 = vmov 1983009808   ;;  %vm54_vm0 = vcmask 1040384   ;;  %s256_s0 = inlined_call_operand.vmem [shape: bf16[2,1,512], index: 0, kind: input, shape index: {}]   ;;  %s257_s1 = inlined_call_operand.vmem [shape: f32[1,128], index: 1, kind: output, shape index: {}]  }
   0x1   :  { %v205_v1 = vld [vmem:[%s256_s0] sm:$0xff]   ;;  %v79_v3 = vunpack.c.l.s4 %v217_v2 }
   0x2   :  { %v206_v4 = vunpack.c.l.bf16 %v205_v1  ;;  %v15_v5 = vshrl.u32 %v14_v0, 7  ;;  %v207_v6 = vunpack.c.h.bf16 %v205_v1 }
   0x3   :  { %v80_v11 = vunpack.c.0.s8 %v79_v3 }
   0x4   :  { %v16_v7 = vsub.s32 0, %v15_v5  ;;  %v20_v8 = vsub.s32 2, %v15_v5  ;;  %v24_v9 = vsub.s32 4, %v15_v5  ;;  %v28_v10 = vsub.s32 6, %v15_v5 }
   0x5   :  { %v83_v32 = vsub.s32 %v80_v11, %v15_v5 }
   0x6   :  { %v17_v12 = vrot.slane %v206_v4, %v16_v7  ;;  %v21_v13 = vrot.slane %v206_v4, %v20_v8  ;;  %v25_v14 = vrot.slane %v206_v4, %v24_v9  ;;  %v29_v15 = vrot.slane %v206_v4, %v28_v10 }
   0x7   :  { %v33_v16 = vrot.slane %v207_v6, %v16_v7  ;;  %v37_v17 = vrot.slane %v207_v6, %v20_v8  ;;  %v41_v18 = vrot.slane %v207_v6, %v24_v9  ;;  %v45_v19 = vrot.slane %v207_v6, %v28_v10 }
   0x8   :  { %v55_v20 = vsel %vm54_vm0, %v17_v12, 0.0  ;;  %v58_v21 = vsel %vm54_vm0, %v21_v13, 0.0  ;;  %v61_v22 = vsel %vm54_vm0, %v25_v14, 0.0  ;;  %v64_v23 = vsel %vm54_vm0, %v29_v15, 0.0 }
   0x9   :  { %v56_v24 = vsel %vm54_vm0, %v33_v16, 0.0  ;;  %v59_v25 = vsel %vm54_vm0, %v37_v17, 0.0  ;;  %v62_v26 = vsel %vm54_vm0, %v41_v18, 0.0  ;;  %v65_v27 = vsel %vm54_vm0, %v45_v19, 0.0 }
   0xa   :  { %v57_v28 = vadd.f32 %v56_v24, %v55_v20  ;;  %v60_v29 = vadd.f32 %v59_v25, %v58_v21  ;;  %v63_v30 = vadd.f32 %v62_v26, %v61_v22  ;;  %v66_v31 = vadd.f32 %v65_v27, %v64_v23 }
   0xc   :  { %v68_v33 = vmul.f32 0.5, %v57_v28  ;;  %v69_v34 = vmul.f32 0.5, %v60_v29  ;;  %v70_v35 = vmul.f32 0.5, %v63_v30  ;;  %v71_v36 = vmul.f32 0.5, %v66_v31 }
   0xe   :  { %v76_v37 = vcombine.low %v68_v33, %v69_v34  ;;  %v77_v38 = vcombine.low %v70_v35, %v71_v36 }
  0x10   :  { %v84_v39 = vrot.slane %v76_v37, %v83_v32  ;;  %v91_v40 = vrot.slane %v77_v38, %v83_v32 }
  0x12   :  { %v92_v41 = vcombine.low %v84_v39, %v91_v40 }
  0x14   :  { %v94_v42 = vsub.f32 %v206_v4, %v92_v41  ;;  %v95_v43 = vsub.f32 %v207_v6, %v92_v41 }
  0x16   :  { %v96_v44 = vmul.f32 %v94_v42, %v94_v42  ;;  %v97_v45 = vmul.f32 %v95_v43, %v95_v43 }
  0x18   :  { %v103_v46 = vrot.slane %v96_v44, %v16_v7  ;;  %v107_v47 = vrot.slane %v96_v44, %v20_v8  ;;  %v111_v48 = vrot.slane %v96_v44, %v24_v9  ;;  %v115_v49 = vrot.slane %v96_v44, %v28_v10 }
  0x19   :  { %v119_v50 = vrot.slane %v97_v45, %v16_v7  ;;  %v123_v51 = vrot.slane %v97_v45, %v20_v8  ;;  %v127_v52 = vrot.slane %v97_v45, %v24_v9  ;;  %v131_v53 = vrot.slane %v97_v45, %v28_v10 }
  0x1a   :  { %v140_v54 = vsel %vm54_vm0, %v103_v46, 0.0  ;;  %v143_v55 = vsel %vm54_vm0, %v107_v47, 0.0  ;;  %v146_v56 = vsel %vm54_vm0, %v111_v48, 0.0  ;;  %v149_v57 = vsel %vm54_vm0, %v115_v49, 0.0 }
  0x1b   :  { %v141_v58 = vsel %vm54_vm0, %v119_v50, 0.0  ;;  %v144_v59 = vsel %vm54_vm0, %v123_v51, 0.0  ;;  %v147_v60 = vsel %vm54_vm0, %v127_v52, 0.0  ;;  %v150_v61 = vsel %vm54_vm0, %v131_v53, 0.0 }
  0x1c   :  { %v142_v62 = vadd.f32 %v141_v58, %v140_v54  ;;  %v145_v63 = vadd.f32 %v144_v59, %v143_v55  ;;  %v148_v0 = vadd.f32 %v147_v60, %v146_v56  ;;  %v151_v1 = vadd.f32 %v150_v61, %v149_v57 }
  0x1e   :  { %v152_v2 = vmul.f32 0.5, %v142_v62  ;;  %v153_v3 = vmul.f32 0.5, %v145_v63  ;;  %v154_v4 = vmul.f32 0.5, %v148_v0  ;;  %v155_v5 = vmul.f32 0.5, %v151_v1 }
  0x20   :  { %v156_v6 = vadd.f32 1e-08, %v152_v2  ;;  %v157_v7 = vadd.f32 1e-08, %v153_v3  ;;  %v158_v8 = vadd.f32 1e-08, %v154_v4 }
  0x21   :  { %v159_v9 = vadd.f32 1e-08, %v155_v5 }
  0x22   :  { %209 = vrsqrt.f32 %v156_v6  ;;  %vm162_vm1 = vcmp.eq.f32.partialorder %v156_v6, inf  ;;  %vm164_vm2 = vcmp.eq.f32.partialorder %v156_v6, 0.0  ;;  %v165_v11 = vand.u32 2147483648, %v156_v6 }
  0x23   :  { %211 = vrsqrt.f32 %v157_v7  ;;  %vm169_vm3 = vcmp.eq.f32.partialorder %v157_v7, inf  ;;  %vm171_vm4 = vcmp.eq.f32.partialorder %v157_v7, 0.0  ;;  %v172_v14 = vand.u32 2147483648, %v157_v7 }
  0x24   :  { %213 = vrsqrt.f32 %v158_v8  ;;  %vm176_vm5 = vcmp.eq.f32.partialorder %v158_v8, inf  ;;  %vm178_vm6 = vcmp.eq.f32.partialorder %v158_v8, 0.0  ;;  %v179_v17 = vand.u32 2147483648, %v158_v8 }
  0x25   :  { %215 = vrsqrt.f32 %v159_v9  ;;  %vm183_vm7 = vcmp.eq.f32.partialorder %v159_v9, inf  ;;  %v186_v21 = vand.u32 2147483648, %v159_v9  ;;  %vm185_vm8 = vcmp.eq.f32.partialorder %v159_v9, 0.0 }
  0x2c   :  { %v210_v10 = vpop.eup %209 }
  0x2d   :  { %v212_v12 = vpop.eup %211  ;;  %v161_v13 = vmul.f32 %v210_v10, %v156_v6 }
  0x2e   :  { %v214_v15 = vpop.eup %213  ;;  %v168_v16 = vmul.f32 %v212_v12, %v157_v7 }
  0x2f   :  { %v216_v18 = vpop.eup %215  ;;  %v163_v19 = vsel %vm162_vm1, %v156_v6, %v161_v13  ;;  %v175_v20 = vmul.f32 %v214_v15, %v158_v8 }
  0x30   :  { %v166_v22 = vsel %vm164_vm2, %v165_v11, %v163_v19  ;;  %v170_v23 = vsel %vm169_vm3, %v157_v7, %v168_v16  ;;  %v182_v24 = vmul.f32 %v216_v18, %v159_v9 }
  0x31   :  { %v173_v25 = vsel %vm171_vm4, %v172_v14, %v170_v23  ;;  %v177_v26 = vsel %vm176_vm5, %v158_v8, %v175_v20  ;;  %v188_v27 = vsel %vm54_vm0, %v166_v22, 0.0 }
  0x32   :  { %v180_v28 = vsel %vm178_vm6, %v179_v17, %v177_v26  ;;  %v184_v29 = vsel %vm183_vm7, %v159_v9, %v182_v24  ;;  %v189_v30 = vsel %vm54_vm0, %v173_v25, 0.0 }
  0x33   :  { %v187_v31 = vsel %vm185_vm8, %v186_v21, %v184_v29  ;;  %v190_v32 = vadd.f32 %v189_v30, %v188_v27  ;;  %v191_v33 = vsel %vm54_vm0, %v180_v28, 0.0 }
  0x34   :  { %v193_v34 = vsel %vm54_vm0, %v187_v31, 0.0 }
  0x35   :  { %v192_v35 = vadd.f32 %v191_v33, %v190_v32 }
  0x37   :  { %v194_v36 = vadd.f32 %v193_v34, %v192_v35 }
  0x39   :  { %195 = vadd.xlane.f32.xlu0 %v194_v36 }
  0xc6   :  { %v196_v37 = vpop.xlane.xlu0 %195 }
  0xc7   :  { %v198_v38 = vmul.f32 0.001953125, %v196_v37 }
  0xc9   :  { %199 = vst [vmem:[%s257_s1] sm:$0x1] %v198_v38 }

// kernel: discriminator_forward.16
= control target key start
LH: loop header
LB: loop body
LE: loop exit
PB: predicated region body
PF: predicated region fallthrough
CT: control target
= control target key end

     0   :  { %s1510_s12 = smov 0   ;;  %s1512_s13 = smov 0   ;;  %s1644_s0 = inlined_call_operand.vmem [shape: bf16[2,4,32,32], index: 0, kind: input, shape index: {}]   ;;  %s1645_s1 = inlined_call_operand.vmem [shape: bf16[9,32,32], index: 1, kind: input, shape index: {}]   ;;  %s1646_s2 = inlined_call_operand.vmem [shape: f32[1,32], index: 2, kind: input, shape index: {}]   ;;  %s1647_s3 = inlined_call_operand.vmem [shape: bf16[2,20,32], index: 3, kind: output, shape index: {}]  }
   0x1   :  { %s1514_s14 = smov 0  }
   0x2 LB: > { %s25_s15 = sadd.s32 1, %s1484_s13  ;;  %p1189_p0 = scmp.ge.s32.totalorder %s1488_s14, 1  ;;  %s1488_s14 = sphi %s1514_s14, %s13_s14   ;;  %s1484_s13 = sphi %s1512_s13, %s1649_s13   ;;  %s1480_s12 = sphi %s1510_s12, %s1648_s12  }
   0x3   : > { %p27_p1 = scmp.ge.s32.totalorder %s25_s15, 2  ;;  %p168_p2 = scmp.lt.s32.totalorder %s1488_s14, 3 }
   0x5   : > { %s1651_s15 = smov (%p27_p1, %s25_s15), 0  ;;  %p169_p3 = pnand %p1189_p0, %p168_p2 }
   0x6   : > { %v1433_v0 = vld [vmem:[%s1645_s1 + $0x10] sm:$0xff] (!%p169_p3)   ;;  %p202_p4 = scmp.lt.s32.totalorder (!%p169_p3), %s1480_s12, 1  ;;  %v1434_v1 = vld [vmem:[%s1645_s1] sm:$0xff] (!%p169_p3)   ;;  %v1435_v2 = vld [vmem:[%s1645_s1 + $0x18] sm:$0xff] (!%p169_p3)   ;;  %vm259_vm0 = vcmask (!%p169_p3), 261120   ;;  %vm965_vm3 = vcmask (!%p169_p3), 1044480  }
   0x7   : > { %172 = sbr.rel (%p169_p3) target bundleno = 278 (0x116), region = 32  ;;  %1336 = vmatprep.subr.bf16.mxu0 (!%p169_p3), %v1433_v0  ;;  %1344 = vmatprep.subr.bf16.mxu1 (!%p169_p3), %v1434_v1  ;;  %v1436_v3 = vld [vmem:[%s1645_s1 + $0x8] sm:$0xff] (!%p169_p3)   ;;  %v1441_v4 = vld [vmem:[%s1645_s1 + $0x20] sm:$0xff] (!%p169_p3)   ;;  %v1442_v5 = vld [vmem:[%s1645_s1 + $0x30] sm:$0xff] (!%p169_p3)   ;;  %vm397_vm1 = vsmask.f32 (!%p169_p3), 7424 }
   0x8   : > { %1337 = vmatpush3.bf16.msra.mxu0 (!%p169_p3), %v1433_v0  ;;  %1345 = vmatpush3.bf16.msra.mxu1 (!%p169_p3), %v1434_v1  ;;  %v1443_v9 = vld [vmem:[%s1645_s1 + $0x28] sm:$0xff] (!%p169_p3)   ;;  %v1444_v13 = vld [vmem:[%s1645_s1 + $0x38] sm:$0xff] (!%p169_p3)   ;;  %v1446_v15 = vld [vmem:[%s1645_s1 + $0x40] sm:$0xff] (!%p169_p3)   ;;  %vm764_vm2 = vsmask.f32 (!%p169_p3), 5376  ;;  %vm1076_vm7 = vcmask (!%p169_p3), 254976  }
   0x9   : > { %1338 = vmatprep.subr.bf16.mxu0 (!%p169_p3), %v1435_v2  ;;  %1346 = vmatprep.subr.bf16.mxu1 (!%p169_p3), %v1436_v3  ;;  %v1449_v22 = vld [vmem:[%s1645_s1 + $0x50] sm:$0xff] (!%p169_p3)   ;;  %v1450_v24 = vld [vmem:[%s1645_s1 + $0x48] sm:$0xff] (!%p169_p3)   ;;  %v1451_v27 = vld [vmem:[%s1645_s1 + $0x58] sm:$0xff] (!%p169_p3)   ;;  %vm1073_vm8 = vcmask (!%p169_p3), 257024  }
   0xa   : > { %v1454_v31 = vld [vmem:[%s1645_s1 + $0x60] sm:$0xff] (!%p169_p3)   ;;  %v1456_v35 = vld [vmem:[%s1645_s1 + $0x70] sm:$0xff] (!%p169_p3)   ;;  %v1457_v42 = vld [vmem:[%s1645_s1 + $0x68] sm:$0xff] (!%p169_p3)  }
   0xb   : > { %v1458_v44 = vld [vmem:[%s1645_s1 + $0x78] sm:$0xff] (!%p169_p3)   ;;  %v1461_v50 = vld [vmem:[%s1645_s1 + $0x80] sm:$0xff] (!%p169_p3)  }
   0xc   : > { %1339 = vmatpush3.bf16.msra.mxu0 (!%p169_p3), %v1435_v2  ;;  %1347 = vmatpush3.bf16.msra.mxu1 (!%p169_p3), %v1436_v3 }
   0xd   : > { %1352 = vmatprep.subr.bf16.mxu0 (!%p169_p3), %v1441_v4  ;;  %1360 = vmatprep.subr.bf16.mxu1 (!%p169_p3), %v1442_v5 }
   0xe   : > { %s1653_s12 = smov (!%p202_p4, %s1480_s12), 1 }
   0xf   : > { %s1296_s24 = sshll.u32 %s1653_s12, 6  ;;  %s1408_s8 = smul.u32 12, %s1653_s12 }
  0x10   : > { %s1549_s29 = scalar_lea.vmem %s1644_s0, %s1296_s24 }
  0x11   : > { %v1437_v6 = vld [vmem:[%s1549_s29 + $0x10] sm:$0xff]   ;;  %v1438_v7 = vld [vmem:[%s1549_s29] sm:$0xff]   ;;  %v1439_v8 = vld [vmem:[%s1549_s29 + $0x18] ss:$0 sps:$4 sm:$0x33]   ;;  %s221_s11 = scalar_lea.vmem %s1647_s3, %s1408_s8 }
  0x12   : > { %1340 = vmatprep.mubr.msk.bf16.mxu0 %vm259_vm0, %v1437_v6  ;;  %1348 = vmatprep.mubr.msk.bf16.mxu1 %vm259_vm0, %v1438_v7  ;;  %v398_v10 = vshrl.u32 %v1438_v7, 16  ;;  %v400_v11 = vshll.u32 %v1438_v7, 16  ;;  %v1440_v12 = vld [vmem:[%s1549_s29 + $0x8] ss:$0 sps:$4 sm:$0x33]   ;;  %v1447_v17 = vld [vmem:[%s1549_s29 + $0x20] sm:$0xff]  }
  0x13   : > { %1341 = vmatmul.mubr.msk.bf16.vlgmr.msra.gmra.mrb[0].mxu0 %vm259_vm0, %v1439_v8  ;;  %1349 = vmatmul.mubr.msk.bf16.vlgmr.msra.gmra.mrb[0].mxu1 %vm259_vm0, %v1440_v12  ;;  %v1445_v16 = vld [vmem:[%s1549_s29 + $0x8] ss:$0 sps:$4 sm:$0x77]   ;;  %v1452_v28 = vld [vmem:[%s1549_s29 + $0x30] sm:$0xff]   ;;  %v664_v29 = vshll.u32 %v1447_v17, 16  ;;  %v662_v30 = vshrl.u32 %v1447_v17, 16 }
  0x14   : > { %v402_v14 = vrot.slane %v400_v11, 1  ;;  %1353 = vmatpush3.bf16.msra.mxu0 %v1441_v4  ;;  %1361 = vmatpush3.bf16.msra.mxu1 %v1442_v5  ;;  %v405_v19 = vshll.u32 %v1445_v16, 16  ;;  %v409_v20 = vshrl.u32 %v1445_v16, 16  ;;  %v1448_v21 = vld [vmem:[%s1549_s29 + $0x28] ss:$0 sps:$4 sm:$0x33]  }
  0x15   : > { %1354 = vmatprep.subr.bf16.mxu0 %v1443_v9  ;;  %1362 = vmatprep.subr.bf16.mxu1 %v1444_v13  ;;  %v666_v32 = vrot.slane %v664_v29, 1  ;;  %v1453_v33 = vld [vmem:[%s1549_s29 + $0x38] ss:$0 sps:$4 sm:$0x33]   ;;  %v745_v39 = vld [vmem:[%s1549_s29] sm:$0xc] }
  0x16   : > { %v403_v18 = vor.u32 %v402_v14, %v398_v10  ;;  %1364 = vmatprep.mubr.msk.bf16.mxu1 %vm259_vm0, %v1447_v17  ;;  %v407_v23 = vrot.slane %v405_v19, 1  ;;  %v1455_v34 = vld [vmem:[%s1549_s29 + $0x28] ss:$0 sps:$4 sm:$0x77]   ;;  %v746_v40 = vld [vmem:[%s1549_s29 + $0x4] sm:$0xf] }
  0x17   : > { %v667_v36 = vor.u32 %v666_v32, %v662_v30  ;;  %v669_v37 = vshll.u32 %v1455_v34, 16  ;;  %v673_v38 = vshrl.u32 %v1455_v34, 16  ;;  %v1261_v43 = vcombine.low %v745_v39, %v746_v40  ;;  %v1460_v45 = vld [vmem:[%s1549_s29 + $0x8] sm:$0x1f]   ;;  %v1462_v55 = vld [vmem:[%s1549_s29 + $0x10] sm:$0xfc]  }
  0x18   : > { %1355 = vmatpush3.bf16.msra.mxu0 %v1443_v9  ;;  %1363 = vmatpush3.bf16.msra.mxu1 %v1444_v13  ;;  %v408_v25 = vsel %vm397_vm1, %v403_v18, %v407_v23  ;;  %v411_v26 = vor.u32 %v409_v20, %v407_v23  ;;  %v774_v51 = vshrl.u32 %v1460_v45, 16  ;;  %v777_v52 = vshll.u32 %v1460_v45, 16  ;;  %v1463_v58 = vld [vmem:[%s1549_s29 + $0x18] sm:$0x1f]   ;;  %v956_v1 = vld [vmem:[%s1549_s29] sm:$0x8] }
  0x19   : > { %1368 = vmatprep.subr.bf16.mxu0 %v1446_v15  ;;  %1376 = vmatprep.subr.bf16.mxu1 %v1449_v22  ;;  %v671_v41 = vrot.slane %v669_v37, 1  ;;  %v766_v48 = vshrl.u32 %v1261_v43, 16  ;;  %v769_v49 = vshll.u32 %v1261_v43, 16  ;;  %v871_v60 = vshrl.u32 %v1462_v55, 16  ;;  %v1464_v9 = vld [vmem:[%s1645_s1 + $0x88] sm:$0xff]  }
  0x1a   : > { %1356 = vmatprep.mubr.msk.bf16.mxu0 %vm259_vm0, %v408_v25  ;;  %v776_v56 = vrot.slane %v774_v51, 2  ;;  %v779_v57 = vrot.slane %v777_v52, 3  ;;  %v874_v61 = vshll.u32 %v1462_v55, 16  ;;  %v879_v63 = vshrl.u32 %v1463_v58, 16 }
  0x1b   : > { %1357 = vmatmul.mubr.msk.bf16.vlgmr.msra.gmra.mrb[4].mxu0 %vm259_vm0, %v411_v26  ;;  %1365 = vmatmul.mubr.msk.bf16.vlgmr.msra.gmra.mrb[4].mxu1 %vm259_vm0, %v1448_v21  ;;  %v672_v46 = vsel %vm397_vm1, %v667_v36, %v671_v41  ;;  %v675_v47 = vor.u32 %v673_v38, %v671_v41  ;;  %v768_v53 = vrot.slane %v766_v48, 2  ;;  %v771_v54 = vrot.slane %v769_v49, 3 }
  0x1c   : > { %1369 = vmatpush3.bf16.msra.mxu0 %v1446_v15  ;;  %1377 = vmatpush3.bf16.msra.mxu1 %v1449_v22  ;;  %v780_v62 = vor.u32 %v779_v57, %v776_v56  ;;  %v882_v0 = vshll.u32 %v1463_v58, 16  ;;  %v873_v2 = vrot.slane %v871_v60, 2  ;;  %v876_v3 = vrot.slane %v874_v61, 3 }
  0x1d   : > { %1370 = vmatprep.subr.bf16.mxu0 %v1450_v24  ;;  %1378 = vmatprep.subr.bf16.mxu1 %v1451_v27  ;;  %v772_v59 = vor.u32 %v771_v54, %v768_v53  ;;  %v1285_v4 = vcombine.low %v956_v1, %v746_v40  ;;  %v967_v5 = vrot.slane %v1460_v45, 3  ;;  %v881_v7 = vrot.slane %v879_v63, 2 }
  0x1e   : > { %1372 = vmatprep.mubr.msk.bf16.mxu0 %vm259_vm0, %v1452_v28  ;;  %1380 = vmatprep.mubr.msk.bf16.mxu1 %vm259_vm0, %v672_v46  ;;  %v884_v8 = vrot.slane %v882_v0, 3  ;;  %v877_v10 = vor.u32 %v876_v3, %v873_v2 }
  0x1f   : > { %v781_v6 = vsel %vm764_vm2, %v772_v59, %v780_v62  ;;  %v966_v11 = vrot.slane %v1285_v4, 3 }
  0x20   : > { %1371 = vmatpush3.bf16.msra.mxu0 %v1450_v24  ;;  %1379 = vmatpush3.bf16.msra.mxu1 %v1451_v27  ;;  %v885_v12 = vor.u32 %v884_v8, %v881_v7 }
  0x21   : > { %1384 = vmatprep.subr.bf16.mxu0 %v1454_v31  ;;  %1392 = vmatprep.subr.bf16.mxu1 %v1456_v35  ;;  %v968_v13 = vsel %vm965_vm3, %v966_v11, %v967_v5 }
  0x22   : > { %v886_v14 = vsel %vm764_vm2, %v877_v10, %v885_v12 }
  0x23   : > { %1373 = vmatmul.mubr.msk.bf16.vlgmr.msra.gmra.mrb[8].mxu0 %vm259_vm0, %v1453_v33  ;;  %1381 = vmatmul.mubr.msk.bf16.vlgmr.msra.gmra.mrb[8].mxu1 %vm259_vm0, %v675_v47 }
  0x24   : > { %1385 = vmatpush3.bf16.msra.mxu0 %v1454_v31  ;;  %1393 = vmatpush3.bf16.msra.mxu1 %v1456_v35 }
  0x25   : > { %1386 = vmatprep.subr.bf16.mxu0 %v1457_v42  ;;  %1394 = vmatprep.subr.bf16.mxu1 %v1458_v44 }
  0x26   : > { %1388 = vmatprep.mubr.msk.bf16.mxu0 %vm259_vm0, %v781_v6  ;;  %1396 = vmatprep.mubr.msk.bf16.mxu1 %vm259_vm0, %v886_v14 }
  0x28   : > { %1387 = vmatpush3.bf16.msra.mxu0 %v1457_v42  ;;  %1395 = vmatpush3.bf16.msra.mxu1 %v1458_v44 }
  0x29   : > { %1400 = vmatprep.subr.bf16.mxu0 %v1461_v50 }
  0x2b   : > { %1389 = vmatmul.mubr.msk.bf16.vlgmr.msra.gmra.mrb[12].mxu0 %vm259_vm0, %v780_v62  ;;  %1397 = vmatmul.mubr.msk.bf16.vlgmr.msra.gmra.mrb[12].mxu1 %vm259_vm0, %v885_v12 }
  0x2c   : > { %1401 = vmatpush3.bf16.msra.mxu0 %v1461_v50  ;;  %1404 = vmatprep.mubr.msk.bf16.mxu0 %vm259_vm0, %v968_v13 }
  0x2d   : > { %1402 = vmatprep.subr.bf16.mxu0 %v1464_v9 }
  0x30   : > { %1403 = vmatpush3.bf16.msra.mxu0 %v1464_v9 }
  0x33   : > { %1405 = vmatmul.mubr.msk.bf16.vlgmr.msra.gmra.mrb[16].mxu0 %vm259_vm0, %v967_v5  ;;  %v1290_v5 = vld [vmem:[%s1646_s2] ss:$0 sm:$0xff] }
  0xe6   : > { %v1342_v15 = vpop.f32.mrb[0].mxu0  ;;  %v1350_v17 = vpop.f32.mrb[0].mxu1 }
  0xe7   : > { %v300_v16 = vpop.f32.mrb[1].mxu0  ;;  %v383_v19 = vadd.f32 %v1350_v17, %v1342_v15  ;;  %v374_v20 = vpop.f32.mrb[1].mxu1 }
  0xe8   : > { %v1343_v18 = vpop.f32.mrb[2].mxu0  ;;  %v375_v22 = vadd.f32 %v374_v20, %v300_v16  ;;  %v1351_v23 = vpop.f32.mrb[2].mxu1 }
  0xe9   : > { %v303_v21 = vpop.f32.mrb[3].mxu0  ;;  %v377_v24 = vpop.f32.mrb[3].mxu1 }
  0xea   : > { %v378_v25 = vadd.f32 %v377_v24, %v303_v21 }
  0xee   : > { %v1358_v26 = vpop.f32.mrb[4].mxu0  ;;  %v1366_v27 = vpop.f32.mrb[4].mxu1 }
  0xef   : > { %v480_v28 = vadd.f32 %v1358_v26, %v383_v19  ;;  %v464_v29 = vpop.f32.mrb[5].mxu0  ;;  %v550_v30 = vpop.f32.mrb[5].mxu1 }
  0xf0   : > { %v478_v31 = vadd.f32 %v464_v29, %v375_v22  ;;  %v1359_v32 = vpop.f32.mrb[6].mxu0  ;;  %v1367_v33 = vpop.f32.mrb[6].mxu1 }
  0xf1   : > { %v566_v34 = vadd.f32 %v1366_v27, %v480_v28  ;;  %v467_v35 = vpop.f32.mrb[7].mxu0  ;;  %v553_v36 = vpop.f32.mrb[7].mxu1 }
  0xf2   : > { %v479_v37 = vadd.f32 %v467_v35, %v378_v25  ;;  %v564_v38 = vadd.f32 %v550_v30, %v478_v31 }
  0xf4   : > { %v565_v39 = vadd.f32 %v553_v36, %v479_v37 }
  0xf6   : > { %v1374_v40 = vpop.f32.mrb[8].mxu0  ;;  %v1382_v45 = vpop.f32.mrb[8].mxu1 }
  0xf7   : > { %v652_v41 = vadd.f32 %v1374_v40, %v566_v34  ;;  %v636_v42 = vpop.f32.mrb[9].mxu0  ;;  %v728_v48 = vpop.f32.mrb[9].mxu1 }
  0xf8   : > { %v650_v43 = vadd.f32 %v636_v42, %v564_v38  ;;  %v1375_v44 = vpop.f32.mrb[10].mxu0  ;;  %v1383_v51 = vpop.f32.mrb[10].mxu1 }
  0xf9   : > { %v744_v46 = vadd.f32 %v1382_v45, %v652_v41  ;;  %v639_v47 = vpop.f32.mrb[11].mxu0  ;;  %v731_v52 = vpop.f32.mrb[11].mxu1 }
  0xfa   : > { %v651_v49 = vadd.f32 %v639_v47, %v565_v39  ;;  %v742_v50 = vadd.f32 %v728_v48, %v650_v43 }
  0xfc   : > { %v743_v53 = vadd.f32 %v731_v52, %v651_v49 }
  0xfe   : > { %v1390_v54 = vpop.f32.mrb[12].mxu0  ;;  %v1398_v60 = vpop.f32.mrb[12].mxu1 }
  0xff   : > { %v850_v55 = vadd.f32 %v1390_v54, %v744_v46  ;;  %v834_v56 = vpop.f32.mrb[13].mxu0  ;;  %v939_v63 = vpop.f32.mrb[13].mxu1 }
 0x100   : > { %v848_v57 = vadd.f32 %v834_v56, %v742_v50  ;;  %v1391_v58 = vpop.f32.mrb[14].mxu0  ;;  %v1399_v1 = vpop.f32.mrb[14].mxu1 }
 0x101   : > { %v837_v59 = vpop.f32.mrb[15].mxu0  ;;  %v955_v62 = vadd.f32 %v1398_v60, %v850_v55  ;;  %v942_v2 = vpop.f32.mrb[15].mxu1 }
 0x102   : > { %v849_v61 = vadd.f32 %v837_v59, %v743_v53  ;;  %v953_v0 = vadd.f32 %v939_v63, %v848_v57 }
 0x104   : > { %v954_v3 = vadd.f32 %v942_v2, %v849_v61 }
 0x106   : > { %v1406_v4 = vpop.f32.mrb[16].mxu0 }
 0x107   : > { %v1037_v6 = vadd.f32 %v1406_v4, %v955_v62  ;;  %v1021_v7 = vpop.f32.mrb[17].mxu0 }
 0x108   : > { %v1035_v8 = vadd.f32 %v1021_v7, %v953_v0  ;;  %v1407_v9 = vpop.f32.mrb[18].mxu0 }
 0x109   : > { %v1047_v10 = vadd.f32 %v1290_v5, %v1037_v6  ;;  %v1024_v11 = vpop.f32.mrb[19].mxu0 }
 0x10a   : > { %v1045_v12 = vadd.f32 %v1290_v5, %v1035_v8  ;;  %v1036_v13 = vadd.f32 %v1024_v11, %v954_v3 }
 0x10b   : > { %vm1050_vm4 = vcmp.ge.f32.partialorder %v1047_v10, 0.0  ;;  %v1053_v14 = vmul.f32 0.2, %v1047_v10 }
 0x10c   : > { %vm1048_vm5 = vcmp.ge.f32.partialorder %v1045_v12, 0.0  ;;  %v1051_v15 = vmul.f32 0.2, %v1045_v12  ;;  %v1046_v16 = vadd.f32 %v1290_v5, %v1036_v13 }
 0x10d   : > { %v1056_v17 = vsel %vm1050_vm4, %v1047_v10, %v1053_v14 }
 0x10e   : > { %v1059_v18 = vmul.f32 1.4142135, %v1056_v17  ;;  %v1054_v19 = vsel %vm1048_vm5, %v1045_v12, %v1051_v15  ;;  %vm1049_vm6 = vcmp.ge.f32.partialorder %v1046_v16, 0.0  ;;  %v1052_v20 = vmul.f32 0.2, %v1046_v16 }
 0x10f   : > { %v1057_v21 = vmul.f32 1.4142135, %v1054_v19 }
 0x110   : > { %v1299_v22 = vpack.c.bf16 %v1059_v18, %v1059_v18  ;;  %v1055_v23 = vsel %vm1049_vm6, %v1046_v16, %v1052_v20 }
 0x111   : > { %v1297_v24 = vpack.c.bf16 %v1057_v21, %v1057_v21  ;;  %v1058_v25 = vmul.f32 1.4142135, %v1055_v23 }
 0x112   : > { %1077 = vst.msk [vmem:[%s221_s11 + $0x8] sm:$0x3] %vm1076_vm7, %v1299_v22 }
 0x113   : > { %1074 = vst.msk [vmem:[%s221_s11] sm:$0xf] %vm1073_vm8, %v1297_v24  ;;  %v1298_v26 = vpack.c.bf16 %v1058_v25, %v1058_v25 }
 0x115   : > { %1075 = vst.msk [vmem:[%s221_s11 + $0x4] sm:$0xf] %vm1073_vm8, %v1298_v26 }
 0x116 PF: > { %s13_s14 = sadd.s32 1, %s1488_s14   ;;  %s1648_s12 = smov %s1484_s13 }
 0x117   : > { %p10_p5 = scmp.ge.s32.totalorder %s13_s14, 4   ;;  %s1649_s13 = smov %s1651_s15 }
 0x119   :  { %12 = sbr.rel (!%p10_p5) target bundleno = 2 (0x2), region = 79 }

// kernel: discriminator_forward.21
= control target key start
LH: loop header
LB: loop body
LE: loop exit
PB: predicated region body
PF: predicated region fallthrough
CT: control target
= control target key end

     0   :  { %vm21_vm0 = vcmask 1024   ;;  %v124_v0 = vmov 0.0   ;;  %vm125_vm1 = vmmov 0   ;;  %vm41_vm2 = vcmask 261120   ;;  %s164_s1 = inlined_call_operand.vmem [shape: bf16[32,1], index: 1, kind: input, shape index: {}]   ;;  %s165_s2 = inlined_call_operand.<no memory space> [shape: f32[1,1], index: 2, kind: input, shape index: {}]   ;;  %s166_s0 = inlined_call_operand.vmem [shape: bf16[2,32], index: 0, kind: input, shape index: {}]   ;;  %s167_s3 = inlined_call_operand.vmem [shape: f32[2,1], index: 3, kind: output, shape index: {}]  }
   0x1   :  { %22 = vst.msk [vmem:[#allocation2] sm:$0x3] %vm21_vm0, %v124_v0  ;;  %112 = vmatprep.subr.bf16.mxu0 %v124_v0  ;;  %v122_v1 = vld [vmem:[%s164_s1] sm:$0xff]   ;;  %116 = vmatprep.mubr.msk.bf16.mxu0 %vm125_vm1, %v124_v0  ;;  %v8_v2 = vstv %s165_s2  ;;  %v123_v3 = vld [vmem:[%s164_s1 + $0x8] sm:$0xff]  }
   0x2   :  { %9 = vst [vmem:[#allocation3] sm:$0x1] %v8_v2  ;;  %113 = vmatpush3.bf16.msra.mxu0 %v122_v1  ;;  %v24_v4 = vld [vmem:[%s166_s0] sm:$0x1] }
   0x3   :  { %114 = vmatprep.subr.bf16.mxu0 %v124_v0 }
   0x6   :  { %115 = vmatpush3.bf16.msra.mxu0 %v123_v3 }
   0x8   :  { %v23_v5 = vld [vmem:[#allocation2] sm:$0x3] }
   0x9   :  { %117 = vmatmul.mubr.msk.bf16.vlgmr.msra.gmra.mrb[0].mxu0 %vm41_vm2, %v24_v4  ;;  %v108_v11 = vld [vmem:[#allocation3] ss:$0 sm:$0xff] }
  0xdc   :  { %v79_v6 = vpop.f32.mrb[0].mxu0 }
  0xdd   :  { %v85_v7 = vadd.f32 %v79_v6, %v23_v5  ;;  %v118_v8 = vpop.f32.mrb[1].mxu0 }
  0xde   :  { %v82_v9 = vpop.f32.mrb[2].mxu0 }
  0xdf   :  { %87 = vst.msk [vmem:[#allocation2] sm:$0x3] %vm21_vm0, %v85_v7  ;;  %v119_v10 = vpop.f32.mrb[3].mxu0 }
  0xe6   :  { %v91_v12 = vld [vmem:[#allocation2] sm:$0x3] }
  0xe7   :  { %v99_v13 = vadd.f32 %v108_v11, %v91_v12 }
  0xe9   :  { %100 = vst.msk [vmem:[%s167_s3] sm:$0x3] %vm21_vm0, %v99_v13 }

// kernel: discriminator_forward.20
= control target key start
LH: loop header
LB: loop body
LE: loop exit
PB: predicated region body
PF: predicated region fallthrough
CT: control target
= control target key end

     0   :  { %v526_v22 = vmov 1966171168   ;;  %v99_v24 = vlaneseq  ;;  %vm19_vm0 = vcmask 254976   ;;  %v527_v44 = vmov 0.0   ;;  %s655_s1 = inlined_call_operand.vmem [shape: bf16[512,32], index: 1, kind: input, shape index: {}]   ;;  %s656_s0 = inlined_call_operand.vmem [shape: bf16[2,512], index: 0, kind: input, shape index: {}]   ;;  %s657_s2 = inlined_call_operand.vmem [shape: f32[1,32], index: 2, kind: input, shape index: {}]   ;;  %s658_s3 = inlined_call_operand.vmem [shape: bf16[2,32], index: 3, kind: output, shape index: {}]  }
   0x1   :  { %v494_v0 = vld [vmem:[%s655_s1 + $0x40] sm:$0xff]   ;;  %v498_v4 = vld [vmem:[%s655_s1 + $0x48] sm:$0xff]   ;;  %v502_v8 = vld [vmem:[%s655_s1 + $0x50] sm:$0xff]   ;;  %v97_v23 = vunpack.c.l.s4 %v526_v22  ;;  %20 = vst.msk [vmem:[#allocation2] sm:$0x3] %vm19_vm0, %v527_v44  ;;  %vm408_vm2 = vcmask 253952  }
   0x2   :  { %v495_v1 = vld [vmem:[%s655_s1 + $0xc0] sm:$0xff]   ;;  %448 = vmatprep.subr.bf16.mxu0 %v494_v0  ;;  %v499_v5 = vld [vmem:[%s655_s1 + $0xc8] sm:$0xff]   ;;  %v503_v9 = vld [vmem:[%s655_s1 + $0xd0] sm:$0xff]   ;;  %v100_v30 = vshrl.u32 %v99_v24, 7 }
   0x3   :  { %v496_v2 = vld [vmem:[%s655_s1] sm:$0xff]   ;;  %470 = vmatprep.subr.bf16.mxu1 %v495_v1  ;;  %v500_v6 = vld [vmem:[%s655_s1 + $0x8] sm:$0xff]   ;;  %v504_v10 = vld [vmem:[%s655_s1 + $0x10] sm:$0xff]   ;;  %v98_v29 = vunpack.c.0.s8 %v97_v23 }
   0x4   :  { %v497_v3 = vld [vmem:[%s655_s1 + $0x80] sm:$0xff]   ;;  %449 = vmatpush3.bf16.msra.mxu0 %v496_v2  ;;  %v501_v7 = vld [vmem:[%s655_s1 + $0x88] sm:$0xff]   ;;  %v505_v11 = vld [vmem:[%s655_s1 + $0x90] sm:$0xff]  }
   0x5   :  { %471 = vmatpush3.bf16.msra.mxu1 %v497_v3  ;;  %450 = vmatprep.subr.bf16.mxu0 %v498_v4  ;;  %v506_v12 = vld [vmem:[%s655_s1 + $0x58] sm:$0xff]   ;;  %v510_v16 = vld [vmem:[%s655_s1 + $0x60] sm:$0xff]   ;;  %v514_v20 = vld [vmem:[%s655_s1 + $0x68] sm:$0xff]   ;;  %v101_v35 = vsub.s32 %v98_v29, %v100_v30 }
   0x6   :  { %472 = vmatprep.subr.bf16.mxu1 %v499_v5  ;;  %v507_v13 = vld [vmem:[%s655_s1 + $0xd8] sm:$0xff]   ;;  %v511_v17 = vld [vmem:[%s655_s1 + $0xe0] sm:$0xff]   ;;  %v515_v21 = vld [vmem:[%s655_s1 + $0xe8] sm:$0xff]  }
   0x7   :  { %v508_v14 = vld [vmem:[%s655_s1 + $0x18] sm:$0xff]   ;;  %v512_v18 = vld [vmem:[%s655_s1 + $0x20] sm:$0xff]   ;;  %v516_v25 = vld [vmem:[%s655_s1 + $0x28] sm:$0xff]  }
   0x8   :  { %451 = vmatpush3.bf16.msra.mxu0 %v500_v6  ;;  %v509_v15 = vld [vmem:[%s655_s1 + $0x98] sm:$0xff]   ;;  %v513_v19 = vld [vmem:[%s655_s1 + $0xa0] sm:$0xff]   ;;  %v517_v26 = vld [vmem:[%s655_s1 + $0xa8] sm:$0xff]  }
   0x9   :  { %473 = vmatpush3.bf16.msra.mxu1 %v501_v7  ;;  %452 = vmatprep.subr.bf16.mxu0 %v502_v8  ;;  %v518_v27 = vld [vmem:[%s655_s1 + $0x70] sm:$0xff]   ;;  %v522_v33 = vld [vmem:[%s655_s1 + $0x78] sm:$0xff]   ;;  %v414_v38 = vld.sshfl [vmem:[%s656_s0] sm:$0x33 pattern:$0x75316420] }
   0xa   :  { %474 = vmatprep.subr.bf16.mxu1 %v503_v9  ;;  %v519_v28 = vld [vmem:[%s655_s1 + $0xf0] sm:$0xff]   ;;  %v523_v34 = vld [vmem:[%s655_s1 + $0xf8] sm:$0xff]   ;;  %v95_v39 = vcombine.high %v414_v38, %v414_v38  ;;  %v102_v40 = vrot.slane %v414_v38, %v101_v35  ;;  %v21_v54 = vld [vmem:[#allocation2] sm:$0x3] }
   0xb   :  { %v520_v31 = vld [vmem:[%s655_s1 + $0x30] sm:$0xff]   ;;  %v524_v36 = vld [vmem:[%s655_s1 + $0x38] sm:$0xff]   ;;  %v447_v58 = vld [vmem:[%s657_s2] ss:$0 sm:$0xff] }
   0xc   :  { %453 = vmatpush3.bf16.msra.mxu0 %v504_v10  ;;  %v521_v32 = vld [vmem:[%s655_s1 + $0xb0] sm:$0xff]   ;;  %v525_v37 = vld [vmem:[%s655_s1 + $0xb8] sm:$0xff]   ;;  %v109_v41 = vrot.slane %v95_v39, %v101_v35  ;;  %v110_v42 = vcombine.high %v102_v40, %v102_v40 }
   0xd   :  { %475 = vmatpush3.bf16.msra.mxu1 %v505_v11  ;;  %454 = vmatprep.subr.bf16.mxu0 %v506_v12 }
   0xe   :  { %476 = vmatprep.subr.bf16.mxu1 %v507_v13  ;;  %340 = vmatprep.mubr.bf16.mxu0 %v109_v41  ;;  %v111_v43 = vcombine.high %v109_v41, %v109_v41 }
  0x10   :  { %455 = vmatpush3.bf16.msra.mxu0 %v508_v14  ;;  %380 = vmatprep.mubr.bf16.mxu1 %v111_v43 }
  0x11   :  { %477 = vmatpush3.bf16.msra.mxu1 %v509_v15  ;;  %456 = vmatprep.subr.bf16.mxu0 %v510_v16 }
  0x12   :  { %478 = vmatprep.subr.bf16.mxu1 %v511_v17 }
  0x14   :  { %457 = vmatpush3.bf16.msra.mxu0 %v512_v18 }
  0x15   :  { %479 = vmatpush3.bf16.msra.mxu1 %v513_v19  ;;  %458 = vmatprep.subr.bf16.mxu0 %v514_v20 }
  0x16   :  { %480 = vmatprep.subr.bf16.mxu1 %v515_v21 }
  0x18   :  { %459 = vmatpush3.bf16.msra.mxu0 %v516_v25 }
  0x19   :  { %481 = vmatpush3.bf16.msra.mxu1 %v517_v26  ;;  %460 = vmatprep.subr.bf16.mxu0 %v518_v27 }
  0x1a   :  { %482 = vmatprep.subr.bf16.mxu1 %v519_v28 }
  0x1c   :  { %461 = vmatpush3.bf16.msra.mxu0 %v520_v31 }
  0x1d   :  { %483 = vmatpush3.bf16.msra.mxu1 %v521_v32  ;;  %462 = vmatprep.subr.bf16.mxu0 %v522_v33 }
  0x1e   :  { %484 = vmatprep.subr.bf16.mxu1 %v523_v34 }
  0x20   :  { %463 = vmatpush3.bf16.msra.mxu0 %v524_v36 }
  0x21   :  { %485 = vmatpush3.bf16.msra.mxu1 %v525_v37 }
  0x23   :  { %341 = vmatmul.mubr.bf16.vlgmr.msra.gmra.mrb[0].mxu0 %v102_v40 }
  0x24   :  { %381 = vmatmul.mubr.bf16.vlgmr.msra.gmra.mrb[0].mxu1 %v110_v42 }
  0xf6   :  { %v464_v45 = vpop.f32.mrb[0].mxu0 }
  0xf7   :  { %v465_v46 = vpop.f32.mrb[1].mxu0  ;;  %v486_v47 = vpop.f32.mrb[0].mxu1 }
  0xf8   :  { %v466_v48 = vadd.f32 %v465_v46, %v464_v45  ;;  %v467_v49 = vpop.f32.mrb[2].mxu0  ;;  %v487_v50 = vpop.f32.mrb[1].mxu1 }
  0xf9   :  { %v468_v51 = vpop.f32.mrb[3].mxu0  ;;  %v488_v52 = vadd.f32 %v487_v50, %v486_v47  ;;  %v489_v53 = vpop.f32.mrb[2].mxu1 }
  0xfa   :  { %v490_v55 = vpop.f32.mrb[3].mxu1 }
  0xfb   :  { %v383_v56 = vadd.f32 %v488_v52, %v466_v48 }
  0xfd   :  { %v388_v57 = vadd.f32 %v383_v56, %v21_v54 }
  0xff   :  { %390 = vst.msk [vmem:[#allocation2] sm:$0x3] %vm19_vm0, %v388_v57 }
 0x106   :  { %v394_v59 = vld [vmem:[#allocation2] sm:$0x3] }
 0x107   :  { %v402_v60 = vadd.f32 %v447_v58, %v394_v59 }
 0x109   :  { %vm403_vm1 = vcmp.ge.f32.partialorder %v402_v60, 0.0  ;;  %v404_v61 = vmul.f32 0.2, %v402_v60 }
 0x10b   :  { %v405_v62 = vsel %vm403_vm1, %v402_v60, %v404_v61 }
 0x10c   :  { %v406_v63 = vmul.f32 1.4142135, %v405_v62 }
 0x10e   :  { %v407_v0 = vpack.c.bf16 %v406_v63, %v406_v63 }
 0x110   :  { %409 = vst.msk [vmem:[%s658_s3] sm:$0x1] %vm408_vm2, %v407_v0 }

// kernel: discriminator_forward.19
= control target key start
LH: loop header
LB: loop body
LE: loop exit
PB: predicated region body
PF: predicated region fallthrough
CT: control target
= control target key end

     0   :  { %s1577_s12 = smov 0   ;;  %s1579_s13 = smov 0   ;;  %s1785_s0 = inlined_call_operand.vmem [shape: bf16[2,1,40,33], index: 0, kind: input, shape index: {}]   ;;  %s1786_s1 = inlined_call_operand.vmem [shape: bf16[9,33,32], index: 1, kind: input, shape index: {}]   ;;  %s1787_s2 = inlined_call_operand.vmem [shape: f32[1,32], index: 2, kind: input, shape index: {}]   ;;  %s1788_s3 = inlined_call_operand.vmem [shape: bf16[2,24,32], index: 3, kind: output, shape index: {}]  }
   0x1   :  { %s1581_s14 = smov 0  }
   0x2 LB: > { %s25_s15 = sadd.s32 1, %s1550_s13  ;;  %p1220_p0 = scmp.ge.s32.totalorder %s1554_s14, 1  ;;  %s1554_s14 = sphi %s1581_s14, %s13_s14   ;;  %s1550_s13 = sphi %s1579_s13, %s1790_s13   ;;  %s1546_s12 = sphi %s1577_s12, %s1789_s12  }
   0x3   : > { %p27_p1 = scmp.ge.s32.totalorder %s25_s15, 2  ;;  %p168_p2 = scmp.lt.s32.totalorder %s1554_s14, 3 }
   0x5   : > { %s1792_s15 = smov (%p27_p1, %s25_s15), 0  ;;  %p169_p3 = pnand %p1220_p0, %p168_p2 }
   0x6   : > { %v1492_v0 = vld [vmem:[%s1786_s1 + $0x14] sm:$0xff] (!%p169_p3)   ;;  %vm286_vm0 = vcmask (!%p169_p3), 1040384   ;;  %v1493_v1 = vld [vmem:[%s1786_s1] sm:$0xff] (!%p169_p3)   ;;  %v1556_v3 = vmov (!%p169_p3), 0   ;;  %v1495_v5 = vld [vmem:[%s1786_s1 + $0x8] sm:$0xff] (!%p169_p3)   ;;  %p202_p4 = scmp.lt.s32.totalorder (!%p169_p3), %s1546_s12, 1 }
   0x7   : > { %172 = sbr.rel (%p169_p3) target bundleno = 304 (0x130), region = 32  ;;  %1375 = vmatprep.subr.bf16.mxu0 (!%p169_p3), %v1492_v0  ;;  %v1494_v2 = vld [vmem:[%s1786_s1 + $0x1c] sm:$0xff] (!%p169_p3)   ;;  %v1604_v4 = vsel (!%p169_p3), %vm286_vm0, 65535, %v1556_v3  ;;  %1385 = vmatprep.subr.bf16.mxu1 (!%p169_p3), %v1493_v1  ;;  %v1496_v6 = vld [vmem:[%s1786_s1 + $0x24] ss:$0 sps:$4 sm:$0x11] (!%p169_p3)  }
   0x8   : > { %1376 = vmatpush3.bf16.msra.mxu0 (!%p169_p3), %v1492_v0  ;;  %1386 = vmatpush3.bf16.msra.mxu1 (!%p169_p3), %v1493_v1  ;;  %v1497_v7 = vld [vmem:[%s1786_s1 + $0x10] ss:$0 sps:$4 sm:$0x11] (!%p169_p3)   ;;  %v290_v8 = vand.u32 (!%p169_p3), %v1496_v6, %v1604_v4  ;;  %v1500_v10 = vld [vmem:[%s1786_s1 + $0x28] sm:$0xff] (!%p169_p3)   ;;  %vm279_vm1 = vcmask (!%p169_p3), 269312   ;;  %v1502_v11 = vld [vmem:[%s1786_s1 + $0x3c] sm:$0xff] (!%p169_p3)  }
   0x9   : > { %1377 = vmatprep.subr.bf16.mxu0 (!%p169_p3), %v1494_v2  ;;  %1387 = vmatprep.subr.bf16.mxu1 (!%p169_p3), %v1495_v5  ;;  %v362_v9 = vand.u32 (!%p169_p3), %v1497_v7, %v1604_v4  ;;  %vm248_vm2 = vsmask.f32 (!%p169_p3), 7424  ;;  %v1504_v21 = vld [vmem:[%s1786_s1 + $0x44] sm:$0xff] (!%p169_p3)   ;;  %v1506_v22 = vld [vmem:[%s1786_s1 + $0x4c] ss:$0 sps:$4 sm:$0x11] (!%p169_p3)  }
   0xa   : > { %vm422_vm3 = vcmask (!%p169_p3), 1046528   ;;  %v541_v30 = vand.u32 (!%p169_p3), %v1506_v22, %v1604_v4  ;;  %vm515_vm4 = vcmask (!%p169_p3), 1044480   ;;  %v1503_v34 = vld [vmem:[%s1786_s1 + $0x30] sm:$0xff] (!%p169_p3)   ;;  %v1505_v35 = vld [vmem:[%s1786_s1 + $0x38] ss:$0 sps:$4 sm:$0x11] (!%p169_p3)  }
   0xb   : > { %v1511_v46 = vld [vmem:[%s1786_s1 + $0x64] sm:$0xff] (!%p169_p3)   ;;  %v448_v50 = vand.u32 (!%p169_p3), %v1505_v35, %v1604_v4  ;;  %v1513_v51 = vld [vmem:[%s1786_s1 + $0x6c] sm:$0xff] (!%p169_p3)   ;;  %v1515_v52 = vld [vmem:[%s1786_s1 + $0x74] ss:$0 sps:$4 sm:$0x11] (!%p169_p3)   ;;  %vm800_vm7 = vcmask (!%p169_p3), 1045504  }
   0xc   : > { %1378 = vmatpush3.bf16.msra.mxu0 (!%p169_p3), %v1494_v2  ;;  %1388 = vmatpush3.bf16.msra.mxu1 (!%p169_p3), %v1495_v5  ;;  %v1508_v60 = vld [vmem:[%s1786_s1 + $0x50] sm:$0xff] (!%p169_p3)   ;;  %vm604_vm5 = vsmask.f32 (!%p169_p3), 4352  ;;  %v727_v2 = vand.u32 (!%p169_p3), %v1515_v52, %v1604_v4  ;;  %v1514_v6 = vld [vmem:[%s1786_s1 + $0x60] ss:$0 sps:$4 sm:$0x11] (!%p169_p3)  }
   0xd   : > { %1379 = vmatprep.subr.bf16.mxu0 (!%p169_p3), %v290_v8  ;;  %1389 = vmatprep.subr.bf16.mxu1 (!%p169_p3), %v362_v9  ;;  %vm889_vm6 = vsmask.f32 (!%p169_p3), 5376  ;;  %vm1105_vm11 = vcmask (!%p169_p3), 257024  }
   0xe   : > { %s1794_s12 = smov (!%p202_p4, %s1546_s12), 1 }
   0xf   : > { %s1465_s28 = smul.u32 20, %s1794_s12 }
  0x10   : > { %1380 = vmatpush3.bf16.msra.mxu0 %v290_v8  ;;  %1390 = vmatpush3.bf16.msra.mxu1 %v362_v9  ;;  %v1512_v8 = vld [vmem:[%s1786_s1 + $0x58] sm:$0xff]   ;;  %s1466_s30 = smul.u32 12, %s1794_s12 }
  0x11   : > { %s1626_s6 = scalar_lea.vmem %s1785_s0, %s1465_s28  ;;  %1395 = vmatprep.subr.bf16.mxu0 %v1500_v10  ;;  %1405 = vmatprep.subr.bf16.mxu1 %v1502_v11 }
  0x12   : > { %v223_v12 = vld [vmem:[%s1626_s6] sm:$0xf]  ;;  %v1633_v13 = vld [vmem:[%s1626_s6 + $0x4] sm:$0xf]  ;;  %v1636_v14 = vld [vmem:[%s1626_s6 + $0x8] sm:$0xf]  ;;  %s221_s7 = scalar_lea.vmem %s1788_s3, %s1466_s30 }
  0x13   : > { %v231_v15 = vld [vmem:[%s1626_s6 + $0xc] sm:$0x1]  ;;  %v1228_v16 = vcombine.low %v223_v12, %v1633_v13  ;;  %v1235_v17 = vcombine.low %v1636_v14, %v1636_v14  ;;  %v412_v25 = vld [vmem:[%s1626_s6] sm:$0xe]  ;;  %v1280_v57 = vcombine.low %v1633_v13, %v1636_v14  ;;  %v780_v63 = vld [vmem:[%s1626_s6 + $0x4] sm:$0xc] }
  0x14   : > { %v1643_v18 = vcombine.low %v1636_v14, %v231_v15  ;;  %v1246_v27 = vcombine.low %v412_v25, %v1633_v13  ;;  %v501_v31 = vld [vmem:[%s1626_s6] sm:$0x8]  ;;  %v502_v32 = vld [vmem:[%s1626_s6 + $0xc] sm:$0x7]  ;;  %v1702_v0 = vld [vmem:[%s1626_s6 + $0x8] sm:$0xf] }
  0x15   : > { %v250_v19 = vshrl.u32 %v1228_v16, 16  ;;  %v252_v20 = vshll.u32 %v1228_v16, 16  ;;  %1391 = vmatprep.mubr.msk.bf16.mxu1 %vm279_vm1, %v1228_v16  ;;  %v1257_v37 = vcombine.low %v501_v31, %v1633_v13  ;;  %v1258_v38 = vcombine.low %v1636_v14, %v502_v32  ;;  %v1680_v47 = vld [vmem:[%s1626_s6 + $0xc] sm:$0xf]  ;;  %v879_v5 = vld [vmem:[%s1626_s6 + $0x10] sm:$0x7] }
  0x16   : > { %v257_v23 = vshll.u32 %v1643_v18, 16  ;;  %v261_v24 = vshrl.u32 %v1643_v18, 16  ;;  %1392 = vmatmul.mubr.msk.bf16.vlgmr.msra.gmra.mrb[0].mxu1 %vm279_vm1, %v1235_v17  ;;  %v424_v28 = vrot.slane %v1643_v18, 1  ;;  %v423_v36 = vrot.slane %v1246_v27, 1  ;;  %v782_v1 = vld [vmem:[%s1626_s6 + $0xc] sm:$0xf] }
  0x17   : > { %v254_v26 = vrot.slane %v252_v20, 1  ;;  %1406 = vmatpush3.bf16.msra.mxu1 %v1502_v11  ;;  %v516_v42 = vrot.slane %v1257_v37, 3  ;;  %v517_v43 = vrot.slane %v1258_v38, 3  ;;  %v606_v44 = vshrl.u32 %v1257_v37, 16  ;;  %v783_v12 = vld [vmem:[%s1626_s6 + $0x10] sm:$0x3] }
  0x18   : > { %v259_v29 = vrot.slane %v257_v23, 1  ;;  %1407 = vmatprep.subr.bf16.mxu1 %v1504_v21  ;;  %v425_v41 = vsel %vm422_vm3, %v423_v36, %v424_v28  ;;  %v609_v48 = vshll.u32 %v1257_v37, 16  ;;  %v1269_v49 = vcombine.low %v1636_v14, %v1680_v47  ;;  %v1520_v15 = vld [vmem:[%s1786_s1 + $0x8c] sm:$0xff]   ;;  %v1522_v25 = vld [vmem:[%s1786_s1 + $0x94] sm:$0xff]   ;;  %v1521_v32 = vld [vmem:[%s1786_s1 + $0x80] sm:$0xff]  }
  0x19   : > { %v255_v33 = vor.u32 %v254_v26, %v250_v19  ;;  %v518_v45 = vsel %vm515_vm4, %v516_v42, %v517_v43  ;;  %v608_v53 = vrot.slane %v606_v44, 3  ;;  %v1292_v3 = vcombine.low %v780_v63, %v1702_v0  ;;  %v1524_v26 = vld [vmem:[%s1786_s1 + $0x9c] ss:$0 sps:$4 sm:$0x11]   ;;  %v982_v35 = vld [vmem:[%s1626_s6 + $0x4] sm:$0x8] }
  0x1a   : > { %v263_v39 = vor.u32 %v261_v24, %v259_v29  ;;  %1411 = vmatprep.mubr.msk.bf16.mxu1 %vm279_vm1, %v518_v45  ;;  %v611_v54 = vrot.slane %v609_v48, 4  ;;  %v614_v55 = vshrl.u32 %v1269_v49, 16  ;;  %v617_v56 = vshll.u32 %v1269_v49, 16  ;;  %v1528_v38 = vld [vmem:[%s1786_s1 + $0xa0] sm:$0xff]  }
  0x1b   : > { %v260_v40 = vsel %vm248_vm2, %v255_v33, %v259_v29  ;;  %1408 = vmatpush3.bf16.msra.mxu1 %v1504_v21  ;;  %v1711_v7 = vcombine.low %v782_v1, %v879_v5  ;;  %v894_v11 = vshll.u32 %v1292_v3, 16  ;;  %v644_v19 = vand.u32 %v1514_v6, %v1604_v4  ;;  %v1523_v33 = vld [vmem:[%s1786_s1 + $0x88] ss:$0 sps:$4 sm:$0x11]  }
  0x1c   : > { %1381 = vmatprep.mubr.msk.bf16.mxu0 %vm279_vm1, %v260_v40  ;;  %1409 = vmatprep.subr.bf16.mxu1 %v541_v30  ;;  %v616_v58 = vrot.slane %v614_v55, 3  ;;  %v619_v59 = vrot.slane %v617_v56, 4  ;;  %v612_v61 = vor.u32 %v611_v54, %v608_v53  ;;  %v1281_v18 = vcombine.low %v1680_v47, %v1680_v47  ;;  %v1530_v42 = vld [vmem:[%s1786_s1 + $0xb0] ss:$0 sps:$4 sm:$0x11]  }
  0x1d   : > { %1382 = vmatmul.mubr.msk.bf16.vlgmr.msra.gmra.mrb[0].mxu0 %vm279_vm1, %v263_v39  ;;  %v899_v13 = vshrl.u32 %v1711_v7, 16  ;;  %v902_v14 = vshll.u32 %v1711_v7, 16  ;;  %v896_v17 = vrot.slane %v894_v11, 3  ;;  %v1293_v22 = vcombine.low %v782_v1, %v783_v12 }
  0x1e   : > { %1396 = vmatpush3.bf16.msra.mxu0 %v1500_v10  ;;  %1401 = vmatprep.mubr.msk.bf16.mxu0 %vm279_vm1, %v425_v41  ;;  %v620_v62 = vor.u32 %v619_v59, %v616_v58  ;;  %v891_v10 = vshrl.u32 %v1292_v3, 16  ;;  %v801_v29 = vrot.slane %v1292_v3, 2  ;;  %v929_v31 = vand.u32 %v1524_v26, %v1604_v4  ;;  %v1529_v41 = vld [vmem:[%s1786_s1 + $0xa8] sm:$0xff]  }
  0x1f   : > { %1397 = vmatprep.subr.bf16.mxu0 %v1503_v34  ;;  %1410 = vmatpush3.bf16.msra.mxu1 %v541_v30  ;;  %v901_v20 = vrot.slane %v899_v13, 2  ;;  %v904_v21 = vrot.slane %v902_v14, 3  ;;  %v802_v30 = vrot.slane %v1293_v22, 2  ;;  %v826_v36 = vand.u32 %v1523_v33, %v1604_v4 }
  0x20   : > { %1425 = vmatprep.subr.bf16.mxu1 %v1511_v46  ;;  %v621_v9 = vsel %vm604_vm5, %v612_v61, %v620_v62  ;;  %v893_v16 = vrot.slane %v891_v10, 2  ;;  %v1315_v37 = vcombine.low %v982_v35, %v1702_v0  ;;  %v993_v40 = vrot.slane %v1711_v7, 3  ;;  %v1321_v35 = vld [vmem:[%s1787_s2] ss:$0 sm:$0xff] }
  0x21   : > { %v905_v24 = vor.u32 %v904_v21, %v901_v20  ;;  %v1017_v44 = vand.u32 %v1530_v42, %v1604_v4 }
  0x22   : > { %1398 = vmatpush3.bf16.msra.mxu0 %v1503_v34  ;;  %1412 = vmatmul.mubr.msk.bf16.vlgmr.msra.gmra.mrb[4].mxu1 %vm279_vm1, %v517_v43  ;;  %v897_v23 = vor.u32 %v896_v17, %v893_v16  ;;  %v803_v34 = vsel %vm800_vm7, %v801_v29, %v802_v30  ;;  %v992_v39 = vrot.slane %v1315_v37, 3 }
  0x23   : > { %1399 = vmatprep.subr.bf16.mxu0 %v448_v50  ;;  %1426 = vmatpush3.bf16.msra.mxu1 %v1511_v46 }
  0x24   : > { %1431 = vmatprep.mubr.msk.bf16.mxu1 %vm279_vm1, %v1280_v57  ;;  %1427 = vmatprep.subr.bf16.mxu1 %v1513_v51  ;;  %v906_v27 = vsel %vm889_vm6, %v897_v23, %v905_v24  ;;  %v994_v43 = vsel %vm515_vm4, %v992_v39, %v993_v40 }
  0x26   : > { %1400 = vmatpush3.bf16.msra.mxu0 %v448_v50 }
  0x27   : > { %1415 = vmatprep.subr.bf16.mxu0 %v1508_v60  ;;  %1428 = vmatpush3.bf16.msra.mxu1 %v1513_v51 }
  0x28   : > { %1429 = vmatprep.subr.bf16.mxu1 %v727_v2 }
  0x29   : > { %1402 = vmatmul.mubr.msk.bf16.vlgmr.msra.gmra.mrb[4].mxu0 %vm279_vm1, %v424_v28  ;;  %v1517_v28 = vld [vmem:[%s1786_s1 + $0x78] sm:$0xff]  }
  0x2a   : > { %1416 = vmatpush3.bf16.msra.mxu0 %v1508_v60  ;;  %1421 = vmatprep.mubr.msk.bf16.mxu0 %vm279_vm1, %v621_v9 }
  0x2b   : > { %1417 = vmatprep.subr.bf16.mxu0 %v1512_v8  ;;  %1430 = vmatpush3.bf16.msra.mxu1 %v727_v2 }
  0x2c   : > { %1445 = vmatprep.subr.bf16.mxu1 %v1520_v15 }
  0x2e   : > { %1418 = vmatpush3.bf16.msra.mxu0 %v1512_v8  ;;  %1432 = vmatmul.mubr.msk.bf16.vlgmr.msra.gmra.mrb[8].mxu1 %vm279_vm1, %v1281_v18 }
  0x2f   : > { %1419 = vmatprep.subr.bf16.mxu0 %v644_v19  ;;  %1446 = vmatpush3.bf16.msra.mxu1 %v1520_v15 }
  0x30   : > { %1451 = vmatprep.mubr.msk.bf16.mxu1 %vm279_vm1, %v906_v27  ;;  %1447 = vmatprep.subr.bf16.mxu1 %v1522_v25 }
  0x32   : > { %1420 = vmatpush3.bf16.msra.mxu0 %v644_v19 }
  0x33   : > { %1435 = vmatprep.subr.bf16.mxu0 %v1517_v28  ;;  %1448 = vmatpush3.bf16.msra.mxu1 %v1522_v25 }
  0x34   : > { %1449 = vmatprep.subr.bf16.mxu1 %v929_v31 }
  0x35   : > { %1422 = vmatmul.mubr.msk.bf16.vlgmr.msra.gmra.mrb[8].mxu0 %vm279_vm1, %v620_v62 }
  0x36   : > { %1436 = vmatpush3.bf16.msra.mxu0 %v1517_v28  ;;  %1441 = vmatprep.mubr.msk.bf16.mxu0 %vm279_vm1, %v803_v34 }
  0x37   : > { %1437 = vmatprep.subr.bf16.mxu0 %v1521_v32  ;;  %1450 = vmatpush3.bf16.msra.mxu1 %v929_v31 }
  0x3a   : > { %1438 = vmatpush3.bf16.msra.mxu0 %v1521_v32  ;;  %1452 = vmatmul.mubr.msk.bf16.vlgmr.msra.gmra.mrb[12].mxu1 %vm279_vm1, %v905_v24 }
  0x3b   : > { %1439 = vmatprep.subr.bf16.mxu0 %v826_v36 }
  0x3e   : > { %1440 = vmatpush3.bf16.msra.mxu0 %v826_v36 }
  0x3f   : > { %1455 = vmatprep.subr.bf16.mxu0 %v1528_v38 }
  0x41   : > { %1442 = vmatmul.mubr.msk.bf16.vlgmr.msra.gmra.mrb[12].mxu0 %vm279_vm1, %v802_v30 }
  0x42   : > { %1456 = vmatpush3.bf16.msra.mxu0 %v1528_v38  ;;  %1461 = vmatprep.mubr.msk.bf16.mxu0 %vm279_vm1, %v994_v43 }
  0x43   : > { %1457 = vmatprep.subr.bf16.mxu0 %v1529_v41 }
  0x46   : > { %1458 = vmatpush3.bf16.msra.mxu0 %v1529_v41 }
  0x47   : > { %1459 = vmatprep.subr.bf16.mxu0 %v1017_v44 }
  0x4a   : > { %1460 = vmatpush3.bf16.msra.mxu0 %v1017_v44 }
  0x4d   : > { %1462 = vmatmul.mubr.msk.bf16.vlgmr.msra.gmra.mrb[16].mxu0 %vm279_vm1, %v993_v40 }
  0xe9   : > { %v1393_v45 = vpop.f32.mrb[0].mxu1 }
  0xea   : > { %v398_v46 = vpop.f32.mrb[1].mxu1 }
  0xeb   : > { %v1394_v47 = vpop.f32.mrb[2].mxu1 }
  0xec   : > { %v401_v48 = vpop.f32.mrb[3].mxu1 }
  0xf0   : > { %v1383_v49 = vpop.f32.mrb[0].mxu0 }
  0xf1   : > { %v407_v50 = vadd.f32 %v1393_v45, %v1383_v49  ;;  %v326_v51 = vpop.f32.mrb[1].mxu0 }
  0xf2   : > { %v399_v52 = vadd.f32 %v398_v46, %v326_v51  ;;  %v1384_v53 = vpop.f32.mrb[2].mxu0 }
  0xf3   : > { %v329_v54 = vpop.f32.mrb[3].mxu0 }
  0xf4   : > { %v402_v55 = vadd.f32 %v401_v48, %v329_v54 }
  0xf5   : > { %v1413_v56 = vpop.f32.mrb[4].mxu1 }
  0xf6   : > { %v577_v57 = vpop.f32.mrb[5].mxu1 }
  0xf7   : > { %v1414_v58 = vpop.f32.mrb[6].mxu1 }
  0xf8   : > { %v580_v4 = vpop.f32.mrb[7].mxu1 }
  0xfc   : > { %v1403_v59 = vpop.f32.mrb[4].mxu0 }
  0xfd   : > { %v500_v60 = vadd.f32 %v1403_v59, %v407_v50  ;;  %v484_v61 = vpop.f32.mrb[5].mxu0 }
  0xfe   : > { %v498_v62 = vadd.f32 %v484_v61, %v399_v52  ;;  %v1404_v63 = vpop.f32.mrb[6].mxu0 }
  0xff   : > { %v593_v0 = vadd.f32 %v1413_v56, %v500_v60  ;;  %v487_v1 = vpop.f32.mrb[7].mxu0 }
 0x100   : > { %v499_v2 = vadd.f32 %v487_v1, %v402_v55  ;;  %v591_v3 = vadd.f32 %v577_v57, %v498_v62 }
 0x101   : > { %v1433_v6 = vpop.f32.mrb[8].mxu1 }
 0x102   : > { %v592_v5 = vadd.f32 %v580_v4, %v499_v2  ;;  %v763_v7 = vpop.f32.mrb[9].mxu1 }
 0x103   : > { %v1434_v8 = vpop.f32.mrb[10].mxu1 }
 0x104   : > { %v766_v9 = vpop.f32.mrb[11].mxu1 }
 0x108   : > { %v1423_v10 = vpop.f32.mrb[8].mxu0 }
 0x109   : > { %v696_v11 = vadd.f32 %v1423_v10, %v593_v0  ;;  %v680_v12 = vpop.f32.mrb[9].mxu0 }
 0x10a   : > { %v694_v13 = vadd.f32 %v680_v12, %v591_v3  ;;  %v1424_v14 = vpop.f32.mrb[10].mxu0 }
 0x10b   : > { %v779_v15 = vadd.f32 %v1433_v6, %v696_v11  ;;  %v683_v16 = vpop.f32.mrb[11].mxu0 }
 0x10c   : > { %v695_v17 = vadd.f32 %v683_v16, %v592_v5  ;;  %v777_v19 = vadd.f32 %v763_v7, %v694_v13 }
 0x10d   : > { %v1453_v21 = vpop.f32.mrb[12].mxu1 }
 0x10e   : > { %v778_v20 = vadd.f32 %v766_v9, %v695_v17  ;;  %v965_v18 = vpop.f32.mrb[13].mxu1 }
 0x10f   : > { %v1454_v22 = vpop.f32.mrb[14].mxu1 }
 0x110   : > { %v968_v23 = vpop.f32.mrb[15].mxu1 }
 0x114   : > { %v1443_v24 = vpop.f32.mrb[12].mxu0 }
 0x115   : > { %v878_v25 = vadd.f32 %v1443_v24, %v779_v15  ;;  %v862_v26 = vpop.f32.mrb[13].mxu0 }
 0x116   : > { %v876_v27 = vadd.f32 %v862_v26, %v777_v19  ;;  %v1444_v28 = vpop.f32.mrb[14].mxu0 }
 0x117   : > { %v981_v29 = vadd.f32 %v1453_v21, %v878_v25  ;;  %v865_v30 = vpop.f32.mrb[15].mxu0 }
 0x118   : > { %v877_v31 = vadd.f32 %v865_v30, %v778_v20  ;;  %v979_v32 = vadd.f32 %v965_v18, %v876_v27 }
 0x11a   : > { %v980_v33 = vadd.f32 %v968_v23, %v877_v31 }
 0x120   : > { %v1463_v34 = vpop.f32.mrb[16].mxu0 }
 0x121   : > { %v1069_v36 = vadd.f32 %v1463_v34, %v981_v29  ;;  %v1053_v37 = vpop.f32.mrb[17].mxu0 }
 0x122   : > { %v1067_v38 = vadd.f32 %v1053_v37, %v979_v32  ;;  %v1464_v39 = vpop.f32.mrb[18].mxu0 }
 0x123   : > { %v1079_v40 = vadd.f32 %v1321_v35, %v1069_v36  ;;  %v1056_v41 = vpop.f32.mrb[19].mxu0 }
 0x124   : > { %v1077_v42 = vadd.f32 %v1321_v35, %v1067_v38  ;;  %v1068_v43 = vadd.f32 %v1056_v41, %v980_v33 }
 0x125   : > { %vm1082_vm8 = vcmp.ge.f32.partialorder %v1079_v40, 0.0  ;;  %v1085_v44 = vmul.f32 0.2, %v1079_v40 }
 0x126   : > { %vm1080_vm9 = vcmp.ge.f32.partialorder %v1077_v42, 0.0  ;;  %v1083_v45 = vmul.f32 0.2, %v1077_v42  ;;  %v1078_v46 = vadd.f32 %v1321_v35, %v1068_v43 }
 0x127   : > { %v1088_v47 = vsel %vm1082_vm8, %v1079_v40, %v1085_v44 }
 0x128   : > { %v1091_v48 = vmul.f32 1.4142135, %v1088_v47  ;;  %v1086_v49 = vsel %vm1080_vm9, %v1077_v42, %v1083_v45  ;;  %vm1081_vm10 = vcmp.ge.f32.partialorder %v1078_v46, 0.0  ;;  %v1084_v50 = vmul.f32 0.2, %v1078_v46 }
 0x129   : > { %v1089_v51 = vmul.f32 1.4142135, %v1086_v49 }
 0x12a   : > { %v1329_v52 = vpack.c.bf16 %v1091_v48, %v1091_v48  ;;  %v1087_v53 = vsel %vm1081_vm10, %v1078_v46, %v1084_v50 }
 0x12b   : > { %v1327_v54 = vpack.c.bf16 %v1089_v51, %v1089_v51  ;;  %v1090_v55 = vmul.f32 1.4142135, %v1087_v53 }
 0x12c   : > { %1108 = vst.msk [vmem:[%s221_s7 + $0x8] sm:$0xf] %vm1105_vm11, %v1329_v52 }
 0x12d   : > { %1106 = vst.msk [vmem:[%s221_s7] sm:$0xf] %vm1105_vm11, %v1327_v54  ;;  %v1328_v56 = vpack.c.bf16 %v1090_v55, %v1090_v55 }
 0x12f   : > { %1107 = vst.msk [vmem:[%s221_s7 + $0x4] sm:$0xf] %vm1105_vm11, %v1328_v56 }
 0x130 PF: > { %s13_s14 = sadd.s32 1, %s1554_s14   ;;  %s1789_s12 = smov %s1550_s13 }
 0x131   : > { %p10_p5 = scmp.ge.s32.totalorder %s13_s14, 4   ;;  %s1790_s13 = smov %s1792_s15 }
 0x133   :  { %12 = sbr.rel (!%p10_p5) target bundleno = 2 (0x2), region = 76 }

</bundles_post_ra>
